<compile_context>
chip_gen: v7x
topology: tpu7x:2x2x1
jax: 0.10.0
libtpu: 0.0.40
codegen_flags: <defaults>
</compile_context>

<pallas_src>
import functools

import jax
import jax.numpy as jnp
from jax.experimental import pallas as pl
from jax.experimental.pallas import tpu as pltpu  # noqa: F401  (TPU backend)

# ----------------------------- small config ---------------------------------
N_MELS = 8           # mel channels (80 in real Whisper)
T_MEL = 16           # mel frames (3000 in real Whisper)
D_MODEL = 128        # lane-dense model dim (768 in whisper-small)
N_HEADS = 4
D_HEAD = D_MODEL // N_HEADS
D_FF = 256
N_ENC_LAYERS = 2
N_DEC_LAYERS = 2
VOCAB = 128          # tied-embedding vocab, lane-dense
MAX_GEN = 4
T_ENC = T_MEL // 2   # after stride-2 conv
T_DEC = 8            # fixed decoder buffer (>= MAX_GEN + 1), sublane aligned
# module default: layer = 12 with num_layers = 12  ->  last entry of the
# decoder hidden-state tuple (post final layernorm). Here: index N_DEC_LAYERS.
LAYER = N_DEC_LAYERS


# --------------------------- pallas_call helper ------------------------------
def _zero_index_map(ndim):
    zeros = (0,) * ndim
    return lambda i: zeros


def _full_block(shape):
    return pl.BlockSpec(shape, _zero_index_map(len(shape)))


def _call(kernel, args, out_shape):
    """Single-block pallas_call: whole arrays resident in VMEM (tiny shapes)."""
    in_specs = [_full_block(a.shape) for a in args]
    if isinstance(out_shape, (tuple, list)):
        out_shape = tuple(out_shape)
        out_specs = tuple(_full_block(s.shape) for s in out_shape)
    else:
        out_specs = _full_block(out_shape.shape)
    return pl.pallas_call(
        kernel,
        out_shape=out_shape,
        grid=(1,),
        in_specs=in_specs,
        out_specs=out_specs,
    )(*args)


# --------------------------- in-kernel helpers --------------------------------
def _ln_f(x, g, b):
    mu = jnp.mean(x, axis=-1, keepdims=True)
    var = jnp.mean(jnp.square(x - mu), axis=-1, keepdims=True)
    return (x - mu) * jax.lax.rsqrt(var + 1e-5) * g + b


def _softmax_rows(s):
    s = s - jnp.max(s, axis=-1, keepdims=True)
    p = jnp.exp(s)
    return p * pl.reciprocal(jnp.sum(p, axis=-1, keepdims=True), approx=True)


def _mha_f(q, k, v, wo, bo, causal):
    """q: (Tq, D), k/v: (Tk, D), wo: (D, D), bo: (1, D) -> (Tq, D).
    Per-head loop keeps everything in the fused kernel; output projection is
    accumulated per head (concat(ctx_h) @ Wo == sum_h ctx_h @ Wo[h*Dh:(h+1)*Dh])."""
    tq = q.shape[0]
    tk = k.shape[0]
    scale = 1.0 / (D_HEAD ** 0.5)
    if causal:
        row = jax.lax.broadcasted_iota(jnp.int32, (tq, tk), 0)
        col = jax.lax.broadcasted_iota(jnp.int32, (tq, tk), 1)
        bias = jnp.where(row >= col, 0.0, -1e9).astype(jnp.float32)
    out = jnp.zeros((tq, D_MODEL), jnp.float32) + bo
    for h in range(N_HEADS):
        lo, hi = h * D_HEAD, (h + 1) * D_HEAD
        qh, kh, vh = q[:, lo:hi], k[:, lo:hi], v[:, lo:hi]
        s = jax.lax.dot_general(qh, kh, (((1,), (1,)), ((), ())),
                                preferred_element_type=jnp.float32) * scale
        if causal:
            s = s + bias
        p = _softmax_rows(s)
        ctx = jnp.dot(p, vh, preferred_element_type=jnp.float32)
        out = out + jnp.dot(ctx, wo[lo:hi, :], preferred_element_type=jnp.float32)
    return out


# ----------------------------- Pallas kernels --------------------------------
def _conv_gelu_kernel(x_ref, w_ref, b_ref, o_ref, *, k):
    # x_ref: (K, T_out, Cin) shifted slabs, w_ref: (K, Cin, Cout), b_ref: (1, Cout)
    y = b_ref[...]
    for j in range(k):
        y = y + jnp.dot(x_ref[j], w_ref[j], preferred_element_type=jnp.float32)
    o_ref[...] = jax.nn.gelu(y)


def _layernorm_kernel(x_ref, g_ref, b_ref, o_ref):
    o_ref[...] = _ln_f(x_ref[...], g_ref[...], b_ref[...])


def _enc_layer_kernel(x_ref, ln1g_ref, ln1b_ref, wqkv_ref, bqkv_ref, wo_ref, bo_ref,
                      ln2g_ref, ln2b_ref, w1_ref, b1_ref, w2_ref, b2_ref, o_ref):
    x = x_ref[...]
    # self-attention (fused QKV)
    h = _ln_f(x, ln1g_ref[...], ln1b_ref[...])
    qkv = jnp.dot(h, wqkv_ref[...], preferred_element_type=jnp.float32) + bqkv_ref[...]
    x = x + _mha_f(qkv[:, :D_MODEL], qkv[:, D_MODEL:2 * D_MODEL], qkv[:, 2 * D_MODEL:],
                   wo_ref[...], bo_ref[...], causal=False)
    # FFN
    h = _ln_f(x, ln2g_ref[...], ln2b_ref[...])
    h = jax.nn.gelu(jnp.dot(h, w1_ref[...], preferred_element_type=jnp.float32)
                    + b1_ref[...])
    x = x + jnp.dot(h, w2_ref[...], preferred_element_type=jnp.float32) + b2_ref[...]
    o_ref[...] = x


def _dec_layer_kernel(x_ref, enc_ref,
                      ln1g_ref, ln1b_ref, wqkv_ref, bqkv_ref, wo1_ref, bo1_ref,
                      ln2g_ref, ln2b_ref, wqc_ref, bqc_ref, wkvc_ref, bkvc_ref,
                      wo2_ref, bo2_ref,
                      ln3g_ref, ln3b_ref, w1_ref, b1_ref, w2_ref, b2_ref, o_ref):
    x = x_ref[...]
    enc = enc_ref[...]
    # causal self-attention (fused QKV, iota mask built in-kernel)
    h = _ln_f(x, ln1g_ref[...], ln1b_ref[...])
    qkv = jnp.dot(h, wqkv_ref[...], preferred_element_type=jnp.float32) + bqkv_ref[...]
    x = x + _mha_f(qkv[:, :D_MODEL], qkv[:, D_MODEL:2 * D_MODEL], qkv[:, 2 * D_MODEL:],
                   wo1_ref[...], bo1_ref[...], causal=True)
    # cross-attention over encoder output (fused KV)
    h = _ln_f(x, ln2g_ref[...], ln2b_ref[...])
    q = jnp.dot(h, wqc_ref[...], preferred_element_type=jnp.float32) + bqc_ref[...]
    kv = jnp.dot(enc, wkvc_ref[...], preferred_element_type=jnp.float32) + bkvc_ref[...]
    x = x + _mha_f(q, kv[:, :D_MODEL], kv[:, D_MODEL:],
                   wo2_ref[...], bo2_ref[...], causal=False)
    # FFN
    h = _ln_f(x, ln3g_ref[...], ln3b_ref[...])
    h = jax.nn.gelu(jnp.dot(h, w1_ref[...], preferred_element_type=jnp.float32)
                    + b1_ref[...])
    x = x + jnp.dot(h, w2_ref[...], preferred_element_type=jnp.float32) + b2_ref[...]
    o_ref[...] = x


def _dec_tail_kernel(x_ref, lng_ref, lnb_ref, emb_ref, hid_ref, logit_ref):
    # final layernorm + tied-embedding logits, fused
    h = _ln_f(x_ref[...], lng_ref[...], lnb_ref[...])
    hid_ref[...] = h
    logit_ref[...] = jax.lax.dot_general(
        h, emb_ref[...], (((1,), (1,)), ((), ())),
        preferred_element_type=jnp.float32)


# ----------------------------- model wrappers ---------------------------------
def conv1d_gelu(x, w_pt, b, stride):
    """PyTorch Conv1d(Cin, Cout, k=3, padding=1) + GELU as K shifted matmuls.
    x: (T, Cin) time-major; w_pt: (Cout, Cin, K) PyTorch layout; -> (T_out, Cout)."""
    T, Cin = x.shape
    Cout, _, K = w_pt.shape
    xp = jnp.pad(x, ((1, 1), (0, 0)))
    T_out = (T + 2 - K) // stride + 1
    taps = jnp.stack([xp[j: j + stride * T_out: stride] for j in range(K)], axis=0)
    wmats = jnp.transpose(w_pt, (2, 1, 0))  # (K, Cin, Cout)
    kern = functools.partial(_conv_gelu_kernel, k=K)
    return _call(kern, [taps, wmats, b],
                 jax.ShapeDtypeStruct((T_out, Cout), jnp.float32))


def layernorm(x, g, b):
    return _call(_layernorm_kernel, [x, g, b],
                 jax.ShapeDtypeStruct(x.shape, jnp.float32))


def encoder_layer(x, lp):
    args = [x, lp["ln1_g"], lp["ln1_b"], lp["w_qkv"], lp["b_qkv"], lp["wo"], lp["bo"],
            lp["ln2_g"], lp["ln2_b"], lp["fc1_w"], lp["fc1_b"], lp["fc2_w"], lp["fc2_b"]]
    return _call(_enc_layer_kernel, args, jax.ShapeDtypeStruct(x.shape, jnp.float32))


def decoder_layer(x, enc_out, lp):
    args = [x, enc_out,
            lp["ln1_g"], lp["ln1_b"], lp["w_qkv"], lp["b_qkv"],
            lp["wo_self"], lp["bo_self"],
            lp["ln2_g"], lp["ln2_b"], lp["wq_cross"], lp["bq_cross"],
            lp["w_kv_cross"], lp["b_kv_cross"], lp["wo_cross"], lp["bo_cross"],
            lp["ln3_g"], lp["ln3_b"], lp["fc1_w"], lp["fc1_b"], lp["fc2_w"], lp["fc2_b"]]
    return _call(_dec_layer_kernel, args, jax.ShapeDtypeStruct(x.shape, jnp.float32))


def decoder_tail(x, lng, lnb, emb):
    out_shapes = (jax.ShapeDtypeStruct(x.shape, jnp.float32),
                  jax.ShapeDtypeStruct((x.shape[0], emb.shape[0]), jnp.float32))
    return _call(_dec_tail_kernel, [x, lng, lnb, emb], out_shapes)


def encoder(mel_tc, params):
    """mel_tc: (T_MEL, N_MELS) -> (T_ENC, D_MODEL)."""
    x = conv1d_gelu(mel_tc, params["conv1_w"], params["conv1_b"], stride=1)
    x = conv1d_gelu(x, params["conv2_w"], params["conv2_b"], stride=2)
    x = x + params["enc_pos"]
    for lp in params["enc_layers"]:
        x = encoder_layer(x, lp)
    return layernorm(x, params["enc_ln_g"], params["enc_ln_b"])


@functools.partial(jax.jit, static_argnames=("layer", "max_new_tokens"))
def whisper_wrapper_full_forward(input_features, params, layer=LAYER,
                                 max_new_tokens=MAX_GEN):
    """input_features: (1, N_MELS, T_MEL) — PyTorch NCL convention.
    Returns decoder_hidden: (1, num_generated_words, D_MODEL), matching
    `torch.stack([hs[word][layer][0][0] ...]).unsqueeze(0)`."""
    assert max_new_tokens + 1 <= T_DEC
    mel = jnp.transpose(input_features[0], (1, 0))  # -> (T, n_mels), lane-dense
    enc_out = encoder(mel, params)

    tok_emb = params["tok_emb"]
    dec_pos = params["dec_pos"]
    dec_layers = params["dec_layers"]
    n_dec = len(dec_layers)

    # fixed-length decode: slot 0 = decoder_start_token (id 0); positions past
    # the current step are never read thanks to the causal mask -> static
    # shapes, single compile, no per-word retracing.
    tokens0 = jnp.zeros((T_DEC,), jnp.int32)
    hid0 = jnp.zeros((max_new_tokens, D_MODEL), jnp.float32)

    def body(step, carry):
        tokens, hid = carry
        x = tok_emb[tokens] + dec_pos                      # (T_DEC, D) embed (XLA glue)
        inter = [x]
        for lp in dec_layers:
            x = decoder_layer(x, enc_out, lp)              # one fused pallas_call/layer
            inter.append(x)
        h_ln, logits = decoder_tail(x, params["dec_ln_g"], params["dec_ln_b"], tok_emb)
        # HF (with KV cache) yields the *current* token's hidden at [0][0];
        # without cache that's position `step` of the fixed prefix.
        src = h_ln if layer >= n_dec else inter[layer]
        word_h = jax.lax.dynamic_slice(src, (step, 0), (1, D_MODEL))
        hid = jax.lax.dynamic_update_slice(hid, word_h, (step, 0))
        logit_row = jax.lax.dynamic_slice(logits, (step, 0), (1, VOCAB))
        next_tok = jnp.argmax(logit_row, axis=-1).astype(jnp.int32)  # greedy, tied emb
        tokens = jax.lax.dynamic_update_slice(tokens, next_tok, (step + 1,))
        return tokens, hid

    _, hid = jax.lax.fori_loop(0, max_new_tokens, body, (tokens0, hid0))
    return hid[None]  # (1, num_words, D_MODEL)


# ------------------------------ parameter init --------------------------------
def init_params(key):
    keys = iter(jax.random.split(key, 256))

    def nrm(shape, scale=0.02):
        return scale * jax.random.normal(next(keys), shape, jnp.float32)

    def ones(shape):
        return jnp.ones(shape, jnp.float32)

    def zeros(shape):
        return jnp.zeros(shape, jnp.float32)

    def enc_layer():
        return dict(
            ln1_g=ones((1, D_MODEL)), ln1_b=zeros((1, D_MODEL)),
            w_qkv=nrm((D_MODEL, 3 * D_MODEL)), b_qkv=zeros((1, 3 * D_MODEL)),
            wo=nrm((D_MODEL, D_MODEL)), bo=zeros((1, D_MODEL)),
            ln2_g=ones((1, D_MODEL)), ln2_b=zeros((1, D_MODEL)),
            fc1_w=nrm((D_MODEL, D_FF)), fc1_b=zeros((1, D_FF)),
            fc2_w=nrm((D_FF, D_MODEL)), fc2_b=zeros((1, D_MODEL)),
        )

    def dec_layer():
        return dict(
            ln1_g=ones((1, D_MODEL)), ln1_b=zeros((1, D_MODEL)),
            w_qkv=nrm((D_MODEL, 3 * D_MODEL)), b_qkv=zeros((1, 3 * D_MODEL)),
            wo_self=nrm((D_MODEL, D_MODEL)), bo_self=zeros((1, D_MODEL)),
            ln2_g=ones((1, D_MODEL)), ln2_b=zeros((1, D_MODEL)),
            wq_cross=nrm((D_MODEL, D_MODEL)), bq_cross=zeros((1, D_MODEL)),
            w_kv_cross=nrm((D_MODEL, 2 * D_MODEL)), b_kv_cross=zeros((1, 2 * D_MODEL)),
            wo_cross=nrm((D_MODEL, D_MODEL)), bo_cross=zeros((1, D_MODEL)),
            ln3_g=ones((1, D_MODEL)), ln3_b=zeros((1, D_MODEL)),
            fc1_w=nrm((D_MODEL, D_FF)), fc1_b=zeros((1, D_FF)),
            fc2_w=nrm((D_FF, D_MODEL)), fc2_b=zeros((1, D_MODEL)),
        )

    # sinusoidal encoder positions (Whisper-style, concat(sin, cos))
    pos = jnp.arange(T_ENC)[:, None].astype(jnp.float32)
    dim = jnp.arange(D_MODEL // 2)[None, :].astype(jnp.float32)
    inv = jnp.exp(-jnp.log(10000.0) * dim / (D_MODEL // 2 - 1))
    enc_pos = jnp.concatenate([jnp.sin(pos * inv), jnp.cos(pos * inv)], axis=-1)

    return dict(
        conv1_w=nrm((D_MODEL, N_MELS, 3)), conv1_b=zeros((1, D_MODEL)),
        conv2_w=nrm((D_MODEL, D_MODEL, 3)), conv2_b=zeros((1, D_MODEL)),
        enc_pos=enc_pos,
        enc_layers=[enc_layer() for _ in range(N_ENC_LAYERS)],
        enc_ln_g=ones((1, D_MODEL)), enc_ln_b=zeros((1, D_MODEL)),
        tok_emb=nrm((VOCAB, D_MODEL)),
        dec_pos=nrm((T_DEC, D_MODEL)),
        dec_layers=[dec_layer() for _ in range(N_DEC_LAYERS)],
        dec_ln_g=ones((1, D_MODEL)), dec_ln_b=zeros((1, D_MODEL)),
    )


# ---------------------------------- main --------------------------------------
if __name__ == "__main__":
    key = jax.random.PRNGKey(0)
    k_params, k_data = jax.random.split(key)
    params = init_params(k_params)

    # precomputed log-mel "input_features" (use_feat_extractor=False path),
    # PyTorch NCL layout: (batch=1, n_mels=8, frames=16)
    input_features = jax.random.normal(k_data, (1, N_MELS, T_MEL), jnp.float32)

    decoder_hidden = whisper_wrapper_full_forward(
        input_features, params, layer=LAYER, max_new_tokens=MAX_GEN)
    decoder_hidden = jax.block_until_ready(decoder_hidden)

    assert decoder_hidden.shape == (1, MAX_GEN, D_MODEL), decoder_hidden.shape
    assert bool(jnp.all(jnp.isfinite(decoder_hidden)))
    print("KERNEL_OK")
</pallas_src>

<mosaic_0001>
module attributes {stable_mosaic.version = 11 : i64} {
  func.func @_conv_gelu_kernel(%arg0: i32, %arg1: memref<3x16x8xf32, #tpu.memory_space<vmem>>, %arg2: memref<3x8x128xf32, #tpu.memory_space<vmem>>, %arg3: memref<1x128xf32, #tpu.memory_space<vmem>>, %arg4: memref<16x128xf32, #tpu.memory_space<vmem>>) attributes {dimension_semantics = [#tpu.dimension_semantics<arbitrary>], iteration_bounds = array<i64: 1>, scalar_prefetch = 0 : i64, scratch_operands = 0 : i64, tpu.core_type = #tpu.core_type<tc>, window_params = [{pipeline_mode = #tpu.pipeline_mode<synchronous>, transform_indices = @transform_0, window_bounds = array<i64: 3, 16, 8>}, {pipeline_mode = #tpu.pipeline_mode<synchronous>, transform_indices = @transform_1, window_bounds = array<i64: 3, 8, 128>}, {pipeline_mode = #tpu.pipeline_mode<synchronous>, transform_indices = @transform_2, window_bounds = array<i64: 1, 128>}, {pipeline_mode = #tpu.pipeline_mode<synchronous>, transform_indices = @transform_3, window_bounds = array<i64: 16, 128>}]} {
    %c0 = arith.constant 0 : index
    %c0_0 = arith.constant 0 : index
    %0 = vector.load %arg3[%c0, %c0_0] : memref<1x128xf32, #tpu.memory_space<vmem>>, vector<1x128xf32>
    %c0_1 = arith.constant 0 : index
    %c0_2 = arith.constant 0 : index
    %c0_3 = arith.constant 0 : index
    %1 = vector.load %arg1[%c0_1, %c0_2, %c0_3] : memref<3x16x8xf32, #tpu.memory_space<vmem>>, vector<1x16x8xf32>
    %2 = vector.shape_cast %1 : vector<1x16x8xf32> to vector<16x8xf32>
    %c0_4 = arith.constant 0 : index
    %c0_5 = arith.constant 0 : index
    %c0_6 = arith.constant 0 : index
    %3 = vector.load %arg2[%c0_4, %c0_5, %c0_6] : memref<3x8x128xf32, #tpu.memory_space<vmem>>, vector<1x8x128xf32>
    %4 = vector.shape_cast %3 : vector<1x8x128xf32> to vector<8x128xf32>
    %cst = arith.constant dense<0.000000e+00> : vector<16x128xf32>
    %5 = tpu.matmul %2, %4, %cst {dimension_numbers = #tpu.dot_dimension_numbers<[1], [0], [0], [1], [0, 0, 1, 1], [], []>} : vector<16x8xf32>, vector<8x128xf32>, vector<16x128xf32> -> vector<16x128xf32>
    %6 = vector.broadcast %0 : vector<1x128xf32> to vector<16x128xf32>
    %7 = arith.addf %6, %5 : vector<16x128xf32>
    %c1 = arith.constant 1 : index
    %c0_7 = arith.constant 0 : index
    %c0_8 = arith.constant 0 : index
    %8 = vector.load %arg1[%c1, %c0_7, %c0_8] : memref<3x16x8xf32, #tpu.memory_space<vmem>>, vector<1x16x8xf32>
    %9 = vector.shape_cast %8 : vector<1x16x8xf32> to vector<16x8xf32>
    %c1_9 = arith.constant 1 : index
    %c0_10 = arith.constant 0 : index
    %c0_11 = arith.constant 0 : index
    %10 = vector.load %arg2[%c1_9, %c0_10, %c0_11] : memref<3x8x128xf32, #tpu.memory_space<vmem>>, vector<1x8x128xf32>
    %11 = vector.shape_cast %10 : vector<1x8x128xf32> to vector<8x128xf32>
    %cst_12 = arith.constant dense<0.000000e+00> : vector<16x128xf32>
    %12 = tpu.matmul %9, %11, %cst_12 {dimension_numbers = #tpu.dot_dimension_numbers<[1], [0], [0], [1], [0, 0, 1, 1], [], []>} : vector<16x8xf32>, vector<8x128xf32>, vector<16x128xf32> -> vector<16x128xf32>
    %13 = arith.addf %7, %12 : vector<16x128xf32>
    %c2 = arith.constant 2 : index
    %c0_13 = arith.constant 0 : index
    %c0_14 = arith.constant 0 : index
    %14 = vector.load %arg1[%c2, %c0_13, %c0_14] : memref<3x16x8xf32, #tpu.memory_space<vmem>>, vector<1x16x8xf32>
    %15 = vector.shape_cast %14 : vector<1x16x8xf32> to vector<16x8xf32>
    %c2_15 = arith.constant 2 : index
    %c0_16 = arith.constant 0 : index
    %c0_17 = arith.constant 0 : index
    %16 = vector.load %arg2[%c2_15, %c0_16, %c0_17] : memref<3x8x128xf32, #tpu.memory_space<vmem>>, vector<1x8x128xf32>
    %17 = vector.shape_cast %16 : vector<1x8x128xf32> to vector<8x128xf32>
    %cst_18 = arith.constant dense<0.000000e+00> : vector<16x128xf32>
    %18 = tpu.matmul %15, %17, %cst_18 {dimension_numbers = #tpu.dot_dimension_numbers<[1], [0], [0], [1], [0, 0, 1, 1], [], []>} : vector<16x8xf32>, vector<8x128xf32>, vector<16x128xf32> -> vector<16x128xf32>
    %19 = arith.addf %13, %18 : vector<16x128xf32>
    %20 = arith.mulf %19, %19 : vector<16x128xf32>
    %21 = arith.mulf %19, %20 : vector<16x128xf32>
    %cst_19 = arith.constant 4.471500e-02 : f32
    %22 = vector.broadcast %cst_19 : f32 to vector<16x128xf32>
    %23 = arith.mulf %22, %21 : vector<16x128xf32>
    %24 = arith.addf %19, %23 : vector<16x128xf32>
    %cst_20 = arith.constant 0.797884583 : f32
    %25 = vector.broadcast %cst_20 : f32 to vector<16x128xf32>
    %26 = arith.mulf %25, %24 : vector<16x128xf32>
    %27 = math.tanh %26 : vector<16x128xf32>
    %cst_21 = arith.constant 1.000000e+00 : f32
    %28 = vector.broadcast %cst_21 : f32 to vector<16x128xf32>
    %29 = arith.addf %28, %27 : vector<16x128xf32>
    %cst_22 = arith.constant 5.000000e-01 : f32
    %30 = vector.broadcast %cst_22 : f32 to vector<16x128xf32>
    %31 = arith.mulf %30, %29 : vector<16x128xf32>
    %32 = arith.mulf %19, %31 : vector<16x128xf32>
    %c0_23 = arith.constant 0 : index
    %c0_24 = arith.constant 0 : index
    %33 = vector.load %arg4[%c0_23, %c0_24] : memref<16x128xf32, #tpu.memory_space<vmem>>, vector<16x128xf32>
    tpu.vector_store %arg4[%c0_23, %c0_24], %32 {strides = array<i32>} : memref<16x128xf32, #tpu.memory_space<vmem>>, vector<16x128xf32>,
    return
  }
  func.func @transform_0(%arg0: i32) -> (i32, i32, i32) {
    %c0_i32 = arith.constant 0 : i32
    %c0_i32_0 = arith.constant 0 : i32
    %c0_i32_1 = arith.constant 0 : i32
    %c0_i32_2 = arith.constant 0 : i32
    return %c0_i32, %c0_i32_0, %c0_i32_1 : i32, i32, i32
  }
  func.func @transform_1(%arg0: i32) -> (i32, i32, i32) {
    %c0_i32 = arith.constant 0 : i32
    %c0_i32_0 = arith.constant 0 : i32
    %c0_i32_1 = arith.constant 0 : i32
    %c0_i32_2 = arith.constant 0 : i32
    return %c0_i32, %c0_i32_0, %c0_i32_1 : i32, i32, i32
  }
  func.func @transform_2(%arg0: i32) -> (i32, i32) {
    %c0_i32 = arith.constant 0 : i32
    %c0_i32_0 = arith.constant 0 : i32
    %c0_i32_1 = arith.constant 0 : i32
    return %c0_i32, %c0_i32_0 : i32, i32
  }
  func.func @transform_3(%arg0: i32) -> (i32, i32) {
    %c0_i32 = arith.constant 0 : i32
    %c0_i32_0 = arith.constant 0 : i32
    %c0_i32_1 = arith.constant 0 : i32
    return %c0_i32, %c0_i32_0 : i32, i32
  }
}

module attributes {stable_mosaic.version = 11 : i64} {
  func.func @_conv_gelu_kernel(%arg0: i32, %arg1: memref<3x8x128xf32, #tpu.memory_space<vmem>>, %arg2: memref<3x128x128xf32, #tpu.memory_space<vmem>>, %arg3: memref<1x128xf32, #tpu.memory_space<vmem>>, %arg4: memref<8x128xf32, #tpu.memory_space<vmem>>) attributes {dimension_semantics = [#tpu.dimension_semantics<arbitrary>], iteration_bounds = array<i64: 1>, scalar_prefetch = 0 : i64, scratch_operands = 0 : i64, tpu.core_type = #tpu.core_type<tc>, window_params = [{pipeline_mode = #tpu.pipeline_mode<synchronous>, transform_indices = @transform_0, window_bounds = array<i64: 3, 8, 128>}, {pipeline_mode = #tpu.pipeline_mode<synchronous>, transform_indices = @transform_1, window_bounds = array<i64: 3, 128, 128>}, {pipeline_mode = #tpu.pipeline_mode<synchronous>, transform_indices = @transform_2, window_bounds = array<i64: 1, 128>}, {pipeline_mode = #tpu.pipeline_mode<synchronous>, transform_indices = @transform_3, window_bounds = array<i64: 8, 128>}]} {
    %c0 = arith.constant 0 : index
    %c0_0 = arith.constant 0 : index
    %0 = vector.load %arg3[%c0, %c0_0] : memref<1x128xf32, #tpu.memory_space<vmem>>, vector<1x128xf32>
    %c0_1 = arith.constant 0 : index
    %c0_2 = arith.constant 0 : index
    %c0_3 = arith.constant 0 : index
    %1 = vector.load %arg1[%c0_1, %c0_2, %c0_3] : memref<3x8x128xf32, #tpu.memory_space<vmem>>, vector<1x8x128xf32>
    %2 = vector.shape_cast %1 : vector<1x8x128xf32> to vector<8x128xf32>
    %c0_4 = arith.constant 0 : index
    %c0_5 = arith.constant 0 : index
    %c0_6 = arith.constant 0 : index
    %3 = vector.load %arg2[%c0_4, %c0_5, %c0_6] : memref<3x128x128xf32, #tpu.memory_space<vmem>>, vector<1x128x128xf32>
    %4 = vector.shape_cast %3 : vector<1x128x128xf32> to vector<128x128xf32>
    %cst = arith.constant dense<0.000000e+00> : vector<8x128xf32>
    %5 = tpu.matmul %2, %4, %cst {dimension_numbers = #tpu.dot_dimension_numbers<[1], [0], [0], [1], [0, 0, 1, 1], [], []>} : vector<8x128xf32>, vector<128x128xf32>, vector<8x128xf32> -> vector<8x128xf32>
    %6 = vector.broadcast %0 : vector<1x128xf32> to vector<8x128xf32>
    %7 = arith.addf %6, %5 : vector<8x128xf32>
    %c1 = arith.constant 1 : index
    %c0_7 = arith.constant 0 : index
    %c0_8 = arith.constant 0 : index
    %8 = vector.load %arg1[%c1, %c0_7, %c0_8] : memref<3x8x128xf32, #tpu.memory_space<vmem>>, vector<1x8x128xf32>
    %9 = vector.shape_cast %8 : vector<1x8x128xf32> to vector<8x128xf32>
    %c1_9 = arith.constant 1 : index
    %c0_10 = arith.constant 0 : index
    %c0_11 = arith.constant 0 : index
    %10 = vector.load %arg2[%c1_9, %c0_10, %c0_11] : memref<3x128x128xf32, #tpu.memory_space<vmem>>, vector<1x128x128xf32>
    %11 = vector.shape_cast %10 : vector<1x128x128xf32> to vector<128x128xf32>
    %cst_12 = arith.constant dense<0.000000e+00> : vector<8x128xf32>
    %12 = tpu.matmul %9, %11, %cst_12 {dimension_numbers = #tpu.dot_dimension_numbers<[1], [0], [0], [1], [0, 0, 1, 1], [], []>} : vector<8x128xf32>, vector<128x128xf32>, vector<8x128xf32> -> vector<8x128xf32>
    %13 = arith.addf %7, %12 : vector<8x128xf32>
    %c2 = arith.constant 2 : index
    %c0_13 = arith.constant 0 : index
    %c0_14 = arith.constant 0 : index
    %14 = vector.load %arg1[%c2, %c0_13, %c0_14] : memref<3x8x128xf32, #tpu.memory_space<vmem>>, vector<1x8x128xf32>
    %15 = vector.shape_cast %14 : vector<1x8x128xf32> to vector<8x128xf32>
    %c2_15 = arith.constant 2 : index
    %c0_16 = arith.constant 0 : index
    %c0_17 = arith.constant 0 : index
    %16 = vector.load %arg2[%c2_15, %c0_16, %c0_17] : memref<3x128x128xf32, #tpu.memory_space<vmem>>, vector<1x128x128xf32>
    %17 = vector.shape_cast %16 : vector<1x128x128xf32> to vector<128x128xf32>
    %cst_18 = arith.constant dense<0.000000e+00> : vector<8x128xf32>
    %18 = tpu.matmul %15, %17, %cst_18 {dimension_numbers = #tpu.dot_dimension_numbers<[1], [0], [0], [1], [0, 0, 1, 1], [], []>} : vector<8x128xf32>, vector<128x128xf32>, vector<8x128xf32> -> vector<8x128xf32>
    %19 = arith.addf %13, %18 : vector<8x128xf32>
    %20 = arith.mulf %19, %19 : vector<8x128xf32>
    %21 = arith.mulf %19, %20 : vector<8x128xf32>
    %cst_19 = arith.constant 4.471500e-02 : f32
    %22 = vector.broadcast %cst_19 : f32 to vector<8x128xf32>
    %23 = arith.mulf %22, %21 : vector<8x128xf32>
    %24 = arith.addf %19, %23 : vector<8x128xf32>
    %cst_20 = arith.constant 0.797884583 : f32
    %25 = vector.broadcast %cst_20 : f32 to vector<8x128xf32>
    %26 = arith.mulf %25, %24 : vector<8x128xf32>
    %27 = math.tanh %26 : vector<8x128xf32>
    %cst_21 = arith.constant 1.000000e+00 : f32
    %28 = vector.broadcast %cst_21 : f32 to vector<8x128xf32>
    %29 = arith.addf %28, %27 : vector<8x128xf32>
    %cst_22 = arith.constant 5.000000e-01 : f32
    %30 = vector.broadcast %cst_22 : f32 to vector<8x128xf32>
    %31 = arith.mulf %30, %29 : vector<8x128xf32>
    %32 = arith.mulf %19, %31 : vector<8x128xf32>
    %c0_23 = arith.constant 0 : index
    %c0_24 = arith.constant 0 : index
    %33 = vector.load %arg4[%c0_23, %c0_24] : memref<8x128xf32, #tpu.memory_space<vmem>>, vector<8x128xf32>
    tpu.vector_store %arg4[%c0_23, %c0_24], %32 {strides = array<i32>} : memref<8x128xf32, #tpu.memory_space<vmem>>, vector<8x128xf32>,
    return
  }
  func.func @transform_0(%arg0: i32) -> (i32, i32, i32) {
    %c0_i32 = arith.constant 0 : i32
    %c0_i32_0 = arith.constant 0 : i32
    %c0_i32_1 = arith.constant 0 : i32
    %c0_i32_2 = arith.constant 0 : i32
    return %c0_i32, %c0_i32_0, %c0_i32_1 : i32, i32, i32
  }
  func.func @transform_1(%arg0: i32) -> (i32, i32, i32) {
    %c0_i32 = arith.constant 0 : i32
    %c0_i32_0 = arith.constant 0 : i32
    %c0_i32_1 = arith.constant 0 : i32
    %c0_i32_2 = arith.constant 0 : i32
    return %c0_i32, %c0_i32_0, %c0_i32_1 : i32, i32, i32
  }
  func.func @transform_2(%arg0: i32) -> (i32, i32) {
    %c0_i32 = arith.constant 0 : i32
    %c0_i32_0 = arith.constant 0 : i32
    %c0_i32_1 = arith.constant 0 : i32
    return %c0_i32, %c0_i32_0 : i32, i32
  }
  func.func @transform_3(%arg0: i32) -> (i32, i32) {
    %c0_i32 = arith.constant 0 : i32
    %c0_i32_0 = arith.constant 0 : i32
    %c0_i32_1 = arith.constant 0 : i32
    return %c0_i32, %c0_i32_0 : i32, i32
  }
}

module attributes {stable_mosaic.version = 11 : i64} {
  func.func @_enc_layer_kernel(%arg0: i32, %arg1: memref<8x128xf32, #tpu.memory_space<vmem>>, %arg2: memref<1x128xf32, #tpu.memory_space<vmem>>, %arg3: memref<1x128xf32, #tpu.memory_space<vmem>>, %arg4: memref<128x384xf32, #tpu.memory_space<vmem>>, %arg5: memref<1x384xf32, #tpu.memory_space<vmem>>, %arg6: memref<128x128xf32, #tpu.memory_space<vmem>>, %arg7: memref<1x128xf32, #tpu.memory_space<vmem>>, %arg8: memref<1x128xf32, #tpu.memory_space<vmem>>, %arg9: memref<1x128xf32, #tpu.memory_space<vmem>>, %arg10: memref<128x256xf32, #tpu.memory_space<vmem>>, %arg11: memref<1x256xf32, #tpu.memory_space<vmem>>, %arg12: memref<256x128xf32, #tpu.memory_space<vmem>>, %arg13: memref<1x128xf32, #tpu.memory_space<vmem>>, %arg14: memref<8x128xf32, #tpu.memory_space<vmem>>) attributes {dimension_semantics = [#tpu.dimension_semantics<arbitrary>], iteration_bounds = array<i64: 1>, scalar_prefetch = 0 : i64, scratch_operands = 0 : i64, tpu.core_type = #tpu.core_type<tc>, window_params = [{pipeline_mode = #tpu.pipeline_mode<synchronous>, transform_indices = @transform_0, window_bounds = array<i64: 8, 128>}, {pipeline_mode = #tpu.pipeline_mode<synchronous>, transform_indices = @transform_1, window_bounds = array<i64: 1, 128>}, {pipeline_mode = #tpu.pipeline_mode<synchronous>, transform_indices = @transform_2, window_bounds = array<i64: 1, 128>}, {pipeline_mode = #tpu.pipeline_mode<synchronous>, transform_indices = @transform_3, window_bounds = array<i64: 128, 384>}, {pipeline_mode = #tpu.pipeline_mode<synchronous>, transform_indices = @transform_4, window_bounds = array<i64: 1, 384>}, {pipeline_mode = #tpu.pipeline_mode<synchronous>, transform_indices = @transform_5, window_bounds = array<i64: 128, 128>}, {pipeline_mode = #tpu.pipeline_mode<synchronous>, transform_indices = @transform_6, window_bounds = array<i64: 1, 128>}, {pipeline_mode = #tpu.pipeline_mode<synchronous>, transform_indices = @transform_7, window_bounds = array<i64: 1, 128>}, {pipeline_mode = #tpu.pipeline_mode<synchronous>, transform_indices = @transform_8, window_bounds = array<i64: 1, 128>}, {pipeline_mode = #tpu.pipeline_mode<synchronous>, transform_indices = @transform_9, window_bounds = array<i64: 128, 256>}, {pipeline_mode = #tpu.pipeline_mode<synchronous>, transform_indices = @transform_10, window_bounds = array<i64: 1, 256>}, {pipeline_mode = #tpu.pipeline_mode<synchronous>, transform_indices = @transform_11, window_bounds = array<i64: 256, 128>}, {pipeline_mode = #tpu.pipeline_mode<synchronous>, transform_indices = @transform_12, window_bounds = array<i64: 1, 128>}, {pipeline_mode = #tpu.pipeline_mode<synchronous>, transform_indices = @transform_13, window_bounds = array<i64: 8, 128>}]} {
    %c0 = arith.constant 0 : index
    %c0_0 = arith.constant 0 : index
    %0 = vector.load %arg1[%c0, %c0_0] : memref<8x128xf32, #tpu.memory_space<vmem>>, vector<8x128xf32>
    %c0_1 = arith.constant 0 : index
    %c0_2 = arith.constant 0 : index
    %1 = vector.load %arg2[%c0_1, %c0_2] : memref<1x128xf32, #tpu.memory_space<vmem>>, vector<1x128xf32>
    %c0_3 = arith.constant 0 : index
    %c0_4 = arith.constant 0 : index
    %2 = vector.load %arg3[%c0_3, %c0_4] : memref<1x128xf32, #tpu.memory_space<vmem>>, vector<1x128xf32>
    %cst = arith.constant dense<0.000000e+00> : vector<8xf32>
    %3 = vector.multi_reduction <add>, %0, %cst [1] : vector<8x128xf32> to vector<8xf32>
    %4 = vector.shape_cast %3 : vector<8xf32> to vector<8x1xf32>
    %cst_5 = arith.constant 1.280000e+02 : f32
    %5 = vector.broadcast %cst_5 : f32 to vector<8x1xf32>
    %6 = arith.divf %4, %5 : vector<8x1xf32>
    %7 = vector.broadcast %6 : vector<8x1xf32> to vector<8x128xf32>
    %8 = arith.subf %0, %7 : vector<8x128xf32>
    %9 = arith.mulf %8, %8 : vector<8x128xf32>
    %cst_6 = arith.constant dense<0.000000e+00> : vector<8xf32>
    %10 = vector.multi_reduction <add>, %9, %cst_6 [1] : vector<8x128xf32> to vector<8xf32>
    %11 = vector.shape_cast %10 : vector<8xf32> to vector<8x1xf32>
    %cst_7 = arith.constant 1.280000e+02 : f32
    %12 = vector.broadcast %cst_7 : f32 to vector<8x1xf32>
    %13 = arith.divf %11, %12 : vector<8x1xf32>
    %14 = vector.broadcast %6 : vector<8x1xf32> to vector<8x128xf32>
    %15 = arith.subf %0, %14 : vector<8x128xf32>
    %cst_8 = arith.constant 9.99999974E-6 : f32
    %16 = vector.broadcast %cst_8 : f32 to vector<8x1xf32>
    %17 = arith.addf %13, %16 : vector<8x1xf32>
    %18 = math.rsqrt %17 : vector<8x1xf32>
    %19 = vector.broadcast %18 : vector<8x1xf32> to vector<8x128xf32>
    %20 = arith.mulf %15, %19 : vector<8x128xf32>
    %21 = vector.broadcast %1 : vector<1x128xf32> to vector<8x128xf32>
    %22 = arith.mulf %20, %21 : vector<8x128xf32>
    %23 = vector.broadcast %2 : vector<1x128xf32> to vector<8x128xf32>
    %24 = arith.addf %22, %23 : vector<8x128xf32>
    %c0_9 = arith.constant 0 : index
    %c0_10 = arith.constant 0 : index
    %25 = vector.load %arg4[%c0_9, %c0_10] : memref<128x384xf32, #tpu.memory_space<vmem>>, vector<128x384xf32>
    %cst_11 = arith.constant dense<0.000000e+00> : vector<8x384xf32>
    %26 = tpu.matmul %24, %25, %cst_11 {dimension_numbers = #tpu.dot_dimension_numbers<[1], [0], [0], [1], [0, 0, 1, 1], [], []>} : vector<8x128xf32>, vector<128x384xf32>, vector<8x384xf32> -> vector<8x384xf32>
    %c0_12 = arith.constant 0 : index
    %c0_13 = arith.constant 0 : index
    %27 = vector.load %arg5[%c0_12, %c0_13] : memref<1x384xf32, #tpu.memory_space<vmem>>, vector<1x384xf32>
    %28 = vector.broadcast %27 : vector<1x384xf32> to vector<8x384xf32>
    %29 = arith.addf %26, %28 : vector<8x384xf32>
    %30 = vector.extract_strided_slice %29 {offsets = [0, 0], sizes = [8, 128], strides = [1, 1]} : vector<8x384xf32> to vector<8x128xf32>
    %31 = vector.extract_strided_slice %29 {offsets = [0, 128], sizes = [8, 128], strides = [1, 1]} : vector<8x384xf32> to vector<8x128xf32>
    %32 = vector.extract_strided_slice %29 {offsets = [0, 256], sizes = [8, 128], strides = [1, 1]} : vector<8x384xf32> to vector<8x128xf32>
    %c0_14 = arith.constant 0 : index
    %c0_15 = arith.constant 0 : index
    %33 = vector.load %arg6[%c0_14, %c0_15] : memref<128x128xf32, #tpu.memory_space<vmem>>, vector<128x128xf32>
    %c0_16 = arith.constant 0 : index
    %c0_17 = arith.constant 0 : index
    %34 = vector.load %arg7[%c0_16, %c0_17] : memref<1x128xf32, #tpu.memory_space<vmem>>, vector<1x128xf32>
    %cst_18 = arith.constant 0.000000e+00 : f32
    %35 = vector.broadcast %cst_18 : f32 to vector<8x128xf32>
    %36 = vector.broadcast %34 : vector<1x128xf32> to vector<8x128xf32>
    %37 = arith.addf %35, %36 : vector<8x128xf32>
    %38 = vector.extract_strided_slice %30 {offsets = [0, 0], sizes = [8, 32], strides = [1, 1]} : vector<8x128xf32> to vector<8x32xf32>
    %39 = vector.extract_strided_slice %31 {offsets = [0, 0], sizes = [8, 32], strides = [1, 1]} : vector<8x128xf32> to vector<8x32xf32>
    %40 = vector.extract_strided_slice %32 {offsets = [0, 0], sizes = [8, 32], strides = [1, 1]} : vector<8x128xf32> to vector<8x32xf32>
    %cst_19 = arith.constant dense<0.000000e+00> : vector<8x8xf32>
    %41 = tpu.matmul %38, %39, %cst_19 {dimension_numbers = #tpu.dot_dimension_numbers<[1], [1], [0], [0], [0, 0, 1, 0], [], []>} : vector<8x32xf32>, vector<8x32xf32>, vector<8x8xf32> -> vector<8x8xf32>
    %cst_20 = arith.constant 0.176776692 : f32
    %42 = vector.broadcast %cst_20 : f32 to vector<8x8xf32>
    %43 = arith.mulf %41, %42 : vector<8x8xf32>
    %cst_21 = arith.constant dense<0xFF800000> : vector<8xf32>
    %44 = vector.multi_reduction <maximumf>, %43, %cst_21 [1] : vector<8x8xf32> to vector<8xf32>
    %45 = vector.shape_cast %44 : vector<8xf32> to vector<8x1xf32>
    %46 = vector.broadcast %45 : vector<8x1xf32> to vector<8x8xf32>
    %47 = arith.subf %43, %46 : vector<8x8xf32>
    %48 = math.exp %47 : vector<8x8xf32>
    %cst_22 = arith.constant dense<0.000000e+00> : vector<8xf32>
    %49 = vector.multi_reduction <add>, %48, %cst_22 [1] : vector<8x8xf32> to vector<8xf32>
    %50 = vector.shape_cast %49 : vector<8xf32> to vector<8x1xf32>
    %51 = tpu.reciprocal %50 {approx = true} : vector<8x1xf32> -> vector<8x1xf32>
    %52 = vector.broadcast %51 : vector<8x1xf32> to vector<8x8xf32>
    %53 = arith.mulf %48, %52 : vector<8x8xf32>
    %cst_23 = arith.constant dense<0.000000e+00> : vector<8x32xf32>
    %54 = tpu.matmul %53, %40, %cst_23 {dimension_numbers = #tpu.dot_dimension_numbers<[1], [0], [0], [1], [0, 0, 1, 1], [], []>} : vector<8x8xf32>, vector<8x32xf32>, vector<8x32xf32> -> vector<8x32xf32>
    %55 = vector.extract_strided_slice %33 {offsets = [0, 0], sizes = [32, 128], strides = [1, 1]} : vector<128x128xf32> to vector<32x128xf32>
    %cst_24 = arith.constant dense<0.000000e+00> : vector<8x128xf32>
    %56 = tpu.matmul %54, %55, %cst_24 {dimension_numbers = #tpu.dot_dimension_numbers<[1], [0], [0], [1], [0, 0, 1, 1], [], []>} : vector<8x32xf32>, vector<32x128xf32>, vector<8x128xf32> -> vector<8x128xf32>
    %57 = arith.addf %37, %56 : vector<8x128xf32>
    %58 = vector.extract_strided_slice %30 {offsets = [0, 32], sizes = [8, 32], strides = [1, 1]} : vector<8x128xf32> to vector<8x32xf32>
    %59 = vector.extract_strided_slice %31 {offsets = [0, 32], sizes = [8, 32], strides = [1, 1]} : vector<8x128xf32> to vector<8x32xf32>
    %60 = vector.extract_strided_slice %32 {offsets = [0, 32], sizes = [8, 32], strides = [1, 1]} : vector<8x128xf32> to vector<8x32xf32>
    %cst_25 = arith.constant dense<0.000000e+00> : vector<8x8xf32>
    %61 = tpu.matmul %58, %59, %cst_25 {dimension_numbers = #tpu.dot_dimension_numbers<[1], [1], [0], [0], [0, 0, 1, 0], [], []>} : vector<8x32xf32>, vector<8x32xf32>, vector<8x8xf32> -> vector<8x8xf32>
    %cst_26 = arith.constant 0.176776692 : f32
    %62 = vector.broadcast %cst_26 : f32 to vector<8x8xf32>
    %63 = arith.mulf %61, %62 : vector<8x8xf32>
    %cst_27 = arith.constant dense<0xFF800000> : vector<8xf32>
    %64 = vector.multi_reduction <maximumf>, %63, %cst_27 [1] : vector<8x8xf32> to vector<8xf32>
    %65 = vector.shape_cast %64 : vector<8xf32> to vector<8x1xf32>
    %66 = vector.broadcast %65 : vector<8x1xf32> to vector<8x8xf32>
    %67 = arith.subf %63, %66 : vector<8x8xf32>
    %68 = math.exp %67 : vector<8x8xf32>
    %cst_28 = arith.constant dense<0.000000e+00> : vector<8xf32>
    %69 = vector.multi_reduction <add>, %68, %cst_28 [1] : vector<8x8xf32> to vector<8xf32>
    %70 = vector.shape_cast %69 : vector<8xf32> to vector<8x1xf32>
    %71 = tpu.reciprocal %70 {approx = true} : vector<8x1xf32> -> vector<8x1xf32>
    %72 = vector.broadcast %71 : vector<8x1xf32> to vector<8x8xf32>
    %73 = arith.mulf %68, %72 : vector<8x8xf32>
    %cst_29 = arith.constant dense<0.000000e+00> : vector<8x32xf32>
    %74 = tpu.matmul %73, %60, %cst_29 {dimension_numbers = #tpu.dot_dimension_numbers<[1], [0], [0], [1], [0, 0, 1, 1], [], []>} : vector<8x8xf32>, vector<8x32xf32>, vector<8x32xf32> -> vector<8x32xf32>
    %75 = vector.extract_strided_slice %33 {offsets = [32, 0], sizes = [32, 128], strides = [1, 1]} : vector<128x128xf32> to vector<32x128xf32>
    %cst_30 = arith.constant dense<0.000000e+00> : vector<8x128xf32>
    %76 = tpu.matmul %74, %75, %cst_30 {dimension_numbers = #tpu.dot_dimension_numbers<[1], [0], [0], [1], [0, 0, 1, 1], [], []>} : vector<8x32xf32>, vector<32x128xf32>, vector<8x128xf32> -> vector<8x128xf32>
    %77 = arith.addf %57, %76 : vector<8x128xf32>
    %78 = vector.extract_strided_slice %30 {offsets = [0, 64], sizes = [8, 32], strides = [1, 1]} : vector<8x128xf32> to vector<8x32xf32>
    %79 = vector.extract_strided_slice %31 {offsets = [0, 64], sizes = [8, 32], strides = [1, 1]} : vector<8x128xf32> to vector<8x32xf32>
    %80 = vector.extract_strided_slice %32 {offsets = [0, 64], sizes = [8, 32], strides = [1, 1]} : vector<8x128xf32> to vector<8x32xf32>
    %cst_31 = arith.constant dense<0.000000e+00> : vector<8x8xf32>
    %81 = tpu.matmul %78, %79, %cst_31 {dimension_numbers = #tpu.dot_dimension_numbers<[1], [1], [0], [0], [0, 0, 1, 0], [], []>} : vector<8x32xf32>, vector<8x32xf32>, vector<8x8xf32> -> vector<8x8xf32>
    %cst_32 = arith.constant 0.176776692 : f32
    %82 = vector.broadcast %cst_32 : f32 to vector<8x8xf32>
    %83 = arith.mulf %81, %82 : vector<8x8xf32>
    %cst_33 = arith.constant dense<0xFF800000> : vector<8xf32>
    %84 = vector.multi_reduction <maximumf>, %83, %cst_33 [1] : vector<8x8xf32> to vector<8xf32>
    %85 = vector.shape_cast %84 : vector<8xf32> to vector<8x1xf32>
    %86 = vector.broadcast %85 : vector<8x1xf32> to vector<8x8xf32>
    %87 = arith.subf %83, %86 : vector<8x8xf32>
    %88 = math.exp %87 : vector<8x8xf32>
    %cst_34 = arith.constant dense<0.000000e+00> : vector<8xf32>
    %89 = vector.multi_reduction <add>, %88, %cst_34 [1] : vector<8x8xf32> to vector<8xf32>
    %90 = vector.shape_cast %89 : vector<8xf32> to vector<8x1xf32>
    %91 = tpu.reciprocal %90 {approx = true} : vector<8x1xf32> -> vector<8x1xf32>
    %92 = vector.broadcast %91 : vector<8x1xf32> to vector<8x8xf32>
    %93 = arith.mulf %88, %92 : vector<8x8xf32>
    %cst_35 = arith.constant dense<0.000000e+00> : vector<8x32xf32>
    %94 = tpu.matmul %93, %80, %cst_35 {dimension_numbers = #tpu.dot_dimension_numbers<[1], [0], [0], [1], [0, 0, 1, 1], [], []>} : vector<8x8xf32>, vector<8x32xf32>, vector<8x32xf32> -> vector<8x32xf32>
    %95 = vector.extract_strided_slice %33 {offsets = [64, 0], sizes = [32, 128], strides = [1, 1]} : vector<128x128xf32> to vector<32x128xf32>
    %cst_36 = arith.constant dense<0.000000e+00> : vector<8x128xf32>
    %96 = tpu.matmul %94, %95, %cst_36 {dimension_numbers = #tpu.dot_dimension_numbers<[1], [0], [0], [1], [0, 0, 1, 1], [], []>} : vector<8x32xf32>, vector<32x128xf32>, vector<8x128xf32> -> vector<8x128xf32>
    %97 = arith.addf %77, %96 : vector<8x128xf32>
    %98 = vector.extract_strided_slice %30 {offsets = [0, 96], sizes = [8, 32], strides = [1, 1]} : vector<8x128xf32> to vector<8x32xf32>
    %99 = vector.extract_strided_slice %31 {offsets = [0, 96], sizes = [8, 32], strides = [1, 1]} : vector<8x128xf32> to vector<8x32xf32>
    %100 = vector.extract_strided_slice %32 {offsets = [0, 96], sizes = [8, 32], strides = [1, 1]} : vector<8x128xf32> to vector<8x32xf32>
    %cst_37 = arith.constant dense<0.000000e+00> : vector<8x8xf32>
    %101 = tpu.matmul %98, %99, %cst_37 {dimension_numbers = #tpu.dot_dimension_numbers<[1], [1], [0], [0], [0, 0, 1, 0], [], []>} : vector<8x32xf32>, vector<8x32xf32>, vector<8x8xf32> -> vector<8x8xf32>
    %cst_38 = arith.constant 0.176776692 : f32
    %102 = vector.broadcast %cst_38 : f32 to vector<8x8xf32>
    %103 = arith.mulf %101, %102 : vector<8x8xf32>
    %cst_39 = arith.constant dense<0xFF800000> : vector<8xf32>
    %104 = vector.multi_reduction <maximumf>, %103, %cst_39 [1] : vector<8x8xf32> to vector<8xf32>
    %105 = vector.shape_cast %104 : vector<8xf32> to vector<8x1xf32>
    %106 = vector.broadcast %105 : vector<8x1xf32> to vector<8x8xf32>
    %107 = arith.subf %103, %106 : vector<8x8xf32>
    %108 = math.exp %107 : vector<8x8xf32>
    %cst_40 = arith.constant dense<0.000000e+00> : vector<8xf32>
    %109 = vector.multi_reduction <add>, %108, %cst_40 [1] : vector<8x8xf32> to vector<8xf32>
    %110 = vector.shape_cast %109 : vector<8xf32> to vector<8x1xf32>
    %111 = tpu.reciprocal %110 {approx = true} : vector<8x1xf32> -> vector<8x1xf32>
    %112 = vector.broadcast %111 : vector<8x1xf32> to vector<8x8xf32>
    %113 = arith.mulf %108, %112 : vector<8x8xf32>
    %cst_41 = arith.constant dense<0.000000e+00> : vector<8x32xf32>
    %114 = tpu.matmul %113, %100, %cst_41 {dimension_numbers = #tpu.dot_dimension_numbers<[1], [0], [0], [1], [0, 0, 1, 1], [], []>} : vector<8x8xf32>, vector<8x32xf32>, vector<8x32xf32> -> vector<8x32xf32>
    %115 = vector.extract_strided_slice %33 {offsets = [96, 0], sizes = [32, 128], strides = [1, 1]} : vector<128x128xf32> to vector<32x128xf32>
    %cst_42 = arith.constant dense<0.000000e+00> : vector<8x128xf32>
    %116 = tpu.matmul %114, %115, %cst_42 {dimension_numbers = #tpu.dot_dimension_numbers<[1], [0], [0], [1], [0, 0, 1, 1], [], []>} : vector<8x32xf32>, vector<32x128xf32>, vector<8x128xf32> -> vector<8x128xf32>
    %117 = arith.addf %97, %116 : vector<8x128xf32>
    %118 = arith.addf %0, %117 : vector<8x128xf32>
    %c0_43 = arith.constant 0 : index
    %c0_44 = arith.constant 0 : index
    %119 = vector.load %arg8[%c0_43, %c0_44] : memref<1x128xf32, #tpu.memory_space<vmem>>, vector<1x128xf32>
    %c0_45 = arith.constant 0 : index
    %c0_46 = arith.constant 0 : index
    %120 = vector.load %arg9[%c0_45, %c0_46] : memref<1x128xf32, #tpu.memory_space<vmem>>, vector<1x128xf32>
    %cst_47 = arith.constant dense<0.000000e+00> : vector<8xf32>
    %121 = vector.multi_reduction <add>, %118, %cst_47 [1] : vector<8x128xf32> to vector<8xf32>
    %122 = vector.shape_cast %121 : vector<8xf32> to vector<8x1xf32>
    %cst_48 = arith.constant 1.280000e+02 : f32
    %123 = vector.broadcast %cst_48 : f32 to vector<8x1xf32>
    %124 = arith.divf %122, %123 : vector<8x1xf32>
    %125 = vector.broadcast %124 : vector<8x1xf32> to vector<8x128xf32>
    %126 = arith.subf %118, %125 : vector<8x128xf32>
    %127 = arith.mulf %126, %126 : vector<8x128xf32>
    %cst_49 = arith.constant dense<0.000000e+00> : vector<8xf32>
    %128 = vector.multi_reduction <add>, %127, %cst_49 [1] : vector<8x128xf32> to vector<8xf32>
    %129 = vector.shape_cast %128 : vector<8xf32> to vector<8x1xf32>
    %cst_50 = arith.constant 1.280000e+02 : f32
    %130 = vector.broadcast %cst_50 : f32 to vector<8x1xf32>
    %131 = arith.divf %129, %130 : vector<8x1xf32>
    %132 = vector.broadcast %124 : vector<8x1xf32> to vector<8x128xf32>
    %133 = arith.subf %118, %132 : vector<8x128xf32>
    %cst_51 = arith.constant 9.99999974E-6 : f32
    %134 = vector.broadcast %cst_51 : f32 to vector<8x1xf32>
    %135 = arith.addf %131, %134 : vector<8x1xf32>
    %136 = math.rsqrt %135 : vector<8x1xf32>
    %137 = vector.broadcast %136 : vector<8x1xf32> to vector<8x128xf32>
    %138 = arith.mulf %133, %137 : vector<8x128xf32>
    %139 = vector.broadcast %119 : vector<1x128xf32> to vector<8x128xf32>
    %140 = arith.mulf %138, %139 : vector<8x128xf32>
    %141 = vector.broadcast %120 : vector<1x128xf32> to vector<8x128xf32>
    %142 = arith.addf %140, %141 : vector<8x128xf32>
    %c0_52 = arith.constant 0 : index
    %c0_53 = arith.constant 0 : index
    %143 = vector.load %arg10[%c0_52, %c0_53] : memref<128x256xf32, #tpu.memory_space<vmem>>, vector<128x256xf32>
    %cst_54 = arith.constant dense<0.000000e+00> : vector<8x256xf32>
    %144 = tpu.matmul %142, %143, %cst_54 {dimension_numbers = #tpu.dot_dimension_numbers<[1], [0], [0], [1], [0, 0, 1, 1], [], []>} : vector<8x128xf32>, vector<128x256xf32>, vector<8x256xf32> -> vector<8x256xf32>
    %c0_55 = arith.constant 0 : index
    %c0_56 = arith.constant 0 : index
    %145 = vector.load %arg11[%c0_55, %c0_56] : memref<1x256xf32, #tpu.memory_space<vmem>>, vector<1x256xf32>
    %146 = vector.broadcast %145 : vector<1x256xf32> to vector<8x256xf32>
    %147 = arith.addf %144, %146 : vector<8x256xf32>
    %148 = arith.mulf %147, %147 : vector<8x256xf32>
    %149 = arith.mulf %147, %148 : vector<8x256xf32>
    %cst_57 = arith.constant 4.471500e-02 : f32
    %150 = vector.broadcast %cst_57 : f32 to vector<8x256xf32>
    %151 = arith.mulf %150, %149 : vector<8x256xf32>
    %152 = arith.addf %147, %151 : vector<8x256xf32>
    %cst_58 = arith.constant 0.797884583 : f32
    %153 = vector.broadcast %cst_58 : f32 to vector<8x256xf32>
    %154 = arith.mulf %153, %152 : vector<8x256xf32>
    %155 = math.tanh %154 : vector<8x256xf32>
    %cst_59 = arith.constant 1.000000e+00 : f32
    %156 = vector.broadcast %cst_59 : f32 to vector<8x256xf32>
    %157 = arith.addf %156, %155 : vector<8x256xf32>
    %cst_60 = arith.constant 5.000000e-01 : f32
    %158 = vector.broadcast %cst_60 : f32 to vector<8x256xf32>
    %159 = arith.mulf %158, %157 : vector<8x256xf32>
    %160 = arith.mulf %147, %159 : vector<8x256xf32>
    %c0_61 = arith.constant 0 : index
    %c0_62 = arith.constant 0 : index
    %161 = vector.load %arg12[%c0_61, %c0_62] : memref<256x128xf32, #tpu.memory_space<vmem>>, vector<256x128xf32>
    %cst_63 = arith.constant dense<0.000000e+00> : vector<8x128xf32>
    %162 = tpu.matmul %160, %161, %cst_63 {dimension_numbers = #tpu.dot_dimension_numbers<[1], [0], [0], [1], [0, 0, 1, 1], [], []>} : vector<8x256xf32>, vector<256x128xf32>, vector<8x128xf32> -> vector<8x128xf32>
    %163 = arith.addf %118, %162 : vector<8x128xf32>
    %c0_64 = arith.constant 0 : index
    %c0_65 = arith.constant 0 : index
    %164 = vector.load %arg13[%c0_64, %c0_65] : memref<1x128xf32, #tpu.memory_space<vmem>>, vector<1x128xf32>
    %165 = vector.broadcast %164 : vector<1x128xf32> to vector<8x128xf32>
    %166 = arith.addf %163, %165 : vector<8x128xf32>
    %c0_66 = arith.constant 0 : index
    %c0_67 = arith.constant 0 : index
    %167 = vector.load %arg14[%c0_66, %c0_67] : memref<8x128xf32, #tpu.memory_space<vmem>>, vector<8x128xf32>
    tpu.vector_store %arg14[%c0_66, %c0_67], %166 {strides = array<i32>} : memref<8x128xf32, #tpu.memory_space<vmem>>, vector<8x128xf32>,
    return
  }
  func.func @transform_0(%arg0: i32) -> (i32, i32) {
    %c0_i32 = arith.constant 0 : i32
    %c0_i32_0 = arith.constant 0 : i32
    %c0_i32_1 = arith.constant 0 : i32
    return %c0_i32, %c0_i32_0 : i32, i32
  }
  func.func @transform_1(%arg0: i32) -> (i32, i32) {
    %c0_i32 = arith.constant 0 : i32
    %c0_i32_0 = arith.constant 0 : i32
    %c0_i32_1 = arith.constant 0 : i32
    return %c0_i32, %c0_i32_0 : i32, i32
  }
  func.func @transform_2(%arg0: i32) -> (i32, i32) {
    %c0_i32 = arith.constant 0 : i32
    %c0_i32_0 = arith.constant 0 : i32
    %c0_i32_1 = arith.constant 0 : i32
    return %c0_i32, %c0_i32_0 : i32, i32
  }
  func.func @transform_3(%arg0: i32) -> (i32, i32) {
    %c0_i32 = arith.constant 0 : i32
    %c0_i32_0 = arith.constant 0 : i32
    %c0_i32_1 = arith.constant 0 : i32
    return %c0_i32, %c0_i32_0 : i32, i32
  }
  func.func @transform_4(%arg0: i32) -> (i32, i32) {
    %c0_i32 = arith.constant 0 : i32
    %c0_i32_0 = arith.constant 0 : i32
    %c0_i32_1 = arith.constant 0 : i32
    return %c0_i32, %c0_i32_0 : i32, i32
  }
  func.func @transform_5(%arg0: i32) -> (i32, i32) {
    %c0_i32 = arith.constant 0 : i32
    %c0_i32_0 = arith.constant 0 : i32
    %c0_i32_1 = arith.constant 0 : i32
    return %c0_i32, %c0_i32_0 : i32, i32
  }
  func.func @transform_6(%arg0: i32) -> (i32, i32) {
    %c0_i32 = arith.constant 0 : i32
    %c0_i32_0 = arith.constant 0 : i32
    %c0_i32_1 = arith.constant 0 : i32
    return %c0_i32, %c0_i32_0 : i32, i32
  }
  func.func @transform_7(%arg0: i32) -> (i32, i32) {
    %c0_i32 = arith.constant 0 : i32
    %c0_i32_0 = arith.constant 0 : i32
    %c0_i32_1 = arith.constant 0 : i32
    return %c0_i32, %c0_i32_0 : i32, i32
  }
  func.func @transform_8(%arg0: i32) -> (i32, i32) {
    %c0_i32 = arith.constant 0 : i32
    %c0_i32_0 = arith.constant 0 : i32
    %c0_i32_1 = arith.constant 0 : i32
    return %c0_i32, %c0_i32_0 : i32, i32
  }
  func.func @transform_9(%arg0: i32) -> (i32, i32) {
    %c0_i32 = arith.constant 0 : i32
    %c0_i32_0 = arith.constant 0 : i32
    %c0_i32_1 = arith.constant 0 : i32
    return %c0_i32, %c0_i32_0 : i32, i32
  }
  func.func @transform_10(%arg0: i32) -> (i32, i32) {
    %c0_i32 = arith.constant 0 : i32
    %c0_i32_0 = arith.constant 0 : i32
    %c0_i32_1 = arith.constant 0 : i32
    return %c0_i32, %c0_i32_0 : i32, i32
  }
  func.func @transform_11(%arg0: i32) -> (i32, i32) {
    %c0_i32 = arith.constant 0 : i32
    %c0_i32_0 = arith.constant 0 : i32
    %c0_i32_1 = arith.constant 0 : i32
    return %c0_i32, %c0_i32_0 : i32, i32
  }
  func.func @transform_12(%arg0: i32) -> (i32, i32) {
    %c0_i32 = arith.constant 0 : i32
    %c0_i32_0 = arith.constant 0 : i32
    %c0_i32_1 = arith.constant 0 : i32
    return %c0_i32, %c0_i32_0 : i32, i32
  }
  func.func @transform_13(%arg0: i32) -> (i32, i32) {
    %c0_i32 = arith.constant 0 : i32
    %c0_i32_0 = arith.constant 0 : i32
    %c0_i32_1 = arith.constant 0 : i32
    return %c0_i32, %c0_i32_0 : i32, i32
  }
}

module attributes {stable_mosaic.version = 11 : i64} {
  func.func @_enc_layer_kernel(%arg0: i32, %arg1: memref<8x128xf32, #tpu.memory_space<vmem>>, %arg2: memref<1x128xf32, #tpu.memory_space<vmem>>, %arg3: memref<1x128xf32, #tpu.memory_space<vmem>>, %arg4: memref<128x384xf32, #tpu.memory_space<vmem>>, %arg5: memref<1x384xf32, #tpu.memory_space<vmem>>, %arg6: memref<128x128xf32, #tpu.memory_space<vmem>>, %arg7: memref<1x128xf32, #tpu.memory_space<vmem>>, %arg8: memref<1x128xf32, #tpu.memory_space<vmem>>, %arg9: memref<1x128xf32, #tpu.memory_space<vmem>>, %arg10: memref<128x256xf32, #tpu.memory_space<vmem>>, %arg11: memref<1x256xf32, #tpu.memory_space<vmem>>, %arg12: memref<256x128xf32, #tpu.memory_space<vmem>>, %arg13: memref<1x128xf32, #tpu.memory_space<vmem>>, %arg14: memref<8x128xf32, #tpu.memory_space<vmem>>) attributes {dimension_semantics = [#tpu.dimension_semantics<arbitrary>], iteration_bounds = array<i64: 1>, scalar_prefetch = 0 : i64, scratch_operands = 0 : i64, tpu.core_type = #tpu.core_type<tc>, window_params = [{pipeline_mode = #tpu.pipeline_mode<synchronous>, transform_indices = @transform_0, window_bounds = array<i64: 8, 128>}, {pipeline_mode = #tpu.pipeline_mode<synchronous>, transform_indices = @transform_1, window_bounds = array<i64: 1, 128>}, {pipeline_mode = #tpu.pipeline_mode<synchronous>, transform_indices = @transform_2, window_bounds = array<i64: 1, 128>}, {pipeline_mode = #tpu.pipeline_mode<synchronous>, transform_indices = @transform_3, window_bounds = array<i64: 128, 384>}, {pipeline_mode = #tpu.pipeline_mode<synchronous>, transform_indices = @transform_4, window_bounds = array<i64: 1, 384>}, {pipeline_mode = #tpu.pipeline_mode<synchronous>, transform_indices = @transform_5, window_bounds = array<i64: 128, 128>}, {pipeline_mode = #tpu.pipeline_mode<synchronous>, transform_indices = @transform_6, window_bounds = array<i64: 1, 128>}, {pipeline_mode = #tpu.pipeline_mode<synchronous>, transform_indices = @transform_7, window_bounds = array<i64: 1, 128>}, {pipeline_mode = #tpu.pipeline_mode<synchronous>, transform_indices = @transform_8, window_bounds = array<i64: 1, 128>}, {pipeline_mode = #tpu.pipeline_mode<synchronous>, transform_indices = @transform_9, window_bounds = array<i64: 128, 256>}, {pipeline_mode = #tpu.pipeline_mode<synchronous>, transform_indices = @transform_10, window_bounds = array<i64: 1, 256>}, {pipeline_mode = #tpu.pipeline_mode<synchronous>, transform_indices = @transform_11, window_bounds = array<i64: 256, 128>}, {pipeline_mode = #tpu.pipeline_mode<synchronous>, transform_indices = @transform_12, window_bounds = array<i64: 1, 128>}, {pipeline_mode = #tpu.pipeline_mode<synchronous>, transform_indices = @transform_13, window_bounds = array<i64: 8, 128>}]} {
    %c0 = arith.constant 0 : index
    %c0_0 = arith.constant 0 : index
    %0 = vector.load %arg1[%c0, %c0_0] : memref<8x128xf32, #tpu.memory_space<vmem>>, vector<8x128xf32>
    %c0_1 = arith.constant 0 : index
    %c0_2 = arith.constant 0 : index
    %1 = vector.load %arg2[%c0_1, %c0_2] : memref<1x128xf32, #tpu.memory_space<vmem>>, vector<1x128xf32>
    %c0_3 = arith.constant 0 : index
    %c0_4 = arith.constant 0 : index
    %2 = vector.load %arg3[%c0_3, %c0_4] : memref<1x128xf32, #tpu.memory_space<vmem>>, vector<1x128xf32>
    %cst = arith.constant dense<0.000000e+00> : vector<8xf32>
    %3 = vector.multi_reduction <add>, %0, %cst [1] : vector<8x128xf32> to vector<8xf32>
    %4 = vector.shape_cast %3 : vector<8xf32> to vector<8x1xf32>
    %cst_5 = arith.constant 1.280000e+02 : f32
    %5 = vector.broadcast %cst_5 : f32 to vector<8x1xf32>
    %6 = arith.divf %4, %5 : vector<8x1xf32>
    %7 = vector.broadcast %6 : vector<8x1xf32> to vector<8x128xf32>
    %8 = arith.subf %0, %7 : vector<8x128xf32>
    %9 = arith.mulf %8, %8 : vector<8x128xf32>
    %cst_6 = arith.constant dense<0.000000e+00> : vector<8xf32>
    %10 = vector.multi_reduction <add>, %9, %cst_6 [1] : vector<8x128xf32> to vector<8xf32>
    %11 = vector.shape_cast %10 : vector<8xf32> to vector<8x1xf32>
    %cst_7 = arith.constant 1.280000e+02 : f32
    %12 = vector.broadcast %cst_7 : f32 to vector<8x1xf32>
    %13 = arith.divf %11, %12 : vector<8x1xf32>
    %14 = vector.broadcast %6 : vector<8x1xf32> to vector<8x128xf32>
    %15 = arith.subf %0, %14 : vector<8x128xf32>
    %cst_8 = arith.constant 9.99999974E-6 : f32
    %16 = vector.broadcast %cst_8 : f32 to vector<8x1xf32>
    %17 = arith.addf %13, %16 : vector<8x1xf32>
    %18 = math.rsqrt %17 : vector<8x1xf32>
    %19 = vector.broadcast %18 : vector<8x1xf32> to vector<8x128xf32>
    %20 = arith.mulf %15, %19 : vector<8x128xf32>
    %21 = vector.broadcast %1 : vector<1x128xf32> to vector<8x128xf32>
    %22 = arith.mulf %20, %21 : vector<8x128xf32>
    %23 = vector.broadcast %2 : vector<1x128xf32> to vector<8x128xf32>
    %24 = arith.addf %22, %23 : vector<8x128xf32>
    %c0_9 = arith.constant 0 : index
    %c0_10 = arith.constant 0 : index
    %25 = vector.load %arg4[%c0_9, %c0_10] : memref<128x384xf32, #tpu.memory_space<vmem>>, vector<128x384xf32>
    %cst_11 = arith.constant dense<0.000000e+00> : vector<8x384xf32>
    %26 = tpu.matmul %24, %25, %cst_11 {dimension_numbers = #tpu.dot_dimension_numbers<[1], [0], [0], [1], [0, 0, 1, 1], [], []>} : vector<8x128xf32>, vector<128x384xf32>, vector<8x384xf32> -> vector<8x384xf32>
    %c0_12 = arith.constant 0 : index
    %c0_13 = arith.constant 0 : index
    %27 = vector.load %arg5[%c0_12, %c0_13] : memref<1x384xf32, #tpu.memory_space<vmem>>, vector<1x384xf32>
    %28 = vector.broadcast %27 : vector<1x384xf32> to vector<8x384xf32>
    %29 = arith.addf %26, %28 : vector<8x384xf32>
    %30 = vector.extract_strided_slice %29 {offsets = [0, 0], sizes = [8, 128], strides = [1, 1]} : vector<8x384xf32> to vector<8x128xf32>
    %31 = vector.extract_strided_slice %29 {offsets = [0, 128], sizes = [8, 128], strides = [1, 1]} : vector<8x384xf32> to vector<8x128xf32>
    %32 = vector.extract_strided_slice %29 {offsets = [0, 256], sizes = [8, 128], strides = [1, 1]} : vector<8x384xf32> to vector<8x128xf32>
    %c0_14 = arith.constant 0 : index
    %c0_15 = arith.constant 0 : index
    %33 = vector.load %arg6[%c0_14, %c0_15] : memref<128x128xf32, #tpu.memory_space<vmem>>, vector<128x128xf32>
    %c0_16 = arith.constant 0 : index
    %c0_17 = arith.constant 0 : index
    %34 = vector.load %arg7[%c0_16, %c0_17] : memref<1x128xf32, #tpu.memory_space<vmem>>, vector<1x128xf32>
    %cst_18 = arith.constant 0.000000e+00 : f32
    %35 = vector.broadcast %cst_18 : f32 to vector<8x128xf32>
    %36 = vector.broadcast %34 : vector<1x128xf32> to vector<8x128xf32>
    %37 = arith.addf %35, %36 : vector<8x128xf32>
    %38 = vector.extract_strided_slice %30 {offsets = [0, 0], sizes = [8, 32], strides = [1, 1]} : vector<8x128xf32> to vector<8x32xf32>
    %39 = vector.extract_strided_slice %31 {offsets = [0, 0], sizes = [8, 32], strides = [1, 1]} : vector<8x128xf32> to vector<8x32xf32>
    %40 = vector.extract_strided_slice %32 {offsets = [0, 0], sizes = [8, 32], strides = [1, 1]} : vector<8x128xf32> to vector<8x32xf32>
    %cst_19 = arith.constant dense<0.000000e+00> : vector<8x8xf32>
    %41 = tpu.matmul %38, %39, %cst_19 {dimension_numbers = #tpu.dot_dimension_numbers<[1], [1], [0], [0], [0, 0, 1, 0], [], []>} : vector<8x32xf32>, vector<8x32xf32>, vector<8x8xf32> -> vector<8x8xf32>
    %cst_20 = arith.constant 0.176776692 : f32
    %42 = vector.broadcast %cst_20 : f32 to vector<8x8xf32>
    %43 = arith.mulf %41, %42 : vector<8x8xf32>
    %cst_21 = arith.constant dense<0xFF800000> : vector<8xf32>
    %44 = vector.multi_reduction <maximumf>, %43, %cst_21 [1] : vector<8x8xf32> to vector<8xf32>
    %45 = vector.shape_cast %44 : vector<8xf32> to vector<8x1xf32>
    %46 = vector.broadcast %45 : vector<8x1xf32> to vector<8x8xf32>
    %47 = arith.subf %43, %46 : vector<8x8xf32>
    %48 = math.exp %47 : vector<8x8xf32>
    %cst_22 = arith.constant dense<0.000000e+00> : vector<8xf32>
    %49 = vector.multi_reduction <add>, %48, %cst_22 [1] : vector<8x8xf32> to vector<8xf32>
    %50 = vector.shape_cast %49 : vector<8xf32> to vector<8x1xf32>
    %51 = tpu.reciprocal %50 {approx = true} : vector<8x1xf32> -> vector<8x1xf32>
    %52 = vector.broadcast %51 : vector<8x1xf32> to vector<8x8xf32>
    %53 = arith.mulf %48, %52 : vector<8x8xf32>
    %cst_23 = arith.constant dense<0.000000e+00> : vector<8x32xf32>
    %54 = tpu.matmul %53, %40, %cst_23 {dimension_numbers = #tpu.dot_dimension_numbers<[1], [0], [0], [1], [0, 0, 1, 1], [], []>} : vector<8x8xf32>, vector<8x32xf32>, vector<8x32xf32> -> vector<8x32xf32>
    %55 = vector.extract_strided_slice %33 {offsets = [0, 0], sizes = [32, 128], strides = [1, 1]} : vector<128x128xf32> to vector<32x128xf32>
    %cst_24 = arith.constant dense<0.000000e+00> : vector<8x128xf32>
    %56 = tpu.matmul %54, %55, %cst_24 {dimension_numbers = #tpu.dot_dimension_numbers<[1], [0], [0], [1], [0, 0, 1, 1], [], []>} : vector<8x32xf32>, vector<32x128xf32>, vector<8x128xf32> -> vector<8x128xf32>
    %57 = arith.addf %37, %56 : vector<8x128xf32>
    %58 = vector.extract_strided_slice %30 {offsets = [0, 32], sizes = [8, 32], strides = [1, 1]} : vector<8x128xf32> to vector<8x32xf32>
    %59 = vector.extract_strided_slice %31 {offsets = [0, 32], sizes = [8, 32], strides = [1, 1]} : vector<8x128xf32> to vector<8x32xf32>
    %60 = vector.extract_strided_slice %32 {offsets = [0, 32], sizes = [8, 32], strides = [1, 1]} : vector<8x128xf32> to vector<8x32xf32>
    %cst_25 = arith.constant dense<0.000000e+00> : vector<8x8xf32>
    %61 = tpu.matmul %58, %59, %cst_25 {dimension_numbers = #tpu.dot_dimension_numbers<[1], [1], [0], [0], [0, 0, 1, 0], [], []>} : vector<8x32xf32>, vector<8x32xf32>, vector<8x8xf32> -> vector<8x8xf32>
    %cst_26 = arith.constant 0.176776692 : f32
    %62 = vector.broadcast %cst_26 : f32 to vector<8x8xf32>
    %63 = arith.mulf %61, %62 : vector<8x8xf32>
    %cst_27 = arith.constant dense<0xFF800000> : vector<8xf32>
    %64 = vector.multi_reduction <maximumf>, %63, %cst_27 [1] : vector<8x8xf32> to vector<8xf32>
    %65 = vector.shape_cast %64 : vector<8xf32> to vector<8x1xf32>
    %66 = vector.broadcast %65 : vector<8x1xf32> to vector<8x8xf32>
    %67 = arith.subf %63, %66 : vector<8x8xf32>
    %68 = math.exp %67 : vector<8x8xf32>
    %cst_28 = arith.constant dense<0.000000e+00> : vector<8xf32>
    %69 = vector.multi_reduction <add>, %68, %cst_28 [1] : vector<8x8xf32> to vector<8xf32>
    %70 = vector.shape_cast %69 : vector<8xf32> to vector<8x1xf32>
    %71 = tpu.reciprocal %70 {approx = true} : vector<8x1xf32> -> vector<8x1xf32>
    %72 = vector.broadcast %71 : vector<8x1xf32> to vector<8x8xf32>
    %73 = arith.mulf %68, %72 : vector<8x8xf32>
    %cst_29 = arith.constant dense<0.000000e+00> : vector<8x32xf32>
    %74 = tpu.matmul %73, %60, %cst_29 {dimension_numbers = #tpu.dot_dimension_numbers<[1], [0], [0], [1], [0, 0, 1, 1], [], []>} : vector<8x8xf32>, vector<8x32xf32>, vector<8x32xf32> -> vector<8x32xf32>
    %75 = vector.extract_strided_slice %33 {offsets = [32, 0], sizes = [32, 128], strides = [1, 1]} : vector<128x128xf32> to vector<32x128xf32>
    %cst_30 = arith.constant dense<0.000000e+00> : vector<8x128xf32>
    %76 = tpu.matmul %74, %75, %cst_30 {dimension_numbers = #tpu.dot_dimension_numbers<[1], [0], [0], [1], [0, 0, 1, 1], [], []>} : vector<8x32xf32>, vector<32x128xf32>, vector<8x128xf32> -> vector<8x128xf32>
    %77 = arith.addf %57, %76 : vector<8x128xf32>
    %78 = vector.extract_strided_slice %30 {offsets = [0, 64], sizes = [8, 32], strides = [1, 1]} : vector<8x128xf32> to vector<8x32xf32>
    %79 = vector.extract_strided_slice %31 {offsets = [0, 64], sizes = [8, 32], strides = [1, 1]} : vector<8x128xf32> to vector<8x32xf32>
    %80 = vector.extract_strided_slice %32 {offsets = [0, 64], sizes = [8, 32], strides = [1, 1]} : vector<8x128xf32> to vector<8x32xf32>
    %cst_31 = arith.constant dense<0.000000e+00> : vector<8x8xf32>
    %81 = tpu.matmul %78, %79, %cst_31 {dimension_numbers = #tpu.dot_dimension_numbers<[1], [1], [0], [0], [0, 0, 1, 0], [], []>} : vector<8x32xf32>, vector<8x32xf32>, vector<8x8xf32> -> vector<8x8xf32>
    %cst_32 = arith.constant 0.176776692 : f32
    %82 = vector.broadcast %cst_32 : f32 to vector<8x8xf32>
    %83 = arith.mulf %81, %82 : vector<8x8xf32>
    %cst_33 = arith.constant dense<0xFF800000> : vector<8xf32>
    %84 = vector.multi_reduction <maximumf>, %83, %cst_33 [1] : vector<8x8xf32> to vector<8xf32>
    %85 = vector.shape_cast %84 : vector<8xf32> to vector<8x1xf32>
    %86 = vector.broadcast %85 : vector<8x1xf32> to vector<8x8xf32>
    %87 = arith.subf %83, %86 : vector<8x8xf32>
    %88 = math.exp %87 : vector<8x8xf32>
    %cst_34 = arith.constant dense<0.000000e+00> : vector<8xf32>
    %89 = vector.multi_reduction <add>, %88, %cst_34 [1] : vector<8x8xf32> to vector<8xf32>
    %90 = vector.shape_cast %89 : vector<8xf32> to vector<8x1xf32>
    %91 = tpu.reciprocal %90 {approx = true} : vector<8x1xf32> -> vector<8x1xf32>
    %92 = vector.broadcast %91 : vector<8x1xf32> to vector<8x8xf32>
    %93 = arith.mulf %88, %92 : vector<8x8xf32>
    %cst_35 = arith.constant dense<0.000000e+00> : vector<8x32xf32>
    %94 = tpu.matmul %93, %80, %cst_35 {dimension_numbers = #tpu.dot_dimension_numbers<[1], [0], [0], [1], [0, 0, 1, 1], [], []>} : vector<8x8xf32>, vector<8x32xf32>, vector<8x32xf32> -> vector<8x32xf32>
    %95 = vector.extract_strided_slice %33 {offsets = [64, 0], sizes = [32, 128], strides = [1, 1]} : vector<128x128xf32> to vector<32x128xf32>
    %cst_36 = arith.constant dense<0.000000e+00> : vector<8x128xf32>
    %96 = tpu.matmul %94, %95, %cst_36 {dimension_numbers = #tpu.dot_dimension_numbers<[1], [0], [0], [1], [0, 0, 1, 1], [], []>} : vector<8x32xf32>, vector<32x128xf32>, vector<8x128xf32> -> vector<8x128xf32>
    %97 = arith.addf %77, %96 : vector<8x128xf32>
    %98 = vector.extract_strided_slice %30 {offsets = [0, 96], sizes = [8, 32], strides = [1, 1]} : vector<8x128xf32> to vector<8x32xf32>
    %99 = vector.extract_strided_slice %31 {offsets = [0, 96], sizes = [8, 32], strides = [1, 1]} : vector<8x128xf32> to vector<8x32xf32>
    %100 = vector.extract_strided_slice %32 {offsets = [0, 96], sizes = [8, 32], strides = [1, 1]} : vector<8x128xf32> to vector<8x32xf32>
    %cst_37 = arith.constant dense<0.000000e+00> : vector<8x8xf32>
    %101 = tpu.matmul %98, %99, %cst_37 {dimension_numbers = #tpu.dot_dimension_numbers<[1], [1], [0], [0], [0, 0, 1, 0], [], []>} : vector<8x32xf32>, vector<8x32xf32>, vector<8x8xf32> -> vector<8x8xf32>
    %cst_38 = arith.constant 0.176776692 : f32
    %102 = vector.broadcast %cst_38 : f32 to vector<8x8xf32>
    %103 = arith.mulf %101, %102 : vector<8x8xf32>
    %cst_39 = arith.constant dense<0xFF800000> : vector<8xf32>
    %104 = vector.multi_reduction <maximumf>, %103, %cst_39 [1] : vector<8x8xf32> to vector<8xf32>
    %105 = vector.shape_cast %104 : vector<8xf32> to vector<8x1xf32>
    %106 = vector.broadcast %105 : vector<8x1xf32> to vector<8x8xf32>
    %107 = arith.subf %103, %106 : vector<8x8xf32>
    %108 = math.exp %107 : vector<8x8xf32>
    %cst_40 = arith.constant dense<0.000000e+00> : vector<8xf32>
    %109 = vector.multi_reduction <add>, %108, %cst_40 [1] : vector<8x8xf32> to vector<8xf32>
    %110 = vector.shape_cast %109 : vector<8xf32> to vector<8x1xf32>
    %111 = tpu.reciprocal %110 {approx = true} : vector<8x1xf32> -> vector<8x1xf32>
    %112 = vector.broadcast %111 : vector<8x1xf32> to vector<8x8xf32>
    %113 = arith.mulf %108, %112 : vector<8x8xf32>
    %cst_41 = arith.constant dense<0.000000e+00> : vector<8x32xf32>
    %114 = tpu.matmul %113, %100, %cst_41 {dimension_numbers = #tpu.dot_dimension_numbers<[1], [0], [0], [1], [0, 0, 1, 1], [], []>} : vector<8x8xf32>, vector<8x32xf32>, vector<8x32xf32> -> vector<8x32xf32>
    %115 = vector.extract_strided_slice %33 {offsets = [96, 0], sizes = [32, 128], strides = [1, 1]} : vector<128x128xf32> to vector<32x128xf32>
    %cst_42 = arith.constant dense<0.000000e+00> : vector<8x128xf32>
    %116 = tpu.matmul %114, %115, %cst_42 {dimension_numbers = #tpu.dot_dimension_numbers<[1], [0], [0], [1], [0, 0, 1, 1], [], []>} : vector<8x32xf32>, vector<32x128xf32>, vector<8x128xf32> -> vector<8x128xf32>
    %117 = arith.addf %97, %116 : vector<8x128xf32>
    %118 = arith.addf %0, %117 : vector<8x128xf32>
    %c0_43 = arith.constant 0 : index
    %c0_44 = arith.constant 0 : index
    %119 = vector.load %arg8[%c0_43, %c0_44] : memref<1x128xf32, #tpu.memory_space<vmem>>, vector<1x128xf32>
    %c0_45 = arith.constant 0 : index
    %c0_46 = arith.constant 0 : index
    %120 = vector.load %arg9[%c0_45, %c0_46] : memref<1x128xf32, #tpu.memory_space<vmem>>, vector<1x128xf32>
    %cst_47 = arith.constant dense<0.000000e+00> : vector<8xf32>
    %121 = vector.multi_reduction <add>, %118, %cst_47 [1] : vector<8x128xf32> to vector<8xf32>
    %122 = vector.shape_cast %121 : vector<8xf32> to vector<8x1xf32>
    %cst_48 = arith.constant 1.280000e+02 : f32
    %123 = vector.broadcast %cst_48 : f32 to vector<8x1xf32>
    %124 = arith.divf %122, %123 : vector<8x1xf32>
    %125 = vector.broadcast %124 : vector<8x1xf32> to vector<8x128xf32>
    %126 = arith.subf %118, %125 : vector<8x128xf32>
    %127 = arith.mulf %126, %126 : vector<8x128xf32>
    %cst_49 = arith.constant dense<0.000000e+00> : vector<8xf32>
    %128 = vector.multi_reduction <add>, %127, %cst_49 [1] : vector<8x128xf32> to vector<8xf32>
    %129 = vector.shape_cast %128 : vector<8xf32> to vector<8x1xf32>
    %cst_50 = arith.constant 1.280000e+02 : f32
    %130 = vector.broadcast %cst_50 : f32 to vector<8x1xf32>
    %131 = arith.divf %129, %130 : vector<8x1xf32>
    %132 = vector.broadcast %124 : vector<8x1xf32> to vector<8x128xf32>
    %133 = arith.subf %118, %132 : vector<8x128xf32>
    %cst_51 = arith.constant 9.99999974E-6 : f32
    %134 = vector.broadcast %cst_51 : f32 to vector<8x1xf32>
    %135 = arith.addf %131, %134 : vector<8x1xf32>
    %136 = math.rsqrt %135 : vector<8x1xf32>
    %137 = vector.broadcast %136 : vector<8x1xf32> to vector<8x128xf32>
    %138 = arith.mulf %133, %137 : vector<8x128xf32>
    %139 = vector.broadcast %119 : vector<1x128xf32> to vector<8x128xf32>
    %140 = arith.mulf %138, %139 : vector<8x128xf32>
    %141 = vector.broadcast %120 : vector<1x128xf32> to vector<8x128xf32>
    %142 = arith.addf %140, %141 : vector<8x128xf32>
    %c0_52 = arith.constant 0 : index
    %c0_53 = arith.constant 0 : index
    %143 = vector.load %arg10[%c0_52, %c0_53] : memref<128x256xf32, #tpu.memory_space<vmem>>, vector<128x256xf32>
    %cst_54 = arith.constant dense<0.000000e+00> : vector<8x256xf32>
    %144 = tpu.matmul %142, %143, %cst_54 {dimension_numbers = #tpu.dot_dimension_numbers<[1], [0], [0], [1], [0, 0, 1, 1], [], []>} : vector<8x128xf32>, vector<128x256xf32>, vector<8x256xf32> -> vector<8x256xf32>
    %c0_55 = arith.constant 0 : index
    %c0_56 = arith.constant 0 : index
    %145 = vector.load %arg11[%c0_55, %c0_56] : memref<1x256xf32, #tpu.memory_space<vmem>>, vector<1x256xf32>
    %146 = vector.broadcast %145 : vector<1x256xf32> to vector<8x256xf32>
    %147 = arith.addf %144, %146 : vector<8x256xf32>
    %148 = arith.mulf %147, %147 : vector<8x256xf32>
    %149 = arith.mulf %147, %148 : vector<8x256xf32>
    %cst_57 = arith.constant 4.471500e-02 : f32
    %150 = vector.broadcast %cst_57 : f32 to vector<8x256xf32>
    %151 = arith.mulf %150, %149 : vector<8x256xf32>
    %152 = arith.addf %147, %151 : vector<8x256xf32>
    %cst_58 = arith.constant 0.797884583 : f32
    %153 = vector.broadcast %cst_58 : f32 to vector<8x256xf32>
    %154 = arith.mulf %153, %152 : vector<8x256xf32>
    %155 = math.tanh %154 : vector<8x256xf32>
    %cst_59 = arith.constant 1.000000e+00 : f32
    %156 = vector.broadcast %cst_59 : f32 to vector<8x256xf32>
    %157 = arith.addf %156, %155 : vector<8x256xf32>
    %cst_60 = arith.constant 5.000000e-01 : f32
    %158 = vector.broadcast %cst_60 : f32 to vector<8x256xf32>
    %159 = arith.mulf %158, %157 : vector<8x256xf32>
    %160 = arith.mulf %147, %159 : vector<8x256xf32>
    %c0_61 = arith.constant 0 : index
    %c0_62 = arith.constant 0 : index
    %161 = vector.load %arg12[%c0_61, %c0_62] : memref<256x128xf32, #tpu.memory_space<vmem>>, vector<256x128xf32>
    %cst_63 = arith.constant dense<0.000000e+00> : vector<8x128xf32>
    %162 = tpu.matmul %160, %161, %cst_63 {dimension_numbers = #tpu.dot_dimension_numbers<[1], [0], [0], [1], [0, 0, 1, 1], [], []>} : vector<8x256xf32>, vector<256x128xf32>, vector<8x128xf32> -> vector<8x128xf32>
    %163 = arith.addf %118, %162 : vector<8x128xf32>
    %c0_64 = arith.constant 0 : index
    %c0_65 = arith.constant 0 : index
    %164 = vector.load %arg13[%c0_64, %c0_65] : memref<1x128xf32, #tpu.memory_space<vmem>>, vector<1x128xf32>
    %165 = vector.broadcast %164 : vector<1x128xf32> to vector<8x128xf32>
    %166 = arith.addf %163, %165 : vector<8x128xf32>
    %c0_66 = arith.constant 0 : index
    %c0_67 = arith.constant 0 : index
    %167 = vector.load %arg14[%c0_66, %c0_67] : memref<8x128xf32, #tpu.memory_space<vmem>>, vector<8x128xf32>
    tpu.vector_store %arg14[%c0_66, %c0_67], %166 {strides = array<i32>} : memref<8x128xf32, #tpu.memory_space<vmem>>, vector<8x128xf32>,
    return
  }
  func.func @transform_0(%arg0: i32) -> (i32, i32) {
    %c0_i32 = arith.constant 0 : i32
    %c0_i32_0 = arith.constant 0 : i32
    %c0_i32_1 = arith.constant 0 : i32
    return %c0_i32, %c0_i32_0 : i32, i32
  }
  func.func @transform_1(%arg0: i32) -> (i32, i32) {
    %c0_i32 = arith.constant 0 : i32
    %c0_i32_0 = arith.constant 0 : i32
    %c0_i32_1 = arith.constant 0 : i32
    return %c0_i32, %c0_i32_0 : i32, i32
  }
  func.func @transform_2(%arg0: i32) -> (i32, i32) {
    %c0_i32 = arith.constant 0 : i32
    %c0_i32_0 = arith.constant 0 : i32
    %c0_i32_1 = arith.constant 0 : i32
    return %c0_i32, %c0_i32_0 : i32, i32
  }
  func.func @transform_3(%arg0: i32) -> (i32, i32) {
    %c0_i32 = arith.constant 0 : i32
    %c0_i32_0 = arith.constant 0 : i32
    %c0_i32_1 = arith.constant 0 : i32
    return %c0_i32, %c0_i32_0 : i32, i32
  }
  func.func @transform_4(%arg0: i32) -> (i32, i32) {
    %c0_i32 = arith.constant 0 : i32
    %c0_i32_0 = arith.constant 0 : i32
    %c0_i32_1 = arith.constant 0 : i32
    return %c0_i32, %c0_i32_0 : i32, i32
  }
  func.func @transform_5(%arg0: i32) -> (i32, i32) {
    %c0_i32 = arith.constant 0 : i32
    %c0_i32_0 = arith.constant 0 : i32
    %c0_i32_1 = arith.constant 0 : i32
    return %c0_i32, %c0_i32_0 : i32, i32
  }
  func.func @transform_6(%arg0: i32) -> (i32, i32) {
    %c0_i32 = arith.constant 0 : i32
    %c0_i32_0 = arith.constant 0 : i32
    %c0_i32_1 = arith.constant 0 : i32
    return %c0_i32, %c0_i32_0 : i32, i32
  }
  func.func @transform_7(%arg0: i32) -> (i32, i32) {
    %c0_i32 = arith.constant 0 : i32
    %c0_i32_0 = arith.constant 0 : i32
    %c0_i32_1 = arith.constant 0 : i32
    return %c0_i32, %c0_i32_0 : i32, i32
  }
  func.func @transform_8(%arg0: i32) -> (i32, i32) {
    %c0_i32 = arith.constant 0 : i32
    %c0_i32_0 = arith.constant 0 : i32
    %c0_i32_1 = arith.constant 0 : i32
    return %c0_i32, %c0_i32_0 : i32, i32
  }
  func.func @transform_9(%arg0: i32) -> (i32, i32) {
    %c0_i32 = arith.constant 0 : i32
    %c0_i32_0 = arith.constant 0 : i32
    %c0_i32_1 = arith.constant 0 : i32
    return %c0_i32, %c0_i32_0 : i32, i32
  }
  func.func @transform_10(%arg0: i32) -> (i32, i32) {
    %c0_i32 = arith.constant 0 : i32
    %c0_i32_0 = arith.constant 0 : i32
    %c0_i32_1 = arith.constant 0 : i32
    return %c0_i32, %c0_i32_0 : i32, i32
  }
  func.func @transform_11(%arg0: i32) -> (i32, i32) {
    %c0_i32 = arith.constant 0 : i32
    %c0_i32_0 = arith.constant 0 : i32
    %c0_i32_1 = arith.constant 0 : i32
    return %c0_i32, %c0_i32_0 : i32, i32
  }
  func.func @transform_12(%arg0: i32) -> (i32, i32) {
    %c0_i32 = arith.constant 0 : i32
    %c0_i32_0 = arith.constant 0 : i32
    %c0_i32_1 = arith.constant 0 : i32
    return %c0_i32, %c0_i32_0 : i32, i32
  }
  func.func @transform_13(%arg0: i32) -> (i32, i32) {
    %c0_i32 = arith.constant 0 : i32
    %c0_i32_0 = arith.constant 0 : i32
    %c0_i32_1 = arith.constant 0 : i32
    return %c0_i32, %c0_i32_0 : i32, i32
  }
}

module attributes {stable_mosaic.version = 11 : i64} {
  func.func @_layernorm_kernel(%arg0: i32, %arg1: memref<8x128xf32, #tpu.memory_space<vmem>>, %arg2: memref<1x128xf32, #tpu.memory_space<vmem>>, %arg3: memref<1x128xf32, #tpu.memory_space<vmem>>, %arg4: memref<8x128xf32, #tpu.memory_space<vmem>>) attributes {dimension_semantics = [#tpu.dimension_semantics<arbitrary>], iteration_bounds = array<i64: 1>, scalar_prefetch = 0 : i64, scratch_operands = 0 : i64, tpu.core_type = #tpu.core_type<tc>, window_params = [{pipeline_mode = #tpu.pipeline_mode<synchronous>, transform_indices = @transform_0, window_bounds = array<i64: 8, 128>}, {pipeline_mode = #tpu.pipeline_mode<synchronous>, transform_indices = @transform_1, window_bounds = array<i64: 1, 128>}, {pipeline_mode = #tpu.pipeline_mode<synchronous>, transform_indices = @transform_2, window_bounds = array<i64: 1, 128>}, {pipeline_mode = #tpu.pipeline_mode<synchronous>, transform_indices = @transform_3, window_bounds = array<i64: 8, 128>}]} {
    %c0 = arith.constant 0 : index
    %c0_0 = arith.constant 0 : index
    %0 = vector.load %arg1[%c0, %c0_0] : memref<8x128xf32, #tpu.memory_space<vmem>>, vector<8x128xf32>
    %c0_1 = arith.constant 0 : index
    %c0_2 = arith.constant 0 : index
    %1 = vector.load %arg2[%c0_1, %c0_2] : memref<1x128xf32, #tpu.memory_space<vmem>>, vector<1x128xf32>
    %c0_3 = arith.constant 0 : index
    %c0_4 = arith.constant 0 : index
    %2 = vector.load %arg3[%c0_3, %c0_4] : memref<1x128xf32, #tpu.memory_space<vmem>>, vector<1x128xf32>
    %cst = arith.constant dense<0.000000e+00> : vector<8xf32>
    %3 = vector.multi_reduction <add>, %0, %cst [1] : vector<8x128xf32> to vector<8xf32>
    %4 = vector.shape_cast %3 : vector<8xf32> to vector<8x1xf32>
    %cst_5 = arith.constant 1.280000e+02 : f32
    %5 = vector.broadcast %cst_5 : f32 to vector<8x1xf32>
    %6 = arith.divf %4, %5 : vector<8x1xf32>
    %7 = vector.broadcast %6 : vector<8x1xf32> to vector<8x128xf32>
    %8 = arith.subf %0, %7 : vector<8x128xf32>
    %9 = arith.mulf %8, %8 : vector<8x128xf32>
    %cst_6 = arith.constant dense<0.000000e+00> : vector<8xf32>
    %10 = vector.multi_reduction <add>, %9, %cst_6 [1] : vector<8x128xf32> to vector<8xf32>
    %11 = vector.shape_cast %10 : vector<8xf32> to vector<8x1xf32>
    %cst_7 = arith.constant 1.280000e+02 : f32
    %12 = vector.broadcast %cst_7 : f32 to vector<8x1xf32>
    %13 = arith.divf %11, %12 : vector<8x1xf32>
    %14 = vector.broadcast %6 : vector<8x1xf32> to vector<8x128xf32>
    %15 = arith.subf %0, %14 : vector<8x128xf32>
    %cst_8 = arith.constant 9.99999974E-6 : f32
    %16 = vector.broadcast %cst_8 : f32 to vector<8x1xf32>
    %17 = arith.addf %13, %16 : vector<8x1xf32>
    %18 = math.rsqrt %17 : vector<8x1xf32>
    %19 = vector.broadcast %18 : vector<8x1xf32> to vector<8x128xf32>
    %20 = arith.mulf %15, %19 : vector<8x128xf32>
    %21 = vector.broadcast %1 : vector<1x128xf32> to vector<8x128xf32>
    %22 = arith.mulf %20, %21 : vector<8x128xf32>
    %23 = vector.broadcast %2 : vector<1x128xf32> to vector<8x128xf32>
    %24 = arith.addf %22, %23 : vector<8x128xf32>
    %c0_9 = arith.constant 0 : index
    %c0_10 = arith.constant 0 : index
    %25 = vector.load %arg4[%c0_9, %c0_10] : memref<8x128xf32, #tpu.memory_space<vmem>>, vector<8x128xf32>
    tpu.vector_store %arg4[%c0_9, %c0_10], %24 {strides = array<i32>} : memref<8x128xf32, #tpu.memory_space<vmem>>, vector<8x128xf32>,
    return
  }
  func.func @transform_0(%arg0: i32) -> (i32, i32) {
    %c0_i32 = arith.constant 0 : i32
    %c0_i32_0 = arith.constant 0 : i32
    %c0_i32_1 = arith.constant 0 : i32
    return %c0_i32, %c0_i32_0 : i32, i32
  }
  func.func @transform_1(%arg0: i32) -> (i32, i32) {
    %c0_i32 = arith.constant 0 : i32
    %c0_i32_0 = arith.constant 0 : i32
    %c0_i32_1 = arith.constant 0 : i32
    return %c0_i32, %c0_i32_0 : i32, i32
  }
  func.func @transform_2(%arg0: i32) -> (i32, i32) {
    %c0_i32 = arith.constant 0 : i32
    %c0_i32_0 = arith.constant 0 : i32
    %c0_i32_1 = arith.constant 0 : i32
    return %c0_i32, %c0_i32_0 : i32, i32
  }
  func.func @transform_3(%arg0: i32) -> (i32, i32) {
    %c0_i32 = arith.constant 0 : i32
    %c0_i32_0 = arith.constant 0 : i32
    %c0_i32_1 = arith.constant 0 : i32
    return %c0_i32, %c0_i32_0 : i32, i32
  }
}

module attributes {stable_mosaic.version = 11 : i64} {
  func.func @_dec_tail_kernel(%arg0: i32, %arg1: memref<8x128xf32, #tpu.memory_space<vmem>>, %arg2: memref<1x128xf32, #tpu.memory_space<vmem>>, %arg3: memref<1x128xf32, #tpu.memory_space<vmem>>, %arg4: memref<128x128xf32, #tpu.memory_space<vmem>>, %arg5: memref<8x128xf32, #tpu.memory_space<vmem>>, %arg6: memref<8x128xf32, #tpu.memory_space<vmem>>) attributes {dimension_semantics = [#tpu.dimension_semantics<arbitrary>], iteration_bounds = array<i64: 1>, scalar_prefetch = 0 : i64, scratch_operands = 0 : i64, tpu.core_type = #tpu.core_type<tc>, window_params = [{pipeline_mode = #tpu.pipeline_mode<synchronous>, transform_indices = @transform_0, window_bounds = array<i64: 8, 128>}, {pipeline_mode = #tpu.pipeline_mode<synchronous>, transform_indices = @transform_1, window_bounds = array<i64: 1, 128>}, {pipeline_mode = #tpu.pipeline_mode<synchronous>, transform_indices = @transform_2, window_bounds = array<i64: 1, 128>}, {pipeline_mode = #tpu.pipeline_mode<synchronous>, transform_indices = @transform_3, window_bounds = array<i64: 128, 128>}, {pipeline_mode = #tpu.pipeline_mode<synchronous>, transform_indices = @transform_4, window_bounds = array<i64: 8, 128>}, {pipeline_mode = #tpu.pipeline_mode<synchronous>, transform_indices = @transform_5, window_bounds = array<i64: 8, 128>}]} {
    %c0 = arith.constant 0 : index
    %c0_0 = arith.constant 0 : index
    %0 = vector.load %arg1[%c0, %c0_0] : memref<8x128xf32, #tpu.memory_space<vmem>>, vector<8x128xf32>
    %c0_1 = arith.constant 0 : index
    %c0_2 = arith.constant 0 : index
    %1 = vector.load %arg2[%c0_1, %c0_2] : memref<1x128xf32, #tpu.memory_space<vmem>>, vector<1x128xf32>
    %c0_3 = arith.constant 0 : index
    %c0_4 = arith.constant 0 : index
    %2 = vector.load %arg3[%c0_3, %c0_4] : memref<1x128xf32, #tpu.memory_space<vmem>>, vector<1x128xf32>
    %cst = arith.constant dense<0.000000e+00> : vector<8xf32>
    %3 = vector.multi_reduction <add>, %0, %cst [1] : vector<8x128xf32> to vector<8xf32>
    %4 = vector.shape_cast %3 : vector<8xf32> to vector<8x1xf32>
    %cst_5 = arith.constant 1.280000e+02 : f32
    %5 = vector.broadcast %cst_5 : f32 to vector<8x1xf32>
    %6 = arith.divf %4, %5 : vector<8x1xf32>
    %7 = vector.broadcast %6 : vector<8x1xf32> to vector<8x128xf32>
    %8 = arith.subf %0, %7 : vector<8x128xf32>
    %9 = arith.mulf %8, %8 : vector<8x128xf32>
    %cst_6 = arith.constant dense<0.000000e+00> : vector<8xf32>
    %10 = vector.multi_reduction <add>, %9, %cst_6 [1] : vector<8x128xf32> to vector<8xf32>
    %11 = vector.shape_cast %10 : vector<8xf32> to vector<8x1xf32>
    %cst_7 = arith.constant 1.280000e+02 : f32
    %12 = vector.broadcast %cst_7 : f32 to vector<8x1xf32>
    %13 = arith.divf %11, %12 : vector<8x1xf32>
    %14 = vector.broadcast %6 : vector<8x1xf32> to vector<8x128xf32>
    %15 = arith.subf %0, %14 : vector<8x128xf32>
    %cst_8 = arith.constant 9.99999974E-6 : f32
    %16 = vector.broadcast %cst_8 : f32 to vector<8x1xf32>
    %17 = arith.addf %13, %16 : vector<8x1xf32>
    %18 = math.rsqrt %17 : vector<8x1xf32>
    %19 = vector.broadcast %18 : vector<8x1xf32> to vector<8x128xf32>
    %20 = arith.mulf %15, %19 : vector<8x128xf32>
    %21 = vector.broadcast %1 : vector<1x128xf32> to vector<8x128xf32>
    %22 = arith.mulf %20, %21 : vector<8x128xf32>
    %23 = vector.broadcast %2 : vector<1x128xf32> to vector<8x128xf32>
    %24 = arith.addf %22, %23 : vector<8x128xf32>
    %c0_9 = arith.constant 0 : index
    %c0_10 = arith.constant 0 : index
    %25 = vector.load %arg5[%c0_9, %c0_10] : memref<8x128xf32, #tpu.memory_space<vmem>>, vector<8x128xf32>
    tpu.vector_store %arg5[%c0_9, %c0_10], %24 {strides = array<i32>} : memref<8x128xf32, #tpu.memory_space<vmem>>, vector<8x128xf32>,
    %c0_11 = arith.constant 0 : index
    %c0_12 = arith.constant 0 : index
    %26 = vector.load %arg4[%c0_11, %c0_12] : memref<128x128xf32, #tpu.memory_space<vmem>>, vector<128x128xf32>
    %cst_13 = arith.constant dense<0.000000e+00> : vector<8x128xf32>
    %27 = tpu.matmul %24, %26, %cst_13 {dimension_numbers = #tpu.dot_dimension_numbers<[1], [1], [0], [0], [0, 0, 1, 0], [], []>} : vector<8x128xf32>, vector<128x128xf32>, vector<8x128xf32> -> vector<8x128xf32>
    %c0_14 = arith.constant 0 : index
    %c0_15 = arith.constant 0 : index
    %28 = vector.load %arg6[%c0_14, %c0_15] : memref<8x128xf32, #tpu.memory_space<vmem>>, vector<8x128xf32>
    tpu.vector_store %arg6[%c0_14, %c0_15], %27 {strides = array<i32>} : memref<8x128xf32, #tpu.memory_space<vmem>>, vector<8x128xf32>,
    return
  }
  func.func @transform_0(%arg0: i32) -> (i32, i32) {
    %c0_i32 = arith.constant 0 : i32
    %c0_i32_0 = arith.constant 0 : i32
    %c0_i32_1 = arith.constant 0 : i32
    return %c0_i32, %c0_i32_0 : i32, i32
  }
  func.func @transform_1(%arg0: i32) -> (i32, i32) {
    %c0_i32 = arith.constant 0 : i32
    %c0_i32_0 = arith.constant 0 : i32
    %c0_i32_1 = arith.constant 0 : i32
    return %c0_i32, %c0_i32_0 : i32, i32
  }
  func.func @transform_2(%arg0: i32) -> (i32, i32) {
    %c0_i32 = arith.constant 0 : i32
    %c0_i32_0 = arith.constant 0 : i32
    %c0_i32_1 = arith.constant 0 : i32
    return %c0_i32, %c0_i32_0 : i32, i32
  }
  func.func @transform_3(%arg0: i32) -> (i32, i32) {
    %c0_i32 = arith.constant 0 : i32
    %c0_i32_0 = arith.constant 0 : i32
    %c0_i32_1 = arith.constant 0 : i32
    return %c0_i32, %c0_i32_0 : i32, i32
  }
  func.func @transform_4(%arg0: i32) -> (i32, i32) {
    %c0_i32 = arith.constant 0 : i32
    %c0_i32_0 = arith.constant 0 : i32
    %c0_i32_1 = arith.constant 0 : i32
    return %c0_i32, %c0_i32_0 : i32, i32
  }
  func.func @transform_5(%arg0: i32) -> (i32, i32) {
    %c0_i32 = arith.constant 0 : i32
    %c0_i32_0 = arith.constant 0 : i32
    %c0_i32_1 = arith.constant 0 : i32
    return %c0_i32, %c0_i32_0 : i32, i32
  }
}

module attributes {stable_mosaic.version = 11 : i64} {
  func.func @_dec_layer_kernel(%arg0: i32, %arg1: memref<8x128xf32, #tpu.memory_space<vmem>>, %arg2: memref<8x128xf32, #tpu.memory_space<vmem>>, %arg3: memref<1x128xf32, #tpu.memory_space<vmem>>, %arg4: memref<1x128xf32, #tpu.memory_space<vmem>>, %arg5: memref<128x384xf32, #tpu.memory_space<vmem>>, %arg6: memref<1x384xf32, #tpu.memory_space<vmem>>, %arg7: memref<128x128xf32, #tpu.memory_space<vmem>>, %arg8: memref<1x128xf32, #tpu.memory_space<vmem>>, %arg9: memref<1x128xf32, #tpu.memory_space<vmem>>, %arg10: memref<1x128xf32, #tpu.memory_space<vmem>>, %arg11: memref<128x128xf32, #tpu.memory_space<vmem>>, %arg12: memref<1x128xf32, #tpu.memory_space<vmem>>, %arg13: memref<128x256xf32, #tpu.memory_space<vmem>>, %arg14: memref<1x256xf32, #tpu.memory_space<vmem>>, %arg15: memref<128x128xf32, #tpu.memory_space<vmem>>, %arg16: memref<1x128xf32, #tpu.memory_space<vmem>>, %arg17: memref<1x128xf32, #tpu.memory_space<vmem>>, %arg18: memref<1x128xf32, #tpu.memory_space<vmem>>, %arg19: memref<128x256xf32, #tpu.memory_space<vmem>>, %arg20: memref<1x256xf32, #tpu.memory_space<vmem>>, %arg21: memref<256x128xf32, #tpu.memory_space<vmem>>, %arg22: memref<1x128xf32, #tpu.memory_space<vmem>>, %arg23: memref<8x128xf32, #tpu.memory_space<vmem>>) attributes {dimension_semantics = [#tpu.dimension_semantics<arbitrary>], iteration_bounds = array<i64: 1>, scalar_prefetch = 0 : i64, scratch_operands = 0 : i64, tpu.core_type = #tpu.core_type<tc>, window_params = [{pipeline_mode = #tpu.pipeline_mode<synchronous>, transform_indices = @transform_0, window_bounds = array<i64: 8, 128>}, {pipeline_mode = #tpu.pipeline_mode<synchronous>, transform_indices = @transform_1, window_bounds = array<i64: 8, 128>}, {pipeline_mode = #tpu.pipeline_mode<synchronous>, transform_indices = @transform_2, window_bounds = array<i64: 1, 128>}, {pipeline_mode = #tpu.pipeline_mode<synchronous>, transform_indices = @transform_3, window_bounds = array<i64: 1, 128>}, {pipeline_mode = #tpu.pipeline_mode<synchronous>, transform_indices = @transform_4, window_bounds = array<i64: 128, 384>}, {pipeline_mode = #tpu.pipeline_mode<synchronous>, transform_indices = @transform_5, window_bounds = array<i64: 1, 384>}, {pipeline_mode = #tpu.pipeline_mode<synchronous>, transform_indices = @transform_6, window_bounds = array<i64: 128, 128>}, {pipeline_mode = #tpu.pipeline_mode<synchronous>, transform_indices = @transform_7, window_bounds = array<i64: 1, 128>}, {pipeline_mode = #tpu.pipeline_mode<synchronous>, transform_indices = @transform_8, window_bounds = array<i64: 1, 128>}, {pipeline_mode = #tpu.pipeline_mode<synchronous>, transform_indices = @transform_9, window_bounds = array<i64: 1, 128>}, {pipeline_mode = #tpu.pipeline_mode<synchronous>, transform_indices = @transform_10, window_bounds = array<i64: 128, 128>}, {pipeline_mode = #tpu.pipeline_mode<synchronous>, transform_indices = @transform_11, window_bounds = array<i64: 1, 128>}, {pipeline_mode = #tpu.pipeline_mode<synchronous>, transform_indices = @transform_12, window_bounds = array<i64: 128, 256>}, {pipeline_mode = #tpu.pipeline_mode<synchronous>, transform_indices = @transform_13, window_bounds = array<i64: 1, 256>}, {pipeline_mode = #tpu.pipeline_mode<synchronous>, transform_indices = @transform_14, window_bounds = array<i64: 128, 128>}, {pipeline_mode = #tpu.pipeline_mode<synchronous>, transform_indices = @transform_15, window_bounds = array<i64: 1, 128>}, {pipeline_mode = #tpu.pipeline_mode<synchronous>, transform_indices = @transform_16, window_bounds = array<i64: 1, 128>}, {pipeline_mode = #tpu.pipeline_mode<synchronous>, transform_indices = @transform_17, window_bounds = array<i64: 1, 128>}, {pipeline_mode = #tpu.pipeline_mode<synchronous>, transform_indices = @transform_18, window_bounds = array<i64: 128, 256>}, {pipeline_mode = #tpu.pipeline_mode<synchronous>, transform_indices = @transform_19, window_bounds = array<i64: 1, 256>}, {pipeline_mode = #tpu.pipeline_mode<synchronous>, transform_indices = @transform_20, window_bounds = array<i64: 256, 128>}, {pipeline_mode = #tpu.pipeline_mode<synchronous>, transform_indices = @transform_21, window_bounds = array<i64: 1, 128>}, {pipeline_mode = #tpu.pipeline_mode<synchronous>, transform_indices = @transform_22, window_bounds = array<i64: 8, 128>}]} {
    %c0 = arith.constant 0 : index
    %c0_0 = arith.constant 0 : index
    %0 = vector.load %arg1[%c0, %c0_0] : memref<8x128xf32, #tpu.memory_space<vmem>>, vector<8x128xf32>
    %c0_1 = arith.constant 0 : index
    %c0_2 = arith.constant 0 : index
    %1 = vector.load %arg2[%c0_1, %c0_2] : memref<8x128xf32, #tpu.memory_space<vmem>>, vector<8x128xf32>
    %c0_3 = arith.constant 0 : index
    %c0_4 = arith.constant 0 : index
    %2 = vector.load %arg3[%c0_3, %c0_4] : memref<1x128xf32, #tpu.memory_space<vmem>>, vector<1x128xf32>
    %c0_5 = arith.constant 0 : index
    %c0_6 = arith.constant 0 : index
    %3 = vector.load %arg4[%c0_5, %c0_6] : memref<1x128xf32, #tpu.memory_space<vmem>>, vector<1x128xf32>
    %cst = arith.constant dense<0.000000e+00> : vector<8xf32>
    %4 = vector.multi_reduction <add>, %0, %cst [1] : vector<8x128xf32> to vector<8xf32>
    %5 = vector.shape_cast %4 : vector<8xf32> to vector<8x1xf32>
    %cst_7 = arith.constant 1.280000e+02 : f32
    %6 = vector.broadcast %cst_7 : f32 to vector<8x1xf32>
    %7 = arith.divf %5, %6 : vector<8x1xf32>
    %8 = vector.broadcast %7 : vector<8x1xf32> to vector<8x128xf32>
    %9 = arith.subf %0, %8 : vector<8x128xf32>
    %10 = arith.mulf %9, %9 : vector<8x128xf32>
    %cst_8 = arith.constant dense<0.000000e+00> : vector<8xf32>
    %11 = vector.multi_reduction <add>, %10, %cst_8 [1] : vector<8x128xf32> to vector<8xf32>
    %12 = vector.shape_cast %11 : vector<8xf32> to vector<8x1xf32>
    %cst_9 = arith.constant 1.280000e+02 : f32
    %13 = vector.broadcast %cst_9 : f32 to vector<8x1xf32>
    %14 = arith.divf %12, %13 : vector<8x1xf32>
    %15 = vector.broadcast %7 : vector<8x1xf32> to vector<8x128xf32>
    %16 = arith.subf %0, %15 : vector<8x128xf32>
    %cst_10 = arith.constant 9.99999974E-6 : f32
    %17 = vector.broadcast %cst_10 : f32 to vector<8x1xf32>
    %18 = arith.addf %14, %17 : vector<8x1xf32>
    %19 = math.rsqrt %18 : vector<8x1xf32>
    %20 = vector.broadcast %19 : vector<8x1xf32> to vector<8x128xf32>
    %21 = arith.mulf %16, %20 : vector<8x128xf32>
    %22 = vector.broadcast %2 : vector<1x128xf32> to vector<8x128xf32>
    %23 = arith.mulf %21, %22 : vector<8x128xf32>
    %24 = vector.broadcast %3 : vector<1x128xf32> to vector<8x128xf32>
    %25 = arith.addf %23, %24 : vector<8x128xf32>
    %c0_11 = arith.constant 0 : index
    %c0_12 = arith.constant 0 : index
    %26 = vector.load %arg5[%c0_11, %c0_12] : memref<128x384xf32, #tpu.memory_space<vmem>>, vector<128x384xf32>
    %cst_13 = arith.constant dense<0.000000e+00> : vector<8x384xf32>
    %27 = tpu.matmul %25, %26, %cst_13 {dimension_numbers = #tpu.dot_dimension_numbers<[1], [0], [0], [1], [0, 0, 1, 1], [], []>} : vector<8x128xf32>, vector<128x384xf32>, vector<8x384xf32> -> vector<8x384xf32>
    %c0_14 = arith.constant 0 : index
    %c0_15 = arith.constant 0 : index
    %28 = vector.load %arg6[%c0_14, %c0_15] : memref<1x384xf32, #tpu.memory_space<vmem>>, vector<1x384xf32>
    %29 = vector.broadcast %28 : vector<1x384xf32> to vector<8x384xf32>
    %30 = arith.addf %27, %29 : vector<8x384xf32>
    %31 = vector.extract_strided_slice %30 {offsets = [0, 0], sizes = [8, 128], strides = [1, 1]} : vector<8x384xf32> to vector<8x128xf32>
    %32 = vector.extract_strided_slice %30 {offsets = [0, 128], sizes = [8, 128], strides = [1, 1]} : vector<8x384xf32> to vector<8x128xf32>
    %33 = vector.extract_strided_slice %30 {offsets = [0, 256], sizes = [8, 128], strides = [1, 1]} : vector<8x384xf32> to vector<8x128xf32>
    %c0_16 = arith.constant 0 : index
    %c0_17 = arith.constant 0 : index
    %34 = vector.load %arg7[%c0_16, %c0_17] : memref<128x128xf32, #tpu.memory_space<vmem>>, vector<128x128xf32>
    %c0_18 = arith.constant 0 : index
    %c0_19 = arith.constant 0 : index
    %35 = vector.load %arg8[%c0_18, %c0_19] : memref<1x128xf32, #tpu.memory_space<vmem>>, vector<1x128xf32>
    %36 = tpu.iota {dimensions = array<i32: 0>} : vector<8x8xi32>
    %37 = tpu.iota {dimensions = array<i32: 1>} : vector<8x8xi32>
    %38 = arith.cmpi sge, %36, %37 : vector<8x8xi32>
    %cst_20 = arith.constant 0.000000e+00 : f32
    %cst_21 = arith.constant -1.000000e+09 : f32
    %39 = vector.broadcast %cst_20 : f32 to vector<8x8xf32>
    %40 = vector.broadcast %cst_21 : f32 to vector<8x8xf32>
    %41 = arith.select %38, %39, %40 : vector<8x8xi1>, vector<8x8xf32>
    %cst_22 = arith.constant 0.000000e+00 : f32
    %42 = vector.broadcast %cst_22 : f32 to vector<8x128xf32>
    %43 = vector.broadcast %35 : vector<1x128xf32> to vector<8x128xf32>
    %44 = arith.addf %42, %43 : vector<8x128xf32>
    %45 = vector.extract_strided_slice %31 {offsets = [0, 0], sizes = [8, 32], strides = [1, 1]} : vector<8x128xf32> to vector<8x32xf32>
    %46 = vector.extract_strided_slice %32 {offsets = [0, 0], sizes = [8, 32], strides = [1, 1]} : vector<8x128xf32> to vector<8x32xf32>
    %47 = vector.extract_strided_slice %33 {offsets = [0, 0], sizes = [8, 32], strides = [1, 1]} : vector<8x128xf32> to vector<8x32xf32>
    %cst_23 = arith.constant dense<0.000000e+00> : vector<8x8xf32>
    %48 = tpu.matmul %45, %46, %cst_23 {dimension_numbers = #tpu.dot_dimension_numbers<[1], [1], [0], [0], [0, 0, 1, 0], [], []>} : vector<8x32xf32>, vector<8x32xf32>, vector<8x8xf32> -> vector<8x8xf32>
    %cst_24 = arith.constant 0.176776692 : f32
    %49 = vector.broadcast %cst_24 : f32 to vector<8x8xf32>
    %50 = arith.mulf %48, %49 : vector<8x8xf32>
    %51 = arith.addf %50, %41 : vector<8x8xf32>
    %cst_25 = arith.constant dense<0xFF800000> : vector<8xf32>
    %52 = vector.multi_reduction <maximumf>, %51, %cst_25 [1] : vector<8x8xf32> to vector<8xf32>
    %53 = vector.shape_cast %52 : vector<8xf32> to vector<8x1xf32>
    %54 = vector.broadcast %53 : vector<8x1xf32> to vector<8x8xf32>
    %55 = arith.subf %51, %54 : vector<8x8xf32>
    %56 = math.exp %55 : vector<8x8xf32>
    %cst_26 = arith.constant dense<0.000000e+00> : vector<8xf32>
    %57 = vector.multi_reduction <add>, %56, %cst_26 [1] : vector<8x8xf32> to vector<8xf32>
    %58 = vector.shape_cast %57 : vector<8xf32> to vector<8x1xf32>
    %59 = tpu.reciprocal %58 {approx = true} : vector<8x1xf32> -> vector<8x1xf32>
    %60 = vector.broadcast %59 : vector<8x1xf32> to vector<8x8xf32>
    %61 = arith.mulf %56, %60 : vector<8x8xf32>
    %cst_27 = arith.constant dense<0.000000e+00> : vector<8x32xf32>
    %62 = tpu.matmul %61, %47, %cst_27 {dimension_numbers = #tpu.dot_dimension_numbers<[1], [0], [0], [1], [0, 0, 1, 1], [], []>} : vector<8x8xf32>, vector<8x32xf32>, vector<8x32xf32> -> vector<8x32xf32>
    %63 = vector.extract_strided_slice %34 {offsets = [0, 0], sizes = [32, 128], strides = [1, 1]} : vector<128x128xf32> to vector<32x128xf32>
    %cst_28 = arith.constant dense<0.000000e+00> : vector<8x128xf32>
    %64 = tpu.matmul %62, %63, %cst_28 {dimension_numbers = #tpu.dot_dimension_numbers<[1], [0], [0], [1], [0, 0, 1, 1], [], []>} : vector<8x32xf32>, vector<32x128xf32>, vector<8x128xf32> -> vector<8x128xf32>
    %65 = arith.addf %44, %64 : vector<8x128xf32>
    %66 = vector.extract_strided_slice %31 {offsets = [0, 32], sizes = [8, 32], strides = [1, 1]} : vector<8x128xf32> to vector<8x32xf32>
    %67 = vector.extract_strided_slice %32 {offsets = [0, 32], sizes = [8, 32], strides = [1, 1]} : vector<8x128xf32> to vector<8x32xf32>
    %68 = vector.extract_strided_slice %33 {offsets = [0, 32], sizes = [8, 32], strides = [1, 1]} : vector<8x128xf32> to vector<8x32xf32>
    %cst_29 = arith.constant dense<0.000000e+00> : vector<8x8xf32>
    %69 = tpu.matmul %66, %67, %cst_29 {dimension_numbers = #tpu.dot_dimension_numbers<[1], [1], [0], [0], [0, 0, 1, 0], [], []>} : vector<8x32xf32>, vector<8x32xf32>, vector<8x8xf32> -> vector<8x8xf32>
    %cst_30 = arith.constant 0.176776692 : f32
    %70 = vector.broadcast %cst_30 : f32 to vector<8x8xf32>
    %71 = arith.mulf %69, %70 : vector<8x8xf32>
    %72 = arith.addf %71, %41 : vector<8x8xf32>
    %cst_31 = arith.constant dense<0xFF800000> : vector<8xf32>
    %73 = vector.multi_reduction <maximumf>, %72, %cst_31 [1] : vector<8x8xf32> to vector<8xf32>
    %74 = vector.shape_cast %73 : vector<8xf32> to vector<8x1xf32>
    %75 = vector.broadcast %74 : vector<8x1xf32> to vector<8x8xf32>
    %76 = arith.subf %72, %75 : vector<8x8xf32>
    %77 = math.exp %76 : vector<8x8xf32>
    %cst_32 = arith.constant dense<0.000000e+00> : vector<8xf32>
    %78 = vector.multi_reduction <add>, %77, %cst_32 [1] : vector<8x8xf32> to vector<8xf32>
    %79 = vector.shape_cast %78 : vector<8xf32> to vector<8x1xf32>
    %80 = tpu.reciprocal %79 {approx = true} : vector<8x1xf32> -> vector<8x1xf32>
    %81 = vector.broadcast %80 : vector<8x1xf32> to vector<8x8xf32>
    %82 = arith.mulf %77, %81 : vector<8x8xf32>
    %cst_33 = arith.constant dense<0.000000e+00> : vector<8x32xf32>
    %83 = tpu.matmul %82, %68, %cst_33 {dimension_numbers = #tpu.dot_dimension_numbers<[1], [0], [0], [1], [0, 0, 1, 1], [], []>} : vector<8x8xf32>, vector<8x32xf32>, vector<8x32xf32> -> vector<8x32xf32>
    %84 = vector.extract_strided_slice %34 {offsets = [32, 0], sizes = [32, 128], strides = [1, 1]} : vector<128x128xf32> to vector<32x128xf32>
    %cst_34 = arith.constant dense<0.000000e+00> : vector<8x128xf32>
    %85 = tpu.matmul %83, %84, %cst_34 {dimension_numbers = #tpu.dot_dimension_numbers<[1], [0], [0], [1], [0, 0, 1, 1], [], []>} : vector<8x32xf32>, vector<32x128xf32>, vector<8x128xf32> -> vector<8x128xf32>
    %86 = arith.addf %65, %85 : vector<8x128xf32>
    %87 = vector.extract_strided_slice %31 {offsets = [0, 64], sizes = [8, 32], strides = [1, 1]} : vector<8x128xf32> to vector<8x32xf32>
    %88 = vector.extract_strided_slice %32 {offsets = [0, 64], sizes = [8, 32], strides = [1, 1]} : vector<8x128xf32> to vector<8x32xf32>
    %89 = vector.extract_strided_slice %33 {offsets = [0, 64], sizes = [8, 32], strides = [1, 1]} : vector<8x128xf32> to vector<8x32xf32>
    %cst_35 = arith.constant dense<0.000000e+00> : vector<8x8xf32>
    %90 = tpu.matmul %87, %88, %cst_35 {dimension_numbers = #tpu.dot_dimension_numbers<[1], [1], [0], [0], [0, 0, 1, 0], [], []>} : vector<8x32xf32>, vector<8x32xf32>, vector<8x8xf32> -> vector<8x8xf32>
    %cst_36 = arith.constant 0.176776692 : f32
    %91 = vector.broadcast %cst_36 : f32 to vector<8x8xf32>
    %92 = arith.mulf %90, %91 : vector<8x8xf32>
    %93 = arith.addf %92, %41 : vector<8x8xf32>
    %cst_37 = arith.constant dense<0xFF800000> : vector<8xf32>
    %94 = vector.multi_reduction <maximumf>, %93, %cst_37 [1] : vector<8x8xf32> to vector<8xf32>
    %95 = vector.shape_cast %94 : vector<8xf32> to vector<8x1xf32>
    %96 = vector.broadcast %95 : vector<8x1xf32> to vector<8x8xf32>
    %97 = arith.subf %93, %96 : vector<8x8xf32>
    %98 = math.exp %97 : vector<8x8xf32>
    %cst_38 = arith.constant dense<0.000000e+00> : vector<8xf32>
    %99 = vector.multi_reduction <add>, %98, %cst_38 [1] : vector<8x8xf32> to vector<8xf32>
    %100 = vector.shape_cast %99 : vector<8xf32> to vector<8x1xf32>
    %101 = tpu.reciprocal %100 {approx = true} : vector<8x1xf32> -> vector<8x1xf32>
    %102 = vector.broadcast %101 : vector<8x1xf32> to vector<8x8xf32>
    %103 = arith.mulf %98, %102 : vector<8x8xf32>
    %cst_39 = arith.constant dense<0.000000e+00> : vector<8x32xf32>
    %104 = tpu.matmul %103, %89, %cst_39 {dimension_numbers = #tpu.dot_dimension_numbers<[1], [0], [0], [1], [0, 0, 1, 1], [], []>} : vector<8x8xf32>, vector<8x32xf32>, vector<8x32xf32> -> vector<8x32xf32>
    %105 = vector.extract_strided_slice %34 {offsets = [64, 0], sizes = [32, 128], strides = [1, 1]} : vector<128x128xf32> to vector<32x128xf32>
    %cst_40 = arith.constant dense<0.000000e+00> : vector<8x128xf32>
    %106 = tpu.matmul %104, %105, %cst_40 {dimension_numbers = #tpu.dot_dimension_numbers<[1], [0], [0], [1], [0, 0, 1, 1], [], []>} : vector<8x32xf32>, vector<32x128xf32>, vector<8x128xf32> -> vector<8x128xf32>
    %107 = arith.addf %86, %106 : vector<8x128xf32>
    %108 = vector.extract_strided_slice %31 {offsets = [0, 96], sizes = [8, 32], strides = [1, 1]} : vector<8x128xf32> to vector<8x32xf32>
    %109 = vector.extract_strided_slice %32 {offsets = [0, 96], sizes = [8, 32], strides = [1, 1]} : vector<8x128xf32> to vector<8x32xf32>
    %110 = vector.extract_strided_slice %33 {offsets = [0, 96], sizes = [8, 32], strides = [1, 1]} : vector<8x128xf32> to vector<8x32xf32>
    %cst_41 = arith.constant dense<0.000000e+00> : vector<8x8xf32>
    %111 = tpu.matmul %108, %109, %cst_41 {dimension_numbers = #tpu.dot_dimension_numbers<[1], [1], [0], [0], [0, 0, 1, 0], [], []>} : vector<8x32xf32>, vector<8x32xf32>, vector<8x8xf32> -> vector<8x8xf32>
    %cst_42 = arith.constant 0.176776692 : f32
    %112 = vector.broadcast %cst_42 : f32 to vector<8x8xf32>
    %113 = arith.mulf %111, %112 : vector<8x8xf32>
    %114 = arith.addf %113, %41 : vector<8x8xf32>
    %cst_43 = arith.constant dense<0xFF800000> : vector<8xf32>
    %115 = vector.multi_reduction <maximumf>, %114, %cst_43 [1] : vector<8x8xf32> to vector<8xf32>
    %116 = vector.shape_cast %115 : vector<8xf32> to vector<8x1xf32>
    %117 = vector.broadcast %116 : vector<8x1xf32> to vector<8x8xf32>
    %118 = arith.subf %114, %117 : vector<8x8xf32>
    %119 = math.exp %118 : vector<8x8xf32>
    %cst_44 = arith.constant dense<0.000000e+00> : vector<8xf32>
    %120 = vector.multi_reduction <add>, %119, %cst_44 [1] : vector<8x8xf32> to vector<8xf32>
    %121 = vector.shape_cast %120 : vector<8xf32> to vector<8x1xf32>
    %122 = tpu.reciprocal %121 {approx = true} : vector<8x1xf32> -> vector<8x1xf32>
    %123 = vector.broadcast %122 : vector<8x1xf32> to vector<8x8xf32>
    %124 = arith.mulf %119, %123 : vector<8x8xf32>
    %cst_45 = arith.constant dense<0.000000e+00> : vector<8x32xf32>
    %125 = tpu.matmul %124, %110, %cst_45 {dimension_numbers = #tpu.dot_dimension_numbers<[1], [0], [0], [1], [0, 0, 1, 1], [], []>} : vector<8x8xf32>, vector<8x32xf32>, vector<8x32xf32> -> vector<8x32xf32>
    %126 = vector.extract_strided_slice %34 {offsets = [96, 0], sizes = [32, 128], strides = [1, 1]} : vector<128x128xf32> to vector<32x128xf32>
    %cst_46 = arith.constant dense<0.000000e+00> : vector<8x128xf32>
    %127 = tpu.matmul %125, %126, %cst_46 {dimension_numbers = #tpu.dot_dimension_numbers<[1], [0], [0], [1], [0, 0, 1, 1], [], []>} : vector<8x32xf32>, vector<32x128xf32>, vector<8x128xf32> -> vector<8x128xf32>
    %128 = arith.addf %107, %127 : vector<8x128xf32>
    %129 = arith.addf %0, %128 : vector<8x128xf32>
    %c0_47 = arith.constant 0 : index
    %c0_48 = arith.constant 0 : index
    %130 = vector.load %arg9[%c0_47, %c0_48] : memref<1x128xf32, #tpu.memory_space<vmem>>, vector<1x128xf32>
    %c0_49 = arith.constant 0 : index
    %c0_50 = arith.constant 0 : index
    %131 = vector.load %arg10[%c0_49, %c0_50] : memref<1x128xf32, #tpu.memory_space<vmem>>, vector<1x128xf32>
    %cst_51 = arith.constant dense<0.000000e+00> : vector<8xf32>
    %132 = vector.multi_reduction <add>, %129, %cst_51 [1] : vector<8x128xf32> to vector<8xf32>
    %133 = vector.shape_cast %132 : vector<8xf32> to vector<8x1xf32>
    %cst_52 = arith.constant 1.280000e+02 : f32
    %134 = vector.broadcast %cst_52 : f32 to vector<8x1xf32>
    %135 = arith.divf %133, %134 : vector<8x1xf32>
    %136 = vector.broadcast %135 : vector<8x1xf32> to vector<8x128xf32>
    %137 = arith.subf %129, %136 : vector<8x128xf32>
    %138 = arith.mulf %137, %137 : vector<8x128xf32>
    %cst_53 = arith.constant dense<0.000000e+00> : vector<8xf32>
    %139 = vector.multi_reduction <add>, %138, %cst_53 [1] : vector<8x128xf32> to vector<8xf32>
    %140 = vector.shape_cast %139 : vector<8xf32> to vector<8x1xf32>
    %cst_54 = arith.constant 1.280000e+02 : f32
    %141 = vector.broadcast %cst_54 : f32 to vector<8x1xf32>
    %142 = arith.divf %140, %141 : vector<8x1xf32>
    %143 = vector.broadcast %135 : vector<8x1xf32> to vector<8x128xf32>
    %144 = arith.subf %129, %143 : vector<8x128xf32>
    %cst_55 = arith.constant 9.99999974E-6 : f32
    %145 = vector.broadcast %cst_55 : f32 to vector<8x1xf32>
    %146 = arith.addf %142, %145 : vector<8x1xf32>
    %147 = math.rsqrt %146 : vector<8x1xf32>
    %148 = vector.broadcast %147 : vector<8x1xf32> to vector<8x128xf32>
    %149 = arith.mulf %144, %148 : vector<8x128xf32>
    %150 = vector.broadcast %130 : vector<1x128xf32> to vector<8x128xf32>
    %151 = arith.mulf %149, %150 : vector<8x128xf32>
    %152 = vector.broadcast %131 : vector<1x128xf32> to vector<8x128xf32>
    %153 = arith.addf %151, %152 : vector<8x128xf32>
    %c0_56 = arith.constant 0 : index
    %c0_57 = arith.constant 0 : index
    %154 = vector.load %arg11[%c0_56, %c0_57] : memref<128x128xf32, #tpu.memory_space<vmem>>, vector<128x128xf32>
    %cst_58 = arith.constant dense<0.000000e+00> : vector<8x128xf32>
    %155 = tpu.matmul %153, %154, %cst_58 {dimension_numbers = #tpu.dot_dimension_numbers<[1], [0], [0], [1], [0, 0, 1, 1], [], []>} : vector<8x128xf32>, vector<128x128xf32>, vector<8x128xf32> -> vector<8x128xf32>
    %c0_59 = arith.constant 0 : index
    %c0_60 = arith.constant 0 : index
    %156 = vector.load %arg12[%c0_59, %c0_60] : memref<1x128xf32, #tpu.memory_space<vmem>>, vector<1x128xf32>
    %157 = vector.broadcast %156 : vector<1x128xf32> to vector<8x128xf32>
    %158 = arith.addf %155, %157 : vector<8x128xf32>
    %c0_61 = arith.constant 0 : index
    %c0_62 = arith.constant 0 : index
    %159 = vector.load %arg13[%c0_61, %c0_62] : memref<128x256xf32, #tpu.memory_space<vmem>>, vector<128x256xf32>
    %cst_63 = arith.constant dense<0.000000e+00> : vector<8x256xf32>
    %160 = tpu.matmul %1, %159, %cst_63 {dimension_numbers = #tpu.dot_dimension_numbers<[1], [0], [0], [1], [0, 0, 1, 1], [], []>} : vector<8x128xf32>, vector<128x256xf32>, vector<8x256xf32> -> vector<8x256xf32>
    %c0_64 = arith.constant 0 : index
    %c0_65 = arith.constant 0 : index
    %161 = vector.load %arg14[%c0_64, %c0_65] : memref<1x256xf32, #tpu.memory_space<vmem>>, vector<1x256xf32>
    %162 = vector.broadcast %161 : vector<1x256xf32> to vector<8x256xf32>
    %163 = arith.addf %160, %162 : vector<8x256xf32>
    %164 = vector.extract_strided_slice %163 {offsets = [0, 0], sizes = [8, 128], strides = [1, 1]} : vector<8x256xf32> to vector<8x128xf32>
    %165 = vector.extract_strided_slice %163 {offsets = [0, 128], sizes = [8, 128], strides = [1, 1]} : vector<8x256xf32> to vector<8x128xf32>
    %c0_66 = arith.constant 0 : index
    %c0_67 = arith.constant 0 : index
    %166 = vector.load %arg15[%c0_66, %c0_67] : memref<128x128xf32, #tpu.memory_space<vmem>>, vector<128x128xf32>
    %c0_68 = arith.constant 0 : index
    %c0_69 = arith.constant 0 : index
    %167 = vector.load %arg16[%c0_68, %c0_69] : memref<1x128xf32, #tpu.memory_space<vmem>>, vector<1x128xf32>
    %cst_70 = arith.constant 0.000000e+00 : f32
    %168 = vector.broadcast %cst_70 : f32 to vector<8x128xf32>
    %169 = vector.broadcast %167 : vector<1x128xf32> to vector<8x128xf32>
    %170 = arith.addf %168, %169 : vector<8x128xf32>
    %171 = vector.extract_strided_slice %158 {offsets = [0, 0], sizes = [8, 32], strides = [1, 1]} : vector<8x128xf32> to vector<8x32xf32>
    %172 = vector.extract_strided_slice %164 {offsets = [0, 0], sizes = [8, 32], strides = [1, 1]} : vector<8x128xf32> to vector<8x32xf32>
    %173 = vector.extract_strided_slice %165 {offsets = [0, 0], sizes = [8, 32], strides = [1, 1]} : vector<8x128xf32> to vector<8x32xf32>
    %cst_71 = arith.constant dense<0.000000e+00> : vector<8x8xf32>
    %174 = tpu.matmul %171, %172, %cst_71 {dimension_numbers = #tpu.dot_dimension_numbers<[1], [1], [0], [0], [0, 0, 1, 0], [], []>} : vector<8x32xf32>, vector<8x32xf32>, vector<8x8xf32> -> vector<8x8xf32>
    %cst_72 = arith.constant 0.176776692 : f32
    %175 = vector.broadcast %cst_72 : f32 to vector<8x8xf32>
    %176 = arith.mulf %174, %175 : vector<8x8xf32>
    %cst_73 = arith.constant dense<0xFF800000> : vector<8xf32>
    %177 = vector.multi_reduction <maximumf>, %176, %cst_73 [1] : vector<8x8xf32> to vector<8xf32>
    %178 = vector.shape_cast %177 : vector<8xf32> to vector<8x1xf32>
    %179 = vector.broadcast %178 : vector<8x1xf32> to vector<8x8xf32>
    %180 = arith.subf %176, %179 : vector<8x8xf32>
    %181 = math.exp %180 : vector<8x8xf32>
    %cst_74 = arith.constant dense<0.000000e+00> : vector<8xf32>
    %182 = vector.multi_reduction <add>, %181, %cst_74 [1] : vector<8x8xf32> to vector<8xf32>
    %183 = vector.shape_cast %182 : vector<8xf32> to vector<8x1xf32>
    %184 = tpu.reciprocal %183 {approx = true} : vector<8x1xf32> -> vector<8x1xf32>
    %185 = vector.broadcast %184 : vector<8x1xf32> to vector<8x8xf32>
    %186 = arith.mulf %181, %185 : vector<8x8xf32>
    %cst_75 = arith.constant dense<0.000000e+00> : vector<8x32xf32>
    %187 = tpu.matmul %186, %173, %cst_75 {dimension_numbers = #tpu.dot_dimension_numbers<[1], [0], [0], [1], [0, 0, 1, 1], [], []>} : vector<8x8xf32>, vector<8x32xf32>, vector<8x32xf32> -> vector<8x32xf32>
    %188 = vector.extract_strided_slice %166 {offsets = [0, 0], sizes = [32, 128], strides = [1, 1]} : vector<128x128xf32> to vector<32x128xf32>
    %cst_76 = arith.constant dense<0.000000e+00> : vector<8x128xf32>
    %189 = tpu.matmul %187, %188, %cst_76 {dimension_numbers = #tpu.dot_dimension_numbers<[1], [0], [0], [1], [0, 0, 1, 1], [], []>} : vector<8x32xf32>, vector<32x128xf32>, vector<8x128xf32> -> vector<8x128xf32>
    %190 = arith.addf %170, %189 : vector<8x128xf32>
    %191 = vector.extract_strided_slice %158 {offsets = [0, 32], sizes = [8, 32], strides = [1, 1]} : vector<8x128xf32> to vector<8x32xf32>
    %192 = vector.extract_strided_slice %164 {offsets = [0, 32], sizes = [8, 32], strides = [1, 1]} : vector<8x128xf32> to vector<8x32xf32>
    %193 = vector.extract_strided_slice %165 {offsets = [0, 32], sizes = [8, 32], strides = [1, 1]} : vector<8x128xf32> to vector<8x32xf32>
    %cst_77 = arith.constant dense<0.000000e+00> : vector<8x8xf32>
    %194 = tpu.matmul %191, %192, %cst_77 {dimension_numbers = #tpu.dot_dimension_numbers<[1], [1], [0], [0], [0, 0, 1, 0], [], []>} : vector<8x32xf32>, vector<8x32xf32>, vector<8x8xf32> -> vector<8x8xf32>
    %cst_78 = arith.constant 0.176776692 : f32
    %195 = vector.broadcast %cst_78 : f32 to vector<8x8xf32>
    %196 = arith.mulf %194, %195 : vector<8x8xf32>
    %cst_79 = arith.constant dense<0xFF800000> : vector<8xf32>
    %197 = vector.multi_reduction <maximumf>, %196, %cst_79 [1] : vector<8x8xf32> to vector<8xf32>
    %198 = vector.shape_cast %197 : vector<8xf32> to vector<8x1xf32>
    %199 = vector.broadcast %198 : vector<8x1xf32> to vector<8x8xf32>
    %200 = arith.subf %196, %199 : vector<8x8xf32>
    %201 = math.exp %200 : vector<8x8xf32>
    %cst_80 = arith.constant dense<0.000000e+00> : vector<8xf32>
    %202 = vector.multi_reduction <add>, %201, %cst_80 [1] : vector<8x8xf32> to vector<8xf32>
    %203 = vector.shape_cast %202 : vector<8xf32> to vector<8x1xf32>
    %204 = tpu.reciprocal %203 {approx = true} : vector<8x1xf32> -> vector<8x1xf32>
    %205 = vector.broadcast %204 : vector<8x1xf32> to vector<8x8xf32>
    %206 = arith.mulf %201, %205 : vector<8x8xf32>
    %cst_81 = arith.constant dense<0.000000e+00> : vector<8x32xf32>
    %207 = tpu.matmul %206, %193, %cst_81 {dimension_numbers = #tpu.dot_dimension_numbers<[1], [0], [0], [1], [0, 0, 1, 1], [], []>} : vector<8x8xf32>, vector<8x32xf32>, vector<8x32xf32> -> vector<8x32xf32>
    %208 = vector.extract_strided_slice %166 {offsets = [32, 0], sizes = [32, 128], strides = [1, 1]} : vector<128x128xf32> to vector<32x128xf32>
    %cst_82 = arith.constant dense<0.000000e+00> : vector<8x128xf32>
    %209 = tpu.matmul %207, %208, %cst_82 {dimension_numbers = #tpu.dot_dimension_numbers<[1], [0], [0], [1], [0, 0, 1, 1], [], []>} : vector<8x32xf32>, vector<32x128xf32>, vector<8x128xf32> -> vector<8x128xf32>
    %210 = arith.addf %190, %209 : vector<8x128xf32>
    %211 = vector.extract_strided_slice %158 {offsets = [0, 64], sizes = [8, 32], strides = [1, 1]} : vector<8x128xf32> to vector<8x32xf32>
    %212 = vector.extract_strided_slice %164 {offsets = [0, 64], sizes = [8, 32], strides = [1, 1]} : vector<8x128xf32> to vector<8x32xf32>
    %213 = vector.extract_strided_slice %165 {offsets = [0, 64], sizes = [8, 32], strides = [1, 1]} : vector<8x128xf32> to vector<8x32xf32>
    %cst_83 = arith.constant dense<0.000000e+00> : vector<8x8xf32>
    %214 = tpu.matmul %211, %212, %cst_83 {dimension_numbers = #tpu.dot_dimension_numbers<[1], [1], [0], [0], [0, 0, 1, 0], [], []>} : vector<8x32xf32>, vector<8x32xf32>, vector<8x8xf32> -> vector<8x8xf32>
    %cst_84 = arith.constant 0.176776692 : f32
    %215 = vector.broadcast %cst_84 : f32 to vector<8x8xf32>
    %216 = arith.mulf %214, %215 : vector<8x8xf32>
    %cst_85 = arith.constant dense<0xFF800000> : vector<8xf32>
    %217 = vector.multi_reduction <maximumf>, %216, %cst_85 [1] : vector<8x8xf32> to vector<8xf32>
    %218 = vector.shape_cast %217 : vector<8xf32> to vector<8x1xf32>
    %219 = vector.broadcast %218 : vector<8x1xf32> to vector<8x8xf32>
    %220 = arith.subf %216, %219 : vector<8x8xf32>
    %221 = math.exp %220 : vector<8x8xf32>
    %cst_86 = arith.constant dense<0.000000e+00> : vector<8xf32>
    %222 = vector.multi_reduction <add>, %221, %cst_86 [1] : vector<8x8xf32> to vector<8xf32>
    %223 = vector.shape_cast %222 : vector<8xf32> to vector<8x1xf32>
    %224 = tpu.reciprocal %223 {approx = true} : vector<8x1xf32> -> vector<8x1xf32>
    %225 = vector.broadcast %224 : vector<8x1xf32> to vector<8x8xf32>
    %226 = arith.mulf %221, %225 : vector<8x8xf32>
    %cst_87 = arith.constant dense<0.000000e+00> : vector<8x32xf32>
    %227 = tpu.matmul %226, %213, %cst_87 {dimension_numbers = #tpu.dot_dimension_numbers<[1], [0], [0], [1], [0, 0, 1, 1], [], []>} : vector<8x8xf32>, vector<8x32xf32>, vector<8x32xf32> -> vector<8x32xf32>
    %228 = vector.extract_strided_slice %166 {offsets = [64, 0], sizes = [32, 128], strides = [1, 1]} : vector<128x128xf32> to vector<32x128xf32>
    %cst_88 = arith.constant dense<0.000000e+00> : vector<8x128xf32>
    %229 = tpu.matmul %227, %228, %cst_88 {dimension_numbers = #tpu.dot_dimension_numbers<[1], [0], [0], [1], [0, 0, 1, 1], [], []>} : vector<8x32xf32>, vector<32x128xf32>, vector<8x128xf32> -> vector<8x128xf32>
    %230 = arith.addf %210, %229 : vector<8x128xf32>
    %231 = vector.extract_strided_slice %158 {offsets = [0, 96], sizes = [8, 32], strides = [1, 1]} : vector<8x128xf32> to vector<8x32xf32>
    %232 = vector.extract_strided_slice %164 {offsets = [0, 96], sizes = [8, 32], strides = [1, 1]} : vector<8x128xf32> to vector<8x32xf32>
    %233 = vector.extract_strided_slice %165 {offsets = [0, 96], sizes = [8, 32], strides = [1, 1]} : vector<8x128xf32> to vector<8x32xf32>
    %cst_89 = arith.constant dense<0.000000e+00> : vector<8x8xf32>
    %234 = tpu.matmul %231, %232, %cst_89 {dimension_numbers = #tpu.dot_dimension_numbers<[1], [1], [0], [0], [0, 0, 1, 0], [], []>} : vector<8x32xf32>, vector<8x32xf32>, vector<8x8xf32> -> vector<8x8xf32>
    %cst_90 = arith.constant 0.176776692 : f32
    %235 = vector.broadcast %cst_90 : f32 to vector<8x8xf32>
    %236 = arith.mulf %234, %235 : vector<8x8xf32>
    %cst_91 = arith.constant dense<0xFF800000> : vector<8xf32>
    %237 = vector.multi_reduction <maximumf>, %236, %cst_91 [1] : vector<8x8xf32> to vector<8xf32>
    %238 = vector.shape_cast %237 : vector<8xf32> to vector<8x1xf32>
    %239 = vector.broadcast %238 : vector<8x1xf32> to vector<8x8xf32>
    %240 = arith.subf %236, %239 : vector<8x8xf32>
    %241 = math.exp %240 : vector<8x8xf32>
    %cst_92 = arith.constant dense<0.000000e+00> : vector<8xf32>
    %242 = vector.multi_reduction <add>, %241, %cst_92 [1] : vector<8x8xf32> to vector<8xf32>
    %243 = vector.shape_cast %242 : vector<8xf32> to vector<8x1xf32>
    %244 = tpu.reciprocal %243 {approx = true} : vector<8x1xf32> -> vector<8x1xf32>
    %245 = vector.broadcast %244 : vector<8x1xf32> to vector<8x8xf32>
    %246 = arith.mulf %241, %245 : vector<8x8xf32>
    %cst_93 = arith.constant dense<0.000000e+00> : vector<8x32xf32>
    %247 = tpu.matmul %246, %233, %cst_93 {dimension_numbers = #tpu.dot_dimension_numbers<[1], [0], [0], [1], [0, 0, 1, 1], [], []>} : vector<8x8xf32>, vector<8x32xf32>, vector<8x32xf32> -> vector<8x32xf32>
    %248 = vector.extract_strided_slice %166 {offsets = [96, 0], sizes = [32, 128], strides = [1, 1]} : vector<128x128xf32> to vector<32x128xf32>
    %cst_94 = arith.constant dense<0.000000e+00> : vector<8x128xf32>
    %249 = tpu.matmul %247, %248, %cst_94 {dimension_numbers = #tpu.dot_dimension_numbers<[1], [0], [0], [1], [0, 0, 1, 1], [], []>} : vector<8x32xf32>, vector<32x128xf32>, vector<8x128xf32> -> vector<8x128xf32>
    %250 = arith.addf %230, %249 : vector<8x128xf32>
    %251 = arith.addf %129, %250 : vector<8x128xf32>
    %c0_95 = arith.constant 0 : index
    %c0_96 = arith.constant 0 : index
    %252 = vector.load %arg17[%c0_95, %c0_96] : memref<1x128xf32, #tpu.memory_space<vmem>>, vector<1x128xf32>
    %c0_97 = arith.constant 0 : index
    %c0_98 = arith.constant 0 : index
    %253 = vector.load %arg18[%c0_97, %c0_98] : memref<1x128xf32, #tpu.memory_space<vmem>>, vector<1x128xf32>
    %cst_99 = arith.constant dense<0.000000e+00> : vector<8xf32>
    %254 = vector.multi_reduction <add>, %251, %cst_99 [1] : vector<8x128xf32> to vector<8xf32>
    %255 = vector.shape_cast %254 : vector<8xf32> to vector<8x1xf32>
    %cst_100 = arith.constant 1.280000e+02 : f32
    %256 = vector.broadcast %cst_100 : f32 to vector<8x1xf32>
    %257 = arith.divf %255, %256 : vector<8x1xf32>
    %258 = vector.broadcast %257 : vector<8x1xf32> to vector<8x128xf32>
    %259 = arith.subf %251, %258 : vector<8x128xf32>
    %260 = arith.mulf %259, %259 : vector<8x128xf32>
    %cst_101 = arith.constant dense<0.000000e+00> : vector<8xf32>
    %261 = vector.multi_reduction <add>, %260, %cst_101 [1] : vector<8x128xf32> to vector<8xf32>
    %262 = vector.shape_cast %261 : vector<8xf32> to vector<8x1xf32>
    %cst_102 = arith.constant 1.280000e+02 : f32
    %263 = vector.broadcast %cst_102 : f32 to vector<8x1xf32>
    %264 = arith.divf %262, %263 : vector<8x1xf32>
    %265 = vector.broadcast %257 : vector<8x1xf32> to vector<8x128xf32>
    %266 = arith.subf %251, %265 : vector<8x128xf32>
    %cst_103 = arith.constant 9.99999974E-6 : f32
    %267 = vector.broadcast %cst_103 : f32 to vector<8x1xf32>
    %268 = arith.addf %264, %267 : vector<8x1xf32>
    %269 = math.rsqrt %268 : vector<8x1xf32>
    %270 = vector.broadcast %269 : vector<8x1xf32> to vector<8x128xf32>
    %271 = arith.mulf %266, %270 : vector<8x128xf32>
    %272 = vector.broadcast %252 : vector<1x128xf32> to vector<8x128xf32>
    %273 = arith.mulf %271, %272 : vector<8x128xf32>
    %274 = vector.broadcast %253 : vector<1x128xf32> to vector<8x128xf32>
    %275 = arith.addf %273, %274 : vector<8x128xf32>
    %c0_104 = arith.constant 0 : index
    %c0_105 = arith.constant 0 : index
    %276 = vector.load %arg19[%c0_104, %c0_105] : memref<128x256xf32, #tpu.memory_space<vmem>>, vector<128x256xf32>
    %cst_106 = arith.constant dense<0.000000e+00> : vector<8x256xf32>
    %277 = tpu.matmul %275, %276, %cst_106 {dimension_numbers = #tpu.dot_dimension_numbers<[1], [0], [0], [1], [0, 0, 1, 1], [], []>} : vector<8x128xf32>, vector<128x256xf32>, vector<8x256xf32> -> vector<8x256xf32>
    %c0_107 = arith.constant 0 : index
    %c0_108 = arith.constant 0 : index
    %278 = vector.load %arg20[%c0_107, %c0_108] : memref<1x256xf32, #tpu.memory_space<vmem>>, vector<1x256xf32>
    %279 = vector.broadcast %278 : vector<1x256xf32> to vector<8x256xf32>
    %280 = arith.addf %277, %279 : vector<8x256xf32>
    %281 = arith.mulf %280, %280 : vector<8x256xf32>
    %282 = arith.mulf %280, %281 : vector<8x256xf32>
    %cst_109 = arith.constant 4.471500e-02 : f32
    %283 = vector.broadcast %cst_109 : f32 to vector<8x256xf32>
    %284 = arith.mulf %283, %282 : vector<8x256xf32>
    %285 = arith.addf %280, %284 : vector<8x256xf32>
    %cst_110 = arith.constant 0.797884583 : f32
    %286 = vector.broadcast %cst_110 : f32 to vector<8x256xf32>
    %287 = arith.mulf %286, %285 : vector<8x256xf32>
    %288 = math.tanh %287 : vector<8x256xf32>
    %cst_111 = arith.constant 1.000000e+00 : f32
    %289 = vector.broadcast %cst_111 : f32 to vector<8x256xf32>
    %290 = arith.addf %289, %288 : vector<8x256xf32>
    %cst_112 = arith.constant 5.000000e-01 : f32
    %291 = vector.broadcast %cst_112 : f32 to vector<8x256xf32>
    %292 = arith.mulf %291, %290 : vector<8x256xf32>
    %293 = arith.mulf %280, %292 : vector<8x256xf32>
    %c0_113 = arith.constant 0 : index
    %c0_114 = arith.constant 0 : index
    %294 = vector.load %arg21[%c0_113, %c0_114] : memref<256x128xf32, #tpu.memory_space<vmem>>, vector<256x128xf32>
    %cst_115 = arith.constant dense<0.000000e+00> : vector<8x128xf32>
    %295 = tpu.matmul %293, %294, %cst_115 {dimension_numbers = #tpu.dot_dimension_numbers<[1], [0], [0], [1], [0, 0, 1, 1], [], []>} : vector<8x256xf32>, vector<256x128xf32>, vector<8x128xf32> -> vector<8x128xf32>
    %296 = arith.addf %251, %295 : vector<8x128xf32>
    %c0_116 = arith.constant 0 : index
    %c0_117 = arith.constant 0 : index
    %297 = vector.load %arg22[%c0_116, %c0_117] : memref<1x128xf32, #tpu.memory_space<vmem>>, vector<1x128xf32>
    %298 = vector.broadcast %297 : vector<1x128xf32> to vector<8x128xf32>
    %299 = arith.addf %296, %298 : vector<8x128xf32>
    %c0_118 = arith.constant 0 : index
    %c0_119 = arith.constant 0 : index
    %300 = vector.load %arg23[%c0_118, %c0_119] : memref<8x128xf32, #tpu.memory_space<vmem>>, vector<8x128xf32>
    tpu.vector_store %arg23[%c0_118, %c0_119], %299 {strides = array<i32>} : memref<8x128xf32, #tpu.memory_space<vmem>>, vector<8x128xf32>,
    return
  }
  func.func @transform_0(%arg0: i32) -> (i32, i32) {
    %c0_i32 = arith.constant 0 : i32
    %c0_i32_0 = arith.constant 0 : i32
    %c0_i32_1 = arith.constant 0 : i32
    return %c0_i32, %c0_i32_0 : i32, i32
  }
  func.func @transform_1(%arg0: i32) -> (i32, i32) {
    %c0_i32 = arith.constant 0 : i32
    %c0_i32_0 = arith.constant 0 : i32
    %c0_i32_1 = arith.constant 0 : i32
    return %c0_i32, %c0_i32_0 : i32, i32
  }
  func.func @transform_2(%arg0: i32) -> (i32, i32) {
    %c0_i32 = arith.constant 0 : i32
    %c0_i32_0 = arith.constant 0 : i32
    %c0_i32_1 = arith.constant 0 : i32
    return %c0_i32, %c0_i32_0 : i32, i32
  }
  func.func @transform_3(%arg0: i32) -> (i32, i32) {
    %c0_i32 = arith.constant 0 : i32
    %c0_i32_0 = arith.constant 0 : i32
    %c0_i32_1 = arith.constant 0 : i32
    return %c0_i32, %c0_i32_0 : i32, i32
  }
  func.func @transform_4(%arg0: i32) -> (i32, i32) {
    %c0_i32 = arith.constant 0 : i32
    %c0_i32_0 = arith.constant 0 : i32
    %c0_i32_1 = arith.constant 0 : i32
    return %c0_i32, %c0_i32_0 : i32, i32
  }
  func.func @transform_5(%arg0: i32) -> (i32, i32) {
    %c0_i32 = arith.constant 0 : i32
    %c0_i32_0 = arith.constant 0 : i32
    %c0_i32_1 = arith.constant 0 : i32
    return %c0_i32, %c0_i32_0 : i32, i32
  }
  func.func @transform_6(%arg0: i32) -> (i32, i32) {
    %c0_i32 = arith.constant 0 : i32
    %c0_i32_0 = arith.constant 0 : i32
    %c0_i32_1 = arith.constant 0 : i32
    return %c0_i32, %c0_i32_0 : i32, i32
  }
  func.func @transform_7(%arg0: i32) -> (i32, i32) {
    %c0_i32 = arith.constant 0 : i32
    %c0_i32_0 = arith.constant 0 : i32
    %c0_i32_1 = arith.constant 0 : i32
    return %c0_i32, %c0_i32_0 : i32, i32
  }
  func.func @transform_8(%arg0: i32) -> (i32, i32) {
    %c0_i32 = arith.constant 0 : i32
    %c0_i32_0 = arith.constant 0 : i32
    %c0_i32_1 = arith.constant 0 : i32
    return %c0_i32, %c0_i32_0 : i32, i32
  }
  func.func @transform_9(%arg0: i32) -> (i32, i32) {
    %c0_i32 = arith.constant 0 : i32
    %c0_i32_0 = arith.constant 0 : i32
    %c0_i32_1 = arith.constant 0 : i32
    return %c0_i32, %c0_i32_0 : i32, i32
  }
  func.func @transform_10(%arg0: i32) -> (i32, i32) {
    %c0_i32 = arith.constant 0 : i32
    %c0_i32_0 = arith.constant 0 : i32
    %c0_i32_1 = arith.constant 0 : i32
    return %c0_i32, %c0_i32_0 : i32, i32
  }
  func.func @transform_11(%arg0: i32) -> (i32, i32) {
    %c0_i32 = arith.constant 0 : i32
    %c0_i32_0 = arith.constant 0 : i32
    %c0_i32_1 = arith.constant 0 : i32
    return %c0_i32, %c0_i32_0 : i32, i32
  }
  func.func @transform_12(%arg0: i32) -> (i32, i32) {
    %c0_i32 = arith.constant 0 : i32
    %c0_i32_0 = arith.constant 0 : i32
    %c0_i32_1 = arith.constant 0 : i32
    return %c0_i32, %c0_i32_0 : i32, i32
  }
  func.func @transform_13(%arg0: i32) -> (i32, i32) {
    %c0_i32 = arith.constant 0 : i32
    %c0_i32_0 = arith.constant 0 : i32
    %c0_i32_1 = arith.constant 0 : i32
    return %c0_i32, %c0_i32_0 : i32, i32
  }
  func.func @transform_14(%arg0: i32) -> (i32, i32) {
    %c0_i32 = arith.constant 0 : i32
    %c0_i32_0 = arith.constant 0 : i32
    %c0_i32_1 = arith.constant 0 : i32
    return %c0_i32, %c0_i32_0 : i32, i32
  }
  func.func @transform_15(%arg0: i32) -> (i32, i32) {
    %c0_i32 = arith.constant 0 : i32
    %c0_i32_0 = arith.constant 0 : i32
    %c0_i32_1 = arith.constant 0 : i32
    return %c0_i32, %c0_i32_0 : i32, i32
  }
  func.func @transform_16(%arg0: i32) -> (i32, i32) {
    %c0_i32 = arith.constant 0 : i32
    %c0_i32_0 = arith.constant 0 : i32
    %c0_i32_1 = arith.constant 0 : i32
    return %c0_i32, %c0_i32_0 : i32, i32
  }
  func.func @transform_17(%arg0: i32) -> (i32, i32) {
    %c0_i32 = arith.constant 0 : i32
    %c0_i32_0 = arith.constant 0 : i32
    %c0_i32_1 = arith.constant 0 : i32
    return %c0_i32, %c0_i32_0 : i32, i32
  }
  func.func @transform_18(%arg0: i32) -> (i32, i32) {
    %c0_i32 = arith.constant 0 : i32
    %c0_i32_0 = arith.constant 0 : i32
    %c0_i32_1 = arith.constant 0 : i32
    return %c0_i32, %c0_i32_0 : i32, i32
  }
  func.func @transform_19(%arg0: i32) -> (i32, i32) {
    %c0_i32 = arith.constant 0 : i32
    %c0_i32_0 = arith.constant 0 : i32
    %c0_i32_1 = arith.constant 0 : i32
    return %c0_i32, %c0_i32_0 : i32, i32
  }
  func.func @transform_20(%arg0: i32) -> (i32, i32) {
    %c0_i32 = arith.constant 0 : i32
    %c0_i32_0 = arith.constant 0 : i32
    %c0_i32_1 = arith.constant 0 : i32
    return %c0_i32, %c0_i32_0 : i32, i32
  }
  func.func @transform_21(%arg0: i32) -> (i32, i32) {
    %c0_i32 = arith.constant 0 : i32
    %c0_i32_0 = arith.constant 0 : i32
    %c0_i32_1 = arith.constant 0 : i32
    return %c0_i32, %c0_i32_0 : i32, i32
  }
  func.func @transform_22(%arg0: i32) -> (i32, i32) {
    %c0_i32 = arith.constant 0 : i32
    %c0_i32_0 = arith.constant 0 : i32
    %c0_i32_1 = arith.constant 0 : i32
    return %c0_i32, %c0_i32_0 : i32, i32
  }
}

</mosaic_0001>

<bundles_post_ra>
// kernel: whisper_wrapper_full_forward.6
= control target key start
LH: loop header
LB: loop body
LE: loop exit
PB: predicated region body
PF: predicated region fallthrough
CT: control target
= control target key end

     0   :  { %v575_v0 = vmov 0.0|0.0   ;;  %vm576_vm0 = vmmov 0   ;;  %v577_v6 = vmov 0.0   ;;  %s787_s1 = inlined_call_operand.vmem [shape: f32[3,128,128], index: 1, kind: input, shape index: {}]   ;;  %s788_s0 = inlined_call_operand.vmem [shape: f32[3,8,128], index: 0, kind: input, shape index: {}]   ;;  %s789_s2 = inlined_call_operand.vmem [shape: f32[1,128], index: 2, kind: input, shape index: {}]   ;;  %s790_s3 = inlined_call_operand.vmem [shape: f32[8,128], index: 3, kind: output, shape index: {}]  }
   0x1   :  { %518 = vmatprep.subr.bf16.mxu0 %v575_v0  ;;  %v305_v1 = vld [vmem:[%s787_s1 + $0x80] sm:$0xff]  ;;  %v306_v2 = vld [vmem:[%s787_s1 + $0x88] sm:$0xff]  ;;  %v307_v3 = vld [vmem:[%s787_s1 + $0x90] sm:$0xff]  ;;  %494 = vmatprep.subr.bf16.mxu1 %v575_v0 }
   0x2   :  { %v519_v4 = vpack.c.bf16 %v306_v2, %v305_v1  ;;  %v308_v5 = vld [vmem:[%s787_s1 + $0x98] sm:$0xff]  ;;  %456 = vmatprep.mubr.msk.f32.mxu0 %vm576_vm0, %v577_v6  ;;  %421 = vmatprep.mubr.msk.f32.mxu1 %vm576_vm0, %v577_v6  ;;  %v309_v8 = vld [vmem:[%s787_s1 + $0xa0] sm:$0xff]  ;;  %v310_v9 = vld [vmem:[%s787_s1 + $0xa8] sm:$0xff] }
   0x3   :  { %v522_v7 = vpack.c.bf16 %v308_v5, %v307_v3  ;;  %v16_v10 = vld [vmem:[%s787_s1] sm:$0xff]  ;;  %v17_v11 = vld [vmem:[%s787_s1 + $0x8] sm:$0xff]  ;;  %v525_v13 = vpack.c.bf16 %v310_v9, %v309_v8  ;;  %v18_v14 = vld [vmem:[%s787_s1 + $0x10] sm:$0xff] }
   0x4   :  { %520 = vmatpush3.bf16.msra.mxu0 %v519_v4  ;;  %v495_v12 = vpack.c.bf16 %v17_v11, %v16_v10  ;;  %v19_v15 = vld [vmem:[%s787_s1 + $0x18] sm:$0xff]  ;;  %v311_v16 = vld [vmem:[%s787_s1 + $0xb0] sm:$0xff]  ;;  %v20_v19 = vld [vmem:[%s787_s1 + $0x20] sm:$0xff] }
   0x5   :  { %521 = vmatprep.subr.bf16.mxu0 %v575_v0  ;;  %v312_v17 = vld [vmem:[%s787_s1 + $0xb8] sm:$0xff]  ;;  %v498_v18 = vpack.c.bf16 %v19_v15, %v18_v14  ;;  %v21_v20 = vld [vmem:[%s787_s1 + $0x28] sm:$0xff]  ;;  %v313_v22 = vld [vmem:[%s787_s1 + $0xc0] sm:$0xff] }
   0x6   :  { %496 = vmatpush3.bf16.msra.mxu1 %v495_v12  ;;  %v528_v21 = vpack.c.bf16 %v312_v17, %v311_v16  ;;  %v314_v23 = vld [vmem:[%s787_s1 + $0xc8] sm:$0xff]  ;;  %v501_v24 = vpack.c.bf16 %v21_v20, %v20_v19  ;;  %v22_v25 = vld [vmem:[%s787_s1 + $0x30] sm:$0xff]  ;;  %v23_v26 = vld [vmem:[%s787_s1 + $0x38] sm:$0xff] }
   0x7   :  { %497 = vmatprep.subr.bf16.mxu1 %v575_v0  ;;  %v531_v27 = vpack.c.bf16 %v314_v23, %v313_v22  ;;  %v315_v28 = vld [vmem:[%s787_s1 + $0xd0] sm:$0xff]  ;;  %v316_v29 = vld [vmem:[%s787_s1 + $0xd8] sm:$0xff]  ;;  %v504_v30 = vpack.c.bf16 %v23_v26, %v22_v25  ;;  %v24_v31 = vld [vmem:[%s787_s1 + $0x40] sm:$0xff] }
   0x8   :  { %523 = vmatpush3.bf16.msra.mxu0 %v522_v7  ;;  %v25_v32 = vld [vmem:[%s787_s1 + $0x48] sm:$0xff]  ;;  %v534_v33 = vpack.c.bf16 %v316_v29, %v315_v28  ;;  %v317_v34 = vld [vmem:[%s787_s1 + $0xe0] sm:$0xff]  ;;  %v26_v37 = vld [vmem:[%s787_s1 + $0x50] sm:$0xff] }
   0x9   :  { %524 = vmatprep.subr.bf16.mxu0 %v575_v0  ;;  %v318_v35 = vld [vmem:[%s787_s1 + $0xe8] sm:$0xff]  ;;  %v507_v36 = vpack.c.bf16 %v25_v32, %v24_v31  ;;  %v27_v38 = vld [vmem:[%s787_s1 + $0x58] sm:$0xff]  ;;  %v319_v40 = vld [vmem:[%s787_s1 + $0xf0] sm:$0xff] }
   0xa   :  { %499 = vmatpush3.bf16.msra.mxu1 %v498_v18  ;;  %v537_v39 = vpack.c.bf16 %v318_v35, %v317_v34  ;;  %v320_v41 = vld [vmem:[%s787_s1 + $0xf8] sm:$0xff]  ;;  %v510_v42 = vpack.c.bf16 %v27_v38, %v26_v37  ;;  %v28_v43 = vld [vmem:[%s787_s1 + $0x60] sm:$0xff]  ;;  %v29_v44 = vld [vmem:[%s787_s1 + $0x68] sm:$0xff] }
   0xb   :  { %500 = vmatprep.subr.bf16.mxu1 %v575_v0  ;;  %v540_v45 = vpack.c.bf16 %v320_v41, %v319_v40  ;;  %v322_v46 = vld [vmem:[%s787_s1 + $0x100] sm:$0xff]  ;;  %v323_v47 = vld [vmem:[%s787_s1 + $0x108] sm:$0xff]  ;;  %v513_v48 = vpack.c.bf16 %v29_v44, %v28_v43  ;;  %v30_v49 = vld [vmem:[%s787_s1 + $0x70] sm:$0xff] }
   0xc   :  { %526 = vmatpush3.bf16.msra.mxu0 %v525_v13  ;;  %v31_v50 = vld [vmem:[%s787_s1 + $0x78] sm:$0xff]  ;;  %v304_v51 = vld [vmem:[%s788_s0 + $0x8] sm:$0xff]  ;;  %v543_v52 = vpack.c.bf16 %v323_v47, %v322_v46  ;;  %v324_v53 = vld [vmem:[%s787_s1 + $0x110] sm:$0xff] }
   0xd   :  { %527 = vmatprep.subr.bf16.mxu0 %v575_v0  ;;  %v325_v54 = vld [vmem:[%s787_s1 + $0x118] sm:$0xff]  ;;  %v516_v55 = vpack.c.bf16 %v31_v50, %v30_v49  ;;  %v326_v57 = vld [vmem:[%s787_s1 + $0x120] sm:$0xff]  ;;  %v327_v58 = vld [vmem:[%s787_s1 + $0x128] sm:$0xff] }
   0xe   :  { %502 = vmatpush3.bf16.msra.mxu1 %v501_v24  ;;  %v546_v56 = vpack.c.bf16 %v325_v54, %v324_v53  ;;  %v15_v59 = vld [vmem:[%s788_s0] sm:$0xff]  ;;  %v549_v60 = vpack.c.bf16 %v327_v58, %v326_v57  ;;  %v328_v61 = vld [vmem:[%s787_s1 + $0x130] sm:$0xff]  ;;  %v329_v62 = vld [vmem:[%s787_s1 + $0x138] sm:$0xff] }
   0xf   :  { %503 = vmatprep.subr.bf16.mxu1 %v575_v0  ;;  %v552_v63 = vpack.c.bf16 %v329_v62, %v328_v61  ;;  %v330_v1 = vld [vmem:[%s787_s1 + $0x140] sm:$0xff]  ;;  %v331_v2 = vld [vmem:[%s787_s1 + $0x148] sm:$0xff]  ;;  %v332_v4 = vld [vmem:[%s787_s1 + $0x150] sm:$0xff] }
  0x10   :  { %529 = vmatpush3.bf16.msra.mxu0 %v528_v21  ;;  %v555_v3 = vpack.c.bf16 %v331_v2, %v330_v1  ;;  %v333_v5 = vld [vmem:[%s787_s1 + $0x158] sm:$0xff]  ;;  %v334_v7 = vld [vmem:[%s787_s1 + $0x160] sm:$0xff]  ;;  %v335_v8 = vld [vmem:[%s787_s1 + $0x168] sm:$0xff] }
  0x11   :  { %530 = vmatprep.subr.bf16.mxu0 %v575_v0  ;;  %v561_v9 = vpack.c.bf16 %v335_v8, %v334_v7  ;;  %v336_v10 = vld [vmem:[%s787_s1 + $0x170] sm:$0xff]  ;;  %v337_v11 = vld [vmem:[%s787_s1 + $0x178] sm:$0xff]  ;;  %v303_v16 = vld [vmem:[%s789_s2] ss:$0 sm:$0xff] }
  0x12   :  { %505 = vmatpush3.bf16.msra.mxu1 %v504_v30  ;;  %v564_v12 = vpack.c.bf16 %v337_v11, %v336_v10  ;;  %v321_v13 = vld [vmem:[%s788_s0 + $0x10] sm:$0xff] }
  0x13   :  { %506 = vmatprep.subr.bf16.mxu1 %v575_v0 }
  0x14   :  { %532 = vmatpush3.bf16.msra.mxu0 %v531_v27 }
  0x15   :  { %533 = vmatprep.subr.bf16.mxu0 %v575_v0 }
  0x16   :  { %508 = vmatpush3.bf16.msra.mxu1 %v507_v36 }
  0x17   :  { %509 = vmatprep.subr.bf16.mxu1 %v575_v0 }
  0x18   :  { %535 = vmatpush3.bf16.msra.mxu0 %v534_v33 }
  0x19   :  { %536 = vmatprep.subr.bf16.mxu0 %v575_v0 }
  0x1a   :  { %511 = vmatpush3.bf16.msra.mxu1 %v510_v42 }
  0x1b   :  { %512 = vmatprep.subr.bf16.mxu1 %v575_v0 }
  0x1c   :  { %538 = vmatpush3.bf16.msra.mxu0 %v537_v39 }
  0x1d   :  { %539 = vmatprep.subr.bf16.mxu0 %v575_v0 }
  0x1e   :  { %514 = vmatpush3.bf16.msra.mxu1 %v513_v48 }
  0x1f   :  { %515 = vmatprep.subr.bf16.mxu1 %v575_v0 }
  0x20   :  { %541 = vmatpush3.bf16.msra.mxu0 %v540_v45 }
  0x21   :  { %542 = vmatprep.subr.bf16.mxu0 %v575_v0 }
  0x22   :  { %517 = vmatpush3.bf16.msra.mxu1 %v516_v55 }
  0x23   :  { %457 = vmatmul.mubr.f32.vlgmr.msra.gmra.mrb[0].mxu0 %v304_v51 }
  0x24   :  { %544 = vmatpush3.bf16.msra.mxu0 %v543_v52  ;;  %491 = vmatprep.mubr.msk.f32.mxu0 %vm576_vm0, %v577_v6  ;;  %v558_v6 = vpack.c.bf16 %v333_v5, %v332_v4 }
  0x25   :  { %545 = vmatprep.subr.bf16.mxu0 %v575_v0  ;;  %422 = vmatmul.mubr.f32.vlgmr.msra.gmra.mrb[0].mxu1 %v15_v59 }
  0x28   :  { %547 = vmatpush3.bf16.msra.mxu0 %v546_v56 }
  0x29   :  { %548 = vmatprep.subr.bf16.mxu0 %v575_v0 }
  0x2c   :  { %550 = vmatpush3.bf16.msra.mxu0 %v549_v60 }
  0x2d   :  { %551 = vmatprep.subr.bf16.mxu0 %v575_v0 }
  0x30   :  { %553 = vmatpush3.bf16.msra.mxu0 %v552_v63 }
  0x31   :  { %554 = vmatprep.subr.bf16.mxu0 %v575_v0 }
  0x34   :  { %556 = vmatpush3.bf16.msra.mxu0 %v555_v3 }
  0x35   :  { %557 = vmatprep.subr.bf16.mxu0 %v575_v0 }
  0x38   :  { %559 = vmatpush3.bf16.msra.mxu0 %v558_v6 }
  0x39   :  { %560 = vmatprep.subr.bf16.mxu0 %v575_v0 }
  0x3c   :  { %562 = vmatpush3.bf16.msra.mxu0 %v561_v9 }
  0x3d   :  { %563 = vmatprep.subr.bf16.mxu0 %v575_v0 }
  0x40   :  { %565 = vmatpush3.bf16.msra.mxu0 %v564_v12 }
  0x43   :  { %492 = vmatmul.mubr.f32.vlgmr.msra.gmra.mrb[0].mxu0 %v321_v13 }
  0xf8   :  { %v98_v14 = vpop.f32.mrb[0].mxu1 }
  0xf9   :  { %v423_v15 = vpop.f32.mrb[1].mxu1  ;;  %v108_v17 = vadd.f32 %v303_v16, %v98_v14 }
 0x116   :  { %v284_v18 = vpop.f32.mrb[0].mxu0 }
 0x117   :  { %v567_v19 = vadd.f32 %v284_v18, %v108_v17  ;;  %v493_v20 = vpop.f32.mrb[1].mxu0 }
 0x119   :  { %v289_v21 = vmul.f32 %v567_v19, %v567_v19 }
 0x11b   :  { %v290_v22 = vmul.f32 %v567_v19, %v289_v21 }
 0x11d   :  { %v291_v23 = vmul.f32 0.044715, %v290_v22 }
 0x11f   :  { %v292_v0 = vadd.f32 %v567_v19, %v291_v23 }
 0x121   :  { %v293_v24 = vmul.f32 0.7978846, %v292_v0 }
 0x123   :  { %573 = vtanh.f32 %v293_v24 }
 0x12d   :  { %v574_v25 = vpop.eup %573 }
 0x12e   :  { %v295_v26 = vadd.f32 1.0, %v574_v25 }
 0x130   :  { %v296_v27 = vmul.f32 0.5, %v295_v26 }
 0x132   :  { %v297_v28 = vmul.f32 %v567_v19, %v296_v27 }
 0x134   :  { %298 = vst [vmem:[%s790_s3] sm:$0xff] %v297_v28 }

// kernel: whisper_wrapper_full_forward.5
= control target key start
LH: loop header
LB: loop body
LE: loop exit
PB: predicated region body
PF: predicated region fallthrough
CT: control target
= control target key end

     0   :  { %vm18_vm0 = vcmask 64512   ;;  %s417_s1 = inlined_call_operand.vmem [shape: f32[3,8,128], index: 1, kind: input, shape index: {}]   ;;  %s418_s0 = inlined_call_operand.vmem [shape: f32[3,16,8], index: 0, kind: input, shape index: {}]   ;;  %s419_s2 = inlined_call_operand.vmem [shape: f32[1,128], index: 2, kind: input, shape index: {}]   ;;  %s420_s3 = inlined_call_operand.vmem [shape: f32[16,128], index: 3, kind: output, shape index: {}]  }
   0x1   :  { %v313_v0 = vld [vmem:[%s417_s1 + $0x8] sm:$0xff]  ;;  %v311_v1 = vld [vmem:[%s418_s0 + $0x10] sm:$0xff]  ;;  %v312_v2 = vld [vmem:[%s418_s0 + $0x18] sm:$0xff] }
   0x2   :  { %335 = vmatprep.subr.mxu0 %v313_v0  ;;  %337 = vmatprep.mubr.msk.f32.mxu0 %vm18_vm0, %v311_v1  ;;  %v318_v3 = vld [vmem:[%s417_s1 + $0x10] sm:$0xff]  ;;  %v17_v4 = vld [vmem:[%s417_s1] sm:$0xff]  ;;  %v16_v7 = vld [vmem:[%s418_s0 + $0x8] sm:$0xff] }
   0x3   :  { %336 = vmatpush3.msra.mxu0 %v313_v0  ;;  %330 = vmatprep.subr.mxu1 %v17_v4  ;;  %v15_v5 = vld [vmem:[%s418_s0] sm:$0xff]  ;;  %v317_v8 = vld [vmem:[%s418_s0 + $0x28] sm:$0xff] }
   0x4   :  { %v316_v6 = vld [vmem:[%s418_s0 + $0x20] sm:$0xff]  ;;  %338 = vmatmul.mubr.msk.f32.vlgmr.msra.gmra.mrb[0].mxu0 %vm18_vm0, %v312_v2  ;;  %340 = vmatprep.subr.mxu0 %v318_v3 }
   0x5   :  { %341 = vmatpush3.msra.mxu0 %v318_v3  ;;  %331 = vmatpush3.msra.mxu1 %v17_v4  ;;  %v310_v9 = vld [vmem:[%s419_s2] ss:$0 sm:$0xff] }
   0x6   :  { %332 = vmatprep.mubr.msk.f32.mxu1 %vm18_vm0, %v15_v5  ;;  %342 = vmatprep.mubr.msk.f32.mxu0 %vm18_vm0, %v316_v6 }
   0x7   :  { %333 = vmatmul.mubr.msk.f32.vlgmr.msra.gmra.mrb[0].mxu1 %vm18_vm0, %v16_v7 }
   0xc   :  { %343 = vmatmul.mubr.msk.f32.vlgmr.msra.gmra.mrb[0].mxu0 %vm18_vm0, %v317_v8 }
  0xda   :  { %v334_v10 = vpop.f32.mrb[0].mxu1 }
  0xdb   :  { %v91_v11 = vpop.f32.mrb[1].mxu1  ;;  %v107_v12 = vadd.f32 %v334_v10, %v310_v9 }
  0xdc   :  { %v106_v13 = vadd.f32 %v310_v9, %v91_v11 }
  0xdf   :  { %v344_v14 = vpop.f32.mrb[0].mxu0 }
  0xe0   :  { %v346_v15 = vadd.f32 %v344_v14, %v107_v12  ;;  %v273_v16 = vpop.f32.mrb[1].mxu0 }
  0xe1   :  { %v348_v17 = vadd.f32 %v273_v16, %v106_v13 }
  0xe2   :  { %v285_v18 = vmul.f32 %v346_v15, %v346_v15 }
  0xe3   :  { %v284_v19 = vmul.f32 %v348_v17, %v348_v17 }
  0xe4   :  { %v287_v20 = vmul.f32 %v346_v15, %v285_v18 }
  0xe5   :  { %v286_v21 = vmul.f32 %v348_v17, %v284_v19 }
  0xe6   :  { %v289_v22 = vmul.f32 0.044715, %v287_v20 }
  0xe7   :  { %v288_v23 = vmul.f32 0.044715, %v286_v21 }
  0xe8   :  { %v291_v24 = vadd.f32 %v346_v15, %v289_v22 }
  0xe9   :  { %v290_v25 = vadd.f32 %v348_v17, %v288_v23 }
  0xea   :  { %v293_v26 = vmul.f32 0.7978846, %v291_v24 }
  0xeb   :  { %v292_v27 = vmul.f32 0.7978846, %v290_v25 }
  0xec   :  { %351 = vtanh.f32 %v293_v26 }
  0xed   :  { %353 = vtanh.f32 %v292_v27 }
  0xf6   :  { %v352_v28 = vpop.eup %351 }
  0xf7   :  { %v354_v29 = vpop.eup %353  ;;  %v297_v30 = vadd.f32 1.0, %v352_v28 }
  0xf8   :  { %v296_v31 = vadd.f32 1.0, %v354_v29 }
  0xf9   :  { %v299_v32 = vmul.f32 0.5, %v297_v30 }
  0xfa   :  { %v298_v33 = vmul.f32 0.5, %v296_v31 }
  0xfb   :  { %v301_v34 = vmul.f32 %v346_v15, %v299_v32 }
  0xfc   :  { %v300_v35 = vmul.f32 %v348_v17, %v298_v33 }
  0xfd   :  { %303 = vst [vmem:[%s420_s3 + $0x8] sm:$0xff] %v301_v34 }
  0xfe   :  { %302 = vst [vmem:[%s420_s3] sm:$0xff] %v300_v35 }

// kernel: custom-call.2
= control target key start
LH: loop header
LB: loop body
LE: loop exit
PB: predicated region body
PF: predicated region fallthrough
CT: control target
= control target key end

     0   :  { %s6_s0 = inlined_call_operand.hbm [shape: f32[4,128], index: 0, kind: output, shape index: {}]  }

// kernel: whisper_wrapper_full_forward.7
= control target key start
LH: loop header
LB: loop body
LE: loop exit
PB: predicated region body
PF: predicated region fallthrough
CT: control target
= control target key end

     0   :  { %18 = vsyncpa [#allocation3], 0  ;;  %s2767_s0 = inlined_call_operand.vmem [shape: f32[8,128], index: 0, kind: input, shape index: {}]   ;;  %s2768_s1 = inlined_call_operand.hbm [shape: f32[1,128], index: 1, kind: input, shape index: {}]   ;;  %s2769_s2 = inlined_call_operand.hbm [shape: f32[1,128], index: 2, kind: input, shape index: {}]   ;;  %s2770_s3 = inlined_call_operand.vmem [shape: f32[128,384], index: 3, kind: input, shape index: {}]   ;;  %s2771_s4 = inlined_call_operand.vmem [shape: f32[1,384], index: 4, kind: input, shape index: {}]   ;;  %s2772_s5 = inlined_call_operand.hbm [shape: f32[128,128], index: 5, kind: input, shape index: {}]   ;;  %s2773_s6 = inlined_call_operand.hbm [shape: f32[1,128], index: 6, kind: input, shape index: {}]   ;;  %s2774_s7 = inlined_call_operand.hbm [shape: f32[1,128], index: 7, kind: input, shape index: {}]   ;;  %s2775_s8 = inlined_call_operand.hbm [shape: f32[1,128], index: 8, kind: input, shape index: {}]   ;;  %s2776_s9 = inlined_call_operand.hbm [shape: f32[128,256], index: 9, kind: input, shape index: {}]   ;;  %s2777_s10 = inlined_call_operand.vmem [shape: f32[1,256], index: 10, kind: input, shape index: {}]   ;;  %s2778_s11 = inlined_call_operand.hbm [shape: f32[256,128], index: 11, kind: input, shape index: {}]   ;;  %s2779_s12 = inlined_call_operand.hbm [shape: f32[1,128], index: 12, kind: input, shape index: {}]   ;;  %s2780_s13 = inlined_call_operand.vmem [shape: f32[8,128], index: 13, kind: output, shape index: {}]  }
   0x1   :  { %19 = vsyncpa [#allocation5], 0 }
   0x2   :  { %20 = vsyncpa [#allocation8], 0 }
   0x3   :  { %21 = vsyncpa [#allocation11], 0 }
   0x4   :  { %22 = vsyncpa [#allocation14], 0  ;;  %s2277_s25 = smov [#allocation4]   ;;  %s2278_s27 = smov [#allocation7]  }
   0x5   :  { %s41_s26 = sshll.u32 %s2277_s25, 4  ;;  %s67_s28 = sshll.u32 %s2278_s27, 4  ;;  %s42_s26 = int_to_ptr.vmem [resolvable:$true] %s41_s26  ;;  %s68_s28 = int_to_ptr.vmem [resolvable:$true] %s67_s28 }
   0x6   :  { %s2069_s14 = scalar_lea.hbm %s2769_s2, 16 }
   0x7   :  { %p2070_p0 = scmp.ne.s32.totalorder %s2769_s2, %s2069_s14  ;;  %p2073_p1 = scmp.lt.u32.totalorder %s2069_s14, %s2769_s2 }
   0x9   :  { %p2075_p2 = pnand %p2073_p1, %p2070_p0 }
   0xb   :  { %2078 = shalt.err (!%p2075_p2)
}
   0xc   :  { %s2079_s19 = scalar_lea.vmem %s42_s26, 16  ;;  %s2083_s20 = scalar_lea.vmem %s42_s26, 32 }
   0xd   :  { %p2080_p3 = scmp.ne.s32.totalorder %s42_s26, %s2079_s19  ;;  %p2084_p4 = scmp.lt.s32.totalorder %s42_s26, %s42_s26 }
   0xe   :  { %p2085_p5 = scmp.lt.s32.totalorder %s2083_s20, %s2079_s19 }
  0x10   :  { %p2086_p6 = por %p2085_p5, %p2084_p4 }
  0x12   :  { %p2087_p7 = pnand %p2086_p6, %p2080_p3 }
  0x14   :  { %2090 = shalt.err (!%p2087_p7)
}
  0x15   :  { %44 = dma.hbm_to_vmem [thread:$0]  %s2769_s2, 16, %s42_s26, [#allocation5]  }
  0x16   :  { %s2091_s25 = scalar_lea.hbm %s2773_s6, 16 }
  0x17   :  { %p2092_p8 = scmp.ne.s32.totalorder %s2773_s6, %s2091_s25  ;;  %p2095_p9 = scmp.lt.u32.totalorder %s2091_s25, %s2773_s6 }
  0x19   :  { %p2097_p10 = pnand %p2095_p9, %p2092_p8 }
  0x1b   :  { %2100 = shalt.err (!%p2097_p10)
}
  0x1c   :  { %s2101_s15 = scalar_lea.vmem %s68_s28, 16  ;;  %s2105_s16 = scalar_lea.vmem %s68_s28, 32 }
  0x1d   :  { %p2102_p11 = scmp.ne.s32.totalorder %s68_s28, %s2101_s15  ;;  %p2106_p12 = scmp.lt.s32.totalorder %s68_s28, %s68_s28 }
  0x1e   :  { %p2107_p13 = scmp.lt.s32.totalorder %s2105_s16, %s2101_s15 }
  0x20   :  { %p2108_p0 = por %p2107_p13, %p2106_p12 }
  0x22   :  { %p2109_p1 = pnand %p2108_p0, %p2102_p11 }
  0x24   :  { %2112 = shalt.err (!%p2109_p1)
}
  0x25   :  { %70 = dma.hbm_to_vmem [thread:$0]  %s2773_s6, 16, %s68_s28, [#allocation8]  }
  0x26   :  { %s2279_s17 = smov [#allocation10]   ;;  %s2113_s21 = scalar_lea.hbm %s2775_s8, 16 }
  0x27   :  { %s87_s18 = sshll.u32 %s2279_s17, 4  ;;  %p2114_p2 = scmp.ne.s32.totalorder %s2775_s8, %s2113_s21  ;;  %s88_s18 = int_to_ptr.vmem [resolvable:$true] %s87_s18 }
  0x28   :  { %p2117_p3 = scmp.lt.u32.totalorder %s2113_s21, %s2775_s8 }
  0x2a   :  { %p2119_p4 = pnand %p2117_p3, %p2114_p2 }
  0x2c   :  { %2122 = shalt.err (!%p2119_p4)
}
  0x2d   :  { %s2123_s27 = scalar_lea.vmem %s88_s18, 16  ;;  %s2127_s6 = scalar_lea.vmem %s88_s18, 32 }
  0x2e   :  { %p2124_p5 = scmp.ne.s32.totalorder %s88_s18, %s2123_s27  ;;  %p2128_p6 = scmp.lt.s32.totalorder %s88_s18, %s88_s18 }
  0x2f   :  { %p2129_p7 = scmp.lt.s32.totalorder %s2127_s6, %s2123_s27 }
  0x31   :  { %p2130_p8 = por %p2129_p7, %p2128_p6 }
  0x33   :  { %p2131_p9 = pnand %p2130_p8, %p2124_p5 }
  0x35   :  { %2134 = shalt.err (!%p2131_p9)
}
  0x36   :  { %90 = dma.hbm_to_vmem [thread:$0]  %s2775_s8, 16, %s88_s18, [#allocation11]  }
  0x37   :  { %s2280_s30 = smov [#allocation13]   ;;  %s2281_s15 = smov [#allocation2]  }
  0x38   :  { %s110_s14 = sshll.u32 %s2280_s30, 4  ;;  %s31_s16 = sshll.u32 %s2281_s15, 4  ;;  %s111_s14 = int_to_ptr.vmem [resolvable:$true] %s110_s14  ;;  %s32_s16 = int_to_ptr.vmem [resolvable:$true] %s31_s16 }
  0x39   :  { %s2135_s17 = scalar_lea.hbm %s2778_s11, 4096 }
  0x3a   :  { %p2136_p10 = scmp.ne.s32.totalorder %s2778_s11, %s2135_s17  ;;  %p2139_p11 = scmp.lt.u32.totalorder %s2135_s17, %s2778_s11 }
  0x3c   :  { %p2141_p12 = pnand %p2139_p11, %p2136_p10 }
  0x3e   :  { %2144 = shalt.err (!%p2141_p12)
}
  0x3f   :  { %s2145_s8 = scalar_lea.vmem %s111_s14, 4096  ;;  %p2150_p0 = scmp.lt.s32.totalorder %s111_s14, %s111_s14 }
  0x40   :  { %p2146_p13 = scmp.ne.s32.totalorder %s111_s14, %s2145_s8  ;;  %p2151_p1 = scmp.lt.s32.totalorder %s2145_s8, %s2145_s8 }
  0x42   :  { %p2152_p2 = por %p2151_p1, %p2150_p0 }
  0x44   :  { %p2153_p3 = pnand %p2152_p2, %p2146_p13 }
  0x46   :  { %2156 = shalt.err (!%p2153_p3)
}
  0x47   :  { %s2282_s18 = smov 128   ;;  %s2283_s23 = smov 8  }
  0x48   :  { %116 = dma.hbm_to_vmem [thread:$0]  %s2778_s11, 4096, %s111_s14, [#allocation14], %s2282_s18, %s2282_s18, %s2283_s23  }
  0x49   :  { %s2157_s28 = scalar_lea.hbm %s2768_s1, 16 }
  0x4a   :  { %p2158_p4 = scmp.ne.s32.totalorder %s2768_s1, %s2157_s28  ;;  %p2161_p5 = scmp.lt.u32.totalorder %s2157_s28, %s2768_s1 }
  0x4c   :  { %p2163_p6 = pnand %p2161_p5, %p2158_p4 }
  0x4e   :  { %2166 = shalt.err (!%p2163_p6)
}
  0x4f   :  { %s2167_s26 = scalar_lea.vmem %s32_s16, 16  ;;  %s2171_s17 = scalar_lea.vmem %s32_s16, 32 }
  0x50   :  { %p2168_p7 = scmp.ne.s32.totalorder %s32_s16, %s2167_s26  ;;  %p2172_p8 = scmp.lt.s32.totalorder %s32_s16, %s32_s16 }
  0x51   :  { %p2173_p9 = scmp.lt.s32.totalorder %s2171_s17, %s2167_s26 }
  0x53   :  { %p2174_p10 = por %p2173_p9, %p2172_p8 }
  0x55   :  { %p2175_p11 = pnand %p2174_p10, %p2168_p7 }
  0x57   :  { %2178 = shalt.err (!%p2175_p11)
}
  0x58   :  { %34 = dma.hbm_to_vmem [thread:$0]  %s2768_s1, 16, %s32_s16, [#allocation3]  }
  0x59   :  { %s2284_s19 = smov [#allocation6]   ;;  %s2285_s21 = smov [#allocation9]  }
  0x5a   :  { %s54_s20 = sshll.u32 %s2284_s19, 4  ;;  %s77_s22 = sshll.u32 %s2285_s21, 4  ;;  %s55_s20 = int_to_ptr.vmem [resolvable:$true] %s54_s20  ;;  %s78_s22 = int_to_ptr.vmem [resolvable:$true] %s77_s22 }
  0x5b   :  { %s2179_s25 = scalar_lea.hbm %s2772_s5, 2048 }
  0x5c   :  { %p2180_p12 = scmp.ne.s32.totalorder %s2772_s5, %s2179_s25  ;;  %p2183_p13 = scmp.lt.u32.totalorder %s2179_s25, %s2772_s5 }
  0x5e   :  { %p2185_p0 = pnand %p2183_p13, %p2180_p12 }
  0x60   :  { %2188 = shalt.err (!%p2185_p0)
}
  0x61   :  { %s2189_s1 = scalar_lea.vmem %s55_s20, 2048  ;;  %p2194_p2 = scmp.lt.s32.totalorder %s55_s20, %s55_s20 }
  0x62   :  { %p2190_p1 = scmp.ne.s32.totalorder %s55_s20, %s2189_s1  ;;  %p2195_p3 = scmp.lt.s32.totalorder %s2189_s1, %s2189_s1 }
  0x64   :  { %p2196_p4 = por %p2195_p3, %p2194_p2 }
  0x66   :  { %p2197_p5 = pnand %p2196_p4, %p2190_p1 }
  0x68   :  { %2200 = shalt.err (!%p2197_p5)
}
  0x69   :  { %60 = dma.hbm_to_vmem [thread:$0]  %s2772_s5, 2048, %s55_s20, [#allocation5], %s2282_s18, %s2282_s18, %s2283_s23  }
  0x6a   :  { %s2201_s26 = scalar_lea.hbm %s2774_s7, 16 }
  0x6b   :  { %p2202_p6 = scmp.ne.s32.totalorder %s2774_s7, %s2201_s26  ;;  %p2205_p7 = scmp.lt.u32.totalorder %s2201_s26, %s2774_s7 }
  0x6d   :  { %p2207_p8 = pnand %p2205_p7, %p2202_p6 }
  0x6f   :  { %2210 = shalt.err (!%p2207_p8)
}
  0x70   :  { %s2211_s21 = scalar_lea.vmem %s78_s22, 16  ;;  %s2215_s8 = scalar_lea.vmem %s78_s22, 32 }
  0x71   :  { %p2212_p9 = scmp.ne.s32.totalorder %s78_s22, %s2211_s21  ;;  %p2216_p10 = scmp.lt.s32.totalorder %s78_s22, %s78_s22 }
  0x72   :  { %p2217_p11 = scmp.lt.s32.totalorder %s2215_s8, %s2211_s21 }
  0x74   :  { %p2218_p12 = por %p2217_p11, %p2216_p10 }
  0x76   :  { %p2219_p13 = pnand %p2218_p12, %p2212_p9 }
  0x78   :  { %2222 = shalt.err (!%p2219_p13)
}
  0x79   :  { %80 = dma.hbm_to_vmem [thread:$0]  %s2774_s7, 16, %s78_s22, [#allocation8]  }
  0x7a   :  { %s2286_s23 = smov [#allocation12]   ;;  %s2223_s27 = scalar_lea.hbm %s2776_s9, 4096 }
  0x7b   :  { %s96_s20 = sshll.u32 %s2286_s23, 4  ;;  %p2224_p0 = scmp.ne.s32.totalorder %s2776_s9, %s2223_s27  ;;  %s97_s20 = int_to_ptr.vmem [resolvable:$true] %s96_s20 }
  0x7c   :  { %p2227_p1 = scmp.lt.u32.totalorder %s2223_s27, %s2776_s9 }
  0x7e   :  { %p2229_p2 = pnand %p2227_p1, %p2224_p0 }
  0x80   :  { %2232 = shalt.err (!%p2229_p2)
}
  0x81   :  { %s2233_s16 = scalar_lea.vmem %s97_s20, 4096  ;;  %p2238_p4 = scmp.lt.s32.totalorder %s97_s20, %s97_s20 }
  0x82   :  { %p2234_p3 = scmp.ne.s32.totalorder %s97_s20, %s2233_s16  ;;  %p2239_p5 = scmp.lt.s32.totalorder %s2233_s16, %s2233_s16 }
  0x84   :  { %p2240_p6 = por %p2239_p5, %p2238_p4 }
  0x86   :  { %p2241_p7 = pnand %p2240_p6, %p2234_p3 }
  0x88   :  { %2244 = shalt.err (!%p2241_p7)
}
  0x89   :  { %s2287_s7 = smov 256   ;;  %s2288_s22 = smov 16  }
  0x8a   :  { %102 = dma.hbm_to_vmem [thread:$0]  %s2776_s9, 4096, %s97_s20, [#allocation11], %s2287_s7, %s2287_s7, %s2288_s22  }
  0x8b   :  { %s2289_s2 = smov [#allocation15]   ;;  %s2245_s14 = scalar_lea.hbm %s2779_s12, 16 }
  0x8c   :  { %s123_s26 = sshll.u32 %s2289_s2, 4  ;;  %p2246_p8 = scmp.ne.s32.totalorder %s2779_s12, %s2245_s14  ;;  %s124_s26 = int_to_ptr.vmem [resolvable:$true] %s123_s26 }
  0x8d   :  { %p2249_p9 = scmp.lt.u32.totalorder %s2245_s14, %s2779_s12 }
  0x8f   :  { %p2251_p10 = pnand %p2249_p9, %p2246_p8 }
  0x91   :  { %2254 = shalt.err (!%p2251_p10)
}
  0x92   :  { %s2255_s18 = scalar_lea.vmem %s124_s26, 16  ;;  %s2259_s9 = scalar_lea.vmem %s124_s26, 32 }
  0x93   :  { %p2256_p11 = scmp.ne.s32.totalorder %s124_s26, %s2255_s18  ;;  %p2260_p12 = scmp.lt.s32.totalorder %s124_s26, %s124_s26 }
  0x94   :  { %p2261_p13 = scmp.lt.s32.totalorder %s2259_s9, %s2255_s18 }
  0x96   :  { %p2262_p0 = por %p2261_p13, %p2260_p12 }
  0x98   :  { %p2263_p1 = pnand %p2262_p0, %p2256_p11 }
  0x9a   :  { %2266 = shalt.err (!%p2263_p1)
}
  0x9b   :  { %126 = dma.hbm_to_vmem [thread:$0]  %s2779_s12, 16, %s124_s26, [#allocation14]  }
  0x9c   :  { %2267 = dma.done.wait [#allocation3], 16  }
  0x9d   :  { %2268 = vsyncadd [#allocation3], 4294967280 }
  0x9e   :  { %2269 = dma.done.wait [#allocation5], 2064  }
  0x9f   :  { %2270 = vsyncadd [#allocation5], 4294965232 }
  0xa0   :  { %2271 = dma.done.wait [#allocation8], 32  }
  0xa1   :  { %2272 = vsyncadd [#allocation8], 4294967264 }
  0xa2   :  { %2273 = dma.done.wait [#allocation11], 4112  }
  0xa3   :  { %2274 = vsyncadd [#allocation11], 4294963184 }
  0xa4   :  { %2275 = dma.done.wait [#allocation14], 4112  }
  0xa5   :  { %2276 = vsyncadd [#allocation14], 4294963184  ;;  %v2483_v0 = vld [vmem:[%s2767_s0] sm:$0xff]  ;;  %v184_v1 = vld [vmem:[%s2770_s3 + $0x8] sm:$0xff]  ;;  %v2290_v5 = vmov 0.0|0.0   ;;  %v2291_v57 = vmov 0.0  }
  0xa6   :  { %157 = vadd.xlane.f32.xlu0 %v2483_v0  ;;  %v187_v2 = vld [vmem:[%s2770_s3 + $0x20] sm:$0xff]  ;;  %1914 = vmatprep.subr.bf16.mxu1 %v2290_v5  ;;  %v186_v6 = vld [vmem:[%s2770_s3 + $0x18] sm:$0xff]  ;;  %v185_v7 = vld [vmem:[%s2770_s3 + $0x10] sm:$0xff]  ;;  %vm2292_vm0 = vmmov 0   ;;  %vm413_vm1 = vcmask 261120   ;;  %s2293_s14 = smov 96  }
  0xa7   :  { %v183_v3 = vld [vmem:[%s2770_s3] sm:$0xff]  ;;  %v1882_v4 = vpack.c.bf16 %v187_v2, %v184_v1  ;;  %v188_v8 = vld [vmem:[%s2770_s3 + $0x28] sm:$0xff]  ;;  %v190_v11 = vld [vmem:[%s2770_s3 + $0x38] sm:$0xff]  ;;  %312 = vmatprep.mubr.f32.mxu0 %v2291_v57  ;;  %1795 = vmatprep.mubr.msk.f32.mxu1 %vm2292_vm0, %v2291_v57  ;;  %vm491_vm2 = vcmask 64512   ;;  %s2295_s19 = smov 32  }
  0xa8   :  { %v1884_v9 = vpack.c.bf16 %v186_v6, %v183_v3  ;;  %v1915_v10 = vpack.c.bf16 %v188_v8, %v185_v7  ;;  %v193_v12 = vld [vmem:[%s2770_s3 + $0x50] sm:$0xff]  ;;  %v192_v15 = vld [vmem:[%s2770_s3 + $0x48] sm:$0xff]  ;;  %v191_v16 = vld [vmem:[%s2770_s3 + $0x40] sm:$0xff] }
  0xa9   :  { %v189_v13 = vld [vmem:[%s2770_s3 + $0x30] sm:$0xff]  ;;  %1883 = vmatprep.subr.bf16.mxu0 %v1882_v4  ;;  %v1886_v14 = vpack.c.bf16 %v193_v12, %v190_v11  ;;  %v194_v17 = vld [vmem:[%s2770_s3 + $0x58] sm:$0xff]  ;;  %v196_v20 = vld [vmem:[%s2770_s3 + $0x68] sm:$0xff] }
  0xaa   :  { %1885 = vmatpush1.bf16.msra.mxu0 %v1884_v9  ;;  %1916 = vmatpush3.bf16.msra.mxu1 %v1915_v10  ;;  %v1888_v18 = vpack.c.bf16 %v192_v15, %v189_v13  ;;  %v1918_v19 = vpack.c.bf16 %v194_v17, %v191_v16  ;;  %v199_v21 = vld [vmem:[%s2770_s3 + $0x80] sm:$0xff]  ;;  %v198_v24 = vld [vmem:[%s2770_s3 + $0x78] sm:$0xff]  ;;  %v197_v25 = vld [vmem:[%s2770_s3 + $0x70] sm:$0xff] }
  0xab   :  { %v195_v22 = vld [vmem:[%s2770_s3 + $0x60] sm:$0xff]  ;;  %1887 = vmatprep.subr.bf16.mxu0 %v1886_v14  ;;  %1917 = vmatprep.subr.bf16.mxu1 %v2290_v5  ;;  %v1890_v23 = vpack.c.bf16 %v199_v21, %v196_v20  ;;  %v200_v26 = vld [vmem:[%s2770_s3 + $0x88] sm:$0xff]  ;;  %v202_v33 = vld [vmem:[%s2770_s3 + $0x98] sm:$0xff] }
  0xac   :  { %v1892_v27 = vpack.c.bf16 %v198_v24, %v195_v22  ;;  %v1921_v28 = vpack.c.bf16 %v200_v26, %v197_v25  ;;  %v205_v34 = vld [vmem:[%s2770_s3 + $0xb0] sm:$0xff]  ;;  %v204_v37 = vld [vmem:[%s2770_s3 + $0xa8] sm:$0xff]  ;;  %v203_v38 = vld [vmem:[%s2770_s3 + $0xa0] sm:$0xff]  ;;  %v233_v26 = vlaneseq }
  0xad   :  { %v1894_v35 = vpack.c.bf16 %v205_v34, %v202_v33  ;;  %v201_v36 = vld [vmem:[%s2770_s3 + $0x90] sm:$0xff]  ;;  %v206_v40 = vld [vmem:[%s2770_s3 + $0xb8] sm:$0xff]  ;;  %v208_v42 = vld [vmem:[%s2770_s3 + $0xc8] sm:$0xff] }
  0xae   :  { %1889 = vmatpush1.bf16.msra.mxu0 %v1888_v18  ;;  %1919 = vmatpush3.bf16.msra.mxu1 %v1918_v19  ;;  %v1896_v39 = vpack.c.bf16 %v204_v37, %v201_v36  ;;  %v1924_v41 = vpack.c.bf16 %v206_v40, %v203_v38  ;;  %v211_v43 = vld [vmem:[%s2770_s3 + $0xe0] sm:$0xff]  ;;  %v210_v46 = vld [vmem:[%s2770_s3 + $0xd8] sm:$0xff]  ;;  %v209_v47 = vld [vmem:[%s2770_s3 + $0xd0] sm:$0xff] }
  0xaf   :  { %1891 = vmatprep.subr.bf16.mxu0 %v1890_v23  ;;  %1920 = vmatprep.subr.bf16.mxu1 %v2290_v5  ;;  %v1898_v44 = vpack.c.bf16 %v211_v43, %v208_v42  ;;  %v207_v45 = vld [vmem:[%s2770_s3 + $0xc0] sm:$0xff]  ;;  %v212_v49 = vld [vmem:[%s2770_s3 + $0xe8] sm:$0xff]  ;;  %v214_v50 = vld [vmem:[%s2770_s3 + $0xf8] sm:$0xff] }
  0xb0   :  { %v1900_v48 = vpack.c.bf16 %v210_v46, %v207_v45  ;;  %v217_v51 = vld [vmem:[%s2770_s3 + $0x110] sm:$0xff]  ;;  %v1927_v52 = vpack.c.bf16 %v212_v49, %v209_v47  ;;  %v216_v55 = vld [vmem:[%s2770_s3 + $0x108] sm:$0xff]  ;;  %v215_v56 = vld [vmem:[%s2770_s3 + $0x100] sm:$0xff] }
  0xb1   :  { %v1902_v53 = vpack.c.bf16 %v217_v51, %v214_v50  ;;  %v213_v54 = vld [vmem:[%s2770_s3 + $0xf0] sm:$0xff]  ;;  %v218_v59 = vld [vmem:[%s2770_s3 + $0x118] sm:$0xff]  ;;  %v220_v60 = vld [vmem:[%s2770_s3 + $0x128] sm:$0xff] }
  0xb2   :  { %1893 = vmatpush1.bf16.msra.mxu0 %v1892_v27  ;;  %1922 = vmatpush3.bf16.msra.mxu1 %v1921_v28  ;;  %v1904_v58 = vpack.c.bf16 %v216_v55, %v213_v54  ;;  %v223_v61 = vld [vmem:[%s2770_s3 + $0x140] sm:$0xff]  ;;  %v1930_v62 = vpack.c.bf16 %v218_v59, %v215_v56  ;;  %v222_v2 = vld [vmem:[%s2770_s3 + $0x138] sm:$0xff]  ;;  %v221_v3 = vld [vmem:[%s2770_s3 + $0x130] sm:$0xff]  ;;  %v2653_v27 = vshrl.u32 %v233_v26, 7 }
  0xb3   :  { %1923 = vmatprep.subr.bf16.mxu1 %v2290_v5  ;;  %1895 = vmatprep.subr.bf16.mxu0 %v1894_v35  ;;  %v1906_v63 = vpack.c.bf16 %v223_v61, %v220_v60  ;;  %v219_v1 = vld [vmem:[%s2770_s3 + $0x120] sm:$0xff]  ;;  %v224_v4 = vld [vmem:[%s2770_s3 + $0x148] sm:$0xff]  ;;  %v226_v6 = vld [vmem:[%s2770_s3 + $0x158] sm:$0xff] }
  0xb4   :  { %v229_v7 = vld [vmem:[%s2770_s3 + $0x170] sm:$0xff]  ;;  %v1908_v8 = vpack.c.bf16 %v222_v2, %v219_v1  ;;  %v1933_v9 = vpack.c.bf16 %v224_v4, %v221_v3  ;;  %v228_v12 = vld [vmem:[%s2770_s3 + $0x168] sm:$0xff]  ;;  %v227_v13 = vld [vmem:[%s2770_s3 + $0x160] sm:$0xff]  ;;  %v239_v28 = vsub.s32 1, %v2653_v27 }
  0xb5   :  { %v1910_v10 = vpack.c.bf16 %v229_v7, %v226_v6  ;;  %v225_v11 = vld [vmem:[%s2770_s3 + $0x150] sm:$0xff]  ;;  %v230_v14 = vld [vmem:[%s2770_s3 + $0x178] sm:$0xff]  ;;  %v1653_v21 = vld [vmem:[#allocation2] ss:$0 sm:$0xff] }
  0xb6   :  { %1897 = vmatpush1.bf16.msra.mxu0 %v1896_v39  ;;  %1925 = vmatpush3.bf16.msra.mxu1 %v1924_v41  ;;  %v1912_v15 = vpack.c.bf16 %v228_v12, %v225_v11  ;;  %v1936_v16 = vpack.c.bf16 %v230_v14, %v227_v13  ;;  %v1654_v23 = vld [vmem:[#allocation4] ss:$0 sm:$0xff]  ;;  %v389_v51 = vld [vmem:[#allocation6] sm:$0xff]  ;;  %v394_v13 = vld [vmem:[#allocation6 + $0x28] sm:$0xff] }
  0xb7   :  { %1926 = vmatprep.subr.bf16.mxu1 %v2290_v5  ;;  %1899 = vmatprep.subr.bf16.mxu0 %v1898_v44  ;;  %v392_v55 = vld [vmem:[#allocation6 + $0x18] sm:$0xff]  ;;  %v393_v12 = vld [vmem:[#allocation6 + $0x20] sm:$0xff]  ;;  %v395_v14 = vld [vmem:[#allocation6 + $0x30] sm:$0xff] }
  0xba   :  { %1901 = vmatpush1.bf16.msra.mxu0 %v1900_v48  ;;  %1928 = vmatpush3.bf16.msra.mxu1 %v1927_v52  ;;  %v390_v52 = vld [vmem:[#allocation6 + $0x8] sm:$0xff] }
  0xbb   :  { %1903 = vmatprep.subr.bf16.mxu0 %v1902_v53  ;;  %1929 = vmatprep.subr.bf16.mxu1 %v2290_v5  ;;  %v391_v53 = vld [vmem:[#allocation6 + $0x10] sm:$0xff]  ;;  %v1939_v54 = vpack.c.bf16 %v390_v52, %v389_v51 }
  0xbc   :  { %v1942_v56 = vpack.c.bf16 %v392_v55, %v391_v53 }
  0xbe   :  { %1905 = vmatpush1.bf16.msra.mxu0 %v1904_v58  ;;  %1931 = vmatpush3.bf16.msra.mxu1 %v1930_v62 }
  0xbf   :  { %1907 = vmatprep.subr.bf16.mxu0 %v1906_v63  ;;  %1932 = vmatprep.subr.bf16.mxu1 %v2290_v5 }
  0xc2   :  { %1909 = vmatpush1.bf16.msra.mxu0 %v1908_v8  ;;  %1934 = vmatpush3.bf16.msra.mxu1 %v1933_v9 }
  0xc3   :  { %1911 = vmatprep.subr.bf16.mxu0 %v1910_v10  ;;  %1935 = vmatprep.subr.bf16.mxu1 %v2290_v5 }
  0xc6   :  { %1913 = vmatpush1.bf16.msra.mxu0 %v1912_v15  ;;  %1937 = vmatpush3.bf16.msra.mxu1 %v1936_v16  ;;  %v1945_v15 = vpack.c.bf16 %v394_v13, %v393_v12  ;;  %v396_v16 = vld [vmem:[#allocation6 + $0x38] sm:$0xff] }
  0xc7   :  { %1938 = vmatprep.subr.bf16.mxu0 %v2290_v5  ;;  %1798 = vmatprep.subr.mxu1 %v2291_v57  ;;  %v404_v13 = vld [vmem:[#allocation6 + $0x78] sm:$0xff] }
 0x133   :  { %v158_v29 = vpop.xlane.xlu0 %157 }
 0x134   :  { %v160_v30 = vmul.f32 0.0078125, %v158_v29  ;;  %v231_v29 = vld [vmem:[%s2771_s4] sm:$0x7]  ;;  %s2294_s4 = smov 64  }
 0x136   :  { %v2545_v31 = vsub.f32 %v2483_v0, %v160_v30  ;;  %v235_v30 = vsub.s32 0, %v2653_v27 }
 0x138   :  { %v162_v32 = vmul.f32 %v2545_v31, %v2545_v31  ;;  %v236_v35 = vrot.slane %v231_v29, %v235_v30 }
 0x13a   :  { %163 = vadd.xlane.f32.xlu0 %v162_v32  ;;  %v240_v32 = vrot.slane %v231_v29, %v239_v28 }
 0x1c7   :  { %v164_v17 = vpop.xlane.xlu0 %163 }
 0x1c8   :  { %v165_v18 = vmul.f32 0.0078125, %v164_v17  ;;  %v1948_v17 = vpack.c.bf16 %v396_v16, %v395_v14 }
 0x1ca   :  { %v166_v19 = vadd.f32 1e-05, %v165_v18 }
 0x1cc   :  { %2045 = vrsqrt.f32 %v166_v19 }
 0x1d6   :  { %v2046_v20 = vpop.eup %2045 }
 0x1d7   :  { %v168_v22 = vmul.f32 %v2046_v20, %v2545_v31  ;;  %v243_v31 = vsub.s32 2, %v2653_v27 }
 0x1d9   :  { %v175_v24 = vmul.f32 %v1653_v21, %v168_v22  ;;  %v244_v38 = vrot.slane %v231_v29, %v243_v31 }
 0x1db   :  { %v182_v25 = vadd.f32 %v1654_v23, %v175_v24 }
 0x1dd   :  { %313 = vmatmul.mubr.f32.vlgmr.msra.gmra.mrb[0].mxu0 %v182_v25  ;;  %1796 = vmatmul.mubr.f32.vlgmr.msra.gmra.mrb[0].mxu1 %v182_v25 }
 0x1de   :  { %1800 = vmatprep.mubr.msk.f32.mxu1 %vm2292_vm0, %v2291_v57  ;;  %1816 = vmatprep.mubr.msk.f32.mxu0 %vm2292_vm0, %v2291_v57 }
 0x1df   :  { %1940 = vmatpush3.bf16.msra.mxu0 %v1939_v54 }
 0x1e0   :  { %1941 = vmatprep.subr.bf16.mxu0 %v2290_v5 }
 0x1e3   :  { %1943 = vmatpush3.bf16.msra.mxu0 %v1942_v56 }
 0x1e4   :  { %1944 = vmatprep.subr.bf16.mxu0 %v2290_v5 }
 0x2b0   :  { %v314_v33 = vpop.f32.mrb[0].mxu0  ;;  %v385_v34 = vpop.f32.mrb[0].mxu1 }
 0x2b1   :  { %v316_v36 = vpop.f32.mrb[1].mxu0  ;;  %v1797_v37 = vpop.f32.mrb[1].mxu1  ;;  %v2671_v40 = vadd.f32 %v314_v33, %v236_v35  ;;  %v2674_v41 = vadd.f32 %v385_v34, %v244_v38 }
 0x2b2   :  { %v2665_v39 = vadd.f32 %v316_v36, %v240_v32 }
 0x2b4   :  { %652 = vrot.lane.b32.xlu0 %v2665_v39, %s2293_s14  ;;  %1799 = vmatpush3.xpose.msk.msra.mxu1 %vm413_vm1, %v2665_v39 }
 0x2b5   :  { %1803 = vmatprep.subr.mxu1 %v2291_v57 }
 0x2b7   :  { %1801 = vmatmul.mubr.msk.f32.vlgmr.msra.gmra.mrb[2].mxu1 %vm413_vm1, %v2671_v40 }
 0x2b8   :  { %1804 = vmatpush3.msra.mxu1 %v2674_v41  ;;  %1805 = vmatprep.mubr.msk.f32.mxu1 %vm2292_vm0, %v2291_v57 }
 0x2b9   :  { %1819 = vmatprep.subr.mxu1 %v2291_v57 }
 0x326   :  { %v653_v61 = vpop.permute.xlu0 %652 }
 0x38a   :  { %v486_v42 = vpop.f32.mrb[2].mxu1 }
 0x38b   :  { %v490_v43 = vmul.f32 0.17677669, %v486_v42  ;;  %v1802_v44 = vpop.f32.mrb[3].mxu1 }
 0x38c   :  { %v398_v44 = vld [vmem:[#allocation6 + $0x48] sm:$0xff] }
 0x38d   :  { %v492_v45 = vsel %vm491_vm2, %v490_v43, -inf }
 0x38e   :  { %493 = vmax.xlane.f32.xlu1 %v492_v45  ;;  %v399_v45 = vld [vmem:[#allocation6 + $0x50] sm:$0xff] }
 0x41b   :  { %v494_v46 = vpop.xlane.xlu1 %493 }
 0x41c   :  { %v495_v47 = vsub.f32 %v490_v43, %v494_v46  ;;  %v397_v43 = vld [vmem:[#allocation6 + $0x40] sm:$0xff] }
 0x41d   :  { %v1951_v46 = vpack.c.bf16 %v398_v44, %v397_v43  ;;  %v1407_v44 = vld [vmem:[#allocation12 + $0x40] sm:$0xff] }
 0x41e   :  { %v496_v48 = vmul.f32 1.442695, %v495_v47  ;;  %v400_v47 = vld [vmem:[#allocation6 + $0x58] sm:$0xff] }
 0x420   :  { %2047 = vpow2.f32 %v496_v48 }
 0x42a   :  { %v2048_v49 = vpop.eup %2047 }
 0x42b   :  { %v498_v50 = vsel %vm491_vm2, %v2048_v49, 0.0 }
 0x42c   :  { %499 = vadd.xlane.f32.xlu1 %v498_v50 }
 0x43d   :  { %650 = vrot.lane.b32.xlu1 %v2671_v40, %s2293_s14 }
 0x4b9   :  { %v500_v58 = vpop.xlane.xlu1 %499 }
 0x4ba   :  { %2049 = vrcp.f32 %v500_v58 }
 0x4bd   :  { %v651_v62 = vpop.permute.xlu1 %650 }
 0x4c4   :  { %v2050_v59 = vpop.eup %2049 }
 0x4c5   :  { %v502_v60 = vmul.f32 %v2050_v59, %v2048_v49 }
 0x4c7   :  { %1806 = vmatmul.mubr.msk.f32.vlgmr.msra.gmra.mrb[4].mxu1 %vm491_vm2, %v502_v60 }
 0x4c8   :  { %1820 = vmatpush3.xpose.msk.msra.mxu1 %vm413_vm1, %v653_v61  ;;  %1821 = vmatprep.mubr.msk.f32.mxu1 %vm2292_vm0, %v2291_v57 }
 0x4c9   :  { %1824 = vmatprep.subr.mxu1 %v2291_v57 }
 0x4cb   :  { %1822 = vmatmul.mubr.msk.f32.vlgmr.msra.gmra.mrb[6].mxu1 %vm413_vm1, %v651_v62 }
 0x4cc   :  { %1826 = vmatprep.mubr.msk.f32.mxu1 %vm2292_vm0, %v2291_v57 }
 0x59a   :  { %v572_v63 = vpop.f32.mrb[4].mxu1 }
 0x59b   :  { %v1807_v1 = vpop.f32.mrb[5].mxu1  ;;  %1817 = vmatmul.mubr.msk.f32.vlgmr.msra.gmra.mrb[2].mxu0 %vm413_vm1, %v572_v63 }
 0x59c   :  { %1837 = vmatprep.mubr.msk.f32.mxu0 %vm2292_vm0, %v2291_v57  ;;  %1946 = vmatpush3.bf16.msra.mxu0 %v1945_v15 }
 0x59d   :  { %1947 = vmatprep.subr.bf16.mxu0 %v2290_v5 }
 0x59e   :  { %v724_v2 = vpop.f32.mrb[6].mxu1 }
 0x59f   :  { %v728_v3 = vmul.f32 0.17677669, %v724_v2  ;;  %v1823_v4 = vpop.f32.mrb[7].mxu1 }
 0x5a0   :  { %1949 = vmatpush3.bf16.msra.mxu0 %v1948_v17 }
 0x5a1   :  { %v729_v6 = vsel %vm491_vm2, %v728_v3, -inf  ;;  %1950 = vmatprep.subr.bf16.mxu0 %v2290_v5 }
 0x5a2   :  { %730 = vmax.xlane.f32.xlu1 %v729_v6 }
 0x5b3   :  { %893 = vrot.lane.b32.xlu1 %v2665_v39, %s2294_s4 }
 0x5b7   :  { %891 = vrot.lane.b32.xlu1 %v2671_v40, %s2294_s4 }
 0x62f   :  { %v731_v7 = vpop.xlane.xlu1 %730 }
 0x630   :  { %v732_v8 = vsub.f32 %v728_v3, %v731_v7 }
 0x632   :  { %v733_v9 = vmul.f32 1.442695, %v732_v8 }
 0x633   :  { %v894_v23 = vpop.permute.xlu1 %893 }
 0x634   :  { %2051 = vpow2.f32 %v733_v9  ;;  %v401_v9 = vld [vmem:[#allocation6 + $0x60] sm:$0xff] }
 0x637   :  { %v892_v25 = vpop.permute.xlu1 %891 }
 0x63e   :  { %v2052_v10 = vpop.eup %2051 }
 0x63f   :  { %v735_v11 = vsel %vm491_vm2, %v2052_v10, 0.0 }
 0x640   :  { %736 = vadd.xlane.f32.xlu0 %v735_v11  ;;  %v403_v11 = vld [vmem:[#allocation6 + $0x70] sm:$0xff] }
 0x641   :  { %v1960_v14 = vpack.c.bf16 %v404_v13, %v403_v11  ;;  %v1428_v11 = vld [vmem:[#allocation12 + $0xe8] sm:$0xff] }
 0x656   :  { %741 = vrot.lane.b32.xlu0 %v2674_v41, %s2293_s14 }
 0x66e   :  { %v645_v18 = vpop.f32.mrb[2].mxu0 }
 0x66f   :  { %v1818_v19 = vpop.f32.mrb[3].mxu0 }
 0x6cd   :  { %v737_v20 = vpop.xlane.xlu0 %736 }
 0x6ce   :  { %2053 = vrcp.f32 %v737_v20 }
 0x6d1   :  { %v742_v21 = vpop.permute.xlu0 %741 }
 0x6d2   :  { %1825 = vmatpush3.msra.mxu1 %v742_v21 }
 0x6d3   :  { %1840 = vmatprep.subr.mxu1 %v2291_v57 }
 0x6d8   :  { %v2054_v22 = vpop.eup %2053 }
 0x6d9   :  { %v739_v24 = vmul.f32 %v2054_v22, %v2052_v10  ;;  %v402_v10 = vld [vmem:[#allocation6 + $0x68] sm:$0xff] }
 0x6da   :  { %v1957_v12 = vpack.c.bf16 %v402_v10, %v401_v9  ;;  %v1423_v9 = vld [vmem:[#allocation12 + $0xc0] sm:$0xff]  ;;  %v1425_v10 = vld [vmem:[#allocation12 + $0xd0] sm:$0xff] }
 0x6db   :  { %1827 = vmatmul.mubr.msk.f32.vlgmr.msra.gmra.mrb[8].mxu1 %vm491_vm2, %v739_v24  ;;  %v1988_v13 = vpack.c.bf16 %v1425_v10, %v1423_v9  ;;  %v1563_v9 = vld [vmem:[#allocation13 + $0xf8] sm:$0xff] }
 0x6dc   :  { %1841 = vmatpush3.xpose.msk.msra.mxu1 %vm413_vm1, %v894_v23  ;;  %1842 = vmatprep.mubr.msk.f32.mxu1 %vm2292_vm0, %v2291_v57 }
 0x6dd   :  { %1845 = vmatprep.subr.mxu1 %v2291_v57 }
 0x6df   :  { %1843 = vmatmul.mubr.msk.f32.vlgmr.msra.gmra.mrb[10].mxu1 %vm413_vm1, %v892_v25  ;;  %v1400_v25 = vld [vmem:[#allocation12 + $0x8] sm:$0xff] }
 0x6e0   :  { %1847 = vmatprep.mubr.msk.f32.mxu1 %vm2292_vm0, %v2291_v57 }
 0x7ae   :  { %v813_v26 = vpop.f32.mrb[8].mxu1 }
 0x7af   :  { %v1828_v29 = vpop.f32.mrb[9].mxu1  ;;  %1838 = vmatmul.mubr.msk.f32.vlgmr.msra.gmra.mrb[4].mxu0 %vm413_vm1, %v813_v26  ;;  %v1402_v26 = vld [vmem:[#allocation12 + $0x18] sm:$0xff] }
 0x7b0   :  { %1858 = vmatprep.mubr.msk.f32.mxu0 %vm2292_vm0, %v2291_v57  ;;  %1952 = vmatpush3.bf16.msra.mxu0 %v1951_v46  ;;  %v1399_v29 = vld [vmem:[#allocation12] sm:$0xff] }
 0x7b1   :  { %1953 = vmatprep.subr.bf16.mxu0 %v2290_v5 }
 0x7b2   :  { %v965_v31 = vpop.f32.mrb[10].mxu1 }
 0x7b3   :  { %v969_v32 = vmul.f32 0.17677669, %v965_v31  ;;  %v1844_v33 = vpop.f32.mrb[11].mxu1  ;;  %v1962_v31 = vpack.c.bf16 %v1402_v26, %v1400_v25  ;;  %v1548_v26 = vld [vmem:[#allocation13 + $0x80] sm:$0xff] }
 0x7b4   :  { %v1404_v33 = vld [vmem:[#allocation12 + $0x28] sm:$0xff] }
 0x7b5   :  { %v970_v34 = vsel %vm491_vm2, %v969_v32, -inf }
 0x7b6   :  { %971 = vmax.xlane.f32.xlu1 %v970_v34  ;;  %v1406_v34 = vld [vmem:[#allocation12 + $0x38] sm:$0xff] }
 0x7c7   :  { %1133 = vrot.lane.b32.xlu1 %v2665_v39, %s2295_s19  ;;  %v1954_v39 = vpack.c.bf16 %v400_v47, %v399_v45  ;;  %v1409_v45 = vld [vmem:[#allocation12 + $0x50] sm:$0xff] }
 0x7c8   :  { %v1972_v46 = vpack.c.bf16 %v1409_v45, %v1407_v44  ;;  %v1536_v45 = vld [vmem:[#allocation13 + $0x20] sm:$0xff] }
 0x7c9   :  { %1955 = vmatpush3.bf16.msra.mxu0 %v1954_v39 }
 0x7ca   :  { %1956 = vmatprep.subr.bf16.mxu0 %v2290_v5 }
 0x7cb   :  { %1131 = vrot.lane.b32.xlu1 %v2671_v40, %s2295_s19  ;;  %v1655_v40 = vld [vmem:[#allocation7] ss:$0 sm:$0xff] }
 0x7cc   :  { %v649_v48 = vadd.f32 %v1655_v40, %v645_v18 }
 0x843   :  { %v972_v35 = vpop.xlane.xlu1 %971 }
 0x844   :  { %v973_v36 = vsub.f32 %v969_v32, %v972_v35  ;;  %v1401_v32 = vld [vmem:[#allocation12 + $0x10] sm:$0xff]  ;;  %v1966_v35 = vpack.c.bf16 %v1406_v34, %v1404_v33  ;;  %v1533_v33 = vld [vmem:[#allocation13 + $0x8] sm:$0xff] }
 0x846   :  { %v974_v37 = vmul.f32 1.442695, %v973_v36  ;;  %v1403_v36 = vld [vmem:[#allocation12 + $0x20] sm:$0xff] }
 0x847   :  { %v1134_v55 = vpop.permute.xlu1 %1133 }
 0x848   :  { %2055 = vpow2.f32 %v974_v37  ;;  %v1405_v37 = vld [vmem:[#allocation12 + $0x30] sm:$0xff] }
 0x849   :  { %v1968_v43 = vpack.c.bf16 %v1405_v37, %v1403_v36  ;;  %v1534_v37 = vld [vmem:[#allocation13 + $0x10] sm:$0xff] }
 0x84b   :  { %v1132_v58 = vpop.permute.xlu1 %1131 }
 0x852   :  { %v2056_v38 = vpop.eup %2055 }
 0x853   :  { %v976_v42 = vsel %vm491_vm2, %v2056_v38, 0.0 }
 0x854   :  { %977 = vadd.xlane.f32.xlu0 %v976_v42  ;;  %v1410_v42 = vld [vmem:[#allocation12 + $0x58] sm:$0xff] }
 0x86a   :  { %981 = vrot.lane.b32.xlu0 %v2674_v41, %s2294_s4 }
 0x882   :  { %v886_v49 = vpop.f32.mrb[4].mxu0 }
 0x883   :  { %v890_v50 = vadd.f32 %v886_v49, %v649_v48  ;;  %v1839_v51 = vpop.f32.mrb[5].mxu0  ;;  %v1412_v49 = vld [vmem:[#allocation12 + $0x68] sm:$0xff] }
 0x8e1   :  { %v978_v52 = vpop.xlane.xlu0 %977 }
 0x8e2   :  { %2057 = vrcp.f32 %v978_v52  ;;  %v1411_v52 = vld [vmem:[#allocation12 + $0x60] sm:$0xff] }
 0x8e5   :  { %v982_v53 = vpop.permute.xlu0 %981 }
 0x8e6   :  { %1846 = vmatpush3.msra.mxu1 %v982_v53  ;;  %v1413_v53 = vld [vmem:[#allocation12 + $0x70] sm:$0xff] }
 0x8e7   :  { %1861 = vmatprep.subr.mxu1 %v2291_v57 }
 0x8ec   :  { %v2058_v54 = vpop.eup %2057 }
 0x8ed   :  { %v980_v56 = vmul.f32 %v2058_v54, %v2056_v38  ;;  %v1408_v38 = vld [vmem:[#allocation12 + $0x48] sm:$0xff]  ;;  %v1976_v54 = vpack.c.bf16 %v1413_v53, %v1411_v52  ;;  %v1556_v52 = vld [vmem:[#allocation13 + $0xc0] sm:$0xff] }
 0x8ee   :  { %v1557_v53 = vld [vmem:[#allocation13 + $0xc8] sm:$0xff] }
 0x8ef   :  { %1848 = vmatmul.mubr.msk.f32.vlgmr.msra.gmra.mrb[12].mxu1 %vm491_vm2, %v980_v56  ;;  %v1418_v56 = vld [vmem:[#allocation12 + $0x98] sm:$0xff] }
 0x8f0   :  { %1862 = vmatpush3.xpose.msk.msra.mxu1 %vm413_vm1, %v1134_v55  ;;  %1863 = vmatprep.mubr.msk.f32.mxu1 %vm2292_vm0, %v2291_v57  ;;  %v1416_v55 = vld [vmem:[#allocation12 + $0x88] sm:$0xff] }
 0x8f1   :  { %1866 = vmatprep.subr.mxu1 %v2291_v57 }
 0x8f3   :  { %1864 = vmatmul.mubr.msk.f32.vlgmr.msra.gmra.mrb[14].mxu1 %vm413_vm1, %v1132_v58  ;;  %v1978_v58 = vpack.c.bf16 %v1418_v56, %v1416_v55  ;;  %v2010_v55 = vpack.c.bf16 %v1557_v53, %v1556_v52  ;;  %v1541_v56 = vld [vmem:[#allocation13 + $0x48] sm:$0xff] }
 0x8f4   :  { %1868 = vmatprep.mubr.msk.f32.mxu1 %vm2292_vm0, %v2291_v57 }
 0x9c2   :  { %v1053_v59 = vpop.f32.mrb[12].mxu1 }
 0x9c3   :  { %v1849_v60 = vpop.f32.mrb[13].mxu1  ;;  %1859 = vmatmul.mubr.msk.f32.vlgmr.msra.gmra.mrb[6].mxu0 %vm413_vm1, %v1053_v59  ;;  %v1415_v59 = vld [vmem:[#allocation12 + $0x80] sm:$0xff] }
 0x9c4   :  { %1879 = vmatprep.mubr.msk.f32.mxu0 %vm2292_vm0, %v2291_v57  ;;  %1958 = vmatpush3.bf16.msra.mxu0 %v1957_v12  ;;  %v1417_v60 = vld [vmem:[#allocation12 + $0x90] sm:$0xff]  ;;  %v1430_v12 = vld [vmem:[#allocation12 + $0xf8] sm:$0xff] }
 0x9c5   :  { %1959 = vmatprep.subr.bf16.mxu0 %v2290_v5 }
 0x9c6   :  { %v1205_v61 = vpop.f32.mrb[14].mxu1 }
 0x9c7   :  { %v1209_v62 = vmul.f32 0.17677669, %v1205_v61  ;;  %v1865_v63 = vpop.f32.mrb[15].mxu1  ;;  %v1420_v61 = vld [vmem:[#allocation12 + $0xa8] sm:$0xff] }
 0x9c8   :  { %1961 = vmatpush3.bf16.msra.mxu0 %v1960_v14  ;;  %v1422_v63 = vld [vmem:[#allocation12 + $0xb8] sm:$0xff]  ;;  %v1990_v14 = vpack.c.bf16 %v1430_v12, %v1428_v11  ;;  %v1546_v12 = vld [vmem:[#allocation13 + $0x70] sm:$0xff] }
 0x9c9   :  { %v1210_v1 = vsel %vm491_vm2, %v1209_v62, -inf }
 0x9ca   :  { %1211 = vmax.xlane.f32.xlu0 %v1210_v1  ;;  %v1419_v1 = vld [vmem:[#allocation12 + $0xa0] sm:$0xff] }
 0x9e0   :  { %1221 = vrot.lane.b32.xlu0 %v2674_v41, %s2295_s19 }
 0xa57   :  { %v1212_v2 = vpop.xlane.xlu0 %1211 }
 0xa58   :  { %v1213_v3 = vsub.f32 %v1209_v62, %v1212_v2  ;;  %v1980_v62 = vpack.c.bf16 %v1417_v60, %v1415_v59  ;;  %v1421_v2 = vld [vmem:[#allocation12 + $0xb0] sm:$0xff]  ;;  %v1559_v59 = vld [vmem:[#allocation13 + $0xd8] sm:$0xff] }
 0xa5a   :  { %v1214_v4 = vmul.f32 1.442695, %v1213_v3  ;;  %v1982_v3 = vpack.c.bf16 %v1422_v63, %v1420_v61  ;;  %v1543_v63 = vld [vmem:[#allocation13 + $0x58] sm:$0xff] }
 0xa5b   :  { %v1222_v6 = vpop.permute.xlu0 %1221 }
 0xa5c   :  { %2059 = vpow2.f32 %v1214_v4  ;;  %1867 = vmatpush3.msra.mxu1 %v1222_v6  ;;  %v1424_v4 = vld [vmem:[#allocation12 + $0xc8] sm:$0xff]  ;;  %v1426_v6 = vld [vmem:[#allocation12 + $0xd8] sm:$0xff] }
 0xa5d   :  { %1963 = vmatprep.subr.bf16.mxu1 %v1962_v31 }
 0xa66   :  { %v2060_v7 = vpop.eup %2059 }
 0xa67   :  { %v1216_v8 = vsel %vm491_vm2, %v2060_v7, 0.0 }
 0xa68   :  { %1217 = vadd.xlane.f32.xlu1 %v1216_v8  ;;  %v1986_v8 = vpack.c.bf16 %v1426_v6, %v1424_v4  ;;  %v1544_v6 = vld [vmem:[#allocation13 + $0x60] sm:$0xff] }
 0xa96   :  { %v1126_v41 = vpop.f32.mrb[6].mxu0 }
 0xa97   :  { %v1130_v15 = vadd.f32 %v1126_v41, %v890_v50  ;;  %v1860_v16 = vpop.f32.mrb[7].mxu0  ;;  %v1414_v50 = vld [vmem:[#allocation12 + $0x78] sm:$0xff]  ;;  %v1427_v41 = vld [vmem:[#allocation12 + $0xe0] sm:$0xff] }
 0xa98   :  { %v1974_v51 = vpack.c.bf16 %v1414_v50, %v1412_v49  ;;  %v1538_v49 = vld [vmem:[#allocation13 + $0x30] sm:$0xff]  ;;  %v1539_v50 = vld [vmem:[#allocation13 + $0x38] sm:$0xff] }
 0xaf5   :  { %v1218_v17 = vpop.xlane.xlu1 %1217 }
 0xaf6   :  { %2061 = vrcp.f32 %v1218_v17 }
 0xb00   :  { %v2062_v18 = vpop.eup %2061 }
 0xb01   :  { %v1220_v19 = vmul.f32 %v2062_v18, %v2060_v7  ;;  %v1984_v7 = vpack.c.bf16 %v1421_v2, %v1419_v1  ;;  %v1560_v1 = vld [vmem:[#allocation13 + $0xe0] sm:$0xff]  ;;  %v1561_v2 = vld [vmem:[#allocation13 + $0xe8] sm:$0xff] }
 0xb02   :  { %v2018_v4 = vpack.c.bf16 %v1561_v2, %v1560_v1 }
 0xb03   :  { %1869 = vmatmul.mubr.msk.f32.vlgmr.msra.gmra.mrb[16].mxu1 %vm491_vm2, %v1220_v19 }
 0xb04   :  { %1507 = vmatprep.mubr.f32.mxu1 %v2291_v57  ;;  %v1964_v57 = vpack.c.bf16 %v1401_v32, %v1399_v29  ;;  %v1549_v29 = vld [vmem:[#allocation13 + $0x88] sm:$0xff]  ;;  %v1532_v32 = vld [vmem:[#allocation13] sm:$0xff] }
 0xb05   :  { %v1994_v31 = vpack.c.bf16 %v1549_v29, %v1548_v26  ;;  %v1996_v34 = vpack.c.bf16 %v1533_v33, %v1532_v32 }
 0xb06   :  { %1965 = vmatpush1.bf16.msra.mxu1 %v1964_v57  ;;  %v1550_v57 = vld [vmem:[#allocation13 + $0x90] sm:$0xff] }
 0xb07   :  { %1967 = vmatprep.subr.bf16.mxu1 %v1966_v35  ;;  %1995 = vmatprep.subr.bf16.mxu0 %v1994_v31  ;;  %v1551_v35 = vld [vmem:[#allocation13 + $0x98] sm:$0xff] }
 0xb08   :  { %v1998_v36 = vpack.c.bf16 %v1551_v35, %v1550_v57 }
 0xb0a   :  { %1969 = vmatpush1.bf16.msra.mxu1 %v1968_v43  ;;  %v1552_v43 = vld [vmem:[#allocation13 + $0xa0] sm:$0xff] }
 0xbd6   :  { %v1293_v20 = vpop.f32.mrb[16].mxu1 }
 0xbd7   :  { %v1870_v21 = vpop.f32.mrb[17].mxu1  ;;  %1880 = vmatmul.mubr.msk.f32.vlgmr.msra.gmra.mrb[8].mxu0 %vm413_vm1, %v1293_v20 }
 0xbd8   :  { %v1672_v21 = vld [vmem:[#allocation9] ss:$0 sm:$0xff]  ;;  %1997 = vmatpush3.bf16.msra.mxu0 %v1996_v34 }
 0xbd9   :  { %1999 = vmatprep.subr.bf16.mxu0 %v1998_v36 }
 0xcaa   :  { %v1366_v22 = vpop.f32.mrb[8].mxu0 }
 0xcab   :  { %v1370_v23 = vadd.f32 %v1366_v22, %v1130_v15  ;;  %v1881_v24 = vpop.f32.mrb[9].mxu0  ;;  %v1429_v15 = vld [vmem:[#allocation12 + $0xf0] sm:$0xff] }
 0xcac   :  { %v1992_v16 = vpack.c.bf16 %v1429_v15, %v1427_v41  ;;  %v1431_v41 = vld [vmem:[%s2777_s10] sm:$0x3] }
 0xcad   :  { %v2752_v5 = vadd.f32 %v1370_v23, %v2483_v0  ;;  %v1970_v0 = vpack.c.bf16 %v1410_v42, %v1408_v38  ;;  %v1673_v23 = vld [vmem:[#allocation10] ss:$0 sm:$0xff]  ;;  %v1436_v15 = vrot.slane %v1431_v41, %v235_v30 }
 0xcae   :  { %v1535_v38 = vld [vmem:[#allocation13 + $0x18] sm:$0xff] }
 0xcaf   :  { %1374 = vadd.xlane.f32.xlu1 %v2752_v5  ;;  %1971 = vmatprep.subr.bf16.mxu1 %v1970_v0  ;;  %v2000_v42 = vpack.c.bf16 %v1535_v38, %v1534_v37  ;;  %v1553_v0 = vld [vmem:[#allocation13 + $0xa8] sm:$0xff] }
 0xcb0   :  { %1973 = vmatpush1.bf16.msra.mxu1 %v1972_v46  ;;  %v2002_v44 = vpack.c.bf16 %v1553_v0, %v1552_v43  ;;  %v1537_v46 = vld [vmem:[#allocation13 + $0x28] sm:$0xff]  ;;  %v1674_v0 = vld [vmem:[#allocation15] ss:$0 sm:$0xff] }
 0xcb1   :  { %1975 = vmatprep.subr.bf16.mxu1 %v1974_v51  ;;  %2001 = vmatpush3.bf16.msra.mxu0 %v2000_v42  ;;  %v2008_v51 = vpack.c.bf16 %v1539_v50, %v1538_v49 }
 0xcb2   :  { %2003 = vmatprep.subr.bf16.mxu0 %v2002_v44 }
 0xcb4   :  { %1977 = vmatpush1.bf16.msra.mxu1 %v1976_v54  ;;  %v1540_v54 = vld [vmem:[#allocation13 + $0x40] sm:$0xff] }
 0xcb5   :  { %1979 = vmatprep.subr.bf16.mxu1 %v1978_v58  ;;  %v1558_v58 = vld [vmem:[#allocation13 + $0xd0] sm:$0xff]  ;;  %v2012_v60 = vpack.c.bf16 %v1541_v56, %v1540_v54 }
 0xcb6   :  { %v2014_v61 = vpack.c.bf16 %v1559_v59, %v1558_v58 }
 0xcb8   :  { %1981 = vmatpush1.bf16.msra.mxu1 %v1980_v62  ;;  %v1542_v62 = vld [vmem:[#allocation13 + $0x50] sm:$0xff] }
 0xcb9   :  { %1983 = vmatprep.subr.bf16.mxu1 %v1982_v3  ;;  %v2016_v3 = vpack.c.bf16 %v1543_v63, %v1542_v62 }
 0xcbc   :  { %1985 = vmatpush1.bf16.msra.mxu1 %v1984_v7  ;;  %v1545_v7 = vld [vmem:[#allocation13 + $0x68] sm:$0xff] }
 0xcbd   :  { %1987 = vmatprep.subr.bf16.mxu1 %v1986_v8  ;;  %v1562_v8 = vld [vmem:[#allocation13 + $0xf0] sm:$0xff]  ;;  %v2020_v10 = vpack.c.bf16 %v1545_v7, %v1544_v6 }
 0xcbe   :  { %v2022_v11 = vpack.c.bf16 %v1563_v9, %v1562_v8 }
 0xcc0   :  { %1989 = vmatpush1.bf16.msra.mxu1 %v1988_v13  ;;  %v1547_v13 = vld [vmem:[#allocation13 + $0x78] sm:$0xff] }
 0xcc1   :  { %1991 = vmatprep.subr.bf16.mxu1 %v1990_v14  ;;  %v2024_v14 = vpack.c.bf16 %v1547_v13, %v1546_v12 }
 0xcc4   :  { %1993 = vmatpush1.bf16.msra.mxu1 %v1992_v16  ;;  %v1440_v16 = vrot.slane %v1431_v41, %v239_v28 }
 0xd3c   :  { %v1375_v47 = vpop.xlane.xlu1 %1374 }
 0xd3d   :  { %v1376_v39 = vmul.f32 0.0078125, %v1375_v47  ;;  %v2004_v47 = vpack.c.bf16 %v1537_v46, %v1536_v45 }
 0xd3f   :  { %v1377_v40 = vsub.f32 %v2752_v5, %v1376_v39  ;;  %2005 = vmatpush3.bf16.msra.mxu0 %v2004_v47  ;;  %v1554_v39 = vld [vmem:[#allocation13 + $0xb0] sm:$0xff] }
 0xd41   :  { %v1378_v48 = vmul.f32 %v1377_v40, %v1377_v40 }
 0xd43   :  { %1379 = vadd.xlane.f32.xlu1 %v1378_v48 }
 0xdd0   :  { %v1380_v17 = vpop.xlane.xlu1 %1379 }
 0xdd1   :  { %v1381_v18 = vmul.f32 0.0078125, %v1380_v17 }
 0xdd3   :  { %v1382_v19 = vadd.f32 1e-05, %v1381_v18 }
 0xdd5   :  { %2063 = vrsqrt.f32 %v1382_v19 }
 0xddf   :  { %v2064_v20 = vpop.eup %2063 }
 0xde0   :  { %v1384_v22 = vmul.f32 %v2064_v20, %v1377_v40  ;;  %v1555_v40 = vld [vmem:[#allocation13 + $0xb8] sm:$0xff] }
 0xde1   :  { %v2006_v48 = vpack.c.bf16 %v1555_v40, %v1554_v39 }
 0xde2   :  { %v1391_v24 = vmul.f32 %v1672_v21, %v1384_v22 }
 0xde3   :  { %2007 = vmatprep.subr.bf16.mxu0 %v2006_v48 }
 0xde4   :  { %v1398_v25 = vadd.f32 %v1673_v23, %v1391_v24  ;;  %2009 = vmatpush3.bf16.msra.mxu0 %v2008_v51 }
 0xde5   :  { %2011 = vmatprep.subr.bf16.mxu0 %v2010_v55 }
 0xde6   :  { %1508 = vmatmul.mubr.f32.vlgmr.msra.gmra.mrb[18].mxu1 %v1398_v25 }
 0xde8   :  { %2013 = vmatpush3.bf16.msra.mxu0 %v2012_v60 }
 0xde9   :  { %2015 = vmatprep.subr.bf16.mxu0 %v2014_v61 }
 0xdec   :  { %2017 = vmatpush3.bf16.msra.mxu0 %v2016_v3 }
 0xded   :  { %2019 = vmatprep.subr.bf16.mxu0 %v2018_v4 }
 0xdf0   :  { %2021 = vmatpush3.bf16.msra.mxu0 %v2020_v10 }
 0xdf1   :  { %2023 = vmatprep.subr.bf16.mxu0 %v2022_v11 }
 0xdf4   :  { %2025 = vmatpush3.bf16.msra.mxu0 %v2024_v14 }
 0xeb9   :  { %v1509_v17 = vpop.f32.mrb[18].mxu1 }
 0xeba   :  { %v1510_v18 = vadd.f32 %v1509_v17, %v1436_v15  ;;  %v1511_v19 = vpop.f32.mrb[19].mxu1 }
 0xebb   :  { %v1512_v20 = vadd.f32 %v1511_v19, %v1440_v16 }
 0xebc   :  { %v1514_v21 = vmul.f32 %v1510_v18, %v1510_v18 }
 0xebd   :  { %v1515_v22 = vmul.f32 %v1512_v20, %v1512_v20 }
 0xebe   :  { %v1516_v23 = vmul.f32 %v1514_v21, %v1510_v18 }
 0xebf   :  { %v1517_v24 = vmul.f32 %v1515_v22, %v1512_v20 }
 0xec0   :  { %v1518_v25 = vmul.f32 0.044715, %v1516_v23 }
 0xec1   :  { %v1519_v26 = vmul.f32 0.044715, %v1517_v24 }
 0xec2   :  { %v1520_v29 = vadd.f32 %v1518_v25, %v1510_v18 }
 0xec3   :  { %v1521_v31 = vadd.f32 %v1519_v26, %v1512_v20 }
 0xec4   :  { %v1522_v32 = vmul.f32 0.7978846, %v1520_v29 }
 0xec5   :  { %v1523_v33 = vmul.f32 0.7978846, %v1521_v31 }
 0xec6   :  { %2065 = vtanh.f32 %v1522_v32 }
 0xec7   :  { %2067 = vtanh.f32 %v1523_v33 }
 0xed0   :  { %v2066_v30 = vpop.eup %2065 }
 0xed1   :  { %v2068_v34 = vpop.eup %2067  ;;  %v1526_v27 = vadd.f32 1.0, %v2066_v30 }
 0xed2   :  { %v1527_v28 = vadd.f32 1.0, %v2068_v34 }
 0xed3   :  { %v1528_v57 = vmul.f32 0.5, %v1526_v27 }
 0xed4   :  { %v1529_v35 = vmul.f32 0.5, %v1527_v28 }
 0xed5   :  { %v1530_v37 = vmul.f32 %v1528_v57, %v1510_v18 }
 0xed6   :  { %v1531_v36 = vmul.f32 %v1529_v35, %v1512_v20 }
 0xed8   :  { %1628 = vmatprep.mubr.f32.mxu0 %v1531_v36 }
 0xed9   :  { %1629 = vmatmul.mubr.f32.vlgmr.msra.gmra.mrb[10].mxu0 %v1530_v37 }
 0xfac   :  { %v1760_v38 = vpop.f32.mrb[10].mxu0 }
 0xfad   :  { %v1761_v42 = vpop.f32.mrb[11].mxu0 }
 0xfae   :  { %v1762_v43 = vadd.f32 %v1761_v42, %v1760_v38 }
 0xfb0   :  { %v1634_v44 = vadd.f32 %v1762_v43, %v2752_v5 }
 0xfb2   :  { %v1642_v45 = vadd.f32 %v1674_v0, %v1634_v44 }
 0xfb4   :  { %1643 = vst [vmem:[%s2780_s13] sm:$0xff] %v1642_v45 }
 0xfb5   :  { %1648 = vsyncpa [#allocation3], 1 }
 0xfb6   :  { %1649 = vsyncpa [#allocation5], 1 }
 0xfb7   :  { %1650 = vsyncpa [#allocation8], 1 }
 0xfb8   :  { %1651 = vsyncpa [#allocation11], 1 }
 0xfb9   :  { %1652 = vsyncpa [#allocation14], 1 }

// kernel: whisper_wrapper_full_forward.9
= control target key start
LH: loop header
LB: loop body
LE: loop exit
PB: predicated region body
PF: predicated region fallthrough
CT: control target
= control target key end

     0   :  { %8 = vsyncpa [#allocation3], 0  ;;  %s180_s0 = inlined_call_operand.vmem [shape: f32[8,128], index: 0, kind: input, shape index: {}]   ;;  %s181_s1 = inlined_call_operand.hbm [shape: f32[1,128], index: 1, kind: input, shape index: {}]   ;;  %s182_s2 = inlined_call_operand.hbm [shape: f32[1,128], index: 2, kind: input, shape index: {}]   ;;  %s183_s3 = inlined_call_operand.vmem [shape: f32[8,128], index: 3, kind: output, shape index: {}]  }
   0x1   :  { %9 = vsyncpa [#allocation5], 0  ;;  %s128_s12 = smov [#allocation2]   ;;  %s129_s14 = smov [#allocation4]  }
   0x2   :  { %s18_s13 = sshll.u32 %s128_s12, 4  ;;  %s28_s15 = sshll.u32 %s129_s14, 4  ;;  %s19_s13 = int_to_ptr.vmem [resolvable:$true] %s18_s13  ;;  %s29_s15 = int_to_ptr.vmem [resolvable:$true] %s28_s15 }
   0x3   :  { %s80_s18 = scalar_lea.hbm %s181_s1, 16 }
   0x4   :  { %p81_p0 = scmp.ne.s32.totalorder %s181_s1, %s80_s18  ;;  %p84_p1 = scmp.lt.u32.totalorder %s80_s18, %s181_s1 }
   0x6   :  { %p86_p2 = pnand %p84_p1, %p81_p0 }
   0x8   :  { %89 = shalt.err (!%p86_p2)
}
   0x9   :  { %s90_s23 = scalar_lea.vmem %s19_s13, 16  ;;  %s94_s24 = scalar_lea.vmem %s19_s13, 32 }
   0xa   :  { %p91_p3 = scmp.ne.s32.totalorder %s19_s13, %s90_s23  ;;  %p95_p4 = scmp.lt.s32.totalorder %s19_s13, %s19_s13 }
   0xb   :  { %p96_p5 = scmp.lt.s32.totalorder %s94_s24, %s90_s23 }
   0xd   :  { %p97_p6 = por %p96_p5, %p95_p4 }
   0xf   :  { %p98_p7 = pnand %p97_p6, %p91_p3 }
  0x11   :  { %101 = shalt.err (!%p98_p7)
}
  0x12   :  { %21 = dma.hbm_to_vmem [thread:$0]  %s181_s1, 16, %s19_s13, [#allocation3]  }
  0x13   :  { %s102_s29 = scalar_lea.hbm %s182_s2, 16 }
  0x14   :  { %p103_p8 = scmp.ne.s32.totalorder %s182_s2, %s102_s29  ;;  %p106_p9 = scmp.lt.u32.totalorder %s102_s29, %s182_s2 }
  0x16   :  { %p108_p10 = pnand %p106_p9, %p103_p8 }
  0x18   :  { %111 = shalt.err (!%p108_p10)
}
  0x19   :  { %s112_s7 = scalar_lea.vmem %s29_s15, 16  ;;  %s116_s8 = scalar_lea.vmem %s29_s15, 32 }
  0x1a   :  { %p113_p11 = scmp.ne.s32.totalorder %s29_s15, %s112_s7  ;;  %p117_p12 = scmp.lt.s32.totalorder %s29_s15, %s29_s15 }
  0x1b   :  { %p118_p13 = scmp.lt.s32.totalorder %s116_s8, %s112_s7 }
  0x1d   :  { %p119_p0 = por %p118_p13, %p117_p12 }
  0x1f   :  { %p120_p1 = pnand %p119_p0, %p113_p11 }
  0x21   :  { %123 = shalt.err (!%p120_p1)
}
  0x22   :  { %31 = dma.hbm_to_vmem [thread:$0]  %s182_s2, 16, %s29_s15, [#allocation5]  }
  0x23   :  { %124 = dma.done.wait [#allocation3], 16  }
  0x24   :  { %125 = vsyncadd [#allocation3], 4294967280 }
  0x25   :  { %126 = dma.done.wait [#allocation5], 16  }
  0x26   :  { %127 = vsyncadd [#allocation5], 4294967280  ;;  %v38_v0 = vld [vmem:[%s180_s0] sm:$0xff] }
  0x27   :  { %41 = vadd.xlane.f32.xlu0 %v38_v0  ;;  %v74_v9 = vld [vmem:[#allocation2] ss:$0 sm:$0xff]  ;;  %v75_v11 = vld [vmem:[#allocation4] ss:$0 sm:$0xff] }
  0xb4   :  { %v42_v1 = vpop.xlane.xlu0 %41 }
  0xb5   :  { %v44_v2 = vmul.f32 0.0078125, %v42_v1 }
  0xb7   :  { %v45_v3 = vsub.f32 %v38_v0, %v44_v2 }
  0xb9   :  { %v46_v4 = vmul.f32 %v45_v3, %v45_v3 }
  0xbb   :  { %47 = vadd.xlane.f32.xlu0 %v46_v4 }
 0x148   :  { %v48_v5 = vpop.xlane.xlu0 %47 }
 0x149   :  { %v49_v6 = vmul.f32 0.0078125, %v48_v5 }
 0x14b   :  { %v50_v7 = vadd.f32 1e-05, %v49_v6 }
 0x14d   :  { %78 = vrsqrt.f32 %v50_v7 }
 0x157   :  { %v79_v8 = vpop.eup %78 }
 0x158   :  { %v52_v10 = vmul.f32 %v79_v8, %v45_v3 }
 0x15a   :  { %v59_v12 = vmul.f32 %v74_v9, %v52_v10 }
 0x15c   :  { %v66_v13 = vadd.f32 %v75_v11, %v59_v12 }
 0x15e   :  { %67 = vst [vmem:[%s183_s3] sm:$0xff] %v66_v13 }
 0x15f   :  { %72 = vsyncpa [#allocation3], 1 }
 0x160   :  { %73 = vsyncpa [#allocation5], 1 }

// kernel: whisper_wrapper_full_forward.8
= control target key start
LH: loop header
LB: loop body
LE: loop exit
PB: predicated region body
PF: predicated region fallthrough
CT: control target
= control target key end

     0   :  { %18 = vsyncpa [#allocation3], 0  ;;  %s2779_s0 = inlined_call_operand.vmem [shape: f32[8,128], index: 0, kind: input, shape index: {}]   ;;  %s2780_s1 = inlined_call_operand.hbm [shape: f32[1,128], index: 1, kind: input, shape index: {}]   ;;  %s2781_s2 = inlined_call_operand.hbm [shape: f32[1,128], index: 2, kind: input, shape index: {}]   ;;  %s2782_s3 = inlined_call_operand.hbm [shape: f32[128,384], index: 3, kind: input, shape index: {}]   ;;  %s2783_s4 = inlined_call_operand.hbm [shape: f32[1,384], index: 4, kind: input, shape index: {}]   ;;  %s2784_s5 = inlined_call_operand.hbm [shape: f32[128,128], index: 5, kind: input, shape index: {}]   ;;  %s2785_s6 = inlined_call_operand.hbm [shape: f32[1,128], index: 6, kind: input, shape index: {}]   ;;  %s2786_s7 = inlined_call_operand.hbm [shape: f32[1,128], index: 7, kind: input, shape index: {}]   ;;  %s2787_s8 = inlined_call_operand.hbm [shape: f32[1,128], index: 8, kind: input, shape index: {}]   ;;  %s2788_s9 = inlined_call_operand.hbm [shape: f32[128,256], index: 9, kind: input, shape index: {}]   ;;  %s2789_s10 = inlined_call_operand.hbm [shape: f32[1,256], index: 10, kind: input, shape index: {}]   ;;  %s2790_s11 = inlined_call_operand.hbm [shape: f32[256,128], index: 11, kind: input, shape index: {}]   ;;  %s2791_s12 = inlined_call_operand.hbm [shape: f32[1,128], index: 12, kind: input, shape index: {}]   ;;  %s2792_s13 = inlined_call_operand.vmem [shape: f32[8,128], index: 13, kind: output, shape index: {}]  }
   0x1   :  { %19 = vsyncpa [#allocation5], 0 }
   0x2   :  { %20 = vsyncpa [#allocation8], 0 }
   0x3   :  { %21 = vsyncpa [#allocation11], 0 }
   0x4   :  { %22 = vsyncpa [#allocation14], 0 }
   0x5   :  { %23 = vsyncpa [#allocation17], 0 }
   0x6   :  { %24 = vsyncpa [#allocation20], 0  ;;  %s2391_s25 = smov [#allocation4]   ;;  %s2392_s27 = smov [#allocation7]  }
   0x7   :  { %s43_s26 = sshll.u32 %s2391_s25, 4  ;;  %s65_s28 = sshll.u32 %s2392_s27, 4  ;;  %s44_s26 = int_to_ptr.vmem [resolvable:$true] %s43_s26  ;;  %s66_s28 = int_to_ptr.vmem [resolvable:$true] %s65_s28 }
   0x8   :  { %s2113_s14 = scalar_lea.hbm %s2781_s2, 16 }
   0x9   :  { %p2114_p0 = scmp.ne.s32.totalorder %s2781_s2, %s2113_s14  ;;  %p2117_p1 = scmp.lt.u32.totalorder %s2113_s14, %s2781_s2 }
   0xb   :  { %p2119_p2 = pnand %p2117_p1, %p2114_p0 }
   0xd   :  { %2122 = shalt.err (!%p2119_p2)
}
   0xe   :  { %s2123_s19 = scalar_lea.vmem %s44_s26, 16  ;;  %s2127_s20 = scalar_lea.vmem %s44_s26, 32 }
   0xf   :  { %p2124_p3 = scmp.ne.s32.totalorder %s44_s26, %s2123_s19  ;;  %p2128_p4 = scmp.lt.s32.totalorder %s44_s26, %s44_s26 }
  0x10   :  { %p2129_p5 = scmp.lt.s32.totalorder %s2127_s20, %s2123_s19 }
  0x12   :  { %p2130_p6 = por %p2129_p5, %p2128_p4 }
  0x14   :  { %p2131_p7 = pnand %p2130_p6, %p2124_p3 }
  0x16   :  { %2134 = shalt.err (!%p2131_p7)
}
  0x17   :  { %46 = dma.hbm_to_vmem [thread:$0]  %s2781_s2, 16, %s44_s26, [#allocation5]  }
  0x18   :  { %s2135_s25 = scalar_lea.hbm %s2783_s4, 48 }
  0x19   :  { %p2136_p8 = scmp.ne.s32.totalorder %s2783_s4, %s2135_s25  ;;  %p2139_p9 = scmp.lt.u32.totalorder %s2135_s25, %s2783_s4 }
  0x1b   :  { %p2141_p10 = pnand %p2139_p9, %p2136_p8 }
  0x1d   :  { %2144 = shalt.err (!%p2141_p10)
}
  0x1e   :  { %s2145_s15 = scalar_lea.vmem %s66_s28, 48  ;;  %s2149_s16 = scalar_lea.vmem %s66_s28, 64 }
  0x1f   :  { %p2146_p11 = scmp.ne.s32.totalorder %s66_s28, %s2145_s15  ;;  %p2150_p12 = scmp.lt.s32.totalorder %s66_s28, %s66_s28 }
  0x20   :  { %p2151_p13 = scmp.lt.s32.totalorder %s2149_s16, %s2145_s15 }
  0x22   :  { %p2152_p0 = por %p2151_p13, %p2150_p12 }
  0x24   :  { %p2153_p1 = pnand %p2152_p0, %p2146_p11 }
  0x26   :  { %2156 = shalt.err (!%p2153_p1)
}
  0x27   :  { %68 = dma.hbm_to_vmem [thread:$0]  %s2783_s4, 48, %s66_s28, [#allocation8]  }
  0x28   :  { %s2393_s17 = smov [#allocation10]   ;;  %s2394_s19 = smov [#allocation13]  }
  0x29   :  { %s87_s18 = sshll.u32 %s2393_s17, 4  ;;  %s107_s20 = sshll.u32 %s2394_s19, 4  ;;  %s88_s18 = int_to_ptr.vmem [resolvable:$true] %s87_s18  ;;  %s108_s20 = int_to_ptr.vmem [resolvable:$true] %s107_s20 }
  0x2a   :  { %s2157_s23 = scalar_lea.hbm %s2785_s6, 16 }
  0x2b   :  { %p2158_p2 = scmp.ne.s32.totalorder %s2785_s6, %s2157_s23  ;;  %p2161_p3 = scmp.lt.u32.totalorder %s2157_s23, %s2785_s6 }
  0x2d   :  { %p2163_p4 = pnand %p2161_p3, %p2158_p2 }
  0x2f   :  { %2166 = shalt.err (!%p2163_p4)
}
  0x30   :  { %s2167_s4 = scalar_lea.vmem %s88_s18, 16  ;;  %s2171_s28 = scalar_lea.vmem %s88_s18, 32 }
  0x31   :  { %p2168_p5 = scmp.ne.s32.totalorder %s88_s18, %s2167_s4  ;;  %p2172_p6 = scmp.lt.s32.totalorder %s88_s18, %s88_s18 }
  0x32   :  { %p2173_p7 = scmp.lt.s32.totalorder %s2171_s28, %s2167_s4 }
  0x34   :  { %p2174_p8 = por %p2173_p7, %p2172_p6 }
  0x36   :  { %p2175_p9 = pnand %p2174_p8, %p2168_p5 }
  0x38   :  { %2178 = shalt.err (!%p2175_p9)
}
  0x39   :  { %90 = dma.hbm_to_vmem [thread:$0]  %s2785_s6, 16, %s88_s18, [#allocation11]  }
  0x3a   :  { %s2179_s2 = scalar_lea.hbm %s2787_s8, 16 }
  0x3b   :  { %p2180_p10 = scmp.ne.s32.totalorder %s2787_s8, %s2179_s2  ;;  %p2183_p11 = scmp.lt.u32.totalorder %s2179_s2, %s2787_s8 }
  0x3d   :  { %p2185_p12 = pnand %p2183_p11, %p2180_p10 }
  0x3f   :  { %2188 = shalt.err (!%p2185_p12)
}
  0x40   :  { %s2189_s22 = scalar_lea.vmem %s108_s20, 16  ;;  %s2193_s23 = scalar_lea.vmem %s108_s20, 32 }
  0x41   :  { %p2190_p13 = scmp.ne.s32.totalorder %s108_s20, %s2189_s22  ;;  %p2194_p0 = scmp.lt.s32.totalorder %s108_s20, %s108_s20 }
  0x42   :  { %p2195_p1 = scmp.lt.s32.totalorder %s2193_s23, %s2189_s22 }
  0x44   :  { %p2196_p2 = por %p2195_p1, %p2194_p0 }
  0x46   :  { %p2197_p3 = pnand %p2196_p2, %p2190_p13 }
  0x48   :  { %2200 = shalt.err (!%p2197_p3)
}
  0x49   :  { %110 = dma.hbm_to_vmem [thread:$0]  %s2787_s8, 16, %s108_s20, [#allocation14]  }
  0x4a   :  { %s2395_s24 = smov [#allocation16]   ;;  %s2396_s27 = smov [#allocation2]  }
  0x4b   :  { %s129_s25 = sshll.u32 %s2395_s24, 4  ;;  %s33_s29 = sshll.u32 %s2396_s27, 4  ;;  %s130_s25 = int_to_ptr.vmem [resolvable:$true] %s129_s25  ;;  %s34_s29 = int_to_ptr.vmem [resolvable:$true] %s33_s29 }
  0x4c   :  { %s2201_s30 = scalar_lea.hbm %s2789_s10, 32 }
  0x4d   :  { %p2202_p4 = scmp.ne.s32.totalorder %s2789_s10, %s2201_s30  ;;  %p2205_p5 = scmp.lt.u32.totalorder %s2201_s30, %s2789_s10 }
  0x4f   :  { %p2207_p6 = pnand %p2205_p5, %p2202_p4 }
  0x51   :  { %2210 = shalt.err (!%p2207_p6)
}
  0x52   :  { %s2211_s8 = scalar_lea.vmem %s130_s25, 32  ;;  %p2216_p8 = scmp.lt.s32.totalorder %s130_s25, %s130_s25 }
  0x53   :  { %p2212_p7 = scmp.ne.s32.totalorder %s130_s25, %s2211_s8  ;;  %p2217_p9 = scmp.lt.s32.totalorder %s2211_s8, %s2211_s8 }
  0x55   :  { %p2218_p10 = por %p2217_p9, %p2216_p8 }
  0x57   :  { %p2219_p11 = pnand %p2218_p10, %p2212_p7 }
  0x59   :  { %2222 = shalt.err (!%p2219_p11)
}
  0x5a   :  { %132 = dma.hbm_to_vmem [thread:$0]  %s2789_s10, 32, %s130_s25, [#allocation17]  }
  0x5b   :  { %s2223_s21 = scalar_lea.hbm %s2780_s1, 16 }
  0x5c   :  { %p2224_p12 = scmp.ne.s32.totalorder %s2780_s1, %s2223_s21  ;;  %p2227_p13 = scmp.lt.u32.totalorder %s2223_s21, %s2780_s1 }
  0x5e   :  { %p2229_p0 = pnand %p2227_p13, %p2224_p12 }
  0x60   :  { %2232 = shalt.err (!%p2229_p0)
}
  0x61   :  { %s2233_s24 = scalar_lea.vmem %s34_s29, 16  ;;  %s2237_s27 = scalar_lea.vmem %s34_s29, 32 }
  0x62   :  { %p2234_p1 = scmp.ne.s32.totalorder %s34_s29, %s2233_s24  ;;  %p2238_p2 = scmp.lt.s32.totalorder %s34_s29, %s34_s29 }
  0x63   :  { %p2239_p3 = scmp.lt.s32.totalorder %s2237_s27, %s2233_s24 }
  0x65   :  { %p2240_p4 = por %p2239_p3, %p2238_p2 }
  0x67   :  { %p2241_p5 = pnand %p2240_p4, %p2234_p1 }
  0x69   :  { %2244 = shalt.err (!%p2241_p5)
}
  0x6a   :  { %36 = dma.hbm_to_vmem [thread:$0]  %s2780_s1, 16, %s34_s29, [#allocation3]  }
  0x6b   :  { %s2397_s4 = smov [#allocation6]   ;;  %s2245_s15 = scalar_lea.hbm %s2782_s3, 6144 }
  0x6c   :  { %s52_s28 = sshll.u32 %s2397_s4, 4  ;;  %p2246_p6 = scmp.ne.s32.totalorder %s2782_s3, %s2245_s15  ;;  %s53_s28 = int_to_ptr.vmem [resolvable:$true] %s52_s28 }
  0x6d   :  { %p2249_p7 = scmp.lt.u32.totalorder %s2245_s15, %s2782_s3 }
  0x6f   :  { %p2251_p8 = pnand %p2249_p7, %p2246_p6 }
  0x71   :  { %2254 = shalt.err (!%p2251_p8)
}
  0x72   :  { %s2255_s26 = scalar_lea.vmem %s53_s28, 6144  ;;  %p2260_p10 = scmp.lt.s32.totalorder %s53_s28, %s53_s28 }
  0x73   :  { %p2256_p9 = scmp.ne.s32.totalorder %s53_s28, %s2255_s26  ;;  %p2261_p11 = scmp.lt.s32.totalorder %s2255_s26, %s2255_s26 }
  0x75   :  { %p2262_p12 = por %p2261_p11, %p2260_p10 }
  0x77   :  { %p2263_p13 = pnand %p2262_p12, %p2256_p9 }
  0x79   :  { %2266 = shalt.err (!%p2263_p13)
}
  0x7a   :  { %s2398_s1 = smov 384   ;;  %s2399_s29 = smov 24  }
  0x7b   :  { %58 = dma.hbm_to_vmem [thread:$0]  %s2782_s3, 6144, %s53_s28, [#allocation5], %s2398_s1, %s2398_s1, %s2399_s29  }
  0x7c   :  { %s2400_s21 = smov [#allocation9]   ;;  %s2267_s18 = scalar_lea.hbm %s2784_s5, 2048 }
  0x7d   :  { %s74_s22 = sshll.u32 %s2400_s21, 4  ;;  %p2268_p0 = scmp.ne.s32.totalorder %s2784_s5, %s2267_s18  ;;  %s75_s22 = int_to_ptr.vmem [resolvable:$true] %s74_s22 }
  0x7e   :  { %p2271_p1 = scmp.lt.u32.totalorder %s2267_s18, %s2784_s5 }
  0x80   :  { %p2273_p2 = pnand %p2271_p1, %p2268_p0 }
  0x82   :  { %2276 = shalt.err (!%p2273_p2)
}
  0x83   :  { %s2277_s4 = scalar_lea.vmem %s75_s22, 2048  ;;  %p2282_p4 = scmp.lt.s32.totalorder %s75_s22, %s75_s22 }
  0x84   :  { %p2278_p3 = scmp.ne.s32.totalorder %s75_s22, %s2277_s4  ;;  %p2283_p5 = scmp.lt.s32.totalorder %s2277_s4, %s2277_s4 }
  0x86   :  { %p2284_p6 = por %p2283_p5, %p2282_p4 }
  0x88   :  { %p2285_p7 = pnand %p2284_p6, %p2278_p3 }
  0x8a   :  { %2288 = shalt.err (!%p2285_p7)
}
  0x8b   :  { %s2401_s3 = smov 128   ;;  %s2402_s28 = smov 8  }
  0x8c   :  { %80 = dma.hbm_to_vmem [thread:$0]  %s2784_s5, 2048, %s75_s22, [#allocation8], %s2401_s3, %s2401_s3, %s2402_s28  }
  0x8d   :  { %s2403_s15 = smov [#allocation12]   ;;  %s2404_s2 = smov [#allocation15]  }
  0x8e   :  { %s97_s16 = sshll.u32 %s2403_s15, 4  ;;  %s116_s8 = sshll.u32 %s2404_s2, 4  ;;  %s98_s16 = int_to_ptr.vmem [resolvable:$true] %s97_s16  ;;  %s2584_s8 = int_to_ptr.vmem [resolvable:$true] %s116_s8 }
  0x8f   :  { %s2289_s1 = scalar_lea.hbm %s2786_s7, 16 }
  0x90   :  { %p2290_p8 = scmp.ne.s32.totalorder %s2786_s7, %s2289_s1  ;;  %p2293_p9 = scmp.lt.u32.totalorder %s2289_s1, %s2786_s7 }
  0x92   :  { %p2295_p10 = pnand %p2293_p9, %p2290_p8 }
  0x94   :  { %2298 = shalt.err (!%p2295_p10)
}
  0x95   :  { %s2299_s5 = scalar_lea.vmem %s98_s16, 16  ;;  %s2303_s22 = scalar_lea.vmem %s98_s16, 32 }
  0x96   :  { %p2300_p11 = scmp.ne.s32.totalorder %s98_s16, %s2299_s5  ;;  %p2304_p12 = scmp.lt.s32.totalorder %s98_s16, %s98_s16 }
  0x97   :  { %p2305_p13 = scmp.lt.s32.totalorder %s2303_s22, %s2299_s5 }
  0x99   :  { %p2306_p0 = por %p2305_p13, %p2304_p12 }
  0x9b   :  { %p2307_p1 = pnand %p2306_p0, %p2300_p11 }
  0x9d   :  { %2310 = shalt.err (!%p2307_p1)
}
  0x9e   :  { %100 = dma.hbm_to_vmem [thread:$0]  %s2786_s7, 16, %s98_s16, [#allocation11]  }
  0x9f   :  { %s2311_s27 = scalar_lea.hbm %s2788_s9, 4096 }
  0xa0   :  { %p2312_p2 = scmp.ne.s32.totalorder %s2788_s9, %s2311_s27  ;;  %p2315_p3 = scmp.lt.u32.totalorder %s2311_s27, %s2788_s9 }
  0xa2   :  { %p2317_p4 = pnand %p2315_p3, %p2312_p2 }
  0xa4   :  { %2320 = shalt.err (!%p2317_p4)
}
  0xa5   :  { %s2321_s14 = scalar_lea.vmem %s2584_s8, 4096  ;;  %p2326_p6 = scmp.lt.s32.totalorder %s2584_s8, %s2584_s8 }
  0xa6   :  { %p2322_p5 = scmp.ne.s32.totalorder %s2584_s8, %s2321_s14  ;;  %p2327_p7 = scmp.lt.s32.totalorder %s2321_s14, %s2321_s14 }
  0xa8   :  { %p2328_p8 = por %p2327_p7, %p2326_p6 }
  0xaa   :  { %p2329_p9 = pnand %p2328_p8, %p2322_p5 }
  0xac   :  { %2332 = shalt.err (!%p2329_p9)
}
  0xad   :  { %s2405_s7 = smov 256   ;;  %s2406_s15 = smov 16  }
  0xae   :  { %122 = dma.hbm_to_vmem [thread:$0]  %s2788_s9, 4096, %s2584_s8, [#allocation14], %s2405_s7, %s2405_s7, %s2406_s15  }
  0xaf   :  { %s2407_s20 = smov [#allocation18]   ;;  %s2408_s1 = smov [#allocation19]  }
  0xb0   :  { %s138_s26 = sshll.u32 %s2407_s20, 4  ;;  %s151_s29 = sshll.u32 %s2408_s1, 4  ;;  %s139_s26 = int_to_ptr.vmem [resolvable:$true] %s138_s26  ;;  %s152_s29 = int_to_ptr.vmem [resolvable:$true] %s151_s29 }
  0xb1   :  { %s2333_s21 = scalar_lea.hbm %s2790_s11, 4096 }
  0xb2   :  { %p2334_p10 = scmp.ne.s32.totalorder %s2790_s11, %s2333_s21  ;;  %p2337_p11 = scmp.lt.u32.totalorder %s2333_s21, %s2790_s11 }
  0xb4   :  { %p2339_p12 = pnand %p2337_p11, %p2334_p10 }
  0xb6   :  { %2342 = shalt.err (!%p2339_p12)
}
  0xb7   :  { %s2343_s9 = scalar_lea.vmem %s139_s26, 4096  ;;  %p2348_p0 = scmp.lt.s32.totalorder %s139_s26, %s139_s26 }
  0xb8   :  { %p2344_p13 = scmp.ne.s32.totalorder %s139_s26, %s2343_s9  ;;  %p2349_p1 = scmp.lt.s32.totalorder %s2343_s9, %s2343_s9 }
  0xba   :  { %p2350_p2 = por %p2349_p1, %p2348_p0 }
  0xbc   :  { %p2351_p3 = pnand %p2350_p2, %p2344_p13 }
  0xbe   :  { %2354 = shalt.err (!%p2351_p3)
}
  0xbf   :  { %144 = dma.hbm_to_vmem [thread:$0]  %s2790_s11, 4096, %s139_s26, [#allocation17], %s2401_s3, %s2401_s3, %s2402_s28  }
  0xc0   :  { %s2355_s10 = scalar_lea.hbm %s2791_s12, 16 }
  0xc1   :  { %p2356_p4 = scmp.ne.s32.totalorder %s2791_s12, %s2355_s10  ;;  %p2359_p5 = scmp.lt.u32.totalorder %s2355_s10, %s2791_s12 }
  0xc3   :  { %p2361_p6 = pnand %p2359_p5, %p2356_p4 }
  0xc5   :  { %2364 = shalt.err (!%p2361_p6)
}
  0xc6   :  { %s2365_s7 = scalar_lea.vmem %s152_s29, 16  ;;  %s2369_s15 = scalar_lea.vmem %s152_s29, 32 }
  0xc7   :  { %p2366_p7 = scmp.ne.s32.totalorder %s152_s29, %s2365_s7  ;;  %p2370_p8 = scmp.lt.s32.totalorder %s152_s29, %s152_s29 }
  0xc8   :  { %p2371_p9 = scmp.lt.s32.totalorder %s2369_s15, %s2365_s7 }
  0xca   :  { %p2372_p10 = por %p2371_p9, %p2370_p8 }
  0xcc   :  { %p2373_p11 = pnand %p2372_p10, %p2366_p7 }
  0xce   :  { %2376 = shalt.err (!%p2373_p11)
}
  0xcf   :  { %154 = dma.hbm_to_vmem [thread:$0]  %s2791_s12, 16, %s152_s29, [#allocation20]  }
  0xd0   :  { %2377 = dma.done.wait [#allocation3], 16  }
  0xd1   :  { %2378 = vsyncadd [#allocation3], 4294967280 }
  0xd2   :  { %2379 = dma.done.wait [#allocation5], 6160  }
  0xd3   :  { %2380 = vsyncadd [#allocation5], 4294961136 }
  0xd4   :  { %2381 = dma.done.wait [#allocation8], 2096  }
  0xd5   :  { %2382 = vsyncadd [#allocation8], 4294965200 }
  0xd6   :  { %2383 = dma.done.wait [#allocation11], 32  }
  0xd7   :  { %2384 = vsyncadd [#allocation11], 4294967264 }
  0xd8   :  { %2385 = dma.done.wait [#allocation14], 4112  }
  0xd9   :  { %2386 = vsyncadd [#allocation14], 4294963184 }
  0xda   :  { %2387 = dma.done.wait [#allocation17], 4128  }
  0xdb   :  { %2388 = vsyncadd [#allocation17], 4294963168 }
  0xdc   :  { %2389 = dma.done.wait [#allocation20], 16  }
  0xdd   :  { %2390 = vsyncadd [#allocation20], 4294967280  ;;  %v2645_v0 = vld [vmem:[%s2779_s0] sm:$0xff]  ;;  %v221_v1 = vld [vmem:[#allocation6 + $0x8] sm:$0xff]  ;;  %v2409_v5 = vmov 0.0|0.0   ;;  %v2410_v57 = vmov 0.0  }
  0xde   :  { %194 = vadd.xlane.f32.xlu0 %v2645_v0  ;;  %v224_v2 = vld [vmem:[#allocation6 + $0x20] sm:$0xff]  ;;  %1953 = vmatprep.subr.bf16.mxu1 %v2409_v5  ;;  %v223_v6 = vld [vmem:[#allocation6 + $0x18] sm:$0xff]  ;;  %v222_v7 = vld [vmem:[#allocation6 + $0x10] sm:$0xff]  ;;  %vm2411_vm0 = vmmov 0   ;;  %vm450_vm1 = vcmask 261120   ;;  %s2412_s0 = smov 96  }
  0xdf   :  { %v220_v3 = vld [vmem:[#allocation6] sm:$0xff]  ;;  %v1921_v4 = vpack.c.bf16 %v224_v2, %v221_v1  ;;  %v225_v8 = vld [vmem:[#allocation6 + $0x28] sm:$0xff]  ;;  %v227_v11 = vld [vmem:[#allocation6 + $0x38] sm:$0xff]  ;;  %349 = vmatprep.mubr.f32.mxu0 %v2410_v57  ;;  %1834 = vmatprep.mubr.msk.f32.mxu1 %vm2411_vm0, %v2410_v57  ;;  %vm528_vm2 = vcmask 64512   ;;  %s2413_s12 = smov 64   ;;  %s2414_s2 = smov 32  }
  0xe0   :  { %v1923_v9 = vpack.c.bf16 %v223_v6, %v220_v3  ;;  %v1954_v10 = vpack.c.bf16 %v225_v8, %v222_v7  ;;  %v230_v12 = vld [vmem:[#allocation6 + $0x50] sm:$0xff]  ;;  %v229_v15 = vld [vmem:[#allocation6 + $0x48] sm:$0xff]  ;;  %v228_v16 = vld [vmem:[#allocation6 + $0x40] sm:$0xff] }
  0xe1   :  { %v226_v13 = vld [vmem:[#allocation6 + $0x30] sm:$0xff]  ;;  %1922 = vmatprep.subr.bf16.mxu0 %v1921_v4  ;;  %v1925_v14 = vpack.c.bf16 %v230_v12, %v227_v11  ;;  %v231_v17 = vld [vmem:[#allocation6 + $0x58] sm:$0xff]  ;;  %v233_v20 = vld [vmem:[#allocation6 + $0x68] sm:$0xff] }
  0xe2   :  { %1924 = vmatpush1.bf16.msra.mxu0 %v1923_v9  ;;  %1955 = vmatpush3.bf16.msra.mxu1 %v1954_v10  ;;  %v1927_v18 = vpack.c.bf16 %v229_v15, %v226_v13  ;;  %v1957_v19 = vpack.c.bf16 %v231_v17, %v228_v16  ;;  %v236_v21 = vld [vmem:[#allocation6 + $0x80] sm:$0xff]  ;;  %v235_v24 = vld [vmem:[#allocation6 + $0x78] sm:$0xff]  ;;  %v234_v25 = vld [vmem:[#allocation6 + $0x70] sm:$0xff] }
  0xe3   :  { %v232_v22 = vld [vmem:[#allocation6 + $0x60] sm:$0xff]  ;;  %1926 = vmatprep.subr.bf16.mxu0 %v1925_v14  ;;  %1956 = vmatprep.subr.bf16.mxu1 %v2409_v5  ;;  %v1929_v23 = vpack.c.bf16 %v236_v21, %v233_v20  ;;  %v237_v26 = vld [vmem:[#allocation6 + $0x88] sm:$0xff]  ;;  %v239_v33 = vld [vmem:[#allocation6 + $0x98] sm:$0xff] }
  0xe4   :  { %v1931_v27 = vpack.c.bf16 %v235_v24, %v232_v22  ;;  %v1960_v28 = vpack.c.bf16 %v237_v26, %v234_v25  ;;  %v242_v34 = vld [vmem:[#allocation6 + $0xb0] sm:$0xff]  ;;  %v241_v37 = vld [vmem:[#allocation6 + $0xa8] sm:$0xff]  ;;  %v240_v38 = vld [vmem:[#allocation6 + $0xa0] sm:$0xff]  ;;  %v270_v26 = vlaneseq }
  0xe5   :  { %v1933_v35 = vpack.c.bf16 %v242_v34, %v239_v33  ;;  %v238_v36 = vld [vmem:[#allocation6 + $0x90] sm:$0xff]  ;;  %v243_v40 = vld [vmem:[#allocation6 + $0xb8] sm:$0xff]  ;;  %v245_v42 = vld [vmem:[#allocation6 + $0xc8] sm:$0xff] }
  0xe6   :  { %1928 = vmatpush1.bf16.msra.mxu0 %v1927_v18  ;;  %1958 = vmatpush3.bf16.msra.mxu1 %v1957_v19  ;;  %v1935_v39 = vpack.c.bf16 %v241_v37, %v238_v36  ;;  %v1963_v41 = vpack.c.bf16 %v243_v40, %v240_v38  ;;  %v248_v43 = vld [vmem:[#allocation6 + $0xe0] sm:$0xff]  ;;  %v247_v46 = vld [vmem:[#allocation6 + $0xd8] sm:$0xff]  ;;  %v246_v47 = vld [vmem:[#allocation6 + $0xd0] sm:$0xff] }
  0xe7   :  { %1930 = vmatprep.subr.bf16.mxu0 %v1929_v23  ;;  %1959 = vmatprep.subr.bf16.mxu1 %v2409_v5  ;;  %v1937_v44 = vpack.c.bf16 %v248_v43, %v245_v42  ;;  %v244_v45 = vld [vmem:[#allocation6 + $0xc0] sm:$0xff]  ;;  %v249_v49 = vld [vmem:[#allocation6 + $0xe8] sm:$0xff]  ;;  %v251_v50 = vld [vmem:[#allocation6 + $0xf8] sm:$0xff] }
  0xe8   :  { %v1939_v48 = vpack.c.bf16 %v247_v46, %v244_v45  ;;  %v254_v51 = vld [vmem:[#allocation6 + $0x110] sm:$0xff]  ;;  %v1966_v52 = vpack.c.bf16 %v249_v49, %v246_v47  ;;  %v253_v55 = vld [vmem:[#allocation6 + $0x108] sm:$0xff]  ;;  %v252_v56 = vld [vmem:[#allocation6 + $0x100] sm:$0xff] }
  0xe9   :  { %v1941_v53 = vpack.c.bf16 %v254_v51, %v251_v50  ;;  %v250_v54 = vld [vmem:[#allocation6 + $0xf0] sm:$0xff]  ;;  %v255_v59 = vld [vmem:[#allocation6 + $0x118] sm:$0xff]  ;;  %v257_v60 = vld [vmem:[#allocation6 + $0x128] sm:$0xff] }
  0xea   :  { %1932 = vmatpush1.bf16.msra.mxu0 %v1931_v27  ;;  %1961 = vmatpush3.bf16.msra.mxu1 %v1960_v28  ;;  %v1943_v58 = vpack.c.bf16 %v253_v55, %v250_v54  ;;  %v260_v61 = vld [vmem:[#allocation6 + $0x140] sm:$0xff]  ;;  %v1969_v62 = vpack.c.bf16 %v255_v59, %v252_v56  ;;  %v259_v2 = vld [vmem:[#allocation6 + $0x138] sm:$0xff]  ;;  %v258_v3 = vld [vmem:[#allocation6 + $0x130] sm:$0xff]  ;;  %v2671_v27 = vshrl.u32 %v270_v26, 7 }
  0xeb   :  { %1962 = vmatprep.subr.bf16.mxu1 %v2409_v5  ;;  %1934 = vmatprep.subr.bf16.mxu0 %v1933_v35  ;;  %v1945_v63 = vpack.c.bf16 %v260_v61, %v257_v60  ;;  %v256_v1 = vld [vmem:[#allocation6 + $0x120] sm:$0xff]  ;;  %v261_v4 = vld [vmem:[#allocation6 + $0x148] sm:$0xff]  ;;  %v263_v6 = vld [vmem:[#allocation6 + $0x158] sm:$0xff] }
  0xec   :  { %v266_v7 = vld [vmem:[#allocation6 + $0x170] sm:$0xff]  ;;  %v1947_v8 = vpack.c.bf16 %v259_v2, %v256_v1  ;;  %v1972_v9 = vpack.c.bf16 %v261_v4, %v258_v3  ;;  %v265_v12 = vld [vmem:[#allocation6 + $0x168] sm:$0xff]  ;;  %v264_v13 = vld [vmem:[#allocation6 + $0x160] sm:$0xff]  ;;  %v276_v28 = vsub.s32 1, %v2671_v27 }
  0xed   :  { %v1949_v10 = vpack.c.bf16 %v266_v7, %v263_v6  ;;  %v262_v11 = vld [vmem:[#allocation6 + $0x150] sm:$0xff]  ;;  %v267_v14 = vld [vmem:[#allocation6 + $0x178] sm:$0xff]  ;;  %v426_v51 = vld [vmem:[#allocation9] sm:$0xff] }
  0xee   :  { %1936 = vmatpush1.bf16.msra.mxu0 %v1935_v39  ;;  %1964 = vmatpush3.bf16.msra.mxu1 %v1963_v41  ;;  %v1951_v15 = vpack.c.bf16 %v265_v12, %v262_v11  ;;  %v1975_v16 = vpack.c.bf16 %v267_v14, %v264_v13  ;;  %v1692_v21 = vld [vmem:[#allocation2] ss:$0 sm:$0xff]  ;;  %v1693_v23 = vld [vmem:[#allocation4] ss:$0 sm:$0xff]  ;;  %v430_v12 = vld [vmem:[#allocation9 + $0x20] sm:$0xff] }
  0xef   :  { %1965 = vmatprep.subr.bf16.mxu1 %v2409_v5  ;;  %1938 = vmatprep.subr.bf16.mxu0 %v1937_v44  ;;  %v429_v55 = vld [vmem:[#allocation9 + $0x18] sm:$0xff]  ;;  %v431_v13 = vld [vmem:[#allocation9 + $0x28] sm:$0xff]  ;;  %v432_v14 = vld [vmem:[#allocation9 + $0x30] sm:$0xff] }
  0xf2   :  { %1940 = vmatpush1.bf16.msra.mxu0 %v1939_v48  ;;  %1967 = vmatpush3.bf16.msra.mxu1 %v1966_v52  ;;  %v427_v52 = vld [vmem:[#allocation9 + $0x8] sm:$0xff] }
  0xf3   :  { %1942 = vmatprep.subr.bf16.mxu0 %v1941_v53  ;;  %1968 = vmatprep.subr.bf16.mxu1 %v2409_v5  ;;  %v428_v53 = vld [vmem:[#allocation9 + $0x10] sm:$0xff]  ;;  %v1978_v54 = vpack.c.bf16 %v427_v52, %v426_v51 }
  0xf4   :  { %v1981_v56 = vpack.c.bf16 %v429_v55, %v428_v53 }
  0xf6   :  { %1944 = vmatpush1.bf16.msra.mxu0 %v1943_v58  ;;  %1970 = vmatpush3.bf16.msra.mxu1 %v1969_v62 }
  0xf7   :  { %1946 = vmatprep.subr.bf16.mxu0 %v1945_v63  ;;  %1971 = vmatprep.subr.bf16.mxu1 %v2409_v5 }
  0xfa   :  { %1948 = vmatpush1.bf16.msra.mxu0 %v1947_v8  ;;  %1973 = vmatpush3.bf16.msra.mxu1 %v1972_v9 }
  0xfb   :  { %1950 = vmatprep.subr.bf16.mxu0 %v1949_v10  ;;  %1974 = vmatprep.subr.bf16.mxu1 %v2409_v5 }
  0xfe   :  { %1952 = vmatpush1.bf16.msra.mxu0 %v1951_v15  ;;  %1976 = vmatpush3.bf16.msra.mxu1 %v1975_v16  ;;  %v1984_v15 = vpack.c.bf16 %v431_v13, %v430_v12  ;;  %v433_v16 = vld [vmem:[#allocation9 + $0x38] sm:$0xff] }
  0xff   :  { %1977 = vmatprep.subr.bf16.mxu0 %v2409_v5  ;;  %1837 = vmatprep.subr.mxu1 %v2410_v57  ;;  %v441_v13 = vld [vmem:[#allocation9 + $0x78] sm:$0xff] }
 0x16b   :  { %v195_v29 = vpop.xlane.xlu0 %194 }
 0x16c   :  { %v197_v30 = vmul.f32 0.0078125, %v195_v29  ;;  %v268_v29 = vld [vmem:[#allocation7] sm:$0x7] }
 0x16e   :  { %v2653_v31 = vsub.f32 %v2645_v0, %v197_v30  ;;  %v272_v30 = vsub.s32 0, %v2671_v27 }
 0x170   :  { %v199_v32 = vmul.f32 %v2653_v31, %v2653_v31  ;;  %v273_v35 = vrot.slane %v268_v29, %v272_v30 }
 0x172   :  { %200 = vadd.xlane.f32.xlu0 %v199_v32  ;;  %v277_v32 = vrot.slane %v268_v29, %v276_v28 }
 0x1ff   :  { %v201_v17 = vpop.xlane.xlu0 %200 }
 0x200   :  { %v202_v18 = vmul.f32 0.0078125, %v201_v17  ;;  %v1987_v17 = vpack.c.bf16 %v433_v16, %v432_v14 }
 0x202   :  { %v203_v19 = vadd.f32 1e-05, %v202_v18 }
 0x204   :  { %2089 = vrsqrt.f32 %v203_v19 }
 0x20e   :  { %v2090_v20 = vpop.eup %2089 }
 0x20f   :  { %v205_v22 = vmul.f32 %v2090_v20, %v2653_v31  ;;  %v280_v31 = vsub.s32 2, %v2671_v27 }
 0x211   :  { %v212_v24 = vmul.f32 %v1692_v21, %v205_v22  ;;  %v281_v38 = vrot.slane %v268_v29, %v280_v31 }
 0x213   :  { %v219_v25 = vadd.f32 %v1693_v23, %v212_v24 }
 0x215   :  { %350 = vmatmul.mubr.f32.vlgmr.msra.gmra.mrb[0].mxu0 %v219_v25  ;;  %1835 = vmatmul.mubr.f32.vlgmr.msra.gmra.mrb[0].mxu1 %v219_v25 }
 0x216   :  { %1839 = vmatprep.mubr.msk.f32.mxu1 %vm2411_vm0, %v2410_v57  ;;  %1855 = vmatprep.mubr.msk.f32.mxu0 %vm2411_vm0, %v2410_v57 }
 0x217   :  { %1979 = vmatpush3.bf16.msra.mxu0 %v1978_v54 }
 0x218   :  { %1980 = vmatprep.subr.bf16.mxu0 %v2409_v5 }
 0x21b   :  { %1982 = vmatpush3.bf16.msra.mxu0 %v1981_v56 }
 0x21c   :  { %1983 = vmatprep.subr.bf16.mxu0 %v2409_v5 }
 0x2e8   :  { %v351_v33 = vpop.f32.mrb[0].mxu0  ;;  %v422_v34 = vpop.f32.mrb[0].mxu1 }
 0x2e9   :  { %v353_v36 = vpop.f32.mrb[1].mxu0  ;;  %v1836_v37 = vpop.f32.mrb[1].mxu1  ;;  %v2686_v40 = vadd.f32 %v351_v33, %v273_v35  ;;  %v2689_v41 = vadd.f32 %v422_v34, %v281_v38 }
 0x2ea   :  { %v2680_v39 = vadd.f32 %v353_v36, %v277_v32 }
 0x2ec   :  { %689 = vrot.lane.b32.xlu0 %v2680_v39, %s2412_s0  ;;  %1838 = vmatpush3.xpose.msk.msra.mxu1 %vm450_vm1, %v2680_v39 }
 0x2ed   :  { %1842 = vmatprep.subr.mxu1 %v2410_v57 }
 0x2ef   :  { %1840 = vmatmul.mubr.msk.f32.vlgmr.msra.gmra.mrb[2].mxu1 %vm450_vm1, %v2686_v40 }
 0x2f0   :  { %1843 = vmatpush3.msra.mxu1 %v2689_v41  ;;  %1844 = vmatprep.mubr.msk.f32.mxu1 %vm2411_vm0, %v2410_v57 }
 0x2f1   :  { %1858 = vmatprep.subr.mxu1 %v2410_v57 }
 0x35e   :  { %v690_v61 = vpop.permute.xlu0 %689 }
 0x3c2   :  { %v523_v42 = vpop.f32.mrb[2].mxu1 }
 0x3c3   :  { %v527_v43 = vmul.f32 0.17677669, %v523_v42  ;;  %v1841_v44 = vpop.f32.mrb[3].mxu1 }
 0x3c4   :  { %v435_v44 = vld [vmem:[#allocation9 + $0x48] sm:$0xff] }
 0x3c5   :  { %v529_v45 = vsel %vm528_vm2, %v527_v43, -inf }
 0x3c6   :  { %530 = vmax.xlane.f32.xlu1 %v529_v45  ;;  %v436_v45 = vld [vmem:[#allocation9 + $0x50] sm:$0xff] }
 0x453   :  { %v531_v46 = vpop.xlane.xlu1 %530 }
 0x454   :  { %v532_v47 = vsub.f32 %v527_v43, %v531_v46  ;;  %v434_v43 = vld [vmem:[#allocation9 + $0x40] sm:$0xff] }
 0x455   :  { %v1990_v46 = vpack.c.bf16 %v435_v44, %v434_v43  ;;  %v1444_v44 = vld [vmem:[#allocation15 + $0x40] sm:$0xff] }
 0x456   :  { %v533_v48 = vmul.f32 1.442695, %v532_v47  ;;  %v437_v47 = vld [vmem:[#allocation9 + $0x58] sm:$0xff] }
 0x458   :  { %2091 = vpow2.f32 %v533_v48 }
 0x462   :  { %v2092_v49 = vpop.eup %2091 }
 0x463   :  { %v535_v50 = vsel %vm528_vm2, %v2092_v49, 0.0 }
 0x464   :  { %536 = vadd.xlane.f32.xlu1 %v535_v50 }
 0x475   :  { %687 = vrot.lane.b32.xlu1 %v2686_v40, %s2412_s0 }
 0x4f1   :  { %v537_v58 = vpop.xlane.xlu1 %536 }
 0x4f2   :  { %2093 = vrcp.f32 %v537_v58 }
 0x4f5   :  { %v688_v62 = vpop.permute.xlu1 %687 }
 0x4fc   :  { %v2094_v59 = vpop.eup %2093 }
 0x4fd   :  { %v539_v60 = vmul.f32 %v2094_v59, %v2092_v49 }
 0x4ff   :  { %1845 = vmatmul.mubr.msk.f32.vlgmr.msra.gmra.mrb[4].mxu1 %vm528_vm2, %v539_v60 }
 0x500   :  { %1859 = vmatpush3.xpose.msk.msra.mxu1 %vm450_vm1, %v690_v61  ;;  %1860 = vmatprep.mubr.msk.f32.mxu1 %vm2411_vm0, %v2410_v57 }
 0x501   :  { %1863 = vmatprep.subr.mxu1 %v2410_v57 }
 0x503   :  { %1861 = vmatmul.mubr.msk.f32.vlgmr.msra.gmra.mrb[6].mxu1 %vm450_vm1, %v688_v62 }
 0x504   :  { %1865 = vmatprep.mubr.msk.f32.mxu1 %vm2411_vm0, %v2410_v57 }
 0x5d2   :  { %v609_v63 = vpop.f32.mrb[4].mxu1 }
 0x5d3   :  { %v1846_v1 = vpop.f32.mrb[5].mxu1  ;;  %1856 = vmatmul.mubr.msk.f32.vlgmr.msra.gmra.mrb[2].mxu0 %vm450_vm1, %v609_v63 }
 0x5d4   :  { %1876 = vmatprep.mubr.msk.f32.mxu0 %vm2411_vm0, %v2410_v57  ;;  %1985 = vmatpush3.bf16.msra.mxu0 %v1984_v15 }
 0x5d5   :  { %1986 = vmatprep.subr.bf16.mxu0 %v2409_v5 }
 0x5d6   :  { %v761_v2 = vpop.f32.mrb[6].mxu1 }
 0x5d7   :  { %v765_v3 = vmul.f32 0.17677669, %v761_v2  ;;  %v1862_v4 = vpop.f32.mrb[7].mxu1 }
 0x5d8   :  { %1988 = vmatpush3.bf16.msra.mxu0 %v1987_v17 }
 0x5d9   :  { %v766_v6 = vsel %vm528_vm2, %v765_v3, -inf  ;;  %1989 = vmatprep.subr.bf16.mxu0 %v2409_v5 }
 0x5da   :  { %767 = vmax.xlane.f32.xlu1 %v766_v6 }
 0x5eb   :  { %930 = vrot.lane.b32.xlu1 %v2680_v39, %s2413_s12 }
 0x5ef   :  { %928 = vrot.lane.b32.xlu1 %v2686_v40, %s2413_s12 }
 0x667   :  { %v768_v7 = vpop.xlane.xlu1 %767 }
 0x668   :  { %v769_v8 = vsub.f32 %v765_v3, %v768_v7 }
 0x66a   :  { %v770_v9 = vmul.f32 1.442695, %v769_v8 }
 0x66b   :  { %v931_v23 = vpop.permute.xlu1 %930 }
 0x66c   :  { %2095 = vpow2.f32 %v770_v9  ;;  %v438_v9 = vld [vmem:[#allocation9 + $0x60] sm:$0xff] }
 0x66f   :  { %v929_v25 = vpop.permute.xlu1 %928 }
 0x676   :  { %v2096_v10 = vpop.eup %2095 }
 0x677   :  { %v772_v11 = vsel %vm528_vm2, %v2096_v10, 0.0 }
 0x678   :  { %773 = vadd.xlane.f32.xlu0 %v772_v11  ;;  %v440_v11 = vld [vmem:[#allocation9 + $0x70] sm:$0xff] }
 0x679   :  { %v1999_v14 = vpack.c.bf16 %v441_v13, %v440_v11  ;;  %v1465_v11 = vld [vmem:[#allocation15 + $0xe8] sm:$0xff] }
 0x68e   :  { %778 = vrot.lane.b32.xlu0 %v2689_v41, %s2412_s0 }
 0x6a6   :  { %v682_v18 = vpop.f32.mrb[2].mxu0 }
 0x6a7   :  { %v1857_v19 = vpop.f32.mrb[3].mxu0 }
 0x705   :  { %v774_v20 = vpop.xlane.xlu0 %773 }
 0x706   :  { %2097 = vrcp.f32 %v774_v20 }
 0x709   :  { %v779_v21 = vpop.permute.xlu0 %778 }
 0x70a   :  { %1864 = vmatpush3.msra.mxu1 %v779_v21 }
 0x70b   :  { %1879 = vmatprep.subr.mxu1 %v2410_v57 }
 0x710   :  { %v2098_v22 = vpop.eup %2097 }
 0x711   :  { %v776_v24 = vmul.f32 %v2098_v22, %v2096_v10  ;;  %v439_v10 = vld [vmem:[#allocation9 + $0x68] sm:$0xff] }
 0x712   :  { %v1996_v12 = vpack.c.bf16 %v439_v10, %v438_v9  ;;  %v1460_v9 = vld [vmem:[#allocation15 + $0xc0] sm:$0xff]  ;;  %v1462_v10 = vld [vmem:[#allocation15 + $0xd0] sm:$0xff] }
 0x713   :  { %1866 = vmatmul.mubr.msk.f32.vlgmr.msra.gmra.mrb[8].mxu1 %vm528_vm2, %v776_v24  ;;  %v2027_v13 = vpack.c.bf16 %v1462_v10, %v1460_v9  ;;  %v1600_v9 = vld [vmem:[#allocation18 + $0xf8] sm:$0xff] }
 0x714   :  { %1880 = vmatpush3.xpose.msk.msra.mxu1 %vm450_vm1, %v931_v23  ;;  %1881 = vmatprep.mubr.msk.f32.mxu1 %vm2411_vm0, %v2410_v57 }
 0x715   :  { %1884 = vmatprep.subr.mxu1 %v2410_v57 }
 0x717   :  { %1882 = vmatmul.mubr.msk.f32.vlgmr.msra.gmra.mrb[10].mxu1 %vm450_vm1, %v929_v25  ;;  %v1437_v25 = vld [vmem:[#allocation15 + $0x8] sm:$0xff] }
 0x718   :  { %1886 = vmatprep.mubr.msk.f32.mxu1 %vm2411_vm0, %v2410_v57 }
 0x7e6   :  { %v850_v26 = vpop.f32.mrb[8].mxu1 }
 0x7e7   :  { %v1867_v29 = vpop.f32.mrb[9].mxu1  ;;  %1877 = vmatmul.mubr.msk.f32.vlgmr.msra.gmra.mrb[4].mxu0 %vm450_vm1, %v850_v26  ;;  %v1439_v26 = vld [vmem:[#allocation15 + $0x18] sm:$0xff] }
 0x7e8   :  { %1897 = vmatprep.mubr.msk.f32.mxu0 %vm2411_vm0, %v2410_v57  ;;  %1991 = vmatpush3.bf16.msra.mxu0 %v1990_v46  ;;  %v1436_v29 = vld [vmem:[#allocation15] sm:$0xff] }
 0x7e9   :  { %1992 = vmatprep.subr.bf16.mxu0 %v2409_v5 }
 0x7ea   :  { %v1002_v31 = vpop.f32.mrb[10].mxu1 }
 0x7eb   :  { %v1006_v32 = vmul.f32 0.17677669, %v1002_v31  ;;  %v1883_v33 = vpop.f32.mrb[11].mxu1  ;;  %v2001_v31 = vpack.c.bf16 %v1439_v26, %v1437_v25  ;;  %v1585_v26 = vld [vmem:[#allocation18 + $0x80] sm:$0xff] }
 0x7ec   :  { %v1441_v33 = vld [vmem:[#allocation15 + $0x28] sm:$0xff] }
 0x7ed   :  { %v1007_v34 = vsel %vm528_vm2, %v1006_v32, -inf }
 0x7ee   :  { %1008 = vmax.xlane.f32.xlu1 %v1007_v34  ;;  %v1443_v34 = vld [vmem:[#allocation15 + $0x38] sm:$0xff] }
 0x7ff   :  { %1170 = vrot.lane.b32.xlu1 %v2680_v39, %s2414_s2  ;;  %v1993_v39 = vpack.c.bf16 %v437_v47, %v436_v45  ;;  %v1446_v45 = vld [vmem:[#allocation15 + $0x50] sm:$0xff] }
 0x800   :  { %v2011_v46 = vpack.c.bf16 %v1446_v45, %v1444_v44  ;;  %v1573_v45 = vld [vmem:[#allocation18 + $0x20] sm:$0xff] }
 0x801   :  { %1994 = vmatpush3.bf16.msra.mxu0 %v1993_v39 }
 0x802   :  { %1995 = vmatprep.subr.bf16.mxu0 %v2409_v5 }
 0x803   :  { %1168 = vrot.lane.b32.xlu1 %v2686_v40, %s2414_s2  ;;  %v1694_v40 = vld [vmem:[#allocation10] ss:$0 sm:$0xff] }
 0x804   :  { %v686_v48 = vadd.f32 %v1694_v40, %v682_v18 }
 0x87b   :  { %v1009_v35 = vpop.xlane.xlu1 %1008 }
 0x87c   :  { %v1010_v36 = vsub.f32 %v1006_v32, %v1009_v35  ;;  %v1438_v32 = vld [vmem:[#allocation15 + $0x10] sm:$0xff]  ;;  %v2005_v35 = vpack.c.bf16 %v1443_v34, %v1441_v33 }
 0x87d   :  { %v1570_v33 = vld [vmem:[#allocation18 + $0x8] sm:$0xff] }
 0x87e   :  { %v1011_v37 = vmul.f32 1.442695, %v1010_v36  ;;  %v1440_v36 = vld [vmem:[#allocation15 + $0x20] sm:$0xff] }
 0x87f   :  { %v1171_v55 = vpop.permute.xlu1 %1170 }
 0x880   :  { %2099 = vpow2.f32 %v1011_v37  ;;  %v1442_v37 = vld [vmem:[#allocation15 + $0x30] sm:$0xff] }
 0x881   :  { %v2007_v43 = vpack.c.bf16 %v1442_v37, %v1440_v36  ;;  %v1571_v37 = vld [vmem:[#allocation18 + $0x10] sm:$0xff] }
 0x883   :  { %v1169_v58 = vpop.permute.xlu1 %1168 }
 0x88a   :  { %v2100_v38 = vpop.eup %2099 }
 0x88b   :  { %v1013_v42 = vsel %vm528_vm2, %v2100_v38, 0.0 }
 0x88c   :  { %1014 = vadd.xlane.f32.xlu0 %v1013_v42  ;;  %v1447_v42 = vld [vmem:[#allocation15 + $0x58] sm:$0xff] }
 0x8a2   :  { %1018 = vrot.lane.b32.xlu0 %v2689_v41, %s2413_s12 }
 0x8ba   :  { %v923_v49 = vpop.f32.mrb[4].mxu0 }
 0x8bb   :  { %v927_v50 = vadd.f32 %v923_v49, %v686_v48  ;;  %v1878_v51 = vpop.f32.mrb[5].mxu0  ;;  %v1449_v49 = vld [vmem:[#allocation15 + $0x68] sm:$0xff] }
 0x919   :  { %v1015_v52 = vpop.xlane.xlu0 %1014 }
 0x91a   :  { %2101 = vrcp.f32 %v1015_v52  ;;  %v1448_v52 = vld [vmem:[#allocation15 + $0x60] sm:$0xff] }
 0x91d   :  { %v1019_v53 = vpop.permute.xlu0 %1018 }
 0x91e   :  { %1885 = vmatpush3.msra.mxu1 %v1019_v53  ;;  %v1450_v53 = vld [vmem:[#allocation15 + $0x70] sm:$0xff] }
 0x91f   :  { %1900 = vmatprep.subr.mxu1 %v2410_v57 }
 0x924   :  { %v2102_v54 = vpop.eup %2101 }
 0x925   :  { %v1017_v56 = vmul.f32 %v2102_v54, %v2100_v38  ;;  %v1445_v38 = vld [vmem:[#allocation15 + $0x48] sm:$0xff]  ;;  %v2015_v54 = vpack.c.bf16 %v1450_v53, %v1448_v52 }
 0x926   :  { %v1593_v52 = vld [vmem:[#allocation18 + $0xc0] sm:$0xff]  ;;  %v1594_v53 = vld [vmem:[#allocation18 + $0xc8] sm:$0xff] }
 0x927   :  { %1887 = vmatmul.mubr.msk.f32.vlgmr.msra.gmra.mrb[12].mxu1 %vm528_vm2, %v1017_v56  ;;  %v1455_v56 = vld [vmem:[#allocation15 + $0x98] sm:$0xff] }
 0x928   :  { %1901 = vmatpush3.xpose.msk.msra.mxu1 %vm450_vm1, %v1171_v55  ;;  %1902 = vmatprep.mubr.msk.f32.mxu1 %vm2411_vm0, %v2410_v57  ;;  %v1453_v55 = vld [vmem:[#allocation15 + $0x88] sm:$0xff] }
 0x929   :  { %1905 = vmatprep.subr.mxu1 %v2410_v57 }
 0x92b   :  { %1903 = vmatmul.mubr.msk.f32.vlgmr.msra.gmra.mrb[14].mxu1 %vm450_vm1, %v1169_v58  ;;  %v2017_v58 = vpack.c.bf16 %v1455_v56, %v1453_v55  ;;  %v2049_v55 = vpack.c.bf16 %v1594_v53, %v1593_v52  ;;  %v1578_v56 = vld [vmem:[#allocation18 + $0x48] sm:$0xff] }
 0x92c   :  { %1907 = vmatprep.mubr.msk.f32.mxu1 %vm2411_vm0, %v2410_v57 }
 0x9fa   :  { %v1090_v59 = vpop.f32.mrb[12].mxu1 }
 0x9fb   :  { %v1888_v60 = vpop.f32.mrb[13].mxu1  ;;  %1898 = vmatmul.mubr.msk.f32.vlgmr.msra.gmra.mrb[6].mxu0 %vm450_vm1, %v1090_v59  ;;  %v1452_v59 = vld [vmem:[#allocation15 + $0x80] sm:$0xff] }
 0x9fc   :  { %1918 = vmatprep.mubr.msk.f32.mxu0 %vm2411_vm0, %v2410_v57  ;;  %1997 = vmatpush3.bf16.msra.mxu0 %v1996_v12  ;;  %v1454_v60 = vld [vmem:[#allocation15 + $0x90] sm:$0xff]  ;;  %v1467_v12 = vld [vmem:[#allocation15 + $0xf8] sm:$0xff] }
 0x9fd   :  { %1998 = vmatprep.subr.bf16.mxu0 %v2409_v5 }
 0x9fe   :  { %v1242_v61 = vpop.f32.mrb[14].mxu1 }
 0x9ff   :  { %v1246_v62 = vmul.f32 0.17677669, %v1242_v61  ;;  %v1904_v63 = vpop.f32.mrb[15].mxu1  ;;  %v1457_v61 = vld [vmem:[#allocation15 + $0xa8] sm:$0xff] }
 0xa00   :  { %2000 = vmatpush3.bf16.msra.mxu0 %v1999_v14  ;;  %v1459_v63 = vld [vmem:[#allocation15 + $0xb8] sm:$0xff]  ;;  %v2029_v14 = vpack.c.bf16 %v1467_v12, %v1465_v11 }
 0xa01   :  { %v1247_v1 = vsel %vm528_vm2, %v1246_v62, -inf  ;;  %v1583_v12 = vld [vmem:[#allocation18 + $0x70] sm:$0xff] }
 0xa02   :  { %1248 = vmax.xlane.f32.xlu0 %v1247_v1  ;;  %v1456_v1 = vld [vmem:[#allocation15 + $0xa0] sm:$0xff] }
 0xa18   :  { %1258 = vrot.lane.b32.xlu0 %v2689_v41, %s2414_s2 }
 0xa8f   :  { %v1249_v2 = vpop.xlane.xlu0 %1248 }
 0xa90   :  { %v1250_v3 = vsub.f32 %v1246_v62, %v1249_v2  ;;  %v2019_v62 = vpack.c.bf16 %v1454_v60, %v1452_v59  ;;  %v1458_v2 = vld [vmem:[#allocation15 + $0xb0] sm:$0xff]  ;;  %v1596_v59 = vld [vmem:[#allocation18 + $0xd8] sm:$0xff] }
 0xa92   :  { %v1251_v4 = vmul.f32 1.442695, %v1250_v3  ;;  %v2021_v3 = vpack.c.bf16 %v1459_v63, %v1457_v61  ;;  %v1580_v63 = vld [vmem:[#allocation18 + $0x58] sm:$0xff] }
 0xa93   :  { %v1259_v6 = vpop.permute.xlu0 %1258 }
 0xa94   :  { %2103 = vpow2.f32 %v1251_v4  ;;  %1906 = vmatpush3.msra.mxu1 %v1259_v6  ;;  %v1461_v4 = vld [vmem:[#allocation15 + $0xc8] sm:$0xff]  ;;  %v1463_v6 = vld [vmem:[#allocation15 + $0xd8] sm:$0xff] }
 0xa95   :  { %2002 = vmatprep.subr.bf16.mxu1 %v2001_v31 }
 0xa9e   :  { %v2104_v7 = vpop.eup %2103 }
 0xa9f   :  { %v1253_v8 = vsel %vm528_vm2, %v2104_v7, 0.0 }
 0xaa0   :  { %1254 = vadd.xlane.f32.xlu1 %v1253_v8  ;;  %v2025_v8 = vpack.c.bf16 %v1463_v6, %v1461_v4  ;;  %v1581_v6 = vld [vmem:[#allocation18 + $0x60] sm:$0xff] }
 0xace   :  { %v1163_v41 = vpop.f32.mrb[6].mxu0 }
 0xacf   :  { %v1167_v15 = vadd.f32 %v1163_v41, %v927_v50  ;;  %v1899_v16 = vpop.f32.mrb[7].mxu0  ;;  %v1451_v50 = vld [vmem:[#allocation15 + $0x78] sm:$0xff]  ;;  %v1464_v41 = vld [vmem:[#allocation15 + $0xe0] sm:$0xff] }
 0xad0   :  { %v2013_v51 = vpack.c.bf16 %v1451_v50, %v1449_v49  ;;  %v1575_v49 = vld [vmem:[#allocation18 + $0x30] sm:$0xff]  ;;  %v1576_v50 = vld [vmem:[#allocation18 + $0x38] sm:$0xff] }
 0xb2d   :  { %v1255_v17 = vpop.xlane.xlu1 %1254 }
 0xb2e   :  { %2105 = vrcp.f32 %v1255_v17 }
 0xb38   :  { %v2106_v18 = vpop.eup %2105 }
 0xb39   :  { %v1257_v19 = vmul.f32 %v2106_v18, %v2104_v7  ;;  %v2023_v7 = vpack.c.bf16 %v1458_v2, %v1456_v1  ;;  %v1597_v1 = vld [vmem:[#allocation18 + $0xe0] sm:$0xff]  ;;  %v1598_v2 = vld [vmem:[#allocation18 + $0xe8] sm:$0xff] }
 0xb3a   :  { %v2057_v4 = vpack.c.bf16 %v1598_v2, %v1597_v1 }
 0xb3b   :  { %1908 = vmatmul.mubr.msk.f32.vlgmr.msra.gmra.mrb[16].mxu1 %vm528_vm2, %v1257_v19 }
 0xb3c   :  { %1544 = vmatprep.mubr.f32.mxu1 %v2410_v57  ;;  %v2003_v57 = vpack.c.bf16 %v1438_v32, %v1436_v29  ;;  %v1586_v29 = vld [vmem:[#allocation18 + $0x88] sm:$0xff]  ;;  %v1569_v32 = vld [vmem:[#allocation18] sm:$0xff] }
 0xb3d   :  { %v2033_v31 = vpack.c.bf16 %v1586_v29, %v1585_v26  ;;  %v2035_v34 = vpack.c.bf16 %v1570_v33, %v1569_v32 }
 0xb3e   :  { %2004 = vmatpush1.bf16.msra.mxu1 %v2003_v57  ;;  %v1587_v57 = vld [vmem:[#allocation18 + $0x90] sm:$0xff] }
 0xb3f   :  { %2006 = vmatprep.subr.bf16.mxu1 %v2005_v35  ;;  %2034 = vmatprep.subr.bf16.mxu0 %v2033_v31  ;;  %v1588_v35 = vld [vmem:[#allocation18 + $0x98] sm:$0xff] }
 0xb40   :  { %v2037_v36 = vpack.c.bf16 %v1588_v35, %v1587_v57 }
 0xb42   :  { %2008 = vmatpush1.bf16.msra.mxu1 %v2007_v43  ;;  %v1589_v43 = vld [vmem:[#allocation18 + $0xa0] sm:$0xff] }
 0xc0e   :  { %v1330_v20 = vpop.f32.mrb[16].mxu1 }
 0xc0f   :  { %v1909_v21 = vpop.f32.mrb[17].mxu1  ;;  %1919 = vmatmul.mubr.msk.f32.vlgmr.msra.gmra.mrb[8].mxu0 %vm450_vm1, %v1330_v20 }
 0xc10   :  { %v1711_v21 = vld [vmem:[#allocation12] ss:$0 sm:$0xff]  ;;  %2036 = vmatpush3.bf16.msra.mxu0 %v2035_v34 }
 0xc11   :  { %2038 = vmatprep.subr.bf16.mxu0 %v2037_v36 }
 0xce2   :  { %v1403_v22 = vpop.f32.mrb[8].mxu0 }
 0xce3   :  { %v1407_v23 = vadd.f32 %v1403_v22, %v1167_v15  ;;  %v1920_v24 = vpop.f32.mrb[9].mxu0  ;;  %v1466_v15 = vld [vmem:[#allocation15 + $0xf0] sm:$0xff] }
 0xce4   :  { %v2031_v16 = vpack.c.bf16 %v1466_v15, %v1464_v41  ;;  %v1468_v41 = vld [vmem:[#allocation16] sm:$0x3] }
 0xce5   :  { %v2767_v5 = vadd.f32 %v1407_v23, %v2645_v0  ;;  %v2009_v0 = vpack.c.bf16 %v1447_v42, %v1445_v38  ;;  %v1712_v23 = vld [vmem:[#allocation13] ss:$0 sm:$0xff]  ;;  %v1473_v15 = vrot.slane %v1468_v41, %v272_v30 }
 0xce6   :  { %v1572_v38 = vld [vmem:[#allocation18 + $0x18] sm:$0xff] }
 0xce7   :  { %1411 = vadd.xlane.f32.xlu1 %v2767_v5  ;;  %2010 = vmatprep.subr.bf16.mxu1 %v2009_v0  ;;  %v2039_v42 = vpack.c.bf16 %v1572_v38, %v1571_v37  ;;  %v1590_v0 = vld [vmem:[#allocation18 + $0xa8] sm:$0xff] }
 0xce8   :  { %2012 = vmatpush1.bf16.msra.mxu1 %v2011_v46  ;;  %v2041_v44 = vpack.c.bf16 %v1590_v0, %v1589_v43  ;;  %v1574_v46 = vld [vmem:[#allocation18 + $0x28] sm:$0xff]  ;;  %v1713_v0 = vld [vmem:[#allocation19] ss:$0 sm:$0xff] }
 0xce9   :  { %2014 = vmatprep.subr.bf16.mxu1 %v2013_v51  ;;  %2040 = vmatpush3.bf16.msra.mxu0 %v2039_v42  ;;  %v2047_v51 = vpack.c.bf16 %v1576_v50, %v1575_v49 }
 0xcea   :  { %2042 = vmatprep.subr.bf16.mxu0 %v2041_v44 }
 0xcec   :  { %2016 = vmatpush1.bf16.msra.mxu1 %v2015_v54  ;;  %v1577_v54 = vld [vmem:[#allocation18 + $0x40] sm:$0xff] }
 0xced   :  { %2018 = vmatprep.subr.bf16.mxu1 %v2017_v58  ;;  %v1595_v58 = vld [vmem:[#allocation18 + $0xd0] sm:$0xff]  ;;  %v2051_v60 = vpack.c.bf16 %v1578_v56, %v1577_v54 }
 0xcee   :  { %v2053_v61 = vpack.c.bf16 %v1596_v59, %v1595_v58 }
 0xcf0   :  { %2020 = vmatpush1.bf16.msra.mxu1 %v2019_v62  ;;  %v1579_v62 = vld [vmem:[#allocation18 + $0x50] sm:$0xff] }
 0xcf1   :  { %2022 = vmatprep.subr.bf16.mxu1 %v2021_v3  ;;  %v2055_v3 = vpack.c.bf16 %v1580_v63, %v1579_v62 }
 0xcf4   :  { %2024 = vmatpush1.bf16.msra.mxu1 %v2023_v7  ;;  %v1582_v7 = vld [vmem:[#allocation18 + $0x68] sm:$0xff] }
 0xcf5   :  { %2026 = vmatprep.subr.bf16.mxu1 %v2025_v8  ;;  %v1599_v8 = vld [vmem:[#allocation18 + $0xf0] sm:$0xff]  ;;  %v2059_v10 = vpack.c.bf16 %v1582_v7, %v1581_v6 }
 0xcf6   :  { %v2061_v11 = vpack.c.bf16 %v1600_v9, %v1599_v8 }
 0xcf8   :  { %2028 = vmatpush1.bf16.msra.mxu1 %v2027_v13  ;;  %v1584_v13 = vld [vmem:[#allocation18 + $0x78] sm:$0xff] }
 0xcf9   :  { %2030 = vmatprep.subr.bf16.mxu1 %v2029_v14  ;;  %v2063_v14 = vpack.c.bf16 %v1584_v13, %v1583_v12 }
 0xcfc   :  { %2032 = vmatpush1.bf16.msra.mxu1 %v2031_v16  ;;  %v1477_v16 = vrot.slane %v1468_v41, %v276_v28 }
 0xd74   :  { %v1412_v47 = vpop.xlane.xlu1 %1411 }
 0xd75   :  { %v1413_v39 = vmul.f32 0.0078125, %v1412_v47  ;;  %v2043_v47 = vpack.c.bf16 %v1574_v46, %v1573_v45 }
 0xd77   :  { %v1414_v40 = vsub.f32 %v2767_v5, %v1413_v39  ;;  %2044 = vmatpush3.bf16.msra.mxu0 %v2043_v47  ;;  %v1591_v39 = vld [vmem:[#allocation18 + $0xb0] sm:$0xff] }
 0xd79   :  { %v1415_v48 = vmul.f32 %v1414_v40, %v1414_v40 }
 0xd7b   :  { %1416 = vadd.xlane.f32.xlu1 %v1415_v48 }
 0xe08   :  { %v1417_v17 = vpop.xlane.xlu1 %1416 }
 0xe09   :  { %v1418_v18 = vmul.f32 0.0078125, %v1417_v17 }
 0xe0b   :  { %v1419_v19 = vadd.f32 1e-05, %v1418_v18 }
 0xe0d   :  { %2107 = vrsqrt.f32 %v1419_v19 }
 0xe17   :  { %v2108_v20 = vpop.eup %2107 }
 0xe18   :  { %v1421_v22 = vmul.f32 %v2108_v20, %v1414_v40  ;;  %v1592_v40 = vld [vmem:[#allocation18 + $0xb8] sm:$0xff] }
 0xe19   :  { %v2045_v48 = vpack.c.bf16 %v1592_v40, %v1591_v39 }
 0xe1a   :  { %v1428_v24 = vmul.f32 %v1711_v21, %v1421_v22 }
 0xe1b   :  { %2046 = vmatprep.subr.bf16.mxu0 %v2045_v48 }
 0xe1c   :  { %v1435_v25 = vadd.f32 %v1712_v23, %v1428_v24  ;;  %2048 = vmatpush3.bf16.msra.mxu0 %v2047_v51 }
 0xe1d   :  { %2050 = vmatprep.subr.bf16.mxu0 %v2049_v55 }
 0xe1e   :  { %1545 = vmatmul.mubr.f32.vlgmr.msra.gmra.mrb[18].mxu1 %v1435_v25 }
 0xe20   :  { %2052 = vmatpush3.bf16.msra.mxu0 %v2051_v60 }
 0xe21   :  { %2054 = vmatprep.subr.bf16.mxu0 %v2053_v61 }
 0xe24   :  { %2056 = vmatpush3.bf16.msra.mxu0 %v2055_v3 }
 0xe25   :  { %2058 = vmatprep.subr.bf16.mxu0 %v2057_v4 }
 0xe28   :  { %2060 = vmatpush3.bf16.msra.mxu0 %v2059_v10 }
 0xe29   :  { %2062 = vmatprep.subr.bf16.mxu0 %v2061_v11 }
 0xe2c   :  { %2064 = vmatpush3.bf16.msra.mxu0 %v2063_v14 }
 0xef1   :  { %v1546_v17 = vpop.f32.mrb[18].mxu1 }
 0xef2   :  { %v1547_v18 = vadd.f32 %v1546_v17, %v1473_v15  ;;  %v1548_v19 = vpop.f32.mrb[19].mxu1 }
 0xef3   :  { %v1549_v20 = vadd.f32 %v1548_v19, %v1477_v16 }
 0xef4   :  { %v1551_v21 = vmul.f32 %v1547_v18, %v1547_v18 }
 0xef5   :  { %v1552_v22 = vmul.f32 %v1549_v20, %v1549_v20 }
 0xef6   :  { %v1553_v23 = vmul.f32 %v1551_v21, %v1547_v18 }
 0xef7   :  { %v1554_v24 = vmul.f32 %v1552_v22, %v1549_v20 }
 0xef8   :  { %v1555_v25 = vmul.f32 0.044715, %v1553_v23 }
 0xef9   :  { %v1556_v26 = vmul.f32 0.044715, %v1554_v24 }
 0xefa   :  { %v1557_v29 = vadd.f32 %v1555_v25, %v1547_v18 }
 0xefb   :  { %v1558_v31 = vadd.f32 %v1556_v26, %v1549_v20 }
 0xefc   :  { %v1559_v32 = vmul.f32 0.7978846, %v1557_v29 }
 0xefd   :  { %v1560_v33 = vmul.f32 0.7978846, %v1558_v31 }
 0xefe   :  { %2109 = vtanh.f32 %v1559_v32 }
 0xeff   :  { %2111 = vtanh.f32 %v1560_v33 }
 0xf08   :  { %v2110_v30 = vpop.eup %2109 }
 0xf09   :  { %v2112_v34 = vpop.eup %2111  ;;  %v1563_v27 = vadd.f32 1.0, %v2110_v30 }
 0xf0a   :  { %v1564_v28 = vadd.f32 1.0, %v2112_v34 }
 0xf0b   :  { %v1565_v57 = vmul.f32 0.5, %v1563_v27 }
 0xf0c   :  { %v1566_v35 = vmul.f32 0.5, %v1564_v28 }
 0xf0d   :  { %v1567_v37 = vmul.f32 %v1565_v57, %v1547_v18 }
 0xf0e   :  { %v1568_v36 = vmul.f32 %v1566_v35, %v1549_v20 }
 0xf10   :  { %1665 = vmatprep.mubr.f32.mxu0 %v1568_v36 }
 0xf11   :  { %1666 = vmatmul.mubr.f32.vlgmr.msra.gmra.mrb[10].mxu0 %v1567_v37 }
 0xfe4   :  { %v1799_v38 = vpop.f32.mrb[10].mxu0 }
 0xfe5   :  { %v1800_v42 = vpop.f32.mrb[11].mxu0 }
 0xfe6   :  { %v1801_v43 = vadd.f32 %v1800_v42, %v1799_v38 }
 0xfe8   :  { %v1671_v44 = vadd.f32 %v1801_v43, %v2767_v5 }
 0xfea   :  { %v1679_v45 = vadd.f32 %v1713_v0, %v1671_v44 }
 0xfec   :  { %1680 = vst [vmem:[%s2792_s13] sm:$0xff] %v1679_v45 }
 0xfed   :  { %1685 = vsyncpa [#allocation3], 1 }
 0xfee   :  { %1686 = vsyncpa [#allocation5], 1 }
 0xfef   :  { %1687 = vsyncpa [#allocation8], 1 }
 0xff0   :  { %1688 = vsyncpa [#allocation11], 1 }
 0xff1   :  { %1689 = vsyncpa [#allocation14], 1 }
 0xff2   :  { %1690 = vsyncpa [#allocation17], 1 }
 0xff3   :  { %1691 = vsyncpa [#allocation20], 1 }

// kernel: closed_call.36
= control target key start
LH: loop header
LB: loop body
LE: loop exit
PB: predicated region body
PF: predicated region fallthrough
CT: control target
= control target key end

     0   :  { %v227_v1 = vmov 0.0|0.0   ;;  %vm228_vm0 = vmmov 0   ;;  %v229_v27 = vmov 0.0   ;;  %s323_s0 = inlined_call_operand.vmem [shape: f32[8,128], index: 0, kind: input, shape index: {}]   ;;  %s324_s3 = inlined_call_operand.vmem [shape: f32[128,128], index: 3, kind: input, shape index: {}]   ;;  %s325_s1 = inlined_call_operand.vmem [shape: f32[1,128], index: 1, kind: input, shape index: {}]   ;;  %s326_s2 = inlined_call_operand.vmem [shape: f32[1,128], index: 2, kind: input, shape index: {}]   ;;  %s327_s4 = inlined_call_operand.vmem [shape: f32[8,128], index: 4, kind: output, shape index: {0}]   ;;  %s328_s5 = inlined_call_operand.vmem [shape: f32[8,128], index: 5, kind: output, shape index: {1}]  }
   0x1   :  { %v19_v0 = vld [vmem:[%s323_s0] sm:$0xff]  ;;  %198 = vmatprep.subr.bf16.mxu0 %v227_v1  ;;  %v50_v3 = vld [vmem:[%s324_s3 + $0x8] sm:$0xff]  ;;  %v51_v5 = vld [vmem:[%s324_s3 + $0x10] sm:$0xff]  ;;  %195 = vmatprep.mubr.msk.f32.mxu0 %vm228_vm0, %v229_v27 }
   0x2   :  { %22 = vadd.xlane.f32.xlu0 %v19_v0  ;;  %v49_v2 = vld [vmem:[%s324_s3] sm:$0xff]  ;;  %v52_v6 = vld [vmem:[%s324_s3 + $0x18] sm:$0xff]  ;;  %v54_v9 = vld [vmem:[%s324_s3 + $0x28] sm:$0xff] }
   0x3   :  { %v199_v4 = vpack.c.bf16 %v50_v3, %v49_v2  ;;  %v202_v7 = vpack.c.bf16 %v52_v6, %v51_v5  ;;  %v53_v8 = vld [vmem:[%s324_s3 + $0x20] sm:$0xff]  ;;  %v55_v11 = vld [vmem:[%s324_s3 + $0x30] sm:$0xff]  ;;  %v56_v12 = vld [vmem:[%s324_s3 + $0x38] sm:$0xff] }
   0x4   :  { %v205_v10 = vpack.c.bf16 %v54_v9, %v53_v8  ;;  %v208_v13 = vpack.c.bf16 %v56_v12, %v55_v11  ;;  %v57_v14 = vld [vmem:[%s324_s3 + $0x40] sm:$0xff]  ;;  %v58_v15 = vld [vmem:[%s324_s3 + $0x48] sm:$0xff]  ;;  %v59_v17 = vld [vmem:[%s324_s3 + $0x50] sm:$0xff] }
   0x5   :  { %200 = vmatpush3.bf16.xpose.msra.mxu0 %v199_v4  ;;  %v211_v16 = vpack.c.bf16 %v58_v15, %v57_v14  ;;  %v60_v18 = vld [vmem:[%s324_s3 + $0x58] sm:$0xff]  ;;  %v61_v24 = vld [vmem:[%s324_s3 + $0x60] sm:$0xff]  ;;  %v62_v25 = vld [vmem:[%s324_s3 + $0x68] sm:$0xff] }
   0x6   :  { %201 = vmatprep.subr.bf16.mxu0 %v227_v1  ;;  %v214_v19 = vpack.c.bf16 %v60_v18, %v59_v17  ;;  %v217_v26 = vpack.c.bf16 %v62_v25, %v61_v24  ;;  %v63_v28 = vld [vmem:[%s324_s3 + $0x70] sm:$0xff]  ;;  %v64_v29 = vld [vmem:[%s324_s3 + $0x78] sm:$0xff]  ;;  %v144_v35 = vld [vmem:[%s325_s1] ss:$0 sm:$0xff] }
   0x7   :  { %v220_v30 = vpack.c.bf16 %v64_v29, %v63_v28  ;;  %v145_v37 = vld [vmem:[%s326_s2] ss:$0 sm:$0xff] }
   0xd   :  { %203 = vmatpush3.bf16.xpose.msra.mxu0 %v202_v7 }
   0xe   :  { %204 = vmatprep.subr.bf16.mxu0 %v227_v1 }
  0x15   :  { %206 = vmatpush3.bf16.xpose.msra.mxu0 %v205_v10 }
  0x16   :  { %207 = vmatprep.subr.bf16.mxu0 %v227_v1 }
  0x1d   :  { %209 = vmatpush3.bf16.xpose.msra.mxu0 %v208_v13 }
  0x1e   :  { %210 = vmatprep.subr.bf16.mxu0 %v227_v1 }
  0x25   :  { %212 = vmatpush3.bf16.xpose.msra.mxu0 %v211_v16 }
  0x26   :  { %213 = vmatprep.subr.bf16.mxu0 %v227_v1 }
  0x2d   :  { %215 = vmatpush3.bf16.xpose.msra.mxu0 %v214_v19 }
  0x2e   :  { %216 = vmatprep.subr.bf16.mxu0 %v227_v1 }
  0x35   :  { %218 = vmatpush3.bf16.xpose.msra.mxu0 %v217_v26 }
  0x36   :  { %219 = vmatprep.subr.bf16.mxu0 %v227_v1 }
  0x3d   :  { %221 = vmatpush3.bf16.xpose.msra.mxu0 %v220_v30 }
  0x8f   :  { %v23_v20 = vpop.xlane.xlu0 %22 }
  0x90   :  { %v25_v21 = vmul.f32 0.0078125, %v23_v20 }
  0x92   :  { %v26_v22 = vsub.f32 %v19_v0, %v25_v21 }
  0x94   :  { %v27_v23 = vmul.f32 %v26_v22, %v26_v22 }
  0x96   :  { %28 = vadd.xlane.f32.xlu0 %v27_v23 }
 0x123   :  { %v29_v31 = vpop.xlane.xlu0 %28 }
 0x124   :  { %v30_v32 = vmul.f32 0.0078125, %v29_v31 }
 0x126   :  { %v31_v33 = vadd.f32 1e-05, %v30_v32 }
 0x128   :  { %225 = vrsqrt.f32 %v31_v33 }
 0x132   :  { %v226_v34 = vpop.eup %225 }
 0x133   :  { %v33_v36 = vmul.f32 %v226_v34, %v26_v22 }
 0x135   :  { %v40_v38 = vmul.f32 %v144_v35, %v33_v36 }
 0x137   :  { %v47_v39 = vadd.f32 %v145_v37, %v40_v38 }
 0x139   :  { %48 = vst [vmem:[%s327_s4] sm:$0xff] %v47_v39  ;;  %196 = vmatmul.mubr.f32.vlgmr.msra.gmra.mrb[0].mxu0 %v47_v39 }
 0x20c   :  { %v131_v40 = vpop.f32.mrb[0].mxu0 }
 0x20d   :  { %135 = vst [vmem:[%s328_s5] sm:$0xff] %v131_v40  ;;  %v197_v41 = vpop.f32.mrb[1].mxu0 }

// kernel: closed_call.34
= control target key start
LH: loop header
LB: loop body
LE: loop exit
PB: predicated region body
PF: predicated region fallthrough
CT: control target
= control target key end

     0   :  { %v3486_v3 = vmov 0.0|0.0   ;;  %v3487_v57 = vmov 0.0   ;;  %vm3488_vm0 = vmmov 0   ;;  %vm337_vm1 = vcmask 261120   ;;  %s3492_s28 = smov 32   ;;  %s4478_s0 = inlined_call_operand.vmem [shape: f32[8,128], index: 0, kind: input, shape index: {}]   ;;  %s4479_s4 = inlined_call_operand.vmem [shape: f32[128,384], index: 4, kind: input, shape index: {}]   ;;  %s4480_s2 = inlined_call_operand.vmem [shape: f32[1,128], index: 2, kind: input, shape index: {}]   ;;  %s4481_s3 = inlined_call_operand.vmem [shape: f32[1,128], index: 3, kind: input, shape index: {}]   ;;  %s4482_s5 = inlined_call_operand.vmem [shape: f32[1,384], index: 5, kind: input, shape index: {}]   ;;  %s4483_s6 = inlined_call_operand.vmem [shape: f32[128,128], index: 6, kind: input, shape index: {}]   ;;  %s4484_s7 = inlined_call_operand.vmem [shape: f32[1,128], index: 7, kind: input, shape index: {}]   ;;  %s4485_s12 = inlined_call_operand.vmem [shape: f32[128,256], index: 12, kind: input, shape index: {}]   ;;  %s4486_s10 = inlined_call_operand.vmem [shape: f32[128,128], index: 10, kind: input, shape index: {}]   ;;  %s4487_s1 = inlined_call_operand.vmem [shape: f32[8,128], index: 1, kind: input, shape index: {}]   ;;  %s4488_s8 = inlined_call_operand.vmem [shape: f32[1,128], index: 8, kind: input, shape index: {}]   ;;  %s4489_s9 = inlined_call_operand.vmem [shape: f32[1,128], index: 9, kind: input, shape index: {}]   ;;  %s4490_s13 = inlined_call_operand.vmem [shape: f32[1,256], index: 13, kind: input, shape index: {}]   ;;  %s4491_s11 = inlined_call_operand.vmem [shape: f32[1,128], index: 11, kind: input, shape index: {}]   ;;  %s4492_s14 = inlined_call_operand.vmem [shape: f32[128,128], index: 14, kind: input, shape index: {}]   ;;  %s4493_s15 = inlined_call_operand.vmem [shape: f32[1,128], index: 15, kind: input, shape index: {}]   ;;  %s4494_s18 = inlined_call_operand.vmem [shape: f32[128,256], index: 18, kind: input, shape index: {}]   ;;  %s4495_s16 = inlined_call_operand.vmem [shape: f32[1,128], index: 16, kind: input, shape index: {}]   ;;  %s4496_s17 = inlined_call_operand.vmem [shape: f32[1,128], index: 17, kind: input, shape index: {}]   ;;  %s4497_s20 = inlined_call_operand.vmem [shape: f32[256,128], index: 20, kind: input, shape index: {}]   ;;  %s4498_s19 = inlined_call_operand.vmem [shape: f32[1,256], index: 19, kind: input, shape index: {}]   ;;  %s4499_s21 = inlined_call_operand.vmem [shape: f32[1,128], index: 21, kind: input, shape index: {}]   ;;  %s4500_s22 = inlined_call_operand.vmem [shape: f32[8,128], index: 22, kind: output, shape index: {}]  }
   0x1   :  { %4503 = sst [smem:[#allocation2_spill]] %s4478_s0  ;;  %3245 = vmatprep.subr.bf16.mxu1 %v3486_v3  ;;  %230 = vmatprep.mubr.f32.mxu0 %v3487_v57  ;;  %vm416_vm3 = vcmask 64512  }
   0x2   :  { %4504 = sst [smem:[#allocation3_spill]] %s4479_s4  ;;  %s4510_s29 = sld [smem:[#allocation2_spill]]  ;;  %3007 = vmatprep.mubr.msk.f32.mxu1 %vm3488_vm0, %v3487_v57 }
   0x3   :  { %4505 = sst [smem:[#allocation4_spill]] %s4480_s2  ;;  %s4511_s0 = sld [smem:[#allocation3_spill]] }
   0x4   :  { %4506 = sst [smem:[#allocation5_spill]] %s4481_s3 }
   0x5   :  { %4507 = sst [smem:[#allocation6_spill]] %s4482_s5  ;;  %s4513_s23 = sld [smem:[#allocation5_spill]] }
   0x6   :  { %4508 = sst [smem:[#allocation7_spill]] %s4483_s6  ;;  %s4514_s24 = sld [smem:[#allocation6_spill]] }
   0x7   :  { %4509 = sst [smem:[#allocation8_spill]] %s4484_s7  ;;  %s3489_s7 = smov 96  }
   0x8   :  { %v3611_v0 = vld [vmem:[%s4510_s29] sm:$0xff]  ;;  %s4512_s29 = sld [smem:[#allocation4_spill]]  ;;  %s4515_s2 = sld [smem:[#allocation7_spill]] }
   0x9   :  { %75 = vadd.xlane.f32.xlu0 %v3611_v0  ;;  %v102_v1 = vld [vmem:[%s4511_s0 + $0x8] sm:$0xff]  ;;  %v105_v2 = vld [vmem:[%s4511_s0 + $0x20] sm:$0xff]  ;;  %v104_v6 = vld [vmem:[%s4511_s0 + $0x18] sm:$0xff]  ;;  %s3491_s5 = smov 64   ;;  %s4516_s3 = sld [smem:[#allocation8_spill]] }
   0xa   :  { %v101_v4 = vld [vmem:[%s4511_s0] sm:$0xff]  ;;  %v3213_v5 = vpack.c.bf16 %v105_v2, %v102_v1  ;;  %v103_v7 = vld [vmem:[%s4511_s0 + $0x10] sm:$0xff]  ;;  %v106_v8 = vld [vmem:[%s4511_s0 + $0x28] sm:$0xff] }
   0xb   :  { %v3215_v9 = vpack.c.bf16 %v104_v6, %v101_v4  ;;  %v3246_v10 = vpack.c.bf16 %v106_v8, %v103_v7  ;;  %v108_v11 = vld [vmem:[%s4511_s0 + $0x38] sm:$0xff]  ;;  %v111_v12 = vld [vmem:[%s4511_s0 + $0x50] sm:$0xff]  ;;  %v110_v15 = vld [vmem:[%s4511_s0 + $0x48] sm:$0xff] }
   0xc   :  { %v107_v13 = vld [vmem:[%s4511_s0 + $0x30] sm:$0xff]  ;;  %3214 = vmatprep.subr.bf16.mxu0 %v3213_v5  ;;  %v3217_v14 = vpack.c.bf16 %v111_v12, %v108_v11  ;;  %v109_v16 = vld [vmem:[%s4511_s0 + $0x40] sm:$0xff]  ;;  %v112_v17 = vld [vmem:[%s4511_s0 + $0x58] sm:$0xff] }
   0xd   :  { %3216 = vmatpush1.bf16.msra.mxu0 %v3215_v9  ;;  %3247 = vmatpush3.bf16.msra.mxu1 %v3246_v10  ;;  %v3219_v18 = vpack.c.bf16 %v110_v15, %v107_v13  ;;  %v3249_v19 = vpack.c.bf16 %v112_v17, %v109_v16  ;;  %v114_v20 = vld [vmem:[%s4511_s0 + $0x68] sm:$0xff]  ;;  %v117_v21 = vld [vmem:[%s4511_s0 + $0x80] sm:$0xff]  ;;  %v116_v24 = vld [vmem:[%s4511_s0 + $0x78] sm:$0xff] }
   0xe   :  { %v113_v22 = vld [vmem:[%s4511_s0 + $0x60] sm:$0xff]  ;;  %3218 = vmatprep.subr.bf16.mxu0 %v3217_v14  ;;  %3248 = vmatprep.subr.bf16.mxu1 %v3486_v3  ;;  %v3221_v23 = vpack.c.bf16 %v117_v21, %v114_v20  ;;  %v115_v25 = vld [vmem:[%s4511_s0 + $0x70] sm:$0xff]  ;;  %v118_v26 = vld [vmem:[%s4511_s0 + $0x88] sm:$0xff] }
   0xf   :  { %v3223_v27 = vpack.c.bf16 %v116_v24, %v113_v22  ;;  %v3252_v28 = vpack.c.bf16 %v118_v26, %v115_v25  ;;  %v120_v33 = vld [vmem:[%s4511_s0 + $0x98] sm:$0xff]  ;;  %v123_v34 = vld [vmem:[%s4511_s0 + $0xb0] sm:$0xff]  ;;  %v122_v37 = vld [vmem:[%s4511_s0 + $0xa8] sm:$0xff]  ;;  %v151_v26 = vlaneseq }
  0x10   :  { %v3225_v35 = vpack.c.bf16 %v123_v34, %v120_v33  ;;  %v119_v36 = vld [vmem:[%s4511_s0 + $0x90] sm:$0xff]  ;;  %v121_v38 = vld [vmem:[%s4511_s0 + $0xa0] sm:$0xff]  ;;  %v124_v40 = vld [vmem:[%s4511_s0 + $0xb8] sm:$0xff] }
  0x11   :  { %3220 = vmatpush1.bf16.msra.mxu0 %v3219_v18  ;;  %3250 = vmatpush3.bf16.msra.mxu1 %v3249_v19  ;;  %v3227_v39 = vpack.c.bf16 %v122_v37, %v119_v36  ;;  %v3255_v41 = vpack.c.bf16 %v124_v40, %v121_v38  ;;  %v126_v42 = vld [vmem:[%s4511_s0 + $0xc8] sm:$0xff]  ;;  %v129_v43 = vld [vmem:[%s4511_s0 + $0xe0] sm:$0xff]  ;;  %v128_v46 = vld [vmem:[%s4511_s0 + $0xd8] sm:$0xff] }
  0x12   :  { %3222 = vmatprep.subr.bf16.mxu0 %v3221_v23  ;;  %3251 = vmatprep.subr.bf16.mxu1 %v3486_v3  ;;  %v3229_v44 = vpack.c.bf16 %v129_v43, %v126_v42  ;;  %v125_v45 = vld [vmem:[%s4511_s0 + $0xc0] sm:$0xff]  ;;  %v127_v47 = vld [vmem:[%s4511_s0 + $0xd0] sm:$0xff]  ;;  %v130_v49 = vld [vmem:[%s4511_s0 + $0xe8] sm:$0xff]  ;;  %v327_v42 = vand.u32 127, %v151_v26 }
  0x13   :  { %v3231_v48 = vpack.c.bf16 %v128_v46, %v125_v45  ;;  %v132_v50 = vld [vmem:[%s4511_s0 + $0xf8] sm:$0xff]  ;;  %v135_v51 = vld [vmem:[%s4511_s0 + $0x110] sm:$0xff]  ;;  %v3258_v52 = vpack.c.bf16 %v130_v49, %v127_v47  ;;  %v134_v55 = vld [vmem:[%s4511_s0 + $0x108] sm:$0xff] }
  0x14   :  { %v3233_v53 = vpack.c.bf16 %v135_v51, %v132_v50  ;;  %v131_v54 = vld [vmem:[%s4511_s0 + $0xf0] sm:$0xff]  ;;  %v133_v56 = vld [vmem:[%s4511_s0 + $0x100] sm:$0xff]  ;;  %v136_v59 = vld [vmem:[%s4511_s0 + $0x118] sm:$0xff] }
  0x15   :  { %3224 = vmatpush1.bf16.msra.mxu0 %v3223_v27  ;;  %3253 = vmatpush3.bf16.msra.mxu1 %v3252_v28  ;;  %v3235_v58 = vpack.c.bf16 %v134_v55, %v131_v54  ;;  %v138_v60 = vld [vmem:[%s4511_s0 + $0x128] sm:$0xff]  ;;  %v141_v61 = vld [vmem:[%s4511_s0 + $0x140] sm:$0xff]  ;;  %v3261_v62 = vpack.c.bf16 %v136_v59, %v133_v56  ;;  %v140_v2 = vld [vmem:[%s4511_s0 + $0x138] sm:$0xff]  ;;  %v152_v27 = vshrl.u32 %v151_v26, 7 }
  0x16   :  { %3254 = vmatprep.subr.bf16.mxu1 %v3486_v3  ;;  %3226 = vmatprep.subr.bf16.mxu0 %v3225_v35  ;;  %v3237_v63 = vpack.c.bf16 %v141_v61, %v138_v60  ;;  %v137_v1 = vld [vmem:[%s4511_s0 + $0x120] sm:$0xff]  ;;  %v139_v4 = vld [vmem:[%s4511_s0 + $0x130] sm:$0xff]  ;;  %v142_v5 = vld [vmem:[%s4511_s0 + $0x148] sm:$0xff] }
  0x17   :  { %v144_v6 = vld [vmem:[%s4511_s0 + $0x158] sm:$0xff]  ;;  %v147_v7 = vld [vmem:[%s4511_s0 + $0x170] sm:$0xff]  ;;  %v3239_v8 = vpack.c.bf16 %v140_v2, %v137_v1  ;;  %v3264_v9 = vpack.c.bf16 %v142_v5, %v139_v4  ;;  %v146_v12 = vld [vmem:[%s4511_s0 + $0x168] sm:$0xff]  ;;  %v3787_v28 = vsub.s32 1, %v152_v27  ;;  %vm328_vm2 = vcmp.ge.s32.totalorder %v152_v27, %v327_v42 }
  0x18   :  { %v3241_v10 = vpack.c.bf16 %v147_v7, %v144_v6  ;;  %v143_v11 = vld [vmem:[%s4511_s0 + $0x150] sm:$0xff]  ;;  %v145_v13 = vld [vmem:[%s4511_s0 + $0x160] sm:$0xff]  ;;  %v148_v14 = vld [vmem:[%s4511_s0 + $0x178] sm:$0xff] }
  0x19   :  { %3228 = vmatpush1.bf16.msra.mxu0 %v3227_v39  ;;  %3256 = vmatpush3.bf16.msra.mxu1 %v3255_v41  ;;  %v3243_v15 = vpack.c.bf16 %v146_v12, %v143_v11  ;;  %v3267_v16 = vpack.c.bf16 %v148_v14, %v145_v13  ;;  %v2792_v21 = vld [vmem:[%s4512_s29] ss:$0 sm:$0xff]  ;;  %v308_v56 = vld [vmem:[%s4515_s2 + $0x8] sm:$0xff]  ;;  %v310_v60 = vld [vmem:[%s4515_s2 + $0x18] sm:$0xff] }
  0x1a   :  { %3257 = vmatprep.subr.bf16.mxu1 %v3486_v3  ;;  %3230 = vmatprep.subr.bf16.mxu0 %v3229_v44  ;;  %v2793_v23 = vld [vmem:[%s4513_s23] ss:$0 sm:$0xff]  ;;  %v3490_v44 = vmov -1e+09  }
  0x1b   :  { %v3813_v45 = vsel %vm328_vm2, 0.0, %v3490_v44  ;;  %v307_v55 = vld [vmem:[%s4515_s2] sm:$0xff] }
  0x1c   :  { %v3270_v59 = vpack.c.bf16 %v308_v56, %v307_v55 }
  0x1d   :  { %3232 = vmatpush1.bf16.msra.mxu0 %v3231_v48  ;;  %3259 = vmatpush3.bf16.msra.mxu1 %v3258_v52 }
  0x1e   :  { %3234 = vmatprep.subr.bf16.mxu0 %v3233_v53  ;;  %3260 = vmatprep.subr.bf16.mxu1 %v3486_v3 }
  0x21   :  { %3236 = vmatpush1.bf16.msra.mxu0 %v3235_v58  ;;  %3262 = vmatpush3.bf16.msra.mxu1 %v3261_v62  ;;  %v309_v58 = vld [vmem:[%s4515_s2 + $0x10] sm:$0xff] }
  0x22   :  { %3238 = vmatprep.subr.bf16.mxu0 %v3237_v63  ;;  %3263 = vmatprep.subr.bf16.mxu1 %v3486_v3  ;;  %v3273_v61 = vpack.c.bf16 %v310_v60, %v309_v58 }
  0x25   :  { %3240 = vmatpush1.bf16.msra.mxu0 %v3239_v8  ;;  %3265 = vmatpush3.bf16.msra.mxu1 %v3264_v9 }
  0x26   :  { %3242 = vmatprep.subr.bf16.mxu0 %v3241_v10  ;;  %3266 = vmatprep.subr.bf16.mxu1 %v3486_v3 }
  0x29   :  { %3244 = vmatpush1.bf16.msra.mxu0 %v3243_v15  ;;  %3268 = vmatpush3.bf16.msra.mxu1 %v3267_v16 }
  0x2a   :  { %3269 = vmatprep.subr.bf16.mxu0 %v3486_v3  ;;  %3010 = vmatprep.subr.mxu1 %v3487_v57 }
  0x96   :  { %v76_v29 = vpop.xlane.xlu0 %75 }
  0x97   :  { %v78_v30 = vmul.f32 0.0078125, %v76_v29  ;;  %v149_v29 = vld [vmem:[%s4514_s24] sm:$0x7] }
  0x99   :  { %v3673_v31 = vsub.f32 %v3611_v0, %v78_v30  ;;  %v3792_v30 = vsub.s32 0, %v152_v27 }
  0x9b   :  { %v80_v32 = vmul.f32 %v3673_v31, %v3673_v31  ;;  %v154_v35 = vrot.slane %v149_v29, %v3792_v30 }
  0x9d   :  { %81 = vadd.xlane.f32.xlu0 %v80_v32  ;;  %v158_v32 = vrot.slane %v149_v29, %v3787_v28 }
 0x12a   :  { %v82_v17 = vpop.xlane.xlu0 %81 }
 0x12b   :  { %v83_v18 = vmul.f32 0.0078125, %v82_v17  ;;  %v311_v17 = vld [vmem:[%s4515_s2 + $0x20] sm:$0xff] }
 0x12d   :  { %v84_v19 = vadd.f32 1e-05, %v83_v18  ;;  %v312_v18 = vld [vmem:[%s4515_s2 + $0x28] sm:$0xff] }
 0x12f   :  { %3444 = vrsqrt.f32 %v84_v19  ;;  %v313_v19 = vld [vmem:[%s4515_s2 + $0x30] sm:$0xff] }
 0x139   :  { %v3445_v20 = vpop.eup %3444 }
 0x13a   :  { %v86_v22 = vmul.f32 %v3445_v20, %v3673_v31  ;;  %v161_v31 = vsub.s32 2, %v152_v27  ;;  %v3276_v20 = vpack.c.bf16 %v312_v18, %v311_v17  ;;  %v322_v18 = vld [vmem:[%s4515_s2 + $0x78] sm:$0xff] }
 0x13c   :  { %v93_v24 = vmul.f32 %v2792_v21, %v86_v22  ;;  %v162_v38 = vrot.slane %v149_v29, %v161_v31  ;;  %v314_v21 = vld [vmem:[%s4515_s2 + $0x38] sm:$0xff] }
 0x13d   :  { %v3279_v22 = vpack.c.bf16 %v314_v21, %v313_v19 }
 0x13e   :  { %v100_v25 = vadd.f32 %v2793_v23, %v93_v24 }
 0x140   :  { %231 = vmatmul.mubr.f32.vlgmr.msra.gmra.mrb[0].mxu0 %v100_v25  ;;  %3008 = vmatmul.mubr.f32.vlgmr.msra.gmra.mrb[0].mxu1 %v100_v25 }
 0x141   :  { %3012 = vmatprep.mubr.msk.f32.mxu1 %vm3488_vm0, %v3487_v57  ;;  %3028 = vmatprep.mubr.msk.f32.mxu0 %vm3488_vm0, %v3487_v57 }
 0x142   :  { %3271 = vmatpush3.bf16.msra.mxu0 %v3270_v59 }
 0x143   :  { %3272 = vmatprep.subr.bf16.mxu0 %v3486_v3 }
 0x146   :  { %3274 = vmatpush3.bf16.msra.mxu0 %v3273_v61 }
 0x147   :  { %3275 = vmatprep.subr.bf16.mxu0 %v3486_v3 }
 0x213   :  { %v232_v33 = vpop.f32.mrb[0].mxu0  ;;  %v303_v34 = vpop.f32.mrb[0].mxu1 }
 0x214   :  { %v234_v36 = vpop.f32.mrb[1].mxu0  ;;  %v3009_v37 = vpop.f32.mrb[1].mxu1  ;;  %v3802_v40 = vadd.f32 %v232_v33, %v154_v35  ;;  %v3805_v41 = vadd.f32 %v303_v34, %v162_v38 }
 0x215   :  { %v3796_v39 = vadd.f32 %v234_v36, %v158_v32 }
 0x217   :  { %577 = vrot.lane.b32.xlu0 %v3796_v39, %s3489_s7  ;;  %3011 = vmatpush3.xpose.msk.msra.mxu1 %vm337_vm1, %v3796_v39 }
 0x218   :  { %3015 = vmatprep.subr.mxu1 %v3487_v57 }
 0x21a   :  { %3013 = vmatmul.mubr.msk.f32.vlgmr.msra.gmra.mrb[2].mxu1 %vm337_vm1, %v3802_v40 }
 0x21b   :  { %3016 = vmatpush3.msra.mxu1 %v3805_v41  ;;  %3017 = vmatprep.mubr.msk.f32.mxu1 %vm3488_vm0, %v3487_v57 }
 0x21c   :  { %3031 = vmatprep.subr.mxu1 %v3487_v57 }
 0x289   :  { %v578_v2 = vpop.permute.xlu0 %577 }
 0x2ed   :  { %v410_v43 = vpop.f32.mrb[2].mxu1 }
 0x2ee   :  { %v414_v46 = vmul.f32 0.17677669, %v410_v43  ;;  %v3014_v47 = vpop.f32.mrb[3].mxu1 }
 0x2f0   :  { %v415_v48 = vadd.f32 %v414_v46, %v3813_v45 }
 0x2f2   :  { %v417_v49 = vsel %vm416_vm3, %v415_v48, -inf }
 0x2f3   :  { %418 = vmax.xlane.f32.xlu1 %v417_v49  ;;  %v315_v49 = vld [vmem:[%s4515_s2 + $0x40] sm:$0xff] }
 0x380   :  { %v419_v50 = vpop.xlane.xlu1 %418 }
 0x381   :  { %v420_v51 = vsub.f32 %v415_v48, %v419_v50 }
 0x383   :  { %v421_v52 = vmul.f32 1.442695, %v420_v51  ;;  %v318_v51 = vld [vmem:[%s4515_s2 + $0x58] sm:$0xff] }
 0x385   :  { %3446 = vpow2.f32 %v421_v52 }
 0x38f   :  { %v3447_v53 = vpop.eup %3446 }
 0x390   :  { %v423_v54 = vsel %vm416_vm3, %v3447_v53, 0.0 }
 0x391   :  { %424 = vadd.xlane.f32.xlu1 %v423_v54 }
 0x3a2   :  { %575 = vrot.lane.b32.xlu1 %v3802_v40, %s3489_s7 }
 0x41e   :  { %v425_v62 = vpop.xlane.xlu1 %424 }
 0x41f   :  { %3448 = vrcp.f32 %v425_v62 }
 0x422   :  { %v576_v4 = vpop.permute.xlu1 %575 }
 0x429   :  { %v3449_v63 = vpop.eup %3448 }
 0x42a   :  { %v427_v1 = vmul.f32 %v3449_v63, %v3447_v53  ;;  %v2794_v53 = vld [vmem:[%s4516_s3] ss:$0 sm:$0xff] }
 0x42c   :  { %3018 = vmatmul.mubr.msk.f32.vlgmr.msra.gmra.mrb[4].mxu1 %vm416_vm3, %v427_v1 }
 0x42d   :  { %3032 = vmatpush3.xpose.msk.msra.mxu1 %vm337_vm1, %v578_v2  ;;  %3033 = vmatprep.mubr.msk.f32.mxu1 %vm3488_vm0, %v3487_v57 }
 0x42e   :  { %3036 = vmatprep.subr.mxu1 %v3487_v57 }
 0x430   :  { %3034 = vmatmul.mubr.msk.f32.vlgmr.msra.gmra.mrb[6].mxu1 %vm337_vm1, %v576_v4 }
 0x431   :  { %3038 = vmatprep.mubr.msk.f32.mxu1 %vm3488_vm0, %v3487_v57 }
 0x4ff   :  { %v497_v5 = vpop.f32.mrb[4].mxu1 }
 0x500   :  { %v3019_v6 = vpop.f32.mrb[5].mxu1  ;;  %3029 = vmatmul.mubr.msk.f32.vlgmr.msra.gmra.mrb[2].mxu0 %vm337_vm1, %v497_v5 }
 0x501   :  { %3049 = vmatprep.mubr.msk.f32.mxu0 %vm3488_vm0, %v3487_v57  ;;  %3277 = vmatpush3.bf16.msra.mxu0 %v3276_v20 }
 0x502   :  { %3278 = vmatprep.subr.bf16.mxu0 %v3486_v3 }
 0x503   :  { %v649_v7 = vpop.f32.mrb[6].mxu1 }
 0x504   :  { %v653_v8 = vmul.f32 0.17677669, %v649_v7  ;;  %v3035_v9 = vpop.f32.mrb[7].mxu1 }
 0x505   :  { %3280 = vmatpush3.bf16.msra.mxu0 %v3279_v22 }
 0x506   :  { %v654_v10 = vadd.f32 %v653_v8, %v3813_v45  ;;  %3281 = vmatprep.subr.bf16.mxu0 %v3486_v3 }
 0x508   :  { %v655_v11 = vsel %vm416_vm3, %v654_v10, -inf }
 0x509   :  { %656 = vmax.xlane.f32.xlu1 %v655_v11 }
 0x51a   :  { %819 = vrot.lane.b32.xlu1 %v3796_v39, %s3491_s5 }
 0x51e   :  { %817 = vrot.lane.b32.xlu1 %v3802_v40, %s3491_s5 }
 0x596   :  { %v657_v12 = vpop.xlane.xlu1 %656 }
 0x597   :  { %v658_v13 = vsub.f32 %v654_v10, %v657_v12 }
 0x599   :  { %v659_v14 = vmul.f32 1.442695, %v658_v13 }
 0x59a   :  { %v820_v29 = vpop.permute.xlu1 %819 }
 0x59b   :  { %3450 = vpow2.f32 %v659_v14 }
 0x59e   :  { %v818_v32 = vpop.permute.xlu1 %817 }
 0x5a5   :  { %v3451_v15 = vpop.eup %3450 }
 0x5a6   :  { %v661_v16 = vsel %vm416_vm3, %v3451_v15, 0.0 }
 0x5a7   :  { %662 = vadd.xlane.f32.xlu0 %v661_v16  ;;  %v321_v16 = vld [vmem:[%s4515_s2 + $0x70] sm:$0xff] }
 0x5a8   :  { %v3291_v19 = vpack.c.bf16 %v322_v18, %v321_v16  ;;  %v1438_v16 = vld [vmem:[%s4485_s12 + $0x90] sm:$0xff]  ;;  %v1441_v18 = vld [vmem:[%s4485_s12 + $0xa8] sm:$0xff] }
 0x5bd   :  { %667 = vrot.lane.b32.xlu0 %v3805_v41, %s3489_s7 }
 0x5d3   :  { %v570_v23 = vpop.f32.mrb[2].mxu0 }
 0x5d4   :  { %v3030_v24 = vpop.f32.mrb[3].mxu0  ;;  %v574_v54 = vadd.f32 %v2794_v53, %v570_v23  ;;  %v1330_v53 = vld [vmem:[%s4486_s10 + $0x18] sm:$0xff] }
 0x634   :  { %v663_v25 = vpop.xlane.xlu0 %662 }
 0x635   :  { %3452 = vrcp.f32 %v663_v25 }
 0x638   :  { %v668_v26 = vpop.permute.xlu0 %667 }
 0x639   :  { %3037 = vmatpush3.msra.mxu1 %v668_v26 }
 0x63a   :  { %3052 = vmatprep.subr.mxu1 %v3487_v57 }
 0x63f   :  { %v3453_v27 = vpop.eup %3452 }
 0x640   :  { %v665_v31 = vmul.f32 %v3453_v27, %v3451_v15 }
 0x642   :  { %3039 = vmatmul.mubr.msk.f32.vlgmr.msra.gmra.mrb[8].mxu1 %vm416_vm3, %v665_v31 }
 0x643   :  { %3053 = vmatpush3.xpose.msk.msra.mxu1 %vm337_vm1, %v820_v29  ;;  %3054 = vmatprep.mubr.msk.f32.mxu1 %vm3488_vm0, %v3487_v57 }
 0x644   :  { %3057 = vmatprep.subr.mxu1 %v3487_v57 }
 0x646   :  { %3055 = vmatmul.mubr.msk.f32.vlgmr.msra.gmra.mrb[10].mxu1 %vm337_vm1, %v818_v32 }
 0x647   :  { %3059 = vmatprep.mubr.msk.f32.mxu1 %vm3488_vm0, %v3487_v57 }
 0x715   :  { %v739_v33 = vpop.f32.mrb[8].mxu1 }
 0x716   :  { %v3040_v34 = vpop.f32.mrb[9].mxu1  ;;  %3050 = vmatmul.mubr.msk.f32.vlgmr.msra.gmra.mrb[4].mxu0 %vm337_vm1, %v739_v33 }
 0x717   :  { %3070 = vmatprep.mubr.msk.f32.mxu0 %vm3488_vm0, %v3487_v57  ;;  %v1421_v34 = vld [vmem:[%s4485_s12 + $0x8] sm:$0xff] }
 0x719   :  { %v891_v35 = vpop.f32.mrb[10].mxu1 }
 0x71a   :  { %v895_v36 = vmul.f32 0.17677669, %v891_v35  ;;  %v3056_v37 = vpop.f32.mrb[11].mxu1  ;;  %v1423_v35 = vld [vmem:[%s4485_s12 + $0x18] sm:$0xff] }
 0x71b   :  { %v3317_v37 = vpack.c.bf16 %v1423_v35, %v1421_v34  ;;  %v1338_v34 = vld [vmem:[%s4486_s10 + $0x58] sm:$0xff]  ;;  %v1444_v35 = vld [vmem:[%s4485_s12 + $0xc0] sm:$0xff] }
 0x71c   :  { %v896_v38 = vadd.f32 %v895_v36, %v3813_v45  ;;  %v1420_v36 = vld [vmem:[%s4485_s12] sm:$0xff] }
 0x71e   :  { %v897_v42 = vsel %vm416_vm3, %v896_v38, -inf }
 0x71f   :  { %898 = vmax.xlane.f32.xlu1 %v897_v42  ;;  %v1427_v42 = vld [vmem:[%s4485_s12 + $0x38] sm:$0xff] }
 0x730   :  { %1060 = vrot.lane.b32.xlu1 %v3796_v39, %s3492_s28  ;;  %v316_v39 = vld [vmem:[%s4515_s2 + $0x48] sm:$0xff] }
 0x731   :  { %v3282_v50 = vpack.c.bf16 %v316_v39, %v315_v49  ;;  %v1426_v39 = vld [vmem:[%s4485_s12 + $0x30] sm:$0xff] }
 0x733   :  { %3283 = vmatpush3.bf16.msra.mxu0 %v3282_v50  ;;  %v1431_v50 = vld [vmem:[%s4485_s12 + $0x58] sm:$0xff] }
 0x734   :  { %1058 = vrot.lane.b32.xlu1 %v3802_v40, %s3492_s28  ;;  %v317_v40 = vld [vmem:[%s4515_s2 + $0x50] sm:$0xff]  ;;  %3284 = vmatprep.subr.bf16.mxu0 %v3486_v3 }
 0x735   :  { %v3285_v52 = vpack.c.bf16 %v318_v51, %v317_v40  ;;  %v1429_v40 = vld [vmem:[%s4485_s12 + $0x48] sm:$0xff] }
 0x737   :  { %3286 = vmatpush3.bf16.msra.mxu0 %v3285_v52  ;;  %v1329_v52 = vld [vmem:[%s4486_s10 + $0x10] sm:$0xff] }
 0x738   :  { %3287 = vmatprep.subr.bf16.mxu0 %v3486_v3 }
 0x7ac   :  { %v899_v43 = vpop.xlane.xlu1 %898 }
 0x7ad   :  { %v900_v44 = vsub.f32 %v896_v38, %v899_v43  ;;  %v1425_v38 = vld [vmem:[%s4485_s12 + $0x28] sm:$0xff] }
 0x7af   :  { %v901_v46 = vmul.f32 1.442695, %v900_v44  ;;  %v3321_v44 = vpack.c.bf16 %v1427_v42, %v1425_v38  ;;  %v1451_v38 = vld [vmem:[%s4485_s12 + $0xf8] sm:$0xff] }
 0x7b0   :  { %v1061_v62 = vpop.permute.xlu1 %1060 }
 0x7b1   :  { %3454 = vpow2.f32 %v901_v46  ;;  %v1327_v46 = vld [vmem:[%s4486_s10] sm:$0xff] }
 0x7b4   :  { %v1059_v1 = vpop.permute.xlu1 %1058 }
 0x7bb   :  { %v3455_v47 = vpop.eup %3454 }
 0x7bc   :  { %v903_v48 = vsel %vm416_vm3, %v3455_v47, 0.0 }
 0x7bd   :  { %904 = vadd.xlane.f32.xlu0 %v903_v48  ;;  %v1424_v48 = vld [vmem:[%s4485_s12 + $0x20] sm:$0xff] }
 0x7be   :  { %v3323_v51 = vpack.c.bf16 %v1426_v39, %v1424_v48  ;;  %v1450_v48 = vld [vmem:[%s4485_s12 + $0xf0] sm:$0xff] }
 0x7d3   :  { %908 = vrot.lane.b32.xlu0 %v3805_v41, %s3491_s5 }
 0x7e9   :  { %v812_v55 = vpop.f32.mrb[4].mxu0 }
 0x7ea   :  { %v816_v56 = vadd.f32 %v812_v55, %v574_v54  ;;  %v3051_v58 = vpop.f32.mrb[5].mxu0  ;;  %v3325_v54 = vpack.c.bf16 %v1431_v50, %v1429_v40  ;;  %v3297_v55 = vpack.c.bf16 %v1330_v53, %v1329_v52  ;;  %v1341_v40 = vld [vmem:[%s4486_s10 + $0x70] sm:$0xff]  ;;  %v1342_v50 = vld [vmem:[%s4486_s10 + $0x78] sm:$0xff]  ;;  %v72_v52 = vld [vmem:[%s4487_s1] sm:$0xff] }
 0x7eb   :  { %v1430_v58 = vld [vmem:[%s4485_s12 + $0x50] sm:$0xff] }
 0x84a   :  { %v905_v59 = vpop.xlane.xlu0 %904 }
 0x84b   :  { %3456 = vrcp.f32 %v905_v59  ;;  %v1433_v59 = vld [vmem:[%s4485_s12 + $0x68] sm:$0xff] }
 0x84e   :  { %v909_v60 = vpop.permute.xlu0 %908 }
 0x84f   :  { %3058 = vmatpush3.msra.mxu1 %v909_v60  ;;  %v1435_v60 = vld [vmem:[%s4485_s12 + $0x78] sm:$0xff] }
 0x850   :  { %3073 = vmatprep.subr.mxu1 %v3487_v57 }
 0x855   :  { %v3457_v61 = vpop.eup %3456 }
 0x856   :  { %v907_v63 = vmul.f32 %v3457_v61, %v3455_v47  ;;  %v1328_v47 = vld [vmem:[%s4486_s10 + $0x8] sm:$0xff]  ;;  %v1331_v61 = vld [vmem:[%s4486_s10 + $0x20] sm:$0xff] }
 0x857   :  { %v3294_v49 = vpack.c.bf16 %v1328_v47, %v1327_v46  ;;  %v1448_v47 = vld [vmem:[%s4485_s12 + $0xe0] sm:$0xff] }
 0x858   :  { %3060 = vmatmul.mubr.msk.f32.vlgmr.msra.gmra.mrb[12].mxu1 %vm416_vm3, %v907_v63  ;;  %v3347_v39 = vpack.c.bf16 %v1450_v48, %v1448_v47  ;;  %v1539_v48 = vld [vmem:[%s4492_s14 + $0x20] sm:$0xff] }
 0x859   :  { %3074 = vmatpush3.xpose.msk.msra.mxu1 %vm337_vm1, %v1061_v62  ;;  %3075 = vmatprep.mubr.msk.f32.mxu1 %vm3488_vm0, %v3487_v57  ;;  %v1332_v62 = vld [vmem:[%s4486_s10 + $0x28] sm:$0xff] }
 0x85a   :  { %3078 = vmatprep.subr.mxu1 %v3487_v57 }
 0x85c   :  { %3076 = vmatmul.mubr.msk.f32.vlgmr.msra.gmra.mrb[14].mxu1 %vm337_vm1, %v1059_v1  ;;  %v3329_v1 = vpack.c.bf16 %v1435_v60, %v1433_v59  ;;  %v2812_v60 = vld [vmem:[%s4489_s9] ss:$0 sm:$0xff] }
 0x85d   :  { %3080 = vmatprep.mubr.msk.f32.mxu1 %vm3488_vm0, %v3487_v57 }
 0x92b   :  { %v980_v2 = vpop.f32.mrb[12].mxu1 }
 0x92c   :  { %v3061_v4 = vpop.f32.mrb[13].mxu1  ;;  %3071 = vmatmul.mubr.msk.f32.vlgmr.msra.gmra.mrb[6].mxu0 %vm337_vm1, %v980_v2  ;;  %v3300_v2 = vpack.c.bf16 %v1332_v62, %v1331_v61 }
 0x92d   :  { %3091 = vmatprep.mubr.msk.f32.mxu0 %vm3488_vm0, %v3487_v57  ;;  %v1432_v4 = vld [vmem:[%s4485_s12 + $0x60] sm:$0xff] }
 0x92f   :  { %v1132_v5 = vpop.f32.mrb[14].mxu1 }
 0x930   :  { %v1136_v6 = vmul.f32 0.17677669, %v1132_v5  ;;  %v3077_v7 = vpop.f32.mrb[15].mxu1  ;;  %v1434_v5 = vld [vmem:[%s4485_s12 + $0x70] sm:$0xff] }
 0x932   :  { %v1137_v8 = vadd.f32 %v1136_v6, %v3813_v45  ;;  %v319_v45 = vld [vmem:[%s4515_s2 + $0x60] sm:$0xff]  ;;  %v3331_v6 = vpack.c.bf16 %v1434_v5, %v1432_v4 }
 0x934   :  { %v1138_v9 = vsel %vm416_vm3, %v1137_v8, -inf }
 0x935   :  { %1139 = vmax.xlane.f32.xlu0 %v1138_v9 }
 0x94b   :  { %1149 = vrot.lane.b32.xlu0 %v3805_v41, %s3492_s28  ;;  %v320_v41 = vld [vmem:[%s4515_s2 + $0x68] sm:$0xff] }
 0x94c   :  { %v3288_v17 = vpack.c.bf16 %v320_v41, %v319_v45  ;;  %v1436_v45 = vld [vmem:[%s4485_s12 + $0x80] sm:$0xff] }
 0x94e   :  { %3289 = vmatpush3.bf16.msra.mxu0 %v3288_v17  ;;  %v3335_v17 = vpack.c.bf16 %v1438_v16, %v1436_v45 }
 0x94f   :  { %3290 = vmatprep.subr.bf16.mxu0 %v3486_v3 }
 0x952   :  { %3292 = vmatpush3.bf16.msra.mxu0 %v3291_v19  ;;  %v1443_v19 = vld [vmem:[%s4485_s12 + $0xb8] sm:$0xff] }
 0x953   :  { %3318 = vmatprep.subr.bf16.mxu0 %v3317_v37  ;;  %v1446_v37 = vld [vmem:[%s4485_s12 + $0xd0] sm:$0xff] }
 0x954   :  { %v3343_v42 = vpack.c.bf16 %v1446_v37, %v1444_v35 }
 0x9c2   :  { %v1140_v10 = vpop.xlane.xlu0 %1139 }
 0x9c3   :  { %v1141_v11 = vsub.f32 %v1137_v8, %v1140_v10 }
 0x9c5   :  { %v1142_v12 = vmul.f32 1.442695, %v1141_v11  ;;  %v1437_v11 = vld [vmem:[%s4485_s12 + $0x88] sm:$0xff] }
 0x9c6   :  { %v1150_v13 = vpop.permute.xlu0 %1149 }
 0x9c7   :  { %3458 = vpow2.f32 %v1142_v12  ;;  %3079 = vmatpush3.msra.mxu1 %v1150_v13  ;;  %v1439_v12 = vld [vmem:[%s4485_s12 + $0x98] sm:$0xff] }
 0x9c8   :  { %3293 = vmatprep.subr.bf16.mxu1 %v3486_v3  ;;  %v3333_v13 = vpack.c.bf16 %v1439_v12, %v1437_v11 }
 0x9d1   :  { %v3459_v14 = vpop.eup %3458 }
 0x9d2   :  { %v1144_v15 = vsel %vm416_vm3, %v3459_v14, 0.0 }
 0x9d3   :  { %1145 = vadd.xlane.f32.xlu1 %v1144_v15  ;;  %v1334_v15 = vld [vmem:[%s4486_s10 + $0x38] sm:$0xff] }
 0x9ff   :  { %v1053_v20 = vpop.f32.mrb[6].mxu0 }
 0xa00   :  { %v1057_v21 = vadd.f32 %v1053_v20, %v816_v56  ;;  %v3072_v22 = vpop.f32.mrb[7].mxu0  ;;  %v1428_v56 = vld [vmem:[%s4485_s12 + $0x40] sm:$0xff]  ;;  %v3337_v20 = vpack.c.bf16 %v1443_v19, %v1441_v18 }
 0xa01   :  { %v3327_v63 = vpack.c.bf16 %v1430_v58, %v1428_v56  ;;  %v1336_v22 = vld [vmem:[%s4486_s10 + $0x48] sm:$0xff]  ;;  %v2811_v58 = vld [vmem:[%s4488_s8] ss:$0 sm:$0xff] }
 0xa02   :  { %v1535_v19 = vld [vmem:[%s4492_s14] sm:$0xff] }
 0xa60   :  { %v1146_v23 = vpop.xlane.xlu1 %1145 }
 0xa61   :  { %3460 = vrcp.f32 %v1146_v23  ;;  %v1440_v23 = vld [vmem:[%s4485_s12 + $0xa0] sm:$0xff] }
 0xa6b   :  { %v3461_v24 = vpop.eup %3460 }
 0xa6c   :  { %v1148_v25 = vmul.f32 %v3461_v24, %v3459_v14  ;;  %v1333_v14 = vld [vmem:[%s4486_s10 + $0x30] sm:$0xff] }
 0xa6d   :  { %v3303_v41 = vpack.c.bf16 %v1334_v15, %v1333_v14 }
 0xa6e   :  { %3081 = vmatmul.mubr.msk.f32.vlgmr.msra.gmra.mrb[16].mxu1 %vm416_vm3, %v1148_v25  ;;  %v1442_v25 = vld [vmem:[%s4485_s12 + $0xb0] sm:$0xff] }
 0xa6f   :  { %3126 = vmatprep.mubr.msk.f32.mxu1 %vm3488_vm0, %v3487_v57  ;;  %3295 = vmatpush3.bf16.msra.mxu1 %v3294_v49 }
 0xa70   :  { %3296 = vmatprep.subr.bf16.mxu1 %v3486_v3 }
 0xa73   :  { %3298 = vmatpush3.bf16.msra.mxu1 %v3297_v55 }
 0xa74   :  { %3299 = vmatprep.subr.bf16.mxu1 %v3486_v3 }
 0xa77   :  { %3301 = vmatpush3.bf16.msra.mxu1 %v3300_v2 }
 0xa78   :  { %3302 = vmatprep.subr.bf16.mxu1 %v3486_v3 }
 0xa7b   :  { %3304 = vmatpush3.bf16.msra.mxu1 %v3303_v41 }
 0xa7c   :  { %3305 = vmatprep.subr.bf16.mxu1 %v3486_v3 }
 0xb41   :  { %v1221_v26 = vpop.f32.mrb[16].mxu1 }
 0xb42   :  { %v3082_v27 = vpop.f32.mrb[17].mxu1  ;;  %3092 = vmatmul.mubr.msk.f32.vlgmr.msra.gmra.mrb[8].mxu0 %vm337_vm1, %v1221_v26  ;;  %v1445_v26 = vld [vmem:[%s4485_s12 + $0xc8] sm:$0xff] }
 0xb43   :  { %1528 = vmatprep.mubr.f32.mxu0 %v3487_v57  ;;  %v1447_v27 = vld [vmem:[%s4485_s12 + $0xd8] sm:$0xff] }
 0xc15   :  { %v1294_v29 = vpop.f32.mrb[8].mxu0 }
 0xc16   :  { %v1298_v31 = vadd.f32 %v1294_v29, %v1057_v21  ;;  %v3093_v32 = vpop.f32.mrb[9].mxu0  ;;  %v1335_v21 = vld [vmem:[%s4486_s10 + $0x40] sm:$0xff]  ;;  %v3339_v29 = vpack.c.bf16 %v1442_v25, %v1440_v23  ;;  %v1538_v23 = vld [vmem:[%s4492_s14 + $0x18] sm:$0xff] }
 0xc17   :  { %v3306_v24 = vpack.c.bf16 %v1336_v22, %v1335_v21  ;;  %v1337_v32 = vld [vmem:[%s4486_s10 + $0x50] sm:$0xff] }
 0xc18   :  { %v3943_v33 = vadd.f32 %v1298_v31, %v3611_v0  ;;  %v1422_v0 = vld [vmem:[%s4485_s12 + $0x10] sm:$0xff]  ;;  %v3341_v31 = vpack.c.bf16 %v1447_v27, %v1445_v26 }
 0xc19   :  { %v3319_v43 = vpack.c.bf16 %v1422_v0, %v1420_v36  ;;  %3307 = vmatpush3.bf16.msra.mxu1 %v3306_v24  ;;  %v3309_v36 = vpack.c.bf16 %v1338_v34, %v1337_v32  ;;  %v1449_v0 = vld [vmem:[%s4485_s12 + $0xe8] sm:$0xff]  ;;  %v1537_v21 = vld [vmem:[%s4492_s14 + $0x10] sm:$0xff] }
 0xc1a   :  { %1302 = vadd.xlane.f32.xlu1 %v3943_v33  ;;  %3308 = vmatprep.subr.bf16.mxu1 %v3486_v3  ;;  %v3345_v46 = vpack.c.bf16 %v1451_v38, %v1449_v0  ;;  %v3353_v24 = vpack.c.bf16 %v1538_v23, %v1537_v21 }
 0xc1b   :  { %3320 = vmatpush1.bf16.msra.mxu0 %v3319_v43  ;;  %v1339_v43 = vld [vmem:[%s4486_s10 + $0x60] sm:$0xff] }
 0xc1c   :  { %3322 = vmatprep.subr.bf16.mxu0 %v3321_v44  ;;  %v1340_v44 = vld [vmem:[%s4486_s10 + $0x68] sm:$0xff] }
 0xc1d   :  { %3310 = vmatpush3.bf16.msra.mxu1 %v3309_v36  ;;  %v3312_v49 = vpack.c.bf16 %v1340_v44, %v1339_v43 }
 0xc1e   :  { %3311 = vmatprep.subr.bf16.mxu1 %v3486_v3 }
 0xc1f   :  { %3324 = vmatpush1.bf16.msra.mxu0 %v3323_v51  ;;  %v3315_v51 = vpack.c.bf16 %v1342_v50, %v1341_v40  ;;  %v1542_v50 = vld [vmem:[%s4492_s14 + $0x38] sm:$0xff] }
 0xc20   :  { %3326 = vmatprep.subr.bf16.mxu0 %v3325_v54 }
 0xc21   :  { %3313 = vmatpush3.bf16.msra.mxu1 %v3312_v49  ;;  %v1540_v49 = vld [vmem:[%s4492_s14 + $0x28] sm:$0xff] }
 0xc22   :  { %3314 = vmatprep.subr.bf16.mxu1 %v3486_v3  ;;  %v3356_v40 = vpack.c.bf16 %v1540_v49, %v1539_v48 }
 0xc23   :  { %3328 = vmatpush1.bf16.msra.mxu0 %v3327_v63  ;;  %v1452_v63 = vld [vmem:[%s4490_s13] sm:$0x3] }
 0xc24   :  { %3330 = vmatprep.subr.bf16.mxu0 %v3329_v1  ;;  %v1457_v1 = vrot.slane %v1452_v63, %v3792_v30 }
 0xc25   :  { %3316 = vmatpush3.bf16.msra.mxu1 %v3315_v51 }
 0xc26   :  { %3129 = vmatprep.subr.mxu1 %v3487_v57 }
 0xc27   :  { %3332 = vmatpush1.bf16.msra.mxu0 %v3331_v6  ;;  %v1461_v6 = vrot.slane %v1452_v63, %v3787_v28 }
 0xc28   :  { %3334 = vmatprep.subr.bf16.mxu0 %v3333_v13 }
 0xc2b   :  { %3336 = vmatpush1.bf16.msra.mxu0 %v3335_v17 }
 0xc2c   :  { %3338 = vmatprep.subr.bf16.mxu0 %v3337_v20  ;;  %v1536_v20 = vld [vmem:[%s4492_s14 + $0x8] sm:$0xff] }
 0xc2d   :  { %v3350_v22 = vpack.c.bf16 %v1536_v20, %v1535_v19 }
 0xc2f   :  { %3340 = vmatpush1.bf16.msra.mxu0 %v3339_v29 }
 0xc30   :  { %3342 = vmatprep.subr.bf16.mxu0 %v3341_v31 }
 0xc33   :  { %3344 = vmatpush1.bf16.msra.mxu0 %v3343_v42 }
 0xc34   :  { %3346 = vmatprep.subr.bf16.mxu0 %v3345_v46 }
 0xc37   :  { %3348 = vmatpush1.bf16.msra.mxu0 %v3347_v39  ;;  %v1541_v39 = vld [vmem:[%s4492_s14 + $0x30] sm:$0xff] }
 0xc38   :  { %3349 = vmatprep.subr.bf16.mxu0 %v3486_v3  ;;  %v3359_v51 = vpack.c.bf16 %v1542_v50, %v1541_v39 }
 0xc3a   :  { %1529 = vmatmul.mubr.f32.vlgmr.msra.gmra.mrb[10].mxu0 %v72_v52 }
 0xc3b   :  { %3147 = vmatprep.mubr.msk.f32.mxu0 %vm3488_vm0, %v3487_v57  ;;  %3351 = vmatpush3.bf16.msra.mxu0 %v3350_v22 }
 0xc3c   :  { %3352 = vmatprep.subr.bf16.mxu0 %v3486_v3 }
 0xc3f   :  { %3354 = vmatpush3.bf16.msra.mxu0 %v3353_v24 }
 0xc40   :  { %3355 = vmatprep.subr.bf16.mxu0 %v3486_v3 }
 0xca7   :  { %v1303_v7 = vpop.xlane.xlu1 %1302 }
 0xca8   :  { %v1304_v8 = vmul.f32 0.0078125, %v1303_v7  ;;  %v2813_v7 = vld [vmem:[%s4491_s11] ss:$0 sm:$0xff] }
 0xcaa   :  { %v4016_v9 = vsub.f32 %v3943_v33, %v1304_v8 }
 0xcac   :  { %v1306_v10 = vmul.f32 %v4016_v9, %v4016_v9 }
 0xcae   :  { %1307 = vadd.xlane.f32.xlu1 %v1306_v10 }
 0xd0d   :  { %v1530_v2 = vpop.f32.mrb[10].mxu0 }
 0xd0e   :  { %v4122_v4 = vadd.f32 %v1530_v2, %v1457_v1  ;;  %v1532_v5 = vpop.f32.mrb[11].mxu0 }
 0xd0f   :  { %v4135_v11 = vadd.f32 %v1532_v5, %v1461_v6 }
 0xd10   :  { %1796 = vrot.lane.b32.xlu0 %v4122_v4, %s3489_s7 }
 0xd3b   :  { %v1308_v53 = vpop.xlane.xlu1 %1307 }
 0xd3c   :  { %v1309_v54 = vmul.f32 0.0078125, %v1308_v53 }
 0xd3e   :  { %v1310_v55 = vadd.f32 1e-05, %v1309_v54 }
 0xd40   :  { %3462 = vrsqrt.f32 %v1310_v55 }
 0xd4a   :  { %v3463_v56 = vpop.eup %3462 }
 0xd4b   :  { %v1312_v59 = vmul.f32 %v3463_v56, %v4016_v9 }
 0xd4d   :  { %v1319_v61 = vmul.f32 %v2811_v58, %v1312_v59 }
 0xd4f   :  { %v1326_v62 = vadd.f32 %v2812_v60, %v1319_v61 }
 0xd51   :  { %3127 = vmatmul.mubr.f32.vlgmr.msra.gmra.mrb[18].mxu1 %v1326_v62 }
 0xd52   :  { %3131 = vmatprep.mubr.msk.f32.mxu1 %vm3488_vm0, %v3487_v57  ;;  %3130 = vmatpush3.xpose.msk.msra.mxu1 %vm337_vm1, %v4122_v4 }
 0xd53   :  { %3134 = vmatprep.subr.mxu1 %v3487_v57 }
 0xd82   :  { %v1797_v29 = vpop.permute.xlu0 %1796 }
 0xe24   :  { %v1416_v8 = vpop.f32.mrb[18].mxu1 }
 0xe25   :  { %v4133_v9 = vadd.f32 %v2813_v7, %v1416_v8  ;;  %v3128_v10 = vpop.f32.mrb[19].mxu1 }
 0xe27   :  { %3132 = vmatmul.mubr.msk.f32.vlgmr.msra.gmra.mrb[20].mxu1 %vm337_vm1, %v4133_v9 }
 0xe28   :  { %3135 = vmatpush3.msra.mxu1 %v4135_v11  ;;  %3136 = vmatprep.mubr.msk.f32.mxu1 %vm3488_vm0, %v3487_v57 }
 0xe29   :  { %3150 = vmatprep.subr.mxu1 %v3487_v57 }
 0xefa   :  { %v1631_v12 = vpop.f32.mrb[20].mxu1 }
 0xefb   :  { %v1635_v13 = vmul.f32 0.17677669, %v1631_v12  ;;  %v3133_v14 = vpop.f32.mrb[21].mxu1 }
 0xefc   :  { %v1545_v14 = vld [vmem:[%s4492_s14 + $0x50] sm:$0xff] }
 0xefd   :  { %v1636_v15 = vsel %vm416_vm3, %v1635_v13, -inf }
 0xefe   :  { %1637 = vmax.xlane.f32.xlu1 %v1636_v15 }
 0xf8b   :  { %v1638_v45 = vpop.xlane.xlu1 %1637 }
 0xf8c   :  { %v1639_v41 = vsub.f32 %v1635_v13, %v1638_v45  ;;  %v1543_v13 = vld [vmem:[%s4492_s14 + $0x40] sm:$0xff]  ;;  %v1546_v45 = vld [vmem:[%s4492_s14 + $0x58] sm:$0xff] }
 0xf8e   :  { %v1640_v16 = vmul.f32 1.442695, %v1639_v41  ;;  %v3365_v41 = vpack.c.bf16 %v1546_v45, %v1545_v14 }
 0xf90   :  { %3464 = vpow2.f32 %v1640_v16 }
 0xf9a   :  { %v3465_v17 = vpop.eup %3464 }
 0xf9b   :  { %v1642_v18 = vsel %vm416_vm3, %v3465_v17, 0.0 }
 0xf9c   :  { %1643 = vadd.xlane.f32.xlu1 %v1642_v18 }
 0xfad   :  { %1794 = vrot.lane.b32.xlu1 %v4133_v9, %s3489_s7 }
0x1029   :  { %v1644_v25 = vpop.xlane.xlu1 %1643 }
0x102a   :  { %3466 = vrcp.f32 %v1644_v25 }
0x102d   :  { %v1795_v31 = vpop.permute.xlu1 %1794 }
0x1034   :  { %v3467_v26 = vpop.eup %3466 }
0x1035   :  { %v1646_v27 = vmul.f32 %v3467_v26, %v3465_v17 }
0x1037   :  { %3137 = vmatmul.mubr.msk.f32.vlgmr.msra.gmra.mrb[22].mxu1 %vm416_vm3, %v1646_v27 }
0x1038   :  { %3151 = vmatpush3.xpose.msk.msra.mxu1 %vm337_vm1, %v1797_v29  ;;  %3152 = vmatprep.mubr.msk.f32.mxu1 %vm3488_vm0, %v3487_v57 }
0x1039   :  { %3155 = vmatprep.subr.mxu1 %v3487_v57 }
0x103b   :  { %3153 = vmatmul.mubr.msk.f32.vlgmr.msra.gmra.mrb[24].mxu1 %vm337_vm1, %v1795_v31 }
0x103c   :  { %3157 = vmatprep.mubr.msk.f32.mxu1 %vm3488_vm0, %v3487_v57 }
0x110a   :  { %v1716_v32 = vpop.f32.mrb[22].mxu1 }
0x110b   :  { %v3138_v34 = vpop.f32.mrb[23].mxu1  ;;  %3148 = vmatmul.mubr.msk.f32.vlgmr.msra.gmra.mrb[12].mxu0 %vm337_vm1, %v1716_v32 }
0x110c   :  { %3168 = vmatprep.mubr.msk.f32.mxu0 %vm3488_vm0, %v3487_v57  ;;  %3357 = vmatpush3.bf16.msra.mxu0 %v3356_v40 }
0x110d   :  { %3358 = vmatprep.subr.bf16.mxu0 %v3486_v3 }
0x110e   :  { %v1868_v35 = vpop.f32.mrb[24].mxu1 }
0x110f   :  { %v1872_v36 = vmul.f32 0.17677669, %v1868_v35  ;;  %v3154_v37 = vpop.f32.mrb[25].mxu1 }
0x1110   :  { %3360 = vmatpush3.bf16.msra.mxu0 %v3359_v51 }
0x1111   :  { %v1873_v0 = vsel %vm416_vm3, %v1872_v36, -inf  ;;  %3361 = vmatprep.subr.bf16.mxu0 %v3486_v3 }
0x1112   :  { %1874 = vmax.xlane.f32.xlu0 %v1873_v0 }
0x1128   :  { %1885 = vrot.lane.b32.xlu0 %v4135_v11, %s3489_s7 }
0x112c   :  { %2035 = vrot.lane.b32.xlu0 %v4133_v9, %s3491_s5 }
0x119f   :  { %v1875_v38 = vpop.xlane.xlu0 %1874 }
0x11a0   :  { %v1876_v42 = vsub.f32 %v1872_v36, %v1875_v38 }
0x11a2   :  { %v1877_v43 = vmul.f32 1.442695, %v1876_v42  ;;  %v1547_v42 = vld [vmem:[%s4492_s14 + $0x60] sm:$0xff] }
0x11a3   :  { %v1886_v44 = vpop.permute.xlu0 %1885 }
0x11a4   :  { %3468 = vpow2.f32 %v1877_v43  ;;  %3156 = vmatpush3.msra.mxu1 %v1886_v44  ;;  %v1548_v43 = vld [vmem:[%s4492_s14 + $0x68] sm:$0xff] }
0x11a5   :  { %3171 = vmatprep.subr.mxu1 %v3487_v57  ;;  %v3368_v44 = vpack.c.bf16 %v1548_v43, %v1547_v42  ;;  %v2569_v42 = vld [vmem:[%s4494_s18 + $0xd0] sm:$0xff]  ;;  %v2572_v43 = vld [vmem:[%s4494_s18 + $0xe8] sm:$0xff] }
0x11a7   :  { %v2036_v59 = vpop.permute.xlu0 %2035 }
0x11ae   :  { %v3469_v46 = vpop.eup %3468 }
0x11af   :  { %v1879_v47 = vsel %vm416_vm3, %v3469_v46, 0.0 }
0x11b0   :  { %1880 = vadd.xlane.f32.xlu1 %v1879_v47 }
0x11c1   :  { %2037 = vrot.lane.b32.xlu1 %v4122_v4, %s3491_s5 }
0x11de   :  { %v1789_v52 = vpop.f32.mrb[12].mxu0 }
0x11df   :  { %v3149_v53 = vpop.f32.mrb[13].mxu0 }
0x123d   :  { %v1881_v54 = vpop.xlane.xlu1 %1880 }
0x123e   :  { %3470 = vrcp.f32 %v1881_v54 }
0x1241   :  { %v2038_v58 = vpop.permute.xlu1 %2037 }
0x1248   :  { %v3471_v55 = vpop.eup %3470 }
0x1249   :  { %v1883_v56 = vmul.f32 %v3471_v55, %v3469_v46  ;;  %v1550_v46 = vld [vmem:[%s4492_s14 + $0x78] sm:$0xff] }
0x124b   :  { %3158 = vmatmul.mubr.msk.f32.vlgmr.msra.gmra.mrb[26].mxu1 %vm416_vm3, %v1883_v56 }
0x124c   :  { %3172 = vmatpush3.xpose.msk.msra.mxu1 %vm337_vm1, %v2038_v58  ;;  %3173 = vmatprep.mubr.msk.f32.mxu1 %vm3488_vm0, %v3487_v57  ;;  %v2544_v58 = vld [vmem:[%s4494_s18 + $0x8] sm:$0xff] }
0x124d   :  { %3176 = vmatprep.subr.mxu1 %v3487_v57 }
0x124f   :  { %3174 = vmatmul.mubr.msk.f32.vlgmr.msra.gmra.mrb[28].mxu1 %vm337_vm1, %v2036_v59  ;;  %v2543_v59 = vld [vmem:[%s4494_s18] sm:$0xff] }
0x1250   :  { %3178 = vmatprep.mubr.msk.f32.mxu1 %vm3488_vm0, %v3487_v57 }
0x131e   :  { %v1957_v60 = vpop.f32.mrb[26].mxu1 }
0x131f   :  { %v3159_v61 = vpop.f32.mrb[27].mxu1  ;;  %3169 = vmatmul.mubr.msk.f32.vlgmr.msra.gmra.mrb[14].mxu0 %vm337_vm1, %v1957_v60 }
0x1320   :  { %3189 = vmatprep.mubr.msk.f32.mxu0 %vm3488_vm0, %v3487_v57  ;;  %v2548_v61 = vld [vmem:[%s4494_s18 + $0x28] sm:$0xff] }
0x1322   :  { %v2109_v62 = vpop.f32.mrb[28].mxu1 }
0x1323   :  { %v2113_v63 = vmul.f32 0.17677669, %v2109_v62  ;;  %v3175_v1 = vpop.f32.mrb[29].mxu1  ;;  %v2550_v62 = vld [vmem:[%s4494_s18 + $0x38] sm:$0xff] }
0x1324   :  { %v3377_v1 = vpack.c.bf16 %v2550_v62, %v2548_v61  ;;  %v2694_v62 = vld [vmem:[%s4497_s20 + $0x90] sm:$0xff] }
0x1325   :  { %v2114_v2 = vsel %vm416_vm3, %v2113_v63, -inf }
0x1326   :  { %2115 = vmax.xlane.f32.xlu0 %v2114_v2  ;;  %v2547_v2 = vld [vmem:[%s4494_s18 + $0x20] sm:$0xff] }
0x133c   :  { %2125 = vrot.lane.b32.xlu0 %v4135_v11, %s3491_s5 }
0x1340   :  { %2275 = vrot.lane.b32.xlu0 %v4133_v9, %s3492_s28  ;;  %v1544_v9 = vld [vmem:[%s4492_s14 + $0x48] sm:$0xff] }
0x1341   :  { %v3362_v15 = vpack.c.bf16 %v1544_v9, %v1543_v13  ;;  %v2553_v13 = vld [vmem:[%s4494_s18 + $0x50] sm:$0xff] }
0x1343   :  { %3363 = vmatpush3.bf16.msra.mxu0 %v3362_v15 }
0x1344   :  { %3364 = vmatprep.subr.bf16.mxu0 %v3486_v3 }
0x1347   :  { %3366 = vmatpush3.bf16.msra.mxu0 %v3365_v41 }
0x1348   :  { %3367 = vmatprep.subr.bf16.mxu0 %v3486_v3 }
0x13b3   :  { %v2116_v5 = vpop.xlane.xlu0 %2115 }
0x13b4   :  { %v2117_v6 = vsub.f32 %v2113_v63, %v2116_v5  ;;  %v2549_v5 = vld [vmem:[%s4494_s18 + $0x30] sm:$0xff] }
0x13b6   :  { %v2118_v7 = vmul.f32 1.442695, %v2117_v6  ;;  %v2552_v6 = vld [vmem:[%s4494_s18 + $0x48] sm:$0xff] }
0x13b7   :  { %v2126_v8 = vpop.permute.xlu0 %2125 }
0x13b8   :  { %3472 = vpow2.f32 %v2118_v7  ;;  %3177 = vmatpush3.msra.mxu1 %v2126_v8  ;;  %v2554_v7 = vld [vmem:[%s4494_s18 + $0x58] sm:$0xff]  ;;  %v3379_v8 = vpack.c.bf16 %v2549_v5, %v2547_v2  ;;  %v2678_v2 = vld [vmem:[%s4497_s20 + $0x10] sm:$0xff] }
0x13b9   :  { %3192 = vmatprep.subr.mxu1 %v3487_v57  ;;  %v2679_v5 = vld [vmem:[%s4497_s20 + $0x18] sm:$0xff] }
0x13bb   :  { %v2276_v24 = vpop.permute.xlu0 %2275 }
0x13c2   :  { %v3473_v10 = vpop.eup %3472 }
0x13c3   :  { %v2120_v12 = vsel %vm416_vm3, %v3473_v10, 0.0 }
0x13c4   :  { %2121 = vadd.xlane.f32.xlu1 %v2120_v12  ;;  %v2551_v12 = vld [vmem:[%s4494_s18 + $0x40] sm:$0xff] }
0x13c5   :  { %v3383_v9 = vpack.c.bf16 %v2553_v13, %v2551_v12  ;;  %v2680_v12 = vld [vmem:[%s4497_s20 + $0x20] sm:$0xff]  ;;  %v2681_v13 = vld [vmem:[%s4497_s20 + $0x28] sm:$0xff] }
0x13d5   :  { %2277 = vrot.lane.b32.xlu1 %v4122_v4, %s3492_s28  ;;  %v2814_v4 = vld [vmem:[%s4493_s15] ss:$0 sm:$0xff] }
0x13d6   :  { %v1793_v16 = vadd.f32 %v2814_v4, %v1789_v52  ;;  %v2556_v4 = vld [vmem:[%s4494_s18 + $0x68] sm:$0xff] }
0x13f2   :  { %v2030_v17 = vpop.f32.mrb[14].mxu0 }
0x13f3   :  { %v2034_v18 = vadd.f32 %v2030_v17, %v1793_v16  ;;  %v3170_v19 = vpop.f32.mrb[15].mxu0  ;;  %v2558_v16 = vld [vmem:[%s4494_s18 + $0x78] sm:$0xff] }
0x13f4   :  { %v3385_v17 = vpack.c.bf16 %v2558_v16, %v2556_v4  ;;  %v2557_v19 = vld [vmem:[%s4494_s18 + $0x70] sm:$0xff]  ;;  %v2683_v4 = vld [vmem:[%s4497_s20 + $0x38] sm:$0xff] }
0x1451   :  { %v2122_v20 = vpop.xlane.xlu1 %2121 }
0x1452   :  { %3474 = vrcp.f32 %v2122_v20 }
0x1455   :  { %v2278_v23 = vpop.permute.xlu1 %2277 }
0x145c   :  { %v3475_v21 = vpop.eup %3474 }
0x145d   :  { %v2124_v22 = vmul.f32 %v3475_v21, %v3473_v10  ;;  %v3381_v10 = vpack.c.bf16 %v2554_v7, %v2552_v6  ;;  %v2560_v21 = vld [vmem:[%s4494_s18 + $0x88] sm:$0xff]  ;;  %v3411_v6 = vpack.c.bf16 %v2679_v5, %v2678_v2  ;;  %v2696_v7 = vld [vmem:[%s4497_s20 + $0xa0] sm:$0xff] }
0x145f   :  { %3179 = vmatmul.mubr.msk.f32.vlgmr.msra.gmra.mrb[30].mxu1 %vm416_vm3, %v2124_v22  ;;  %v2562_v22 = vld [vmem:[%s4494_s18 + $0x98] sm:$0xff] }
0x1460   :  { %3193 = vmatpush3.xpose.msk.msra.mxu1 %vm337_vm1, %v2278_v23  ;;  %3194 = vmatprep.mubr.msk.f32.mxu1 %vm3488_vm0, %v3487_v57  ;;  %v3389_v23 = vpack.c.bf16 %v2562_v22, %v2560_v21  ;;  %v2685_v21 = vld [vmem:[%s4497_s20 + $0x48] sm:$0xff]  ;;  %v2702_v22 = vld [vmem:[%s4497_s20 + $0xd0] sm:$0xff] }
0x1461   :  { %3197 = vmatprep.subr.mxu1 %v3487_v57 }
0x1463   :  { %3195 = vmatmul.mubr.msk.f32.vlgmr.msra.gmra.mrb[32].mxu1 %vm337_vm1, %v2276_v24  ;;  %v2559_v24 = vld [vmem:[%s4494_s18 + $0x80] sm:$0xff] }
0x1464   :  { %3199 = vmatprep.mubr.msk.f32.mxu1 %vm3488_vm0, %v3487_v57 }
0x1532   :  { %v2197_v25 = vpop.f32.mrb[30].mxu1 }
0x1533   :  { %v3180_v26 = vpop.f32.mrb[31].mxu1  ;;  %3190 = vmatmul.mubr.msk.f32.vlgmr.msra.gmra.mrb[16].mxu0 %vm337_vm1, %v2197_v25  ;;  %v2561_v25 = vld [vmem:[%s4494_s18 + $0x90] sm:$0xff] }
0x1534   :  { %3210 = vmatprep.mubr.msk.f32.mxu0 %vm3488_vm0, %v3487_v57  ;;  %3369 = vmatpush3.bf16.msra.mxu0 %v3368_v44  ;;  %v2564_v26 = vld [vmem:[%s4494_s18 + $0xa8] sm:$0xff] }
0x1535   :  { %3370 = vmatprep.subr.bf16.mxu0 %v3486_v3 }
0x1536   :  { %v2349_v27 = vpop.f32.mrb[32].mxu1 }
0x1537   :  { %v2353_v29 = vmul.f32 0.17677669, %v2349_v27  ;;  %v3196_v31 = vpop.f32.mrb[33].mxu1  ;;  %v3391_v27 = vpack.c.bf16 %v2561_v25, %v2559_v24 }
0x1538   :  { %v2563_v31 = vld [vmem:[%s4494_s18 + $0xa0] sm:$0xff] }
0x1539   :  { %v2354_v32 = vsel %vm416_vm3, %v2353_v29, -inf }
0x153a   :  { %2355 = vmax.xlane.f32.xlu0 %v2354_v32  ;;  %v2565_v32 = vld [vmem:[%s4494_s18 + $0xb0] sm:$0xff] }
0x1550   :  { %2365 = vrot.lane.b32.xlu0 %v4135_v11, %s3492_s28  ;;  %v1549_v11 = vld [vmem:[%s4492_s14 + $0x70] sm:$0xff] }
0x1551   :  { %v3371_v47 = vpack.c.bf16 %v1550_v46, %v1549_v11  ;;  %v2574_v11 = vld [vmem:[%s4494_s18 + $0xf8] sm:$0xff] }
0x1552   :  { %v3401_v46 = vpack.c.bf16 %v2574_v11, %v2572_v43  ;;  %v2690_v43 = vld [vmem:[%s4497_s20 + $0x70] sm:$0xff]  ;;  %v2691_v11 = vld [vmem:[%s4497_s20 + $0x78] sm:$0xff] }
0x1553   :  { %3372 = vmatpush3.bf16.msra.mxu0 %v3371_v47  ;;  %v2571_v47 = vld [vmem:[%s4494_s18 + $0xe0] sm:$0xff] }
0x15c7   :  { %v2356_v34 = vpop.xlane.xlu0 %2355 }
0x15c8   :  { %v2357_v35 = vsub.f32 %v2353_v29, %v2356_v34  ;;  %v2566_v29 = vld [vmem:[%s4494_s18 + $0xb8] sm:$0xff] }
0x15c9   :  { %v3393_v34 = vpack.c.bf16 %v2566_v29, %v2564_v26  ;;  %v2686_v26 = vld [vmem:[%s4497_s20 + $0x50] sm:$0xff]  ;;  %v2704_v29 = vld [vmem:[%s4497_s20 + $0xe0] sm:$0xff] }
0x15ca   :  { %v2358_v36 = vmul.f32 1.442695, %v2357_v35  ;;  %v2568_v35 = vld [vmem:[%s4494_s18 + $0xc8] sm:$0xff] }
0x15cb   :  { %v2366_v37 = vpop.permute.xlu0 %2365 }
0x15cc   :  { %3476 = vpow2.f32 %v2358_v36  ;;  %3198 = vmatpush3.msra.mxu1 %v2366_v37  ;;  %v2570_v36 = vld [vmem:[%s4494_s18 + $0xd8] sm:$0xff]  ;;  %v3395_v37 = vpack.c.bf16 %v2565_v32, %v2563_v31  ;;  %v2705_v31 = vld [vmem:[%s4497_s20 + $0xe8] sm:$0xff] }
0x15d6   :  { %v3477_v0 = vpop.eup %3476 }
0x15d7   :  { %v2360_v38 = vsel %vm416_vm3, %v3477_v0, 0.0 }
0x15d8   :  { %2361 = vadd.xlane.f32.xlu1 %v2360_v38  ;;  %v2567_v38 = vld [vmem:[%s4494_s18 + $0xc0] sm:$0xff] }
0x15d9   :  { %v3399_v44 = vpack.c.bf16 %v2569_v42, %v2567_v38 }
0x1606   :  { %v2270_v48 = vpop.f32.mrb[16].mxu0 }
0x1607   :  { %v2274_v49 = vadd.f32 %v2270_v48, %v2034_v18  ;;  %v3191_v39 = vpop.f32.mrb[17].mxu0  ;;  %v2555_v18 = vld [vmem:[%s4494_s18 + $0x60] sm:$0xff]  ;;  %v2573_v48 = vld [vmem:[%s4494_s18 + $0xf0] sm:$0xff] }
0x1608   :  { %v3387_v20 = vpack.c.bf16 %v2557_v19, %v2555_v18  ;;  %v2701_v18 = vld [vmem:[%s4497_s20 + $0xc8] sm:$0xff]  ;;  %v2684_v19 = vld [vmem:[%s4497_s20 + $0x40] sm:$0xff] }
0x1609   :  { %v3423_v24 = vpack.c.bf16 %v2685_v21, %v2684_v19 }
0x1665   :  { %v2362_v40 = vpop.xlane.xlu1 %2361 }
0x1666   :  { %3478 = vrcp.f32 %v2362_v40 }
0x1670   :  { %v3479_v50 = vpop.eup %3478 }
0x1671   :  { %v2364_v51 = vmul.f32 %v3479_v50, %v3477_v0  ;;  %v3397_v0 = vpack.c.bf16 %v2570_v36, %v2568_v35  ;;  %v2688_v35 = vld [vmem:[%s4497_s20 + $0x60] sm:$0xff]  ;;  %v2689_v36 = vld [vmem:[%s4497_s20 + $0x68] sm:$0xff] }
0x1672   :  { %v3431_v38 = vpack.c.bf16 %v2689_v36, %v2688_v35 }
0x1673   :  { %3200 = vmatmul.mubr.msk.f32.vlgmr.msra.gmra.mrb[34].mxu1 %vm416_vm3, %v2364_v51 }
0x1674   :  { %2651 = vmatprep.mubr.f32.mxu1 %v3487_v57  ;;  %v2546_v57 = vld [vmem:[%s4494_s18 + $0x18] sm:$0xff] }
0x1675   :  { %v3373_v60 = vpack.c.bf16 %v2546_v57, %v2544_v58  ;;  %v2692_v58 = vld [vmem:[%s4497_s20 + $0x80] sm:$0xff]  ;;  %v2693_v57 = vld [vmem:[%s4497_s20 + $0x88] sm:$0xff] }
0x1677   :  { %3374 = vmatprep.subr.bf16.mxu1 %v3373_v60  ;;  %v2676_v60 = vld [vmem:[%s4497_s20] sm:$0xff] }
0x1746   :  { %v2437_v52 = vpop.f32.mrb[34].mxu1 }
0x1747   :  { %v3201_v53 = vpop.f32.mrb[35].mxu1  ;;  %3211 = vmatmul.mubr.msk.f32.vlgmr.msra.gmra.mrb[18].mxu0 %vm337_vm1, %v2437_v52  ;;  %v2831_v52 = vld [vmem:[%s4495_s16] ss:$0 sm:$0xff] }
0x181a   :  { %v2510_v54 = vpop.f32.mrb[18].mxu0 }
0x181b   :  { %v2514_v55 = vadd.f32 %v2510_v54, %v2274_v49  ;;  %v3212_v56 = vpop.f32.mrb[19].mxu0  ;;  %v3403_v49 = vpack.c.bf16 %v2573_v48, %v2571_v47  ;;  %v2832_v54 = vld [vmem:[%s4496_s17] ss:$0 sm:$0xff] }
0x181d   :  { %v4264_v3 = vadd.f32 %v2514_v55, %v3943_v33  ;;  %v2545_v33 = vld [vmem:[%s4494_s18 + $0x10] sm:$0xff] }
0x181e   :  { %v3375_v63 = vpack.c.bf16 %v2545_v33, %v2543_v59  ;;  %v3405_v59 = vpack.c.bf16 %v2693_v57, %v2692_v58  ;;  %v2677_v33 = vld [vmem:[%s4497_s20 + $0x8] sm:$0xff] }
0x181f   :  { %2518 = vadd.xlane.f32.xlu1 %v4264_v3  ;;  %v3407_v61 = vpack.c.bf16 %v2677_v33, %v2676_v60 }
0x1820   :  { %3376 = vmatpush1.bf16.msra.mxu1 %v3375_v63  ;;  %3406 = vmatprep.subr.bf16.mxu0 %v3405_v59  ;;  %v2695_v63 = vld [vmem:[%s4497_s20 + $0x98] sm:$0xff] }
0x1821   :  { %3378 = vmatprep.subr.bf16.mxu1 %v3377_v1  ;;  %3408 = vmatpush3.bf16.msra.mxu0 %v3407_v61  ;;  %v3409_v1 = vpack.c.bf16 %v2695_v63, %v2694_v62 }
0x1823   :  { %3410 = vmatprep.subr.bf16.mxu0 %v3409_v1 }
0x1824   :  { %3380 = vmatpush1.bf16.msra.mxu1 %v3379_v8  ;;  %v2697_v8 = vld [vmem:[%s4497_s20 + $0xa8] sm:$0xff] }
0x1825   :  { %3382 = vmatprep.subr.bf16.mxu1 %v3381_v10  ;;  %3412 = vmatpush3.bf16.msra.mxu0 %v3411_v6  ;;  %v3413_v10 = vpack.c.bf16 %v2697_v8, %v2696_v7  ;;  %v2833_v8 = vld [vmem:[%s4499_s21] ss:$0 sm:$0xff] }
0x1827   :  { %3414 = vmatprep.subr.bf16.mxu0 %v3413_v10 }
0x1828   :  { %3384 = vmatpush1.bf16.msra.mxu1 %v3383_v9  ;;  %v3415_v9 = vpack.c.bf16 %v2681_v13, %v2680_v12 }
0x1829   :  { %3386 = vmatprep.subr.bf16.mxu1 %v3385_v17  ;;  %v2700_v17 = vld [vmem:[%s4497_s20 + $0xc0] sm:$0xff] }
0x182a   :  { %3416 = vmatpush3.bf16.msra.mxu0 %v3415_v9 }
0x182c   :  { %3388 = vmatpush1.bf16.msra.mxu1 %v3387_v20  ;;  %v3421_v20 = vpack.c.bf16 %v2701_v18, %v2700_v17 }
0x182d   :  { %3390 = vmatprep.subr.bf16.mxu1 %v3389_v23  ;;  %v2703_v23 = vld [vmem:[%s4497_s20 + $0xd8] sm:$0xff] }
0x182e   :  { %v3425_v25 = vpack.c.bf16 %v2703_v23, %v2702_v22 }
0x1830   :  { %3392 = vmatpush1.bf16.msra.mxu1 %v3391_v27  ;;  %v2687_v27 = vld [vmem:[%s4497_s20 + $0x58] sm:$0xff] }
0x1831   :  { %3394 = vmatprep.subr.bf16.mxu1 %v3393_v34  ;;  %v3427_v32 = vpack.c.bf16 %v2687_v27, %v2686_v26  ;;  %v3429_v34 = vpack.c.bf16 %v2705_v31, %v2704_v29 }
0x1834   :  { %3396 = vmatpush1.bf16.msra.mxu1 %v3395_v37  ;;  %v2706_v37 = vld [vmem:[%s4497_s20 + $0xf0] sm:$0xff] }
0x1835   :  { %3398 = vmatprep.subr.bf16.mxu1 %v3397_v0  ;;  %v2707_v0 = vld [vmem:[%s4497_s20 + $0xf8] sm:$0xff] }
0x1836   :  { %v3433_v42 = vpack.c.bf16 %v2707_v0, %v2706_v37 }
0x1838   :  { %3400 = vmatpush1.bf16.msra.mxu1 %v3399_v44  ;;  %v3435_v44 = vpack.c.bf16 %v2691_v11, %v2690_v43 }
0x1839   :  { %3402 = vmatprep.subr.bf16.mxu1 %v3401_v46  ;;  %v2575_v46 = vld [vmem:[%s4498_s19] sm:$0x3] }
0x183a   :  { %v2580_v47 = vrot.slane %v2575_v46, %v3792_v30  ;;  %v2584_v48 = vrot.slane %v2575_v46, %v3787_v28 }
0x183c   :  { %3404 = vmatpush1.bf16.msra.mxu1 %v3403_v49 }
0x18ac   :  { %v2519_v14 = vpop.xlane.xlu1 %2518 }
0x18ad   :  { %v2520_v15 = vmul.f32 0.0078125, %v2519_v14  ;;  %v2698_v14 = vld [vmem:[%s4497_s20 + $0xb0] sm:$0xff] }
0x18af   :  { %v2521_v45 = vsub.f32 %v4264_v3, %v2520_v15  ;;  %v2699_v15 = vld [vmem:[%s4497_s20 + $0xb8] sm:$0xff] }
0x18b1   :  { %v2522_v41 = vmul.f32 %v2521_v45, %v2521_v45 }
0x18b3   :  { %2523 = vadd.xlane.f32.xlu1 %v2522_v41  ;;  %v2682_v41 = vld [vmem:[%s4497_s20 + $0x30] sm:$0xff] }
0x18b4   :  { %v3419_v16 = vpack.c.bf16 %v2683_v4, %v2682_v41 }
0x1940   :  { %v2524_v39 = vpop.xlane.xlu1 %2523 }
0x1941   :  { %v2525_v40 = vmul.f32 0.0078125, %v2524_v39 }
0x1943   :  { %v2526_v50 = vadd.f32 1e-05, %v2525_v40 }
0x1945   :  { %3480 = vrsqrt.f32 %v2526_v50 }
0x194f   :  { %v3481_v51 = vpop.eup %3480 }
0x1950   :  { %v2528_v53 = vmul.f32 %v3481_v51, %v2521_v45  ;;  %v3417_v45 = vpack.c.bf16 %v2699_v15, %v2698_v14 }
0x1952   :  { %v2535_v55 = vmul.f32 %v2831_v52, %v2528_v53  ;;  %3418 = vmatprep.subr.bf16.mxu0 %v3417_v45 }
0x1953   :  { %3420 = vmatpush3.bf16.msra.mxu0 %v3419_v16 }
0x1954   :  { %v2542_v56 = vadd.f32 %v2832_v54, %v2535_v55  ;;  %3422 = vmatprep.subr.bf16.mxu0 %v3421_v20 }
0x1956   :  { %2652 = vmatmul.mubr.f32.vlgmr.msra.gmra.mrb[36].mxu1 %v2542_v56 }
0x1957   :  { %3424 = vmatpush3.bf16.msra.mxu0 %v3423_v24 }
0x1958   :  { %3426 = vmatprep.subr.bf16.mxu0 %v3425_v25 }
0x195b   :  { %3428 = vmatpush3.bf16.msra.mxu0 %v3427_v32 }
0x195c   :  { %3430 = vmatprep.subr.bf16.mxu0 %v3429_v34 }
0x195f   :  { %3432 = vmatpush3.bf16.msra.mxu0 %v3431_v38 }
0x1960   :  { %3434 = vmatprep.subr.bf16.mxu0 %v3433_v42 }
0x1963   :  { %3436 = vmatpush3.bf16.msra.mxu0 %v3435_v44 }
0x1a29   :  { %v2653_v49 = vpop.f32.mrb[36].mxu1 }
0x1a2a   :  { %v2654_v39 = vadd.f32 %v2653_v49, %v2580_v47  ;;  %v2655_v40 = vpop.f32.mrb[37].mxu1 }
0x1a2b   :  { %v2656_v50 = vadd.f32 %v2655_v40, %v2584_v48 }
0x1a2c   :  { %v2658_v51 = vmul.f32 %v2654_v39, %v2654_v39 }
0x1a2d   :  { %v2659_v52 = vmul.f32 %v2656_v50, %v2656_v50 }
0x1a2e   :  { %v2660_v53 = vmul.f32 %v2658_v51, %v2654_v39 }
0x1a2f   :  { %v2661_v54 = vmul.f32 %v2659_v52, %v2656_v50 }
0x1a30   :  { %v2662_v55 = vmul.f32 0.044715, %v2660_v53 }
0x1a31   :  { %v2663_v56 = vmul.f32 0.044715, %v2661_v54 }
0x1a32   :  { %v2664_v58 = vadd.f32 %v2662_v55, %v2654_v39 }
0x1a33   :  { %v2665_v57 = vadd.f32 %v2663_v56, %v2656_v50 }
0x1a34   :  { %v2666_v59 = vmul.f32 0.7978846, %v2664_v58 }
0x1a35   :  { %v2667_v60 = vmul.f32 0.7978846, %v2665_v57 }
0x1a36   :  { %3482 = vtanh.f32 %v2666_v59 }
0x1a37   :  { %3484 = vtanh.f32 %v2667_v60 }
0x1a40   :  { %v3483_v33 = vpop.eup %3482 }
0x1a41   :  { %v3485_v30 = vpop.eup %3484  ;;  %v2670_v61 = vadd.f32 1.0, %v3483_v33 }
0x1a42   :  { %v2671_v28 = vadd.f32 1.0, %v3485_v30 }
0x1a43   :  { %v2672_v62 = vmul.f32 0.5, %v2670_v61 }
0x1a44   :  { %v2673_v63 = vmul.f32 0.5, %v2671_v28 }
0x1a45   :  { %v2674_v2 = vmul.f32 %v2672_v62, %v2654_v39 }
0x1a46   :  { %v2675_v1 = vmul.f32 %v2673_v63, %v2656_v50 }
0x1a48   :  { %2772 = vmatprep.mubr.f32.mxu0 %v2675_v1 }
0x1a49   :  { %2773 = vmatmul.mubr.f32.vlgmr.msra.gmra.mrb[20].mxu0 %v2674_v2 }
0x1b1c   :  { %v2972_v5 = vpop.f32.mrb[20].mxu0 }
0x1b1d   :  { %v2973_v6 = vpop.f32.mrb[21].mxu0 }
0x1b1e   :  { %v2974_v7 = vadd.f32 %v2973_v6, %v2972_v5 }
0x1b20   :  { %v2778_v10 = vadd.f32 %v2974_v7, %v4264_v3 }
0x1b22   :  { %v2786_v12 = vadd.f32 %v2833_v8, %v2778_v10 }
0x1b24   :  { %2787 = vst [vmem:[%s4500_s22] sm:$0xff] %v2786_v12 }

</bundles_post_ra>
